<compile_context>
chip_gen: v6e
topology: v6e:2x2x1
jax: 0.10.0
libtpu: 0.0.40
codegen_flags: <defaults>
</compile_context>

<pallas_src>
import functools

import numpy as np
import jax
import jax.numpy as jnp
from jax import lax
from jax.experimental import pallas as pl
from jax.experimental.pallas import tpu as pltpu

BN_EPS = 1e-5
Z_SIZE = 64
FEATURE_SIZE = 4                       # 32 / 2**3
FEATURE_VOLUME = 64 * FEATURE_SIZE ** 2  # 1024

_VMEM = pl.BlockSpec(memory_space=pltpu.MemorySpace.VMEM)
_CPARAMS = pltpu.CompilerParams(vmem_limit_bytes=32 * 1024 * 1024)


# ----------------------------- Pallas kernels -----------------------------

def _enc_conv_bn_relu_kernel(planes_ref, w_ref, b_ref, g_ref, beta_ref, mask_ref,
                             o_ref, *, wop1, valid_count):
    """Conv2d(k=4,s=2,p=1) + BatchNorm2d(batch stats) + ReLU, transposed GEMM.

    planes_ref: (4, Cin, Mpad) f32  -- parity-subsampled, zero-padded input planes,
                flattened over (B, Ho+1, Wo+1) and tail-padded.
    w_ref:      (4, 4, Cout, Cin) bf16 -- [plane(r,s), tap(a,b), Cout, Cin]
    o_ref:      (Cout, Mp) f32,  Mp = B*(Ho+1)*(Wo+1)  (valid region sliced outside)
    """
    cout, m = o_ref.shape
    planes = planes_ref[...]                      # (4, Cin, Mpad) f32
    w = w_ref[...]                                # (4, 4, Cout, Cin) bf16

    acc = jnp.zeros((cout, m), jnp.float32)
    # kernel position (kh, kw) = (2a + r, 2b + s); plane (r, s) holds the stride-2
    # parity subsample of the padded input, so every tap is a constant lane shift.
    for r in range(2):
        for s in range(2):
            plane = planes[2 * r + s]             # (Cin, Mpad)
            for a in range(2):
                for b2 in range(2):
                    shift = a * wop1 + b2
                    win = plane[:, shift:shift + m].astype(jnp.bfloat16)
                    acc += jnp.dot(w[2 * r + s, 2 * a + b2], win,
                                   preferred_element_type=jnp.float32)

    y = acc + b_ref[...]                          # bias (Cout, 1)

    # BatchNorm2d (training-mode) statistics over valid output positions only.
    mask = mask_ref[...]                          # (1, Mp) 0/1
    inv_n = 1.0 / float(valid_count)
    mu = jnp.sum(y * mask, axis=1, keepdims=True) * inv_n
    var = jnp.sum(((y - mu) ** 2) * mask, axis=1, keepdims=True) * inv_n
    y = (y - mu) * lax.rsqrt(var + BN_EPS) * g_ref[...] + beta_ref[...]
    o_ref[...] = jnp.maximum(y, 0.0)


def _dec_convt_act_kernel(x_ref, w_ref, b_ref, o_ref, *, wpad, act):
    """ConvTranspose2d(k=4,s=2,p=1) + activation via sub-pixel decomposition.

    x_ref: (Cin, Mpad) f32 -- spatially zero-padded input, flattened over
           (B, H+2, W+2) and tail-padded.
    w_ref: (4, 4, Cout, Cin) bf16 -- [parity(di,dj), tap(a,b), Cout, Cin],
           flip + channel swap already baked in.
    o_ref: (4, Cout, Mpp) f32, Mpp = B*(H+2)*(W+2); wrapper slices the valid
           region and interleaves the 4 output parities.
    """
    cout = o_ref.shape[1]
    mpp = o_ref.shape[2]
    x = x_ref[...].astype(jnp.bfloat16)           # (Cin, Mpad) bf16
    w = w_ref[...]                                # (4, 4, Cout, Cin) bf16
    bias = b_ref[...]                             # (Cout, 1) f32

    for di in range(2):
        for dj in range(2):
            acc = jnp.zeros((cout, mpp), jnp.float32)
            for a in range(2):
                for b2 in range(2):
                    shift = (di + a) * wpad + (dj + b2)
                    acc += jnp.dot(w[2 * di + dj, 2 * a + b2],
                                   x[:, shift:shift + mpp],
                                   preferred_element_type=jnp.float32)
            acc = acc + bias
            if act == "relu":
                acc = jnp.maximum(acc, 0.0)
            else:  # sigmoid via EUP approx reciprocal (divide stays off the VALU)
                acc = pl.reciprocal(1.0 + jnp.exp(-acc), approx=True)
            o_ref[2 * di + dj] = acc


def _latent_kernel(f_ref, wm_ref, bm_ref, wl_ref, bl_ref, wp_ref, bp_ref, eps_ref,
                   mean_ref, logvar_ref, z_ref, feat_ref):
    """q_mean, q_logvar, reparameterization z = eps*exp(0.5*logvar)+mean, project."""
    f = f_ref[...].astype(jnp.bfloat16)           # (B, 1024)
    mean = jnp.dot(f, wm_ref[...], preferred_element_type=jnp.float32) + bm_ref[...]
    logvar = jnp.dot(f, wl_ref[...], preferred_element_type=jnp.float32) + bl_ref[...]
    z = eps_ref[...] * jnp.exp(0.5 * logvar) + mean
    feat = jnp.dot(z.astype(jnp.bfloat16), wp_ref[...],
                   preferred_element_type=jnp.float32) + bp_ref[...]
    mean_ref[...] = mean
    logvar_ref[...] = logvar
    z_ref[...] = z
    feat_ref[...] = feat


# ------------------------------- wrappers ----------------------------------

def conv_block(x_cnhw, packed):
    """ConvBlock on channel-major activations.  x: (Cin, B, H, W) -> (Cout, B, H/2, W/2)."""
    w4, b, g, beta = packed["w4"], packed["b"], packed["g"], packed["beta"]
    cin, B, H, W = x_cnhw.shape
    ho, wo = H // 2, W // 2
    cout = w4.shape[2]
    mp = B * (ho + 1) * (wo + 1)
    tail = wo + 8                                  # max in-kernel lane shift is wo+2

    xp = jnp.pad(x_cnhw, ((0, 0), (0, 0), (1, 1), (1, 1)))
    planes = jnp.stack([xp[:, :, r::2, s::2] for r in range(2) for s in range(2)],
                       axis=0)                     # (4, Cin, B, ho+1, wo+1)
    planes = planes.reshape(4, cin, mp)
    planes = jnp.pad(planes, ((0, 0), (0, 0), (0, tail)))

    # validity mask over the (B, ho+1, wo+1) window grid (compile-time constant)
    u = np.arange(ho + 1)[:, None] < ho
    v = np.arange(wo + 1)[None, :] < wo
    mask = np.broadcast_to(u & v, (B, ho + 1, wo + 1)).reshape(1, mp)
    mask = jnp.asarray(mask.astype(np.float32))

    out = pl.pallas_call(
        functools.partial(_enc_conv_bn_relu_kernel, wop1=wo + 1,
                          valid_count=B * ho * wo),
        out_shape=jax.ShapeDtypeStruct((cout, mp), jnp.float32),
        in_specs=[_VMEM] * 6,
        out_specs=_VMEM,
        compiler_params=_CPARAMS,
    )(planes, w4, b, g, beta, mask)
    return out.reshape(cout, B, ho + 1, wo + 1)[:, :, :ho, :wo]


def conv_transpose_block(x_cnhw, packed, act):
    """ConvTransposeBlock on channel-major activations: (Cin,B,H,W) -> (Cout,B,2H,2W)."""
    w4, b = packed["w4"], packed["b"]
    cin, B, H, W = x_cnhw.shape
    cout = w4.shape[2]
    wpad = W + 2
    mpp = B * (H + 2) * (W + 2)
    tail = 2 * wpad + 8                            # max in-kernel lane shift is 2*wpad+2

    xp = jnp.pad(x_cnhw, ((0, 0), (0, 0), (1, 1), (1, 1))).reshape(cin, mpp)
    xp = jnp.pad(xp, ((0, 0), (0, tail)))

    out = pl.pallas_call(
        functools.partial(_dec_convt_act_kernel, wpad=wpad, act=act),
        out_shape=jax.ShapeDtypeStruct((4, cout, mpp), jnp.float32),
        in_specs=[_VMEM] * 3,
        out_specs=_VMEM,
        compiler_params=_CPARAMS,
    )(xp, w4, b)

    o = out.reshape(4, cout, B, H + 2, W + 2)[:, :, :, :H, :W]
    o = o.reshape(2, 2, cout, B, H, W).transpose(2, 3, 4, 0, 5, 1)
    return o.reshape(cout, B, 2 * H, 2 * W)


def latent_step(flat, eps, packed):
    B = flat.shape[0]
    return pl.pallas_call(
        _latent_kernel,
        out_shape=(jax.ShapeDtypeStruct((B, Z_SIZE), jnp.float32),
                   jax.ShapeDtypeStruct((B, Z_SIZE), jnp.float32),
                   jax.ShapeDtypeStruct((B, Z_SIZE), jnp.float32),
                   jax.ShapeDtypeStruct((B, FEATURE_VOLUME), jnp.float32)),
        in_specs=[_VMEM] * 8,
        out_specs=(_VMEM,) * 4,
        compiler_params=_CPARAMS,
    )(flat, packed["wm"], packed["bm"], packed["wl"], packed["bl"],
      packed["wp"], packed["bp"], eps)


# --------------------------- parameters & packing ---------------------------

def init_raw_params(key):
    """Raw parameters in PyTorch layouts (used by the reference and for packing)."""
    def uni(k, shape, fan_in):
        bound = 1.0 / float(fan_in) ** 0.5
        return jax.random.uniform(k, shape, jnp.float32, -bound, bound)

    keys = iter(jax.random.split(key, 24))
    raw = {"enc": [], "dec": []}
    for cin, cout in [(3, 16), (16, 32), (32, 64)]:
        fan = cin * 16
        raw["enc"].append(dict(
            w=uni(next(keys), (cout, cin, 4, 4), fan),      # Conv2d (O, I, kh, kw)
            b=uni(next(keys), (cout,), fan),
            gamma=jnp.ones((cout,), jnp.float32),
            beta=jnp.zeros((cout,), jnp.float32)))
    raw["q_mean"] = dict(w=uni(next(keys), (Z_SIZE, FEATURE_VOLUME), FEATURE_VOLUME),
                         b=uni(next(keys), (Z_SIZE,), FEATURE_VOLUME))
    raw["q_logvar"] = dict(w=uni(next(keys), (Z_SIZE, FEATURE_VOLUME), FEATURE_VOLUME),
                           b=uni(next(keys), (Z_SIZE,), FEATURE_VOLUME))
    raw["project"] = dict(w=uni(next(keys), (FEATURE_VOLUME, Z_SIZE), Z_SIZE),
                          b=uni(next(keys), (FEATURE_VOLUME,), Z_SIZE))
    for cin, cout in [(64, 32), (32, 16), (16, 3)]:
        fan = cout * 16
        raw["dec"].append(dict(
            w=uni(next(keys), (cin, cout, 4, 4), fan),      # ConvTranspose2d (I, O, kh, kw)
            b=uni(next(keys), (cout,), fan)))
    return raw


def prepare_params(raw):
    """One-time weight reformatting (hoisted out of the forward path)."""
    packed = {"enc": [], "dec": []}

    for layer in raw["enc"]:
        w = layer["w"]                                      # (Cout, Cin, 4, 4)
        cout = w.shape[0]
        # w4[r*2+s, a*2+b] = W[:, :, 2a+r, 2b+s]  (plane parity (r,s), tap (a,b))
        w4 = jnp.stack([
            jnp.stack([w[:, :, 2 * a + r, 2 * b2 + s]
                       for a in range(2) for b2 in range(2)], axis=0)
            for r in range(2) for s in range(2)], axis=0)
        packed["enc"].append(dict(
            w4=w4.astype(jnp.bfloat16),
            b=layer["b"].reshape(cout, 1),
            g=layer["gamma"].reshape(cout, 1),
            beta=layer["beta"].reshape(cout, 1)))

    packed["latent"] = dict(
        wm=jnp.transpose(raw["q_mean"]["w"]).astype(jnp.bfloat16),     # (1024, 64)
        bm=raw["q_mean"]["b"].reshape(1, Z_SIZE),
        wl=jnp.transpose(raw["q_logvar"]["w"]).astype(jnp.bfloat16),   # (1024, 64)
        bl=raw["q_logvar"]["b"].reshape(1, Z_SIZE),
        wp=jnp.transpose(raw["project"]["w"]).astype(jnp.bfloat16),    # (64, 1024)
        bp=raw["project"]["b"].reshape(1, FEATURE_VOLUME))

    for layer in raw["dec"]:
        wt = layer["w"]                                     # (Cin, Cout, 4, 4)
        cout = wt.shape[1]
        # w4[di*2+dj, a*2+b] = W_t[:, :, 3-di-2a, 3-dj-2b]^T  (output parity (di,dj))
        w4 = jnp.stack([
            jnp.stack([jnp.transpose(wt[:, :, 3 - di - 2 * a, 3 - dj - 2 * b2], (1, 0))
                       for a in range(2) for b2 in range(2)], axis=0)
            for di in range(2) for dj in range(2)], axis=0)
        packed["dec"].append(dict(w4=w4.astype(jnp.bfloat16),
                                  b=layer["b"].reshape(cout, 1)))
    return packed


# --------------------------------- forward ----------------------------------

def ae_forward(x_nchw, eps, packed):
    """Forward of AEModel.  x_nchw: (B, 3, 32, 32); eps: (B, 64) reparam noise."""
    B = x_nchw.shape[0]
    x = jnp.transpose(x_nchw, (1, 0, 2, 3))        # NCHW -> channel-major CNHW

    for p in packed["enc"]:
        x = conv_block(x, p)                       # -> (64, B, 4, 4)

    # PyTorch .view(B, 1024) flatten (c, i, j) ordering
    flat = jnp.transpose(x, (1, 0, 2, 3)).reshape(B, FEATURE_VOLUME)
    mean, logvar, z, feat = latent_step(flat, eps, packed["latent"])

    # project -> (B, 64, 4, 4) NCHW -> channel-major CNHW for the decoder
    y = feat.reshape(B, 64, FEATURE_SIZE, FEATURE_SIZE).transpose(1, 0, 2, 3)
    for p, act in zip(packed["dec"], ("relu", "relu", "sigmoid")):
        y = conv_transpose_block(y, p, act)        # -> (3, B, 32, 32)

    x_reconstructed = jnp.transpose(y, (1, 0, 2, 3))
    return x_reconstructed, (mean, logvar, z)


# --------------------------- pure-JAX reference ------------------------------

def reference_forward(x_nchw, eps, raw):
    """Plain XLA implementation of the same forward (for numeric cross-check)."""
    def conv_bn_relu(x, layer):
        y = lax.conv_general_dilated(x, layer["w"], (2, 2), ((1, 1), (1, 1)),
                                     dimension_numbers=("NCHW", "OIHW", "NCHW"))
        y = y + layer["b"][None, :, None, None]
        mu = jnp.mean(y, axis=(0, 2, 3), keepdims=True)
        var = jnp.mean((y - mu) ** 2, axis=(0, 2, 3), keepdims=True)
        y = (y - mu) * lax.rsqrt(var + BN_EPS)
        y = y * layer["gamma"][None, :, None, None] + layer["beta"][None, :, None, None]
        return jnp.maximum(y, 0.0)

    def conv_t(x, layer):
        wt = jnp.flip(jnp.transpose(layer["w"], (1, 0, 2, 3)), (2, 3))
        y = lax.conv_general_dilated(x, wt, (1, 1), ((2, 2), (2, 2)),
                                     lhs_dilation=(2, 2),
                                     dimension_numbers=("NCHW", "OIHW", "NCHW"))
        return y + layer["b"][None, :, None, None]

    h = x_nchw
    for layer in raw["enc"]:
        h = conv_bn_relu(h, layer)
    B = x_nchw.shape[0]
    flat = h.reshape(B, FEATURE_VOLUME)
    mean = flat @ raw["q_mean"]["w"].T + raw["q_mean"]["b"]
    logvar = flat @ raw["q_logvar"]["w"].T + raw["q_logvar"]["b"]
    z = eps * jnp.exp(0.5 * logvar) + mean
    feat = z @ raw["project"]["w"].T + raw["project"]["b"]
    y = feat.reshape(B, 64, FEATURE_SIZE, FEATURE_SIZE)
    for layer, act in zip(raw["dec"], (jax.nn.relu, jax.nn.relu, jax.nn.sigmoid)):
        y = act(conv_t(y, layer))
    return y, (mean, logvar, z)


if __name__ == "__main__":
    key = jax.random.PRNGKey(0)
    kx, keps, kp = jax.random.split(key, 3)

    B = 2
    # Architecture implies 32x32 spatial input (feature_size = 32 / 2**3 = 4).
    x = jax.random.uniform(kx, (B, 3, 32, 32), jnp.float32)
    # torch.randn reparameterization noise -> explicit deterministic eps input.
    eps = jax.random.normal(keps, (B, Z_SIZE), jnp.float32)

    raw = init_raw_params(kp)
    packed = prepare_params(raw)           # weight reformatting hoisted out of forward

    fwd = jax.jit(lambda xx, ee: ae_forward(xx, ee, packed))
    x_rec, (mean, logvar, z) = fwd(x, eps)
    jax.block_until_ready((x_rec, mean, logvar, z))

    assert x_rec.shape == (B, 3, 32, 32)
    assert mean.shape == (B, Z_SIZE) and logvar.shape == (B, Z_SIZE) and z.shape == (B, Z_SIZE)
    assert bool(jnp.all(jnp.isfinite(x_rec)))
    assert bool(jnp.all((x_rec > -1e-2) & (x_rec < 1.0 + 1e-2)))   # ~sigmoid range

    # numeric cross-check against a pure-XLA reference of the same forward pass
    xr_ref, (m_ref, lv_ref, z_ref) = jax.jit(
        lambda xx, ee: reference_forward(xx, ee, raw))(x, eps)
    jax.block_until_ready((xr_ref, m_ref, lv_ref, z_ref))

    def rel_err(a, b):
        return float(jnp.max(jnp.abs(a - b)) / (jnp.max(jnp.abs(b)) + 1e-6))

    for got, ref in ((x_rec, xr_ref), (mean, m_ref), (logvar, lv_ref), (z, z_ref)):
        err = rel_err(got, ref)
        assert err < 5e-2, f"mismatch vs reference: rel_err={err}"

    print("KERNEL_OK")
</pallas_src>

<mosaic_0001>
module attributes {stable_mosaic.version = 11 : i64} {
  func.func @_enc_conv_bn_relu_kernel(%arg0: memref<4x3x602xf32, #tpu.memory_space<vmem>>, %arg1: memref<4x4x16x3xbf16, #tpu.memory_space<vmem>>, %arg2: memref<16x1xf32, #tpu.memory_space<vmem>>, %arg3: memref<16x1xf32, #tpu.memory_space<vmem>>, %arg4: memref<16x1xf32, #tpu.memory_space<vmem>>, %arg5: memref<1x578xf32, #tpu.memory_space<vmem>>, %arg6: memref<16x578xf32, #tpu.memory_space<vmem>>) attributes {dimension_semantics = [], scalar_prefetch = 0 : i64, scratch_operands = 0 : i64, tpu.core_type = #tpu.core_type<tc>} {
    %c0 = arith.constant 0 : index
    %c0_0 = arith.constant 0 : index
    %c0_1 = arith.constant 0 : index
    %0 = vector.load %arg0[%c0, %c0_0, %c0_1] : memref<4x3x602xf32, #tpu.memory_space<vmem>>, vector<4x3x602xf32>
    %c0_2 = arith.constant 0 : index
    %c0_3 = arith.constant 0 : index
    %c0_4 = arith.constant 0 : index
    %c0_5 = arith.constant 0 : index
    %1 = vector.load %arg1[%c0_2, %c0_3, %c0_4, %c0_5] : memref<4x4x16x3xbf16, #tpu.memory_space<vmem>>, vector<4x4x16x3xbf16>
    %cst = arith.constant 0.000000e+00 : f32
    %2 = vector.broadcast %cst : f32 to vector<16x578xf32>
    %3 = vector.extract_strided_slice %0 {offsets = [0, 0, 0], sizes = [1, 3, 602], strides = [1, 1, 1]} : vector<4x3x602xf32> to vector<1x3x602xf32>
    %4 = vector.shape_cast %3 : vector<1x3x602xf32> to vector<3x602xf32>
    %5 = vector.extract_strided_slice %4 {offsets = [0, 0], sizes = [3, 578], strides = [1, 1]} : vector<3x602xf32> to vector<3x578xf32>
    %6 = arith.truncf %5 : vector<3x578xf32> to vector<3x578xbf16>
    %7 = vector.extract_strided_slice %1 {offsets = [0, 0, 0, 0], sizes = [1, 1, 16, 3], strides = [1, 1, 1, 1]} : vector<4x4x16x3xbf16> to vector<1x1x16x3xbf16>
    %8 = vector.shape_cast %7 : vector<1x1x16x3xbf16> to vector<16x3xbf16>
    %cst_6 = arith.constant dense<0.000000e+00> : vector<16x578xf32>
    %9 = tpu.matmul %8, %6, %cst_6 {dimension_numbers = #tpu.dot_dimension_numbers<[1], [0], [0], [1], [0, 0, 1, 1], [], []>} : vector<16x3xbf16>, vector<3x578xbf16>, vector<16x578xf32> -> vector<16x578xf32>
    %10 = arith.addf %2, %9 : vector<16x578xf32>
    %11 = vector.extract_strided_slice %4 {offsets = [0, 1], sizes = [3, 578], strides = [1, 1]} : vector<3x602xf32> to vector<3x578xf32>
    %12 = arith.truncf %11 : vector<3x578xf32> to vector<3x578xbf16>
    %13 = vector.extract_strided_slice %1 {offsets = [0, 1, 0, 0], sizes = [1, 1, 16, 3], strides = [1, 1, 1, 1]} : vector<4x4x16x3xbf16> to vector<1x1x16x3xbf16>
    %14 = vector.shape_cast %13 : vector<1x1x16x3xbf16> to vector<16x3xbf16>
    %cst_7 = arith.constant dense<0.000000e+00> : vector<16x578xf32>
    %15 = tpu.matmul %14, %12, %cst_7 {dimension_numbers = #tpu.dot_dimension_numbers<[1], [0], [0], [1], [0, 0, 1, 1], [], []>} : vector<16x3xbf16>, vector<3x578xbf16>, vector<16x578xf32> -> vector<16x578xf32>
    %16 = arith.addf %10, %15 : vector<16x578xf32>
    %17 = vector.extract_strided_slice %4 {offsets = [0, 17], sizes = [3, 578], strides = [1, 1]} : vector<3x602xf32> to vector<3x578xf32>
    %18 = arith.truncf %17 : vector<3x578xf32> to vector<3x578xbf16>
    %19 = vector.extract_strided_slice %1 {offsets = [0, 2, 0, 0], sizes = [1, 1, 16, 3], strides = [1, 1, 1, 1]} : vector<4x4x16x3xbf16> to vector<1x1x16x3xbf16>
    %20 = vector.shape_cast %19 : vector<1x1x16x3xbf16> to vector<16x3xbf16>
    %cst_8 = arith.constant dense<0.000000e+00> : vector<16x578xf32>
    %21 = tpu.matmul %20, %18, %cst_8 {dimension_numbers = #tpu.dot_dimension_numbers<[1], [0], [0], [1], [0, 0, 1, 1], [], []>} : vector<16x3xbf16>, vector<3x578xbf16>, vector<16x578xf32> -> vector<16x578xf32>
    %22 = arith.addf %16, %21 : vector<16x578xf32>
    %23 = vector.extract_strided_slice %4 {offsets = [0, 18], sizes = [3, 578], strides = [1, 1]} : vector<3x602xf32> to vector<3x578xf32>
    %24 = arith.truncf %23 : vector<3x578xf32> to vector<3x578xbf16>
    %25 = vector.extract_strided_slice %1 {offsets = [0, 3, 0, 0], sizes = [1, 1, 16, 3], strides = [1, 1, 1, 1]} : vector<4x4x16x3xbf16> to vector<1x1x16x3xbf16>
    %26 = vector.shape_cast %25 : vector<1x1x16x3xbf16> to vector<16x3xbf16>
    %cst_9 = arith.constant dense<0.000000e+00> : vector<16x578xf32>
    %27 = tpu.matmul %26, %24, %cst_9 {dimension_numbers = #tpu.dot_dimension_numbers<[1], [0], [0], [1], [0, 0, 1, 1], [], []>} : vector<16x3xbf16>, vector<3x578xbf16>, vector<16x578xf32> -> vector<16x578xf32>
    %28 = arith.addf %22, %27 : vector<16x578xf32>
    %29 = vector.extract_strided_slice %0 {offsets = [1, 0, 0], sizes = [1, 3, 602], strides = [1, 1, 1]} : vector<4x3x602xf32> to vector<1x3x602xf32>
    %30 = vector.shape_cast %29 : vector<1x3x602xf32> to vector<3x602xf32>
    %31 = vector.extract_strided_slice %30 {offsets = [0, 0], sizes = [3, 578], strides = [1, 1]} : vector<3x602xf32> to vector<3x578xf32>
    %32 = arith.truncf %31 : vector<3x578xf32> to vector<3x578xbf16>
    %33 = vector.extract_strided_slice %1 {offsets = [1, 0, 0, 0], sizes = [1, 1, 16, 3], strides = [1, 1, 1, 1]} : vector<4x4x16x3xbf16> to vector<1x1x16x3xbf16>
    %34 = vector.shape_cast %33 : vector<1x1x16x3xbf16> to vector<16x3xbf16>
    %cst_10 = arith.constant dense<0.000000e+00> : vector<16x578xf32>
    %35 = tpu.matmul %34, %32, %cst_10 {dimension_numbers = #tpu.dot_dimension_numbers<[1], [0], [0], [1], [0, 0, 1, 1], [], []>} : vector<16x3xbf16>, vector<3x578xbf16>, vector<16x578xf32> -> vector<16x578xf32>
    %36 = arith.addf %28, %35 : vector<16x578xf32>
    %37 = vector.extract_strided_slice %30 {offsets = [0, 1], sizes = [3, 578], strides = [1, 1]} : vector<3x602xf32> to vector<3x578xf32>
    %38 = arith.truncf %37 : vector<3x578xf32> to vector<3x578xbf16>
    %39 = vector.extract_strided_slice %1 {offsets = [1, 1, 0, 0], sizes = [1, 1, 16, 3], strides = [1, 1, 1, 1]} : vector<4x4x16x3xbf16> to vector<1x1x16x3xbf16>
    %40 = vector.shape_cast %39 : vector<1x1x16x3xbf16> to vector<16x3xbf16>
    %cst_11 = arith.constant dense<0.000000e+00> : vector<16x578xf32>
    %41 = tpu.matmul %40, %38, %cst_11 {dimension_numbers = #tpu.dot_dimension_numbers<[1], [0], [0], [1], [0, 0, 1, 1], [], []>} : vector<16x3xbf16>, vector<3x578xbf16>, vector<16x578xf32> -> vector<16x578xf32>
    %42 = arith.addf %36, %41 : vector<16x578xf32>
    %43 = vector.extract_strided_slice %30 {offsets = [0, 17], sizes = [3, 578], strides = [1, 1]} : vector<3x602xf32> to vector<3x578xf32>
    %44 = arith.truncf %43 : vector<3x578xf32> to vector<3x578xbf16>
    %45 = vector.extract_strided_slice %1 {offsets = [1, 2, 0, 0], sizes = [1, 1, 16, 3], strides = [1, 1, 1, 1]} : vector<4x4x16x3xbf16> to vector<1x1x16x3xbf16>
    %46 = vector.shape_cast %45 : vector<1x1x16x3xbf16> to vector<16x3xbf16>
    %cst_12 = arith.constant dense<0.000000e+00> : vector<16x578xf32>
    %47 = tpu.matmul %46, %44, %cst_12 {dimension_numbers = #tpu.dot_dimension_numbers<[1], [0], [0], [1], [0, 0, 1, 1], [], []>} : vector<16x3xbf16>, vector<3x578xbf16>, vector<16x578xf32> -> vector<16x578xf32>
    %48 = arith.addf %42, %47 : vector<16x578xf32>
    %49 = vector.extract_strided_slice %30 {offsets = [0, 18], sizes = [3, 578], strides = [1, 1]} : vector<3x602xf32> to vector<3x578xf32>
    %50 = arith.truncf %49 : vector<3x578xf32> to vector<3x578xbf16>
    %51 = vector.extract_strided_slice %1 {offsets = [1, 3, 0, 0], sizes = [1, 1, 16, 3], strides = [1, 1, 1, 1]} : vector<4x4x16x3xbf16> to vector<1x1x16x3xbf16>
    %52 = vector.shape_cast %51 : vector<1x1x16x3xbf16> to vector<16x3xbf16>
    %cst_13 = arith.constant dense<0.000000e+00> : vector<16x578xf32>
    %53 = tpu.matmul %52, %50, %cst_13 {dimension_numbers = #tpu.dot_dimension_numbers<[1], [0], [0], [1], [0, 0, 1, 1], [], []>} : vector<16x3xbf16>, vector<3x578xbf16>, vector<16x578xf32> -> vector<16x578xf32>
    %54 = arith.addf %48, %53 : vector<16x578xf32>
    %55 = vector.extract_strided_slice %0 {offsets = [2, 0, 0], sizes = [1, 3, 602], strides = [1, 1, 1]} : vector<4x3x602xf32> to vector<1x3x602xf32>
    %56 = vector.shape_cast %55 : vector<1x3x602xf32> to vector<3x602xf32>
    %57 = vector.extract_strided_slice %56 {offsets = [0, 0], sizes = [3, 578], strides = [1, 1]} : vector<3x602xf32> to vector<3x578xf32>
    %58 = arith.truncf %57 : vector<3x578xf32> to vector<3x578xbf16>
    %59 = vector.extract_strided_slice %1 {offsets = [2, 0, 0, 0], sizes = [1, 1, 16, 3], strides = [1, 1, 1, 1]} : vector<4x4x16x3xbf16> to vector<1x1x16x3xbf16>
    %60 = vector.shape_cast %59 : vector<1x1x16x3xbf16> to vector<16x3xbf16>
    %cst_14 = arith.constant dense<0.000000e+00> : vector<16x578xf32>
    %61 = tpu.matmul %60, %58, %cst_14 {dimension_numbers = #tpu.dot_dimension_numbers<[1], [0], [0], [1], [0, 0, 1, 1], [], []>} : vector<16x3xbf16>, vector<3x578xbf16>, vector<16x578xf32> -> vector<16x578xf32>
    %62 = arith.addf %54, %61 : vector<16x578xf32>
    %63 = vector.extract_strided_slice %56 {offsets = [0, 1], sizes = [3, 578], strides = [1, 1]} : vector<3x602xf32> to vector<3x578xf32>
    %64 = arith.truncf %63 : vector<3x578xf32> to vector<3x578xbf16>
    %65 = vector.extract_strided_slice %1 {offsets = [2, 1, 0, 0], sizes = [1, 1, 16, 3], strides = [1, 1, 1, 1]} : vector<4x4x16x3xbf16> to vector<1x1x16x3xbf16>
    %66 = vector.shape_cast %65 : vector<1x1x16x3xbf16> to vector<16x3xbf16>
    %cst_15 = arith.constant dense<0.000000e+00> : vector<16x578xf32>
    %67 = tpu.matmul %66, %64, %cst_15 {dimension_numbers = #tpu.dot_dimension_numbers<[1], [0], [0], [1], [0, 0, 1, 1], [], []>} : vector<16x3xbf16>, vector<3x578xbf16>, vector<16x578xf32> -> vector<16x578xf32>
    %68 = arith.addf %62, %67 : vector<16x578xf32>
    %69 = vector.extract_strided_slice %56 {offsets = [0, 17], sizes = [3, 578], strides = [1, 1]} : vector<3x602xf32> to vector<3x578xf32>
    %70 = arith.truncf %69 : vector<3x578xf32> to vector<3x578xbf16>
    %71 = vector.extract_strided_slice %1 {offsets = [2, 2, 0, 0], sizes = [1, 1, 16, 3], strides = [1, 1, 1, 1]} : vector<4x4x16x3xbf16> to vector<1x1x16x3xbf16>
    %72 = vector.shape_cast %71 : vector<1x1x16x3xbf16> to vector<16x3xbf16>
    %cst_16 = arith.constant dense<0.000000e+00> : vector<16x578xf32>
    %73 = tpu.matmul %72, %70, %cst_16 {dimension_numbers = #tpu.dot_dimension_numbers<[1], [0], [0], [1], [0, 0, 1, 1], [], []>} : vector<16x3xbf16>, vector<3x578xbf16>, vector<16x578xf32> -> vector<16x578xf32>
    %74 = arith.addf %68, %73 : vector<16x578xf32>
    %75 = vector.extract_strided_slice %56 {offsets = [0, 18], sizes = [3, 578], strides = [1, 1]} : vector<3x602xf32> to vector<3x578xf32>
    %76 = arith.truncf %75 : vector<3x578xf32> to vector<3x578xbf16>
    %77 = vector.extract_strided_slice %1 {offsets = [2, 3, 0, 0], sizes = [1, 1, 16, 3], strides = [1, 1, 1, 1]} : vector<4x4x16x3xbf16> to vector<1x1x16x3xbf16>
    %78 = vector.shape_cast %77 : vector<1x1x16x3xbf16> to vector<16x3xbf16>
    %cst_17 = arith.constant dense<0.000000e+00> : vector<16x578xf32>
    %79 = tpu.matmul %78, %76, %cst_17 {dimension_numbers = #tpu.dot_dimension_numbers<[1], [0], [0], [1], [0, 0, 1, 1], [], []>} : vector<16x3xbf16>, vector<3x578xbf16>, vector<16x578xf32> -> vector<16x578xf32>
    %80 = arith.addf %74, %79 : vector<16x578xf32>
    %81 = vector.extract_strided_slice %0 {offsets = [3, 0, 0], sizes = [1, 3, 602], strides = [1, 1, 1]} : vector<4x3x602xf32> to vector<1x3x602xf32>
    %82 = vector.shape_cast %81 : vector<1x3x602xf32> to vector<3x602xf32>
    %83 = vector.extract_strided_slice %82 {offsets = [0, 0], sizes = [3, 578], strides = [1, 1]} : vector<3x602xf32> to vector<3x578xf32>
    %84 = arith.truncf %83 : vector<3x578xf32> to vector<3x578xbf16>
    %85 = vector.extract_strided_slice %1 {offsets = [3, 0, 0, 0], sizes = [1, 1, 16, 3], strides = [1, 1, 1, 1]} : vector<4x4x16x3xbf16> to vector<1x1x16x3xbf16>
    %86 = vector.shape_cast %85 : vector<1x1x16x3xbf16> to vector<16x3xbf16>
    %cst_18 = arith.constant dense<0.000000e+00> : vector<16x578xf32>
    %87 = tpu.matmul %86, %84, %cst_18 {dimension_numbers = #tpu.dot_dimension_numbers<[1], [0], [0], [1], [0, 0, 1, 1], [], []>} : vector<16x3xbf16>, vector<3x578xbf16>, vector<16x578xf32> -> vector<16x578xf32>
    %88 = arith.addf %80, %87 : vector<16x578xf32>
    %89 = vector.extract_strided_slice %82 {offsets = [0, 1], sizes = [3, 578], strides = [1, 1]} : vector<3x602xf32> to vector<3x578xf32>
    %90 = arith.truncf %89 : vector<3x578xf32> to vector<3x578xbf16>
    %91 = vector.extract_strided_slice %1 {offsets = [3, 1, 0, 0], sizes = [1, 1, 16, 3], strides = [1, 1, 1, 1]} : vector<4x4x16x3xbf16> to vector<1x1x16x3xbf16>
    %92 = vector.shape_cast %91 : vector<1x1x16x3xbf16> to vector<16x3xbf16>
    %cst_19 = arith.constant dense<0.000000e+00> : vector<16x578xf32>
    %93 = tpu.matmul %92, %90, %cst_19 {dimension_numbers = #tpu.dot_dimension_numbers<[1], [0], [0], [1], [0, 0, 1, 1], [], []>} : vector<16x3xbf16>, vector<3x578xbf16>, vector<16x578xf32> -> vector<16x578xf32>
    %94 = arith.addf %88, %93 : vector<16x578xf32>
    %95 = vector.extract_strided_slice %82 {offsets = [0, 17], sizes = [3, 578], strides = [1, 1]} : vector<3x602xf32> to vector<3x578xf32>
    %96 = arith.truncf %95 : vector<3x578xf32> to vector<3x578xbf16>
    %97 = vector.extract_strided_slice %1 {offsets = [3, 2, 0, 0], sizes = [1, 1, 16, 3], strides = [1, 1, 1, 1]} : vector<4x4x16x3xbf16> to vector<1x1x16x3xbf16>
    %98 = vector.shape_cast %97 : vector<1x1x16x3xbf16> to vector<16x3xbf16>
    %cst_20 = arith.constant dense<0.000000e+00> : vector<16x578xf32>
    %99 = tpu.matmul %98, %96, %cst_20 {dimension_numbers = #tpu.dot_dimension_numbers<[1], [0], [0], [1], [0, 0, 1, 1], [], []>} : vector<16x3xbf16>, vector<3x578xbf16>, vector<16x578xf32> -> vector<16x578xf32>
    %100 = arith.addf %94, %99 : vector<16x578xf32>
    %101 = vector.extract_strided_slice %82 {offsets = [0, 18], sizes = [3, 578], strides = [1, 1]} : vector<3x602xf32> to vector<3x578xf32>
    %102 = arith.truncf %101 : vector<3x578xf32> to vector<3x578xbf16>
    %103 = vector.extract_strided_slice %1 {offsets = [3, 3, 0, 0], sizes = [1, 1, 16, 3], strides = [1, 1, 1, 1]} : vector<4x4x16x3xbf16> to vector<1x1x16x3xbf16>
    %104 = vector.shape_cast %103 : vector<1x1x16x3xbf16> to vector<16x3xbf16>
    %cst_21 = arith.constant dense<0.000000e+00> : vector<16x578xf32>
    %105 = tpu.matmul %104, %102, %cst_21 {dimension_numbers = #tpu.dot_dimension_numbers<[1], [0], [0], [1], [0, 0, 1, 1], [], []>} : vector<16x3xbf16>, vector<3x578xbf16>, vector<16x578xf32> -> vector<16x578xf32>
    %106 = arith.addf %100, %105 : vector<16x578xf32>
    %c0_22 = arith.constant 0 : index
    %c0_23 = arith.constant 0 : index
    %107 = vector.load %arg2[%c0_22, %c0_23] : memref<16x1xf32, #tpu.memory_space<vmem>>, vector<16x1xf32>
    %108 = vector.broadcast %107 : vector<16x1xf32> to vector<16x578xf32>
    %109 = arith.addf %106, %108 : vector<16x578xf32>
    %c0_24 = arith.constant 0 : index
    %c0_25 = arith.constant 0 : index
    %110 = vector.load %arg5[%c0_24, %c0_25] : memref<1x578xf32, #tpu.memory_space<vmem>>, vector<1x578xf32>
    %111 = vector.broadcast %110 : vector<1x578xf32> to vector<16x578xf32>
    %112 = arith.mulf %109, %111 : vector<16x578xf32>
    %cst_26 = arith.constant dense<0.000000e+00> : vector<16xf32>
    %113 = vector.multi_reduction <add>, %112, %cst_26 [1] : vector<16x578xf32> to vector<16xf32>
    %114 = vector.shape_cast %113 : vector<16xf32> to vector<16x1xf32>
    %cst_27 = arith.constant 0.001953125 : f32
    %115 = vector.broadcast %cst_27 : f32 to vector<16x1xf32>
    %116 = arith.mulf %114, %115 : vector<16x1xf32>
    %117 = vector.broadcast %116 : vector<16x1xf32> to vector<16x578xf32>
    %118 = arith.subf %109, %117 : vector<16x578xf32>
    %119 = arith.mulf %118, %118 : vector<16x578xf32>
    %120 = vector.broadcast %110 : vector<1x578xf32> to vector<16x578xf32>
    %121 = arith.mulf %119, %120 : vector<16x578xf32>
    %cst_28 = arith.constant dense<0.000000e+00> : vector<16xf32>
    %122 = vector.multi_reduction <add>, %121, %cst_28 [1] : vector<16x578xf32> to vector<16xf32>
    %123 = vector.shape_cast %122 : vector<16xf32> to vector<16x1xf32>
    %cst_29 = arith.constant 0.001953125 : f32
    %124 = vector.broadcast %cst_29 : f32 to vector<16x1xf32>
    %125 = arith.mulf %123, %124 : vector<16x1xf32>
    %126 = vector.broadcast %116 : vector<16x1xf32> to vector<16x578xf32>
    %127 = arith.subf %109, %126 : vector<16x578xf32>
    %cst_30 = arith.constant 9.99999974E-6 : f32
    %128 = vector.broadcast %cst_30 : f32 to vector<16x1xf32>
    %129 = arith.addf %125, %128 : vector<16x1xf32>
    %130 = math.rsqrt %129 : vector<16x1xf32>
    %131 = vector.broadcast %130 : vector<16x1xf32> to vector<16x578xf32>
    %132 = arith.mulf %127, %131 : vector<16x578xf32>
    %c0_31 = arith.constant 0 : index
    %c0_32 = arith.constant 0 : index
    %133 = vector.load %arg3[%c0_31, %c0_32] : memref<16x1xf32, #tpu.memory_space<vmem>>, vector<16x1xf32>
    %134 = vector.broadcast %133 : vector<16x1xf32> to vector<16x578xf32>
    %135 = arith.mulf %132, %134 : vector<16x578xf32>
    %c0_33 = arith.constant 0 : index
    %c0_34 = arith.constant 0 : index
    %136 = vector.load %arg4[%c0_33, %c0_34] : memref<16x1xf32, #tpu.memory_space<vmem>>, vector<16x1xf32>
    %137 = vector.broadcast %136 : vector<16x1xf32> to vector<16x578xf32>
    %138 = arith.addf %135, %137 : vector<16x578xf32>
    %cst_35 = arith.constant 0.000000e+00 : f32
    %139 = vector.broadcast %cst_35 : f32 to vector<16x578xf32>
    %140 = arith.maximumf %138, %139 : vector<16x578xf32>
    %c0_36 = arith.constant 0 : index
    %c0_37 = arith.constant 0 : index
    %141 = vector.load %arg6[%c0_36, %c0_37] : memref<16x578xf32, #tpu.memory_space<vmem>>, vector<16x578xf32>
    tpu.vector_store %arg6[%c0_36, %c0_37], %140 {strides = array<i32>} : memref<16x578xf32, #tpu.memory_space<vmem>>, vector<16x578xf32>,
    return
  }
}

module attributes {stable_mosaic.version = 11 : i64} {
  func.func @_enc_conv_bn_relu_kernel(%arg0: memref<4x16x178xf32, #tpu.memory_space<vmem>>, %arg1: memref<4x4x32x16xbf16, #tpu.memory_space<vmem>>, %arg2: memref<32x1xf32, #tpu.memory_space<vmem>>, %arg3: memref<32x1xf32, #tpu.memory_space<vmem>>, %arg4: memref<32x1xf32, #tpu.memory_space<vmem>>, %arg5: memref<1x162xf32, #tpu.memory_space<vmem>>, %arg6: memref<32x162xf32, #tpu.memory_space<vmem>>) attributes {dimension_semantics = [], scalar_prefetch = 0 : i64, scratch_operands = 0 : i64, tpu.core_type = #tpu.core_type<tc>} {
    %c0 = arith.constant 0 : index
    %c0_0 = arith.constant 0 : index
    %c0_1 = arith.constant 0 : index
    %0 = vector.load %arg0[%c0, %c0_0, %c0_1] : memref<4x16x178xf32, #tpu.memory_space<vmem>>, vector<4x16x178xf32>
    %c0_2 = arith.constant 0 : index
    %c0_3 = arith.constant 0 : index
    %c0_4 = arith.constant 0 : index
    %c0_5 = arith.constant 0 : index
    %1 = vector.load %arg1[%c0_2, %c0_3, %c0_4, %c0_5] : memref<4x4x32x16xbf16, #tpu.memory_space<vmem>>, vector<4x4x32x16xbf16>
    %cst = arith.constant 0.000000e+00 : f32
    %2 = vector.broadcast %cst : f32 to vector<32x162xf32>
    %3 = vector.extract_strided_slice %0 {offsets = [0, 0, 0], sizes = [1, 16, 178], strides = [1, 1, 1]} : vector<4x16x178xf32> to vector<1x16x178xf32>
    %4 = vector.shape_cast %3 : vector<1x16x178xf32> to vector<16x178xf32>
    %5 = vector.extract_strided_slice %4 {offsets = [0, 0], sizes = [16, 162], strides = [1, 1]} : vector<16x178xf32> to vector<16x162xf32>
    %6 = arith.truncf %5 : vector<16x162xf32> to vector<16x162xbf16>
    %7 = vector.extract_strided_slice %1 {offsets = [0, 0, 0, 0], sizes = [1, 1, 32, 16], strides = [1, 1, 1, 1]} : vector<4x4x32x16xbf16> to vector<1x1x32x16xbf16>
    %8 = vector.shape_cast %7 : vector<1x1x32x16xbf16> to vector<32x16xbf16>
    %cst_6 = arith.constant dense<0.000000e+00> : vector<32x162xf32>
    %9 = tpu.matmul %8, %6, %cst_6 {dimension_numbers = #tpu.dot_dimension_numbers<[1], [0], [0], [1], [0, 0, 1, 1], [], []>} : vector<32x16xbf16>, vector<16x162xbf16>, vector<32x162xf32> -> vector<32x162xf32>
    %10 = arith.addf %2, %9 : vector<32x162xf32>
    %11 = vector.extract_strided_slice %4 {offsets = [0, 1], sizes = [16, 162], strides = [1, 1]} : vector<16x178xf32> to vector<16x162xf32>
    %12 = arith.truncf %11 : vector<16x162xf32> to vector<16x162xbf16>
    %13 = vector.extract_strided_slice %1 {offsets = [0, 1, 0, 0], sizes = [1, 1, 32, 16], strides = [1, 1, 1, 1]} : vector<4x4x32x16xbf16> to vector<1x1x32x16xbf16>
    %14 = vector.shape_cast %13 : vector<1x1x32x16xbf16> to vector<32x16xbf16>
    %cst_7 = arith.constant dense<0.000000e+00> : vector<32x162xf32>
    %15 = tpu.matmul %14, %12, %cst_7 {dimension_numbers = #tpu.dot_dimension_numbers<[1], [0], [0], [1], [0, 0, 1, 1], [], []>} : vector<32x16xbf16>, vector<16x162xbf16>, vector<32x162xf32> -> vector<32x162xf32>
    %16 = arith.addf %10, %15 : vector<32x162xf32>
    %17 = vector.extract_strided_slice %4 {offsets = [0, 9], sizes = [16, 162], strides = [1, 1]} : vector<16x178xf32> to vector<16x162xf32>
    %18 = arith.truncf %17 : vector<16x162xf32> to vector<16x162xbf16>
    %19 = vector.extract_strided_slice %1 {offsets = [0, 2, 0, 0], sizes = [1, 1, 32, 16], strides = [1, 1, 1, 1]} : vector<4x4x32x16xbf16> to vector<1x1x32x16xbf16>
    %20 = vector.shape_cast %19 : vector<1x1x32x16xbf16> to vector<32x16xbf16>
    %cst_8 = arith.constant dense<0.000000e+00> : vector<32x162xf32>
    %21 = tpu.matmul %20, %18, %cst_8 {dimension_numbers = #tpu.dot_dimension_numbers<[1], [0], [0], [1], [0, 0, 1, 1], [], []>} : vector<32x16xbf16>, vector<16x162xbf16>, vector<32x162xf32> -> vector<32x162xf32>
    %22 = arith.addf %16, %21 : vector<32x162xf32>
    %23 = vector.extract_strided_slice %4 {offsets = [0, 10], sizes = [16, 162], strides = [1, 1]} : vector<16x178xf32> to vector<16x162xf32>
    %24 = arith.truncf %23 : vector<16x162xf32> to vector<16x162xbf16>
    %25 = vector.extract_strided_slice %1 {offsets = [0, 3, 0, 0], sizes = [1, 1, 32, 16], strides = [1, 1, 1, 1]} : vector<4x4x32x16xbf16> to vector<1x1x32x16xbf16>
    %26 = vector.shape_cast %25 : vector<1x1x32x16xbf16> to vector<32x16xbf16>
    %cst_9 = arith.constant dense<0.000000e+00> : vector<32x162xf32>
    %27 = tpu.matmul %26, %24, %cst_9 {dimension_numbers = #tpu.dot_dimension_numbers<[1], [0], [0], [1], [0, 0, 1, 1], [], []>} : vector<32x16xbf16>, vector<16x162xbf16>, vector<32x162xf32> -> vector<32x162xf32>
    %28 = arith.addf %22, %27 : vector<32x162xf32>
    %29 = vector.extract_strided_slice %0 {offsets = [1, 0, 0], sizes = [1, 16, 178], strides = [1, 1, 1]} : vector<4x16x178xf32> to vector<1x16x178xf32>
    %30 = vector.shape_cast %29 : vector<1x16x178xf32> to vector<16x178xf32>
    %31 = vector.extract_strided_slice %30 {offsets = [0, 0], sizes = [16, 162], strides = [1, 1]} : vector<16x178xf32> to vector<16x162xf32>
    %32 = arith.truncf %31 : vector<16x162xf32> to vector<16x162xbf16>
    %33 = vector.extract_strided_slice %1 {offsets = [1, 0, 0, 0], sizes = [1, 1, 32, 16], strides = [1, 1, 1, 1]} : vector<4x4x32x16xbf16> to vector<1x1x32x16xbf16>
    %34 = vector.shape_cast %33 : vector<1x1x32x16xbf16> to vector<32x16xbf16>
    %cst_10 = arith.constant dense<0.000000e+00> : vector<32x162xf32>
    %35 = tpu.matmul %34, %32, %cst_10 {dimension_numbers = #tpu.dot_dimension_numbers<[1], [0], [0], [1], [0, 0, 1, 1], [], []>} : vector<32x16xbf16>, vector<16x162xbf16>, vector<32x162xf32> -> vector<32x162xf32>
    %36 = arith.addf %28, %35 : vector<32x162xf32>
    %37 = vector.extract_strided_slice %30 {offsets = [0, 1], sizes = [16, 162], strides = [1, 1]} : vector<16x178xf32> to vector<16x162xf32>
    %38 = arith.truncf %37 : vector<16x162xf32> to vector<16x162xbf16>
    %39 = vector.extract_strided_slice %1 {offsets = [1, 1, 0, 0], sizes = [1, 1, 32, 16], strides = [1, 1, 1, 1]} : vector<4x4x32x16xbf16> to vector<1x1x32x16xbf16>
    %40 = vector.shape_cast %39 : vector<1x1x32x16xbf16> to vector<32x16xbf16>
    %cst_11 = arith.constant dense<0.000000e+00> : vector<32x162xf32>
    %41 = tpu.matmul %40, %38, %cst_11 {dimension_numbers = #tpu.dot_dimension_numbers<[1], [0], [0], [1], [0, 0, 1, 1], [], []>} : vector<32x16xbf16>, vector<16x162xbf16>, vector<32x162xf32> -> vector<32x162xf32>
    %42 = arith.addf %36, %41 : vector<32x162xf32>
    %43 = vector.extract_strided_slice %30 {offsets = [0, 9], sizes = [16, 162], strides = [1, 1]} : vector<16x178xf32> to vector<16x162xf32>
    %44 = arith.truncf %43 : vector<16x162xf32> to vector<16x162xbf16>
    %45 = vector.extract_strided_slice %1 {offsets = [1, 2, 0, 0], sizes = [1, 1, 32, 16], strides = [1, 1, 1, 1]} : vector<4x4x32x16xbf16> to vector<1x1x32x16xbf16>
    %46 = vector.shape_cast %45 : vector<1x1x32x16xbf16> to vector<32x16xbf16>
    %cst_12 = arith.constant dense<0.000000e+00> : vector<32x162xf32>
    %47 = tpu.matmul %46, %44, %cst_12 {dimension_numbers = #tpu.dot_dimension_numbers<[1], [0], [0], [1], [0, 0, 1, 1], [], []>} : vector<32x16xbf16>, vector<16x162xbf16>, vector<32x162xf32> -> vector<32x162xf32>
    %48 = arith.addf %42, %47 : vector<32x162xf32>
    %49 = vector.extract_strided_slice %30 {offsets = [0, 10], sizes = [16, 162], strides = [1, 1]} : vector<16x178xf32> to vector<16x162xf32>
    %50 = arith.truncf %49 : vector<16x162xf32> to vector<16x162xbf16>
    %51 = vector.extract_strided_slice %1 {offsets = [1, 3, 0, 0], sizes = [1, 1, 32, 16], strides = [1, 1, 1, 1]} : vector<4x4x32x16xbf16> to vector<1x1x32x16xbf16>
    %52 = vector.shape_cast %51 : vector<1x1x32x16xbf16> to vector<32x16xbf16>
    %cst_13 = arith.constant dense<0.000000e+00> : vector<32x162xf32>
    %53 = tpu.matmul %52, %50, %cst_13 {dimension_numbers = #tpu.dot_dimension_numbers<[1], [0], [0], [1], [0, 0, 1, 1], [], []>} : vector<32x16xbf16>, vector<16x162xbf16>, vector<32x162xf32> -> vector<32x162xf32>
    %54 = arith.addf %48, %53 : vector<32x162xf32>
    %55 = vector.extract_strided_slice %0 {offsets = [2, 0, 0], sizes = [1, 16, 178], strides = [1, 1, 1]} : vector<4x16x178xf32> to vector<1x16x178xf32>
    %56 = vector.shape_cast %55 : vector<1x16x178xf32> to vector<16x178xf32>
    %57 = vector.extract_strided_slice %56 {offsets = [0, 0], sizes = [16, 162], strides = [1, 1]} : vector<16x178xf32> to vector<16x162xf32>
    %58 = arith.truncf %57 : vector<16x162xf32> to vector<16x162xbf16>
    %59 = vector.extract_strided_slice %1 {offsets = [2, 0, 0, 0], sizes = [1, 1, 32, 16], strides = [1, 1, 1, 1]} : vector<4x4x32x16xbf16> to vector<1x1x32x16xbf16>
    %60 = vector.shape_cast %59 : vector<1x1x32x16xbf16> to vector<32x16xbf16>
    %cst_14 = arith.constant dense<0.000000e+00> : vector<32x162xf32>
    %61 = tpu.matmul %60, %58, %cst_14 {dimension_numbers = #tpu.dot_dimension_numbers<[1], [0], [0], [1], [0, 0, 1, 1], [], []>} : vector<32x16xbf16>, vector<16x162xbf16>, vector<32x162xf32> -> vector<32x162xf32>
    %62 = arith.addf %54, %61 : vector<32x162xf32>
    %63 = vector.extract_strided_slice %56 {offsets = [0, 1], sizes = [16, 162], strides = [1, 1]} : vector<16x178xf32> to vector<16x162xf32>
    %64 = arith.truncf %63 : vector<16x162xf32> to vector<16x162xbf16>
    %65 = vector.extract_strided_slice %1 {offsets = [2, 1, 0, 0], sizes = [1, 1, 32, 16], strides = [1, 1, 1, 1]} : vector<4x4x32x16xbf16> to vector<1x1x32x16xbf16>
    %66 = vector.shape_cast %65 : vector<1x1x32x16xbf16> to vector<32x16xbf16>
    %cst_15 = arith.constant dense<0.000000e+00> : vector<32x162xf32>
    %67 = tpu.matmul %66, %64, %cst_15 {dimension_numbers = #tpu.dot_dimension_numbers<[1], [0], [0], [1], [0, 0, 1, 1], [], []>} : vector<32x16xbf16>, vector<16x162xbf16>, vector<32x162xf32> -> vector<32x162xf32>
    %68 = arith.addf %62, %67 : vector<32x162xf32>
    %69 = vector.extract_strided_slice %56 {offsets = [0, 9], sizes = [16, 162], strides = [1, 1]} : vector<16x178xf32> to vector<16x162xf32>
    %70 = arith.truncf %69 : vector<16x162xf32> to vector<16x162xbf16>
    %71 = vector.extract_strided_slice %1 {offsets = [2, 2, 0, 0], sizes = [1, 1, 32, 16], strides = [1, 1, 1, 1]} : vector<4x4x32x16xbf16> to vector<1x1x32x16xbf16>
    %72 = vector.shape_cast %71 : vector<1x1x32x16xbf16> to vector<32x16xbf16>
    %cst_16 = arith.constant dense<0.000000e+00> : vector<32x162xf32>
    %73 = tpu.matmul %72, %70, %cst_16 {dimension_numbers = #tpu.dot_dimension_numbers<[1], [0], [0], [1], [0, 0, 1, 1], [], []>} : vector<32x16xbf16>, vector<16x162xbf16>, vector<32x162xf32> -> vector<32x162xf32>
    %74 = arith.addf %68, %73 : vector<32x162xf32>
    %75 = vector.extract_strided_slice %56 {offsets = [0, 10], sizes = [16, 162], strides = [1, 1]} : vector<16x178xf32> to vector<16x162xf32>
    %76 = arith.truncf %75 : vector<16x162xf32> to vector<16x162xbf16>
    %77 = vector.extract_strided_slice %1 {offsets = [2, 3, 0, 0], sizes = [1, 1, 32, 16], strides = [1, 1, 1, 1]} : vector<4x4x32x16xbf16> to vector<1x1x32x16xbf16>
    %78 = vector.shape_cast %77 : vector<1x1x32x16xbf16> to vector<32x16xbf16>
    %cst_17 = arith.constant dense<0.000000e+00> : vector<32x162xf32>
    %79 = tpu.matmul %78, %76, %cst_17 {dimension_numbers = #tpu.dot_dimension_numbers<[1], [0], [0], [1], [0, 0, 1, 1], [], []>} : vector<32x16xbf16>, vector<16x162xbf16>, vector<32x162xf32> -> vector<32x162xf32>
    %80 = arith.addf %74, %79 : vector<32x162xf32>
    %81 = vector.extract_strided_slice %0 {offsets = [3, 0, 0], sizes = [1, 16, 178], strides = [1, 1, 1]} : vector<4x16x178xf32> to vector<1x16x178xf32>
    %82 = vector.shape_cast %81 : vector<1x16x178xf32> to vector<16x178xf32>
    %83 = vector.extract_strided_slice %82 {offsets = [0, 0], sizes = [16, 162], strides = [1, 1]} : vector<16x178xf32> to vector<16x162xf32>
    %84 = arith.truncf %83 : vector<16x162xf32> to vector<16x162xbf16>
    %85 = vector.extract_strided_slice %1 {offsets = [3, 0, 0, 0], sizes = [1, 1, 32, 16], strides = [1, 1, 1, 1]} : vector<4x4x32x16xbf16> to vector<1x1x32x16xbf16>
    %86 = vector.shape_cast %85 : vector<1x1x32x16xbf16> to vector<32x16xbf16>
    %cst_18 = arith.constant dense<0.000000e+00> : vector<32x162xf32>
    %87 = tpu.matmul %86, %84, %cst_18 {dimension_numbers = #tpu.dot_dimension_numbers<[1], [0], [0], [1], [0, 0, 1, 1], [], []>} : vector<32x16xbf16>, vector<16x162xbf16>, vector<32x162xf32> -> vector<32x162xf32>
    %88 = arith.addf %80, %87 : vector<32x162xf32>
    %89 = vector.extract_strided_slice %82 {offsets = [0, 1], sizes = [16, 162], strides = [1, 1]} : vector<16x178xf32> to vector<16x162xf32>
    %90 = arith.truncf %89 : vector<16x162xf32> to vector<16x162xbf16>
    %91 = vector.extract_strided_slice %1 {offsets = [3, 1, 0, 0], sizes = [1, 1, 32, 16], strides = [1, 1, 1, 1]} : vector<4x4x32x16xbf16> to vector<1x1x32x16xbf16>
    %92 = vector.shape_cast %91 : vector<1x1x32x16xbf16> to vector<32x16xbf16>
    %cst_19 = arith.constant dense<0.000000e+00> : vector<32x162xf32>
    %93 = tpu.matmul %92, %90, %cst_19 {dimension_numbers = #tpu.dot_dimension_numbers<[1], [0], [0], [1], [0, 0, 1, 1], [], []>} : vector<32x16xbf16>, vector<16x162xbf16>, vector<32x162xf32> -> vector<32x162xf32>
    %94 = arith.addf %88, %93 : vector<32x162xf32>
    %95 = vector.extract_strided_slice %82 {offsets = [0, 9], sizes = [16, 162], strides = [1, 1]} : vector<16x178xf32> to vector<16x162xf32>
    %96 = arith.truncf %95 : vector<16x162xf32> to vector<16x162xbf16>
    %97 = vector.extract_strided_slice %1 {offsets = [3, 2, 0, 0], sizes = [1, 1, 32, 16], strides = [1, 1, 1, 1]} : vector<4x4x32x16xbf16> to vector<1x1x32x16xbf16>
    %98 = vector.shape_cast %97 : vector<1x1x32x16xbf16> to vector<32x16xbf16>
    %cst_20 = arith.constant dense<0.000000e+00> : vector<32x162xf32>
    %99 = tpu.matmul %98, %96, %cst_20 {dimension_numbers = #tpu.dot_dimension_numbers<[1], [0], [0], [1], [0, 0, 1, 1], [], []>} : vector<32x16xbf16>, vector<16x162xbf16>, vector<32x162xf32> -> vector<32x162xf32>
    %100 = arith.addf %94, %99 : vector<32x162xf32>
    %101 = vector.extract_strided_slice %82 {offsets = [0, 10], sizes = [16, 162], strides = [1, 1]} : vector<16x178xf32> to vector<16x162xf32>
    %102 = arith.truncf %101 : vector<16x162xf32> to vector<16x162xbf16>
    %103 = vector.extract_strided_slice %1 {offsets = [3, 3, 0, 0], sizes = [1, 1, 32, 16], strides = [1, 1, 1, 1]} : vector<4x4x32x16xbf16> to vector<1x1x32x16xbf16>
    %104 = vector.shape_cast %103 : vector<1x1x32x16xbf16> to vector<32x16xbf16>
    %cst_21 = arith.constant dense<0.000000e+00> : vector<32x162xf32>
    %105 = tpu.matmul %104, %102, %cst_21 {dimension_numbers = #tpu.dot_dimension_numbers<[1], [0], [0], [1], [0, 0, 1, 1], [], []>} : vector<32x16xbf16>, vector<16x162xbf16>, vector<32x162xf32> -> vector<32x162xf32>
    %106 = arith.addf %100, %105 : vector<32x162xf32>
    %c0_22 = arith.constant 0 : index
    %c0_23 = arith.constant 0 : index
    %107 = vector.load %arg2[%c0_22, %c0_23] : memref<32x1xf32, #tpu.memory_space<vmem>>, vector<32x1xf32>
    %108 = vector.broadcast %107 : vector<32x1xf32> to vector<32x162xf32>
    %109 = arith.addf %106, %108 : vector<32x162xf32>
    %c0_24 = arith.constant 0 : index
    %c0_25 = arith.constant 0 : index
    %110 = vector.load %arg5[%c0_24, %c0_25] : memref<1x162xf32, #tpu.memory_space<vmem>>, vector<1x162xf32>
    %111 = vector.broadcast %110 : vector<1x162xf32> to vector<32x162xf32>
    %112 = arith.mulf %109, %111 : vector<32x162xf32>
    %cst_26 = arith.constant dense<0.000000e+00> : vector<32xf32>
    %113 = vector.multi_reduction <add>, %112, %cst_26 [1] : vector<32x162xf32> to vector<32xf32>
    %114 = vector.shape_cast %113 : vector<32xf32> to vector<32x1xf32>
    %cst_27 = arith.constant 7.812500e-03 : f32
    %115 = vector.broadcast %cst_27 : f32 to vector<32x1xf32>
    %116 = arith.mulf %114, %115 : vector<32x1xf32>
    %117 = vector.broadcast %116 : vector<32x1xf32> to vector<32x162xf32>
    %118 = arith.subf %109, %117 : vector<32x162xf32>
    %119 = arith.mulf %118, %118 : vector<32x162xf32>
    %120 = vector.broadcast %110 : vector<1x162xf32> to vector<32x162xf32>
    %121 = arith.mulf %119, %120 : vector<32x162xf32>
    %cst_28 = arith.constant dense<0.000000e+00> : vector<32xf32>
    %122 = vector.multi_reduction <add>, %121, %cst_28 [1] : vector<32x162xf32> to vector<32xf32>
    %123 = vector.shape_cast %122 : vector<32xf32> to vector<32x1xf32>
    %cst_29 = arith.constant 7.812500e-03 : f32
    %124 = vector.broadcast %cst_29 : f32 to vector<32x1xf32>
    %125 = arith.mulf %123, %124 : vector<32x1xf32>
    %126 = vector.broadcast %116 : vector<32x1xf32> to vector<32x162xf32>
    %127 = arith.subf %109, %126 : vector<32x162xf32>
    %cst_30 = arith.constant 9.99999974E-6 : f32
    %128 = vector.broadcast %cst_30 : f32 to vector<32x1xf32>
    %129 = arith.addf %125, %128 : vector<32x1xf32>
    %130 = math.rsqrt %129 : vector<32x1xf32>
    %131 = vector.broadcast %130 : vector<32x1xf32> to vector<32x162xf32>
    %132 = arith.mulf %127, %131 : vector<32x162xf32>
    %c0_31 = arith.constant 0 : index
    %c0_32 = arith.constant 0 : index
    %133 = vector.load %arg3[%c0_31, %c0_32] : memref<32x1xf32, #tpu.memory_space<vmem>>, vector<32x1xf32>
    %134 = vector.broadcast %133 : vector<32x1xf32> to vector<32x162xf32>
    %135 = arith.mulf %132, %134 : vector<32x162xf32>
    %c0_33 = arith.constant 0 : index
    %c0_34 = arith.constant 0 : index
    %136 = vector.load %arg4[%c0_33, %c0_34] : memref<32x1xf32, #tpu.memory_space<vmem>>, vector<32x1xf32>
    %137 = vector.broadcast %136 : vector<32x1xf32> to vector<32x162xf32>
    %138 = arith.addf %135, %137 : vector<32x162xf32>
    %cst_35 = arith.constant 0.000000e+00 : f32
    %139 = vector.broadcast %cst_35 : f32 to vector<32x162xf32>
    %140 = arith.maximumf %138, %139 : vector<32x162xf32>
    %c0_36 = arith.constant 0 : index
    %c0_37 = arith.constant 0 : index
    %141 = vector.load %arg6[%c0_36, %c0_37] : memref<32x162xf32, #tpu.memory_space<vmem>>, vector<32x162xf32>
    tpu.vector_store %arg6[%c0_36, %c0_37], %140 {strides = array<i32>} : memref<32x162xf32, #tpu.memory_space<vmem>>, vector<32x162xf32>,
    return
  }
}

module attributes {stable_mosaic.version = 11 : i64} {
  func.func @_enc_conv_bn_relu_kernel(%arg0: memref<4x32x62xf32, #tpu.memory_space<vmem>>, %arg1: memref<4x4x64x32xbf16, #tpu.memory_space<vmem>>, %arg2: memref<64x1xf32, #tpu.memory_space<vmem>>, %arg3: memref<64x1xf32, #tpu.memory_space<vmem>>, %arg4: memref<64x1xf32, #tpu.memory_space<vmem>>, %arg5: memref<1x50xf32, #tpu.memory_space<vmem>>, %arg6: memref<64x50xf32, #tpu.memory_space<vmem>>) attributes {dimension_semantics = [], scalar_prefetch = 0 : i64, scratch_operands = 0 : i64, tpu.core_type = #tpu.core_type<tc>} {
    %c0 = arith.constant 0 : index
    %c0_0 = arith.constant 0 : index
    %c0_1 = arith.constant 0 : index
    %0 = vector.load %arg0[%c0, %c0_0, %c0_1] : memref<4x32x62xf32, #tpu.memory_space<vmem>>, vector<4x32x62xf32>
    %c0_2 = arith.constant 0 : index
    %c0_3 = arith.constant 0 : index
    %c0_4 = arith.constant 0 : index
    %c0_5 = arith.constant 0 : index
    %1 = vector.load %arg1[%c0_2, %c0_3, %c0_4, %c0_5] : memref<4x4x64x32xbf16, #tpu.memory_space<vmem>>, vector<4x4x64x32xbf16>
    %cst = arith.constant 0.000000e+00 : f32
    %2 = vector.broadcast %cst : f32 to vector<64x50xf32>
    %3 = vector.extract_strided_slice %0 {offsets = [0, 0, 0], sizes = [1, 32, 62], strides = [1, 1, 1]} : vector<4x32x62xf32> to vector<1x32x62xf32>
    %4 = vector.shape_cast %3 : vector<1x32x62xf32> to vector<32x62xf32>
    %5 = vector.extract_strided_slice %4 {offsets = [0, 0], sizes = [32, 50], strides = [1, 1]} : vector<32x62xf32> to vector<32x50xf32>
    %6 = arith.truncf %5 : vector<32x50xf32> to vector<32x50xbf16>
    %7 = vector.extract_strided_slice %1 {offsets = [0, 0, 0, 0], sizes = [1, 1, 64, 32], strides = [1, 1, 1, 1]} : vector<4x4x64x32xbf16> to vector<1x1x64x32xbf16>
    %8 = vector.shape_cast %7 : vector<1x1x64x32xbf16> to vector<64x32xbf16>
    %cst_6 = arith.constant dense<0.000000e+00> : vector<64x50xf32>
    %9 = tpu.matmul %8, %6, %cst_6 {dimension_numbers = #tpu.dot_dimension_numbers<[1], [0], [0], [1], [0, 0, 1, 1], [], []>} : vector<64x32xbf16>, vector<32x50xbf16>, vector<64x50xf32> -> vector<64x50xf32>
    %10 = arith.addf %2, %9 : vector<64x50xf32>
    %11 = vector.extract_strided_slice %4 {offsets = [0, 1], sizes = [32, 50], strides = [1, 1]} : vector<32x62xf32> to vector<32x50xf32>
    %12 = arith.truncf %11 : vector<32x50xf32> to vector<32x50xbf16>
    %13 = vector.extract_strided_slice %1 {offsets = [0, 1, 0, 0], sizes = [1, 1, 64, 32], strides = [1, 1, 1, 1]} : vector<4x4x64x32xbf16> to vector<1x1x64x32xbf16>
    %14 = vector.shape_cast %13 : vector<1x1x64x32xbf16> to vector<64x32xbf16>
    %cst_7 = arith.constant dense<0.000000e+00> : vector<64x50xf32>
    %15 = tpu.matmul %14, %12, %cst_7 {dimension_numbers = #tpu.dot_dimension_numbers<[1], [0], [0], [1], [0, 0, 1, 1], [], []>} : vector<64x32xbf16>, vector<32x50xbf16>, vector<64x50xf32> -> vector<64x50xf32>
    %16 = arith.addf %10, %15 : vector<64x50xf32>
    %17 = vector.extract_strided_slice %4 {offsets = [0, 5], sizes = [32, 50], strides = [1, 1]} : vector<32x62xf32> to vector<32x50xf32>
    %18 = arith.truncf %17 : vector<32x50xf32> to vector<32x50xbf16>
    %19 = vector.extract_strided_slice %1 {offsets = [0, 2, 0, 0], sizes = [1, 1, 64, 32], strides = [1, 1, 1, 1]} : vector<4x4x64x32xbf16> to vector<1x1x64x32xbf16>
    %20 = vector.shape_cast %19 : vector<1x1x64x32xbf16> to vector<64x32xbf16>
    %cst_8 = arith.constant dense<0.000000e+00> : vector<64x50xf32>
    %21 = tpu.matmul %20, %18, %cst_8 {dimension_numbers = #tpu.dot_dimension_numbers<[1], [0], [0], [1], [0, 0, 1, 1], [], []>} : vector<64x32xbf16>, vector<32x50xbf16>, vector<64x50xf32> -> vector<64x50xf32>
    %22 = arith.addf %16, %21 : vector<64x50xf32>
    %23 = vector.extract_strided_slice %4 {offsets = [0, 6], sizes = [32, 50], strides = [1, 1]} : vector<32x62xf32> to vector<32x50xf32>
    %24 = arith.truncf %23 : vector<32x50xf32> to vector<32x50xbf16>
    %25 = vector.extract_strided_slice %1 {offsets = [0, 3, 0, 0], sizes = [1, 1, 64, 32], strides = [1, 1, 1, 1]} : vector<4x4x64x32xbf16> to vector<1x1x64x32xbf16>
    %26 = vector.shape_cast %25 : vector<1x1x64x32xbf16> to vector<64x32xbf16>
    %cst_9 = arith.constant dense<0.000000e+00> : vector<64x50xf32>
    %27 = tpu.matmul %26, %24, %cst_9 {dimension_numbers = #tpu.dot_dimension_numbers<[1], [0], [0], [1], [0, 0, 1, 1], [], []>} : vector<64x32xbf16>, vector<32x50xbf16>, vector<64x50xf32> -> vector<64x50xf32>
    %28 = arith.addf %22, %27 : vector<64x50xf32>
    %29 = vector.extract_strided_slice %0 {offsets = [1, 0, 0], sizes = [1, 32, 62], strides = [1, 1, 1]} : vector<4x32x62xf32> to vector<1x32x62xf32>
    %30 = vector.shape_cast %29 : vector<1x32x62xf32> to vector<32x62xf32>
    %31 = vector.extract_strided_slice %30 {offsets = [0, 0], sizes = [32, 50], strides = [1, 1]} : vector<32x62xf32> to vector<32x50xf32>
    %32 = arith.truncf %31 : vector<32x50xf32> to vector<32x50xbf16>
    %33 = vector.extract_strided_slice %1 {offsets = [1, 0, 0, 0], sizes = [1, 1, 64, 32], strides = [1, 1, 1, 1]} : vector<4x4x64x32xbf16> to vector<1x1x64x32xbf16>
    %34 = vector.shape_cast %33 : vector<1x1x64x32xbf16> to vector<64x32xbf16>
    %cst_10 = arith.constant dense<0.000000e+00> : vector<64x50xf32>
    %35 = tpu.matmul %34, %32, %cst_10 {dimension_numbers = #tpu.dot_dimension_numbers<[1], [0], [0], [1], [0, 0, 1, 1], [], []>} : vector<64x32xbf16>, vector<32x50xbf16>, vector<64x50xf32> -> vector<64x50xf32>
    %36 = arith.addf %28, %35 : vector<64x50xf32>
    %37 = vector.extract_strided_slice %30 {offsets = [0, 1], sizes = [32, 50], strides = [1, 1]} : vector<32x62xf32> to vector<32x50xf32>
    %38 = arith.truncf %37 : vector<32x50xf32> to vector<32x50xbf16>
    %39 = vector.extract_strided_slice %1 {offsets = [1, 1, 0, 0], sizes = [1, 1, 64, 32], strides = [1, 1, 1, 1]} : vector<4x4x64x32xbf16> to vector<1x1x64x32xbf16>
    %40 = vector.shape_cast %39 : vector<1x1x64x32xbf16> to vector<64x32xbf16>
    %cst_11 = arith.constant dense<0.000000e+00> : vector<64x50xf32>
    %41 = tpu.matmul %40, %38, %cst_11 {dimension_numbers = #tpu.dot_dimension_numbers<[1], [0], [0], [1], [0, 0, 1, 1], [], []>} : vector<64x32xbf16>, vector<32x50xbf16>, vector<64x50xf32> -> vector<64x50xf32>
    %42 = arith.addf %36, %41 : vector<64x50xf32>
    %43 = vector.extract_strided_slice %30 {offsets = [0, 5], sizes = [32, 50], strides = [1, 1]} : vector<32x62xf32> to vector<32x50xf32>
    %44 = arith.truncf %43 : vector<32x50xf32> to vector<32x50xbf16>
    %45 = vector.extract_strided_slice %1 {offsets = [1, 2, 0, 0], sizes = [1, 1, 64, 32], strides = [1, 1, 1, 1]} : vector<4x4x64x32xbf16> to vector<1x1x64x32xbf16>
    %46 = vector.shape_cast %45 : vector<1x1x64x32xbf16> to vector<64x32xbf16>
    %cst_12 = arith.constant dense<0.000000e+00> : vector<64x50xf32>
    %47 = tpu.matmul %46, %44, %cst_12 {dimension_numbers = #tpu.dot_dimension_numbers<[1], [0], [0], [1], [0, 0, 1, 1], [], []>} : vector<64x32xbf16>, vector<32x50xbf16>, vector<64x50xf32> -> vector<64x50xf32>
    %48 = arith.addf %42, %47 : vector<64x50xf32>
    %49 = vector.extract_strided_slice %30 {offsets = [0, 6], sizes = [32, 50], strides = [1, 1]} : vector<32x62xf32> to vector<32x50xf32>
    %50 = arith.truncf %49 : vector<32x50xf32> to vector<32x50xbf16>
    %51 = vector.extract_strided_slice %1 {offsets = [1, 3, 0, 0], sizes = [1, 1, 64, 32], strides = [1, 1, 1, 1]} : vector<4x4x64x32xbf16> to vector<1x1x64x32xbf16>
    %52 = vector.shape_cast %51 : vector<1x1x64x32xbf16> to vector<64x32xbf16>
    %cst_13 = arith.constant dense<0.000000e+00> : vector<64x50xf32>
    %53 = tpu.matmul %52, %50, %cst_13 {dimension_numbers = #tpu.dot_dimension_numbers<[1], [0], [0], [1], [0, 0, 1, 1], [], []>} : vector<64x32xbf16>, vector<32x50xbf16>, vector<64x50xf32> -> vector<64x50xf32>
    %54 = arith.addf %48, %53 : vector<64x50xf32>
    %55 = vector.extract_strided_slice %0 {offsets = [2, 0, 0], sizes = [1, 32, 62], strides = [1, 1, 1]} : vector<4x32x62xf32> to vector<1x32x62xf32>
    %56 = vector.shape_cast %55 : vector<1x32x62xf32> to vector<32x62xf32>
    %57 = vector.extract_strided_slice %56 {offsets = [0, 0], sizes = [32, 50], strides = [1, 1]} : vector<32x62xf32> to vector<32x50xf32>
    %58 = arith.truncf %57 : vector<32x50xf32> to vector<32x50xbf16>
    %59 = vector.extract_strided_slice %1 {offsets = [2, 0, 0, 0], sizes = [1, 1, 64, 32], strides = [1, 1, 1, 1]} : vector<4x4x64x32xbf16> to vector<1x1x64x32xbf16>
    %60 = vector.shape_cast %59 : vector<1x1x64x32xbf16> to vector<64x32xbf16>
    %cst_14 = arith.constant dense<0.000000e+00> : vector<64x50xf32>
    %61 = tpu.matmul %60, %58, %cst_14 {dimension_numbers = #tpu.dot_dimension_numbers<[1], [0], [0], [1], [0, 0, 1, 1], [], []>} : vector<64x32xbf16>, vector<32x50xbf16>, vector<64x50xf32> -> vector<64x50xf32>
    %62 = arith.addf %54, %61 : vector<64x50xf32>
    %63 = vector.extract_strided_slice %56 {offsets = [0, 1], sizes = [32, 50], strides = [1, 1]} : vector<32x62xf32> to vector<32x50xf32>
    %64 = arith.truncf %63 : vector<32x50xf32> to vector<32x50xbf16>
    %65 = vector.extract_strided_slice %1 {offsets = [2, 1, 0, 0], sizes = [1, 1, 64, 32], strides = [1, 1, 1, 1]} : vector<4x4x64x32xbf16> to vector<1x1x64x32xbf16>
    %66 = vector.shape_cast %65 : vector<1x1x64x32xbf16> to vector<64x32xbf16>
    %cst_15 = arith.constant dense<0.000000e+00> : vector<64x50xf32>
    %67 = tpu.matmul %66, %64, %cst_15 {dimension_numbers = #tpu.dot_dimension_numbers<[1], [0], [0], [1], [0, 0, 1, 1], [], []>} : vector<64x32xbf16>, vector<32x50xbf16>, vector<64x50xf32> -> vector<64x50xf32>
    %68 = arith.addf %62, %67 : vector<64x50xf32>
    %69 = vector.extract_strided_slice %56 {offsets = [0, 5], sizes = [32, 50], strides = [1, 1]} : vector<32x62xf32> to vector<32x50xf32>
    %70 = arith.truncf %69 : vector<32x50xf32> to vector<32x50xbf16>
    %71 = vector.extract_strided_slice %1 {offsets = [2, 2, 0, 0], sizes = [1, 1, 64, 32], strides = [1, 1, 1, 1]} : vector<4x4x64x32xbf16> to vector<1x1x64x32xbf16>
    %72 = vector.shape_cast %71 : vector<1x1x64x32xbf16> to vector<64x32xbf16>
    %cst_16 = arith.constant dense<0.000000e+00> : vector<64x50xf32>
    %73 = tpu.matmul %72, %70, %cst_16 {dimension_numbers = #tpu.dot_dimension_numbers<[1], [0], [0], [1], [0, 0, 1, 1], [], []>} : vector<64x32xbf16>, vector<32x50xbf16>, vector<64x50xf32> -> vector<64x50xf32>
    %74 = arith.addf %68, %73 : vector<64x50xf32>
    %75 = vector.extract_strided_slice %56 {offsets = [0, 6], sizes = [32, 50], strides = [1, 1]} : vector<32x62xf32> to vector<32x50xf32>
    %76 = arith.truncf %75 : vector<32x50xf32> to vector<32x50xbf16>
    %77 = vector.extract_strided_slice %1 {offsets = [2, 3, 0, 0], sizes = [1, 1, 64, 32], strides = [1, 1, 1, 1]} : vector<4x4x64x32xbf16> to vector<1x1x64x32xbf16>
    %78 = vector.shape_cast %77 : vector<1x1x64x32xbf16> to vector<64x32xbf16>
    %cst_17 = arith.constant dense<0.000000e+00> : vector<64x50xf32>
    %79 = tpu.matmul %78, %76, %cst_17 {dimension_numbers = #tpu.dot_dimension_numbers<[1], [0], [0], [1], [0, 0, 1, 1], [], []>} : vector<64x32xbf16>, vector<32x50xbf16>, vector<64x50xf32> -> vector<64x50xf32>
    %80 = arith.addf %74, %79 : vector<64x50xf32>
    %81 = vector.extract_strided_slice %0 {offsets = [3, 0, 0], sizes = [1, 32, 62], strides = [1, 1, 1]} : vector<4x32x62xf32> to vector<1x32x62xf32>
    %82 = vector.shape_cast %81 : vector<1x32x62xf32> to vector<32x62xf32>
    %83 = vector.extract_strided_slice %82 {offsets = [0, 0], sizes = [32, 50], strides = [1, 1]} : vector<32x62xf32> to vector<32x50xf32>
    %84 = arith.truncf %83 : vector<32x50xf32> to vector<32x50xbf16>
    %85 = vector.extract_strided_slice %1 {offsets = [3, 0, 0, 0], sizes = [1, 1, 64, 32], strides = [1, 1, 1, 1]} : vector<4x4x64x32xbf16> to vector<1x1x64x32xbf16>
    %86 = vector.shape_cast %85 : vector<1x1x64x32xbf16> to vector<64x32xbf16>
    %cst_18 = arith.constant dense<0.000000e+00> : vector<64x50xf32>
    %87 = tpu.matmul %86, %84, %cst_18 {dimension_numbers = #tpu.dot_dimension_numbers<[1], [0], [0], [1], [0, 0, 1, 1], [], []>} : vector<64x32xbf16>, vector<32x50xbf16>, vector<64x50xf32> -> vector<64x50xf32>
    %88 = arith.addf %80, %87 : vector<64x50xf32>
    %89 = vector.extract_strided_slice %82 {offsets = [0, 1], sizes = [32, 50], strides = [1, 1]} : vector<32x62xf32> to vector<32x50xf32>
    %90 = arith.truncf %89 : vector<32x50xf32> to vector<32x50xbf16>
    %91 = vector.extract_strided_slice %1 {offsets = [3, 1, 0, 0], sizes = [1, 1, 64, 32], strides = [1, 1, 1, 1]} : vector<4x4x64x32xbf16> to vector<1x1x64x32xbf16>
    %92 = vector.shape_cast %91 : vector<1x1x64x32xbf16> to vector<64x32xbf16>
    %cst_19 = arith.constant dense<0.000000e+00> : vector<64x50xf32>
    %93 = tpu.matmul %92, %90, %cst_19 {dimension_numbers = #tpu.dot_dimension_numbers<[1], [0], [0], [1], [0, 0, 1, 1], [], []>} : vector<64x32xbf16>, vector<32x50xbf16>, vector<64x50xf32> -> vector<64x50xf32>
    %94 = arith.addf %88, %93 : vector<64x50xf32>
    %95 = vector.extract_strided_slice %82 {offsets = [0, 5], sizes = [32, 50], strides = [1, 1]} : vector<32x62xf32> to vector<32x50xf32>
    %96 = arith.truncf %95 : vector<32x50xf32> to vector<32x50xbf16>
    %97 = vector.extract_strided_slice %1 {offsets = [3, 2, 0, 0], sizes = [1, 1, 64, 32], strides = [1, 1, 1, 1]} : vector<4x4x64x32xbf16> to vector<1x1x64x32xbf16>
    %98 = vector.shape_cast %97 : vector<1x1x64x32xbf16> to vector<64x32xbf16>
    %cst_20 = arith.constant dense<0.000000e+00> : vector<64x50xf32>
    %99 = tpu.matmul %98, %96, %cst_20 {dimension_numbers = #tpu.dot_dimension_numbers<[1], [0], [0], [1], [0, 0, 1, 1], [], []>} : vector<64x32xbf16>, vector<32x50xbf16>, vector<64x50xf32> -> vector<64x50xf32>
    %100 = arith.addf %94, %99 : vector<64x50xf32>
    %101 = vector.extract_strided_slice %82 {offsets = [0, 6], sizes = [32, 50], strides = [1, 1]} : vector<32x62xf32> to vector<32x50xf32>
    %102 = arith.truncf %101 : vector<32x50xf32> to vector<32x50xbf16>
    %103 = vector.extract_strided_slice %1 {offsets = [3, 3, 0, 0], sizes = [1, 1, 64, 32], strides = [1, 1, 1, 1]} : vector<4x4x64x32xbf16> to vector<1x1x64x32xbf16>
    %104 = vector.shape_cast %103 : vector<1x1x64x32xbf16> to vector<64x32xbf16>
    %cst_21 = arith.constant dense<0.000000e+00> : vector<64x50xf32>
    %105 = tpu.matmul %104, %102, %cst_21 {dimension_numbers = #tpu.dot_dimension_numbers<[1], [0], [0], [1], [0, 0, 1, 1], [], []>} : vector<64x32xbf16>, vector<32x50xbf16>, vector<64x50xf32> -> vector<64x50xf32>
    %106 = arith.addf %100, %105 : vector<64x50xf32>
    %c0_22 = arith.constant 0 : index
    %c0_23 = arith.constant 0 : index
    %107 = vector.load %arg2[%c0_22, %c0_23] : memref<64x1xf32, #tpu.memory_space<vmem>>, vector<64x1xf32>
    %108 = vector.broadcast %107 : vector<64x1xf32> to vector<64x50xf32>
    %109 = arith.addf %106, %108 : vector<64x50xf32>
    %c0_24 = arith.constant 0 : index
    %c0_25 = arith.constant 0 : index
    %110 = vector.load %arg5[%c0_24, %c0_25] : memref<1x50xf32, #tpu.memory_space<vmem>>, vector<1x50xf32>
    %111 = vector.broadcast %110 : vector<1x50xf32> to vector<64x50xf32>
    %112 = arith.mulf %109, %111 : vector<64x50xf32>
    %cst_26 = arith.constant dense<0.000000e+00> : vector<64xf32>
    %113 = vector.multi_reduction <add>, %112, %cst_26 [1] : vector<64x50xf32> to vector<64xf32>
    %114 = vector.shape_cast %113 : vector<64xf32> to vector<64x1xf32>
    %cst_27 = arith.constant 3.125000e-02 : f32
    %115 = vector.broadcast %cst_27 : f32 to vector<64x1xf32>
    %116 = arith.mulf %114, %115 : vector<64x1xf32>
    %117 = vector.broadcast %116 : vector<64x1xf32> to vector<64x50xf32>
    %118 = arith.subf %109, %117 : vector<64x50xf32>
    %119 = arith.mulf %118, %118 : vector<64x50xf32>
    %120 = vector.broadcast %110 : vector<1x50xf32> to vector<64x50xf32>
    %121 = arith.mulf %119, %120 : vector<64x50xf32>
    %cst_28 = arith.constant dense<0.000000e+00> : vector<64xf32>
    %122 = vector.multi_reduction <add>, %121, %cst_28 [1] : vector<64x50xf32> to vector<64xf32>
    %123 = vector.shape_cast %122 : vector<64xf32> to vector<64x1xf32>
    %cst_29 = arith.constant 3.125000e-02 : f32
    %124 = vector.broadcast %cst_29 : f32 to vector<64x1xf32>
    %125 = arith.mulf %123, %124 : vector<64x1xf32>
    %126 = vector.broadcast %116 : vector<64x1xf32> to vector<64x50xf32>
    %127 = arith.subf %109, %126 : vector<64x50xf32>
    %cst_30 = arith.constant 9.99999974E-6 : f32
    %128 = vector.broadcast %cst_30 : f32 to vector<64x1xf32>
    %129 = arith.addf %125, %128 : vector<64x1xf32>
    %130 = math.rsqrt %129 : vector<64x1xf32>
    %131 = vector.broadcast %130 : vector<64x1xf32> to vector<64x50xf32>
    %132 = arith.mulf %127, %131 : vector<64x50xf32>
    %c0_31 = arith.constant 0 : index
    %c0_32 = arith.constant 0 : index
    %133 = vector.load %arg3[%c0_31, %c0_32] : memref<64x1xf32, #tpu.memory_space<vmem>>, vector<64x1xf32>
    %134 = vector.broadcast %133 : vector<64x1xf32> to vector<64x50xf32>
    %135 = arith.mulf %132, %134 : vector<64x50xf32>
    %c0_33 = arith.constant 0 : index
    %c0_34 = arith.constant 0 : index
    %136 = vector.load %arg4[%c0_33, %c0_34] : memref<64x1xf32, #tpu.memory_space<vmem>>, vector<64x1xf32>
    %137 = vector.broadcast %136 : vector<64x1xf32> to vector<64x50xf32>
    %138 = arith.addf %135, %137 : vector<64x50xf32>
    %cst_35 = arith.constant 0.000000e+00 : f32
    %139 = vector.broadcast %cst_35 : f32 to vector<64x50xf32>
    %140 = arith.maximumf %138, %139 : vector<64x50xf32>
    %c0_36 = arith.constant 0 : index
    %c0_37 = arith.constant 0 : index
    %141 = vector.load %arg6[%c0_36, %c0_37] : memref<64x50xf32, #tpu.memory_space<vmem>>, vector<64x50xf32>
    tpu.vector_store %arg6[%c0_36, %c0_37], %140 {strides = array<i32>} : memref<64x50xf32, #tpu.memory_space<vmem>>, vector<64x50xf32>,
    return
  }
}

module attributes {stable_mosaic.version = 11 : i64} {
  func.func @_latent_kernel(%arg0: memref<2x1024xf32, #tpu.memory_space<vmem>>, %arg1: memref<1024x64xbf16, #tpu.memory_space<vmem>>, %arg2: memref<1x64xf32, #tpu.memory_space<vmem>>, %arg3: memref<1024x64xbf16, #tpu.memory_space<vmem>>, %arg4: memref<1x64xf32, #tpu.memory_space<vmem>>, %arg5: memref<64x1024xbf16, #tpu.memory_space<vmem>>, %arg6: memref<1x1024xf32, #tpu.memory_space<vmem>>, %arg7: memref<2x64xf32, #tpu.memory_space<vmem>>, %arg8: memref<2x64xf32, #tpu.memory_space<vmem>>, %arg9: memref<2x64xf32, #tpu.memory_space<vmem>>, %arg10: memref<2x64xf32, #tpu.memory_space<vmem>>, %arg11: memref<2x1024xf32, #tpu.memory_space<vmem>>) attributes {dimension_semantics = [], scalar_prefetch = 0 : i64, scratch_operands = 0 : i64, tpu.core_type = #tpu.core_type<tc>} {
    %c0 = arith.constant 0 : index
    %c0_0 = arith.constant 0 : index
    %0 = vector.load %arg0[%c0, %c0_0] : memref<2x1024xf32, #tpu.memory_space<vmem>>, vector<2x1024xf32>
    %1 = arith.truncf %0 : vector<2x1024xf32> to vector<2x1024xbf16>
    %c0_1 = arith.constant 0 : index
    %c0_2 = arith.constant 0 : index
    %2 = vector.load %arg1[%c0_1, %c0_2] : memref<1024x64xbf16, #tpu.memory_space<vmem>>, vector<1024x64xbf16>
    %cst = arith.constant dense<0.000000e+00> : vector<2x64xf32>
    %3 = tpu.matmul %1, %2, %cst {dimension_numbers = #tpu.dot_dimension_numbers<[1], [0], [0], [1], [0, 0, 1, 1], [], []>} : vector<2x1024xbf16>, vector<1024x64xbf16>, vector<2x64xf32> -> vector<2x64xf32>
    %c0_3 = arith.constant 0 : index
    %c0_4 = arith.constant 0 : index
    %4 = vector.load %arg2[%c0_3, %c0_4] : memref<1x64xf32, #tpu.memory_space<vmem>>, vector<1x64xf32>
    %5 = vector.broadcast %4 : vector<1x64xf32> to vector<2x64xf32>
    %6 = arith.addf %3, %5 : vector<2x64xf32>
    %c0_5 = arith.constant 0 : index
    %c0_6 = arith.constant 0 : index
    %7 = vector.load %arg3[%c0_5, %c0_6] : memref<1024x64xbf16, #tpu.memory_space<vmem>>, vector<1024x64xbf16>
    %cst_7 = arith.constant dense<0.000000e+00> : vector<2x64xf32>
    %8 = tpu.matmul %1, %7, %cst_7 {dimension_numbers = #tpu.dot_dimension_numbers<[1], [0], [0], [1], [0, 0, 1, 1], [], []>} : vector<2x1024xbf16>, vector<1024x64xbf16>, vector<2x64xf32> -> vector<2x64xf32>
    %c0_8 = arith.constant 0 : index
    %c0_9 = arith.constant 0 : index
    %9 = vector.load %arg4[%c0_8, %c0_9] : memref<1x64xf32, #tpu.memory_space<vmem>>, vector<1x64xf32>
    %10 = vector.broadcast %9 : vector<1x64xf32> to vector<2x64xf32>
    %11 = arith.addf %8, %10 : vector<2x64xf32>
    %c0_10 = arith.constant 0 : index
    %c0_11 = arith.constant 0 : index
    %12 = vector.load %arg7[%c0_10, %c0_11] : memref<2x64xf32, #tpu.memory_space<vmem>>, vector<2x64xf32>
    %cst_12 = arith.constant 5.000000e-01 : f32
    %13 = vector.broadcast %cst_12 : f32 to vector<2x64xf32>
    %14 = arith.mulf %13, %11 : vector<2x64xf32>
    %15 = math.exp %14 : vector<2x64xf32>
    %16 = arith.mulf %12, %15 : vector<2x64xf32>
    %17 = arith.addf %16, %6 : vector<2x64xf32>
    %18 = arith.truncf %17 : vector<2x64xf32> to vector<2x64xbf16>
    %c0_13 = arith.constant 0 : index
    %c0_14 = arith.constant 0 : index
    %19 = vector.load %arg5[%c0_13, %c0_14] : memref<64x1024xbf16, #tpu.memory_space<vmem>>, vector<64x1024xbf16>
    %cst_15 = arith.constant dense<0.000000e+00> : vector<2x1024xf32>
    %20 = tpu.matmul %18, %19, %cst_15 {dimension_numbers = #tpu.dot_dimension_numbers<[1], [0], [0], [1], [0, 0, 1, 1], [], []>} : vector<2x64xbf16>, vector<64x1024xbf16>, vector<2x1024xf32> -> vector<2x1024xf32>
    %c0_16 = arith.constant 0 : index
    %c0_17 = arith.constant 0 : index
    %21 = vector.load %arg6[%c0_16, %c0_17] : memref<1x1024xf32, #tpu.memory_space<vmem>>, vector<1x1024xf32>
    %22 = vector.broadcast %21 : vector<1x1024xf32> to vector<2x1024xf32>
    %23 = arith.addf %20, %22 : vector<2x1024xf32>
    %c0_18 = arith.constant 0 : index
    %c0_19 = arith.constant 0 : index
    %24 = vector.load %arg8[%c0_18, %c0_19] : memref<2x64xf32, #tpu.memory_space<vmem>>, vector<2x64xf32>
    tpu.vector_store %arg8[%c0_18, %c0_19], %6 {strides = array<i32>} : memref<2x64xf32, #tpu.memory_space<vmem>>, vector<2x64xf32>,
    %c0_20 = arith.constant 0 : index
    %c0_21 = arith.constant 0 : index
    %25 = vector.load %arg9[%c0_20, %c0_21] : memref<2x64xf32, #tpu.memory_space<vmem>>, vector<2x64xf32>
    tpu.vector_store %arg9[%c0_20, %c0_21], %11 {strides = array<i32>} : memref<2x64xf32, #tpu.memory_space<vmem>>, vector<2x64xf32>,
    %c0_22 = arith.constant 0 : index
    %c0_23 = arith.constant 0 : index
    %26 = vector.load %arg10[%c0_22, %c0_23] : memref<2x64xf32, #tpu.memory_space<vmem>>, vector<2x64xf32>
    tpu.vector_store %arg10[%c0_22, %c0_23], %17 {strides = array<i32>} : memref<2x64xf32, #tpu.memory_space<vmem>>, vector<2x64xf32>,
    %c0_24 = arith.constant 0 : index
    %c0_25 = arith.constant 0 : index
    %27 = vector.load %arg11[%c0_24, %c0_25] : memref<2x1024xf32, #tpu.memory_space<vmem>>, vector<2x1024xf32>
    tpu.vector_store %arg11[%c0_24, %c0_25], %23 {strides = array<i32>} : memref<2x1024xf32, #tpu.memory_space<vmem>>, vector<2x1024xf32>,
    return
  }
}

module attributes {stable_mosaic.version = 11 : i64} {
  func.func @_dec_convt_act_kernel(%arg0: memref<64x92xf32, #tpu.memory_space<vmem>>, %arg1: memref<4x4x32x64xbf16, #tpu.memory_space<vmem>>, %arg2: memref<32x1xf32, #tpu.memory_space<vmem>>, %arg3: memref<4x32x72xf32, #tpu.memory_space<vmem>>) attributes {dimension_semantics = [], scalar_prefetch = 0 : i64, scratch_operands = 0 : i64, tpu.core_type = #tpu.core_type<tc>} {
    %c0 = arith.constant 0 : index
    %c0_0 = arith.constant 0 : index
    %0 = vector.load %arg0[%c0, %c0_0] : memref<64x92xf32, #tpu.memory_space<vmem>>, vector<64x92xf32>
    %1 = arith.truncf %0 : vector<64x92xf32> to vector<64x92xbf16>
    %c0_1 = arith.constant 0 : index
    %c0_2 = arith.constant 0 : index
    %c0_3 = arith.constant 0 : index
    %c0_4 = arith.constant 0 : index
    %2 = vector.load %arg1[%c0_1, %c0_2, %c0_3, %c0_4] : memref<4x4x32x64xbf16, #tpu.memory_space<vmem>>, vector<4x4x32x64xbf16>
    %c0_5 = arith.constant 0 : index
    %c0_6 = arith.constant 0 : index
    %3 = vector.load %arg2[%c0_5, %c0_6] : memref<32x1xf32, #tpu.memory_space<vmem>>, vector<32x1xf32>
    %cst = arith.constant 0.000000e+00 : f32
    %4 = vector.broadcast %cst : f32 to vector<32x72xf32>
    %5 = vector.extract_strided_slice %2 {offsets = [0, 0, 0, 0], sizes = [1, 1, 32, 64], strides = [1, 1, 1, 1]} : vector<4x4x32x64xbf16> to vector<1x1x32x64xbf16>
    %6 = vector.shape_cast %5 : vector<1x1x32x64xbf16> to vector<32x64xbf16>
    %7 = vector.extract_strided_slice %1 {offsets = [0, 0], sizes = [64, 72], strides = [1, 1]} : vector<64x92xbf16> to vector<64x72xbf16>
    %cst_7 = arith.constant dense<0.000000e+00> : vector<32x72xf32>
    %8 = tpu.matmul %6, %7, %cst_7 {dimension_numbers = #tpu.dot_dimension_numbers<[1], [0], [0], [1], [0, 0, 1, 1], [], []>} : vector<32x64xbf16>, vector<64x72xbf16>, vector<32x72xf32> -> vector<32x72xf32>
    %9 = arith.addf %4, %8 : vector<32x72xf32>
    %10 = vector.extract_strided_slice %2 {offsets = [0, 1, 0, 0], sizes = [1, 1, 32, 64], strides = [1, 1, 1, 1]} : vector<4x4x32x64xbf16> to vector<1x1x32x64xbf16>
    %11 = vector.shape_cast %10 : vector<1x1x32x64xbf16> to vector<32x64xbf16>
    %12 = vector.extract_strided_slice %1 {offsets = [0, 1], sizes = [64, 72], strides = [1, 1]} : vector<64x92xbf16> to vector<64x72xbf16>
    %cst_8 = arith.constant dense<0.000000e+00> : vector<32x72xf32>
    %13 = tpu.matmul %11, %12, %cst_8 {dimension_numbers = #tpu.dot_dimension_numbers<[1], [0], [0], [1], [0, 0, 1, 1], [], []>} : vector<32x64xbf16>, vector<64x72xbf16>, vector<32x72xf32> -> vector<32x72xf32>
    %14 = arith.addf %9, %13 : vector<32x72xf32>
    %15 = vector.extract_strided_slice %2 {offsets = [0, 2, 0, 0], sizes = [1, 1, 32, 64], strides = [1, 1, 1, 1]} : vector<4x4x32x64xbf16> to vector<1x1x32x64xbf16>
    %16 = vector.shape_cast %15 : vector<1x1x32x64xbf16> to vector<32x64xbf16>
    %17 = vector.extract_strided_slice %1 {offsets = [0, 6], sizes = [64, 72], strides = [1, 1]} : vector<64x92xbf16> to vector<64x72xbf16>
    %cst_9 = arith.constant dense<0.000000e+00> : vector<32x72xf32>
    %18 = tpu.matmul %16, %17, %cst_9 {dimension_numbers = #tpu.dot_dimension_numbers<[1], [0], [0], [1], [0, 0, 1, 1], [], []>} : vector<32x64xbf16>, vector<64x72xbf16>, vector<32x72xf32> -> vector<32x72xf32>
    %19 = arith.addf %14, %18 : vector<32x72xf32>
    %20 = vector.extract_strided_slice %2 {offsets = [0, 3, 0, 0], sizes = [1, 1, 32, 64], strides = [1, 1, 1, 1]} : vector<4x4x32x64xbf16> to vector<1x1x32x64xbf16>
    %21 = vector.shape_cast %20 : vector<1x1x32x64xbf16> to vector<32x64xbf16>
    %22 = vector.extract_strided_slice %1 {offsets = [0, 7], sizes = [64, 72], strides = [1, 1]} : vector<64x92xbf16> to vector<64x72xbf16>
    %cst_10 = arith.constant dense<0.000000e+00> : vector<32x72xf32>
    %23 = tpu.matmul %21, %22, %cst_10 {dimension_numbers = #tpu.dot_dimension_numbers<[1], [0], [0], [1], [0, 0, 1, 1], [], []>} : vector<32x64xbf16>, vector<64x72xbf16>, vector<32x72xf32> -> vector<32x72xf32>
    %24 = arith.addf %19, %23 : vector<32x72xf32>
    %25 = vector.broadcast %3 : vector<32x1xf32> to vector<32x72xf32>
    %26 = arith.addf %24, %25 : vector<32x72xf32>
    %cst_11 = arith.constant 0.000000e+00 : f32
    %27 = vector.broadcast %cst_11 : f32 to vector<32x72xf32>
    %28 = arith.maximumf %26, %27 : vector<32x72xf32>
    %c0_12 = arith.constant 0 : index
    %c0_13 = arith.constant 0 : index
    %c0_14 = arith.constant 0 : index
    %29 = vector.load %arg3[%c0_12, %c0_13, %c0_14] : memref<4x32x72xf32, #tpu.memory_space<vmem>>, vector<1x32x72xf32>
    %30 = vector.shape_cast %29 : vector<1x32x72xf32> to vector<32x72xf32>
    %31 = vector.shape_cast %28 : vector<32x72xf32> to vector<1x32x72xf32>
    tpu.vector_store %arg3[%c0_12, %c0_13, %c0_14], %31 {strides = array<i32>} : memref<4x32x72xf32, #tpu.memory_space<vmem>>, vector<1x32x72xf32>,
    %cst_15 = arith.constant 0.000000e+00 : f32
    %32 = vector.broadcast %cst_15 : f32 to vector<32x72xf32>
    %33 = vector.extract_strided_slice %2 {offsets = [1, 0, 0, 0], sizes = [1, 1, 32, 64], strides = [1, 1, 1, 1]} : vector<4x4x32x64xbf16> to vector<1x1x32x64xbf16>
    %34 = vector.shape_cast %33 : vector<1x1x32x64xbf16> to vector<32x64xbf16>
    %35 = vector.extract_strided_slice %1 {offsets = [0, 1], sizes = [64, 72], strides = [1, 1]} : vector<64x92xbf16> to vector<64x72xbf16>
    %cst_16 = arith.constant dense<0.000000e+00> : vector<32x72xf32>
    %36 = tpu.matmul %34, %35, %cst_16 {dimension_numbers = #tpu.dot_dimension_numbers<[1], [0], [0], [1], [0, 0, 1, 1], [], []>} : vector<32x64xbf16>, vector<64x72xbf16>, vector<32x72xf32> -> vector<32x72xf32>
    %37 = arith.addf %32, %36 : vector<32x72xf32>
    %38 = vector.extract_strided_slice %2 {offsets = [1, 1, 0, 0], sizes = [1, 1, 32, 64], strides = [1, 1, 1, 1]} : vector<4x4x32x64xbf16> to vector<1x1x32x64xbf16>
    %39 = vector.shape_cast %38 : vector<1x1x32x64xbf16> to vector<32x64xbf16>
    %40 = vector.extract_strided_slice %1 {offsets = [0, 2], sizes = [64, 72], strides = [1, 1]} : vector<64x92xbf16> to vector<64x72xbf16>
    %cst_17 = arith.constant dense<0.000000e+00> : vector<32x72xf32>
    %41 = tpu.matmul %39, %40, %cst_17 {dimension_numbers = #tpu.dot_dimension_numbers<[1], [0], [0], [1], [0, 0, 1, 1], [], []>} : vector<32x64xbf16>, vector<64x72xbf16>, vector<32x72xf32> -> vector<32x72xf32>
    %42 = arith.addf %37, %41 : vector<32x72xf32>
    %43 = vector.extract_strided_slice %2 {offsets = [1, 2, 0, 0], sizes = [1, 1, 32, 64], strides = [1, 1, 1, 1]} : vector<4x4x32x64xbf16> to vector<1x1x32x64xbf16>
    %44 = vector.shape_cast %43 : vector<1x1x32x64xbf16> to vector<32x64xbf16>
    %45 = vector.extract_strided_slice %1 {offsets = [0, 7], sizes = [64, 72], strides = [1, 1]} : vector<64x92xbf16> to vector<64x72xbf16>
    %cst_18 = arith.constant dense<0.000000e+00> : vector<32x72xf32>
    %46 = tpu.matmul %44, %45, %cst_18 {dimension_numbers = #tpu.dot_dimension_numbers<[1], [0], [0], [1], [0, 0, 1, 1], [], []>} : vector<32x64xbf16>, vector<64x72xbf16>, vector<32x72xf32> -> vector<32x72xf32>
    %47 = arith.addf %42, %46 : vector<32x72xf32>
    %48 = vector.extract_strided_slice %2 {offsets = [1, 3, 0, 0], sizes = [1, 1, 32, 64], strides = [1, 1, 1, 1]} : vector<4x4x32x64xbf16> to vector<1x1x32x64xbf16>
    %49 = vector.shape_cast %48 : vector<1x1x32x64xbf16> to vector<32x64xbf16>
    %50 = vector.extract_strided_slice %1 {offsets = [0, 8], sizes = [64, 72], strides = [1, 1]} : vector<64x92xbf16> to vector<64x72xbf16>
    %cst_19 = arith.constant dense<0.000000e+00> : vector<32x72xf32>
    %51 = tpu.matmul %49, %50, %cst_19 {dimension_numbers = #tpu.dot_dimension_numbers<[1], [0], [0], [1], [0, 0, 1, 1], [], []>} : vector<32x64xbf16>, vector<64x72xbf16>, vector<32x72xf32> -> vector<32x72xf32>
    %52 = arith.addf %47, %51 : vector<32x72xf32>
    %53 = vector.broadcast %3 : vector<32x1xf32> to vector<32x72xf32>
    %54 = arith.addf %52, %53 : vector<32x72xf32>
    %cst_20 = arith.constant 0.000000e+00 : f32
    %55 = vector.broadcast %cst_20 : f32 to vector<32x72xf32>
    %56 = arith.maximumf %54, %55 : vector<32x72xf32>
    %c1 = arith.constant 1 : index
    %c0_21 = arith.constant 0 : index
    %c0_22 = arith.constant 0 : index
    %57 = vector.load %arg3[%c1, %c0_21, %c0_22] : memref<4x32x72xf32, #tpu.memory_space<vmem>>, vector<1x32x72xf32>
    %58 = vector.shape_cast %57 : vector<1x32x72xf32> to vector<32x72xf32>
    %59 = vector.shape_cast %56 : vector<32x72xf32> to vector<1x32x72xf32>
    tpu.vector_store %arg3[%c1, %c0_21, %c0_22], %59 {strides = array<i32>} : memref<4x32x72xf32, #tpu.memory_space<vmem>>, vector<1x32x72xf32>,
    %cst_23 = arith.constant 0.000000e+00 : f32
    %60 = vector.broadcast %cst_23 : f32 to vector<32x72xf32>
    %61 = vector.extract_strided_slice %2 {offsets = [2, 0, 0, 0], sizes = [1, 1, 32, 64], strides = [1, 1, 1, 1]} : vector<4x4x32x64xbf16> to vector<1x1x32x64xbf16>
    %62 = vector.shape_cast %61 : vector<1x1x32x64xbf16> to vector<32x64xbf16>
    %63 = vector.extract_strided_slice %1 {offsets = [0, 6], sizes = [64, 72], strides = [1, 1]} : vector<64x92xbf16> to vector<64x72xbf16>
    %cst_24 = arith.constant dense<0.000000e+00> : vector<32x72xf32>
    %64 = tpu.matmul %62, %63, %cst_24 {dimension_numbers = #tpu.dot_dimension_numbers<[1], [0], [0], [1], [0, 0, 1, 1], [], []>} : vector<32x64xbf16>, vector<64x72xbf16>, vector<32x72xf32> -> vector<32x72xf32>
    %65 = arith.addf %60, %64 : vector<32x72xf32>
    %66 = vector.extract_strided_slice %2 {offsets = [2, 1, 0, 0], sizes = [1, 1, 32, 64], strides = [1, 1, 1, 1]} : vector<4x4x32x64xbf16> to vector<1x1x32x64xbf16>
    %67 = vector.shape_cast %66 : vector<1x1x32x64xbf16> to vector<32x64xbf16>
    %68 = vector.extract_strided_slice %1 {offsets = [0, 7], sizes = [64, 72], strides = [1, 1]} : vector<64x92xbf16> to vector<64x72xbf16>
    %cst_25 = arith.constant dense<0.000000e+00> : vector<32x72xf32>
    %69 = tpu.matmul %67, %68, %cst_25 {dimension_numbers = #tpu.dot_dimension_numbers<[1], [0], [0], [1], [0, 0, 1, 1], [], []>} : vector<32x64xbf16>, vector<64x72xbf16>, vector<32x72xf32> -> vector<32x72xf32>
    %70 = arith.addf %65, %69 : vector<32x72xf32>
    %71 = vector.extract_strided_slice %2 {offsets = [2, 2, 0, 0], sizes = [1, 1, 32, 64], strides = [1, 1, 1, 1]} : vector<4x4x32x64xbf16> to vector<1x1x32x64xbf16>
    %72 = vector.shape_cast %71 : vector<1x1x32x64xbf16> to vector<32x64xbf16>
    %73 = vector.extract_strided_slice %1 {offsets = [0, 12], sizes = [64, 72], strides = [1, 1]} : vector<64x92xbf16> to vector<64x72xbf16>
    %cst_26 = arith.constant dense<0.000000e+00> : vector<32x72xf32>
    %74 = tpu.matmul %72, %73, %cst_26 {dimension_numbers = #tpu.dot_dimension_numbers<[1], [0], [0], [1], [0, 0, 1, 1], [], []>} : vector<32x64xbf16>, vector<64x72xbf16>, vector<32x72xf32> -> vector<32x72xf32>
    %75 = arith.addf %70, %74 : vector<32x72xf32>
    %76 = vector.extract_strided_slice %2 {offsets = [2, 3, 0, 0], sizes = [1, 1, 32, 64], strides = [1, 1, 1, 1]} : vector<4x4x32x64xbf16> to vector<1x1x32x64xbf16>
    %77 = vector.shape_cast %76 : vector<1x1x32x64xbf16> to vector<32x64xbf16>
    %78 = vector.extract_strided_slice %1 {offsets = [0, 13], sizes = [64, 72], strides = [1, 1]} : vector<64x92xbf16> to vector<64x72xbf16>
    %cst_27 = arith.constant dense<0.000000e+00> : vector<32x72xf32>
    %79 = tpu.matmul %77, %78, %cst_27 {dimension_numbers = #tpu.dot_dimension_numbers<[1], [0], [0], [1], [0, 0, 1, 1], [], []>} : vector<32x64xbf16>, vector<64x72xbf16>, vector<32x72xf32> -> vector<32x72xf32>
    %80 = arith.addf %75, %79 : vector<32x72xf32>
    %81 = vector.broadcast %3 : vector<32x1xf32> to vector<32x72xf32>
    %82 = arith.addf %80, %81 : vector<32x72xf32>
    %cst_28 = arith.constant 0.000000e+00 : f32
    %83 = vector.broadcast %cst_28 : f32 to vector<32x72xf32>
    %84 = arith.maximumf %82, %83 : vector<32x72xf32>
    %c2 = arith.constant 2 : index
    %c0_29 = arith.constant 0 : index
    %c0_30 = arith.constant 0 : index
    %85 = vector.load %arg3[%c2, %c0_29, %c0_30] : memref<4x32x72xf32, #tpu.memory_space<vmem>>, vector<1x32x72xf32>
    %86 = vector.shape_cast %85 : vector<1x32x72xf32> to vector<32x72xf32>
    %87 = vector.shape_cast %84 : vector<32x72xf32> to vector<1x32x72xf32>
    tpu.vector_store %arg3[%c2, %c0_29, %c0_30], %87 {strides = array<i32>} : memref<4x32x72xf32, #tpu.memory_space<vmem>>, vector<1x32x72xf32>,
    %cst_31 = arith.constant 0.000000e+00 : f32
    %88 = vector.broadcast %cst_31 : f32 to vector<32x72xf32>
    %89 = vector.extract_strided_slice %2 {offsets = [3, 0, 0, 0], sizes = [1, 1, 32, 64], strides = [1, 1, 1, 1]} : vector<4x4x32x64xbf16> to vector<1x1x32x64xbf16>
    %90 = vector.shape_cast %89 : vector<1x1x32x64xbf16> to vector<32x64xbf16>
    %91 = vector.extract_strided_slice %1 {offsets = [0, 7], sizes = [64, 72], strides = [1, 1]} : vector<64x92xbf16> to vector<64x72xbf16>
    %cst_32 = arith.constant dense<0.000000e+00> : vector<32x72xf32>
    %92 = tpu.matmul %90, %91, %cst_32 {dimension_numbers = #tpu.dot_dimension_numbers<[1], [0], [0], [1], [0, 0, 1, 1], [], []>} : vector<32x64xbf16>, vector<64x72xbf16>, vector<32x72xf32> -> vector<32x72xf32>
    %93 = arith.addf %88, %92 : vector<32x72xf32>
    %94 = vector.extract_strided_slice %2 {offsets = [3, 1, 0, 0], sizes = [1, 1, 32, 64], strides = [1, 1, 1, 1]} : vector<4x4x32x64xbf16> to vector<1x1x32x64xbf16>
    %95 = vector.shape_cast %94 : vector<1x1x32x64xbf16> to vector<32x64xbf16>
    %96 = vector.extract_strided_slice %1 {offsets = [0, 8], sizes = [64, 72], strides = [1, 1]} : vector<64x92xbf16> to vector<64x72xbf16>
    %cst_33 = arith.constant dense<0.000000e+00> : vector<32x72xf32>
    %97 = tpu.matmul %95, %96, %cst_33 {dimension_numbers = #tpu.dot_dimension_numbers<[1], [0], [0], [1], [0, 0, 1, 1], [], []>} : vector<32x64xbf16>, vector<64x72xbf16>, vector<32x72xf32> -> vector<32x72xf32>
    %98 = arith.addf %93, %97 : vector<32x72xf32>
    %99 = vector.extract_strided_slice %2 {offsets = [3, 2, 0, 0], sizes = [1, 1, 32, 64], strides = [1, 1, 1, 1]} : vector<4x4x32x64xbf16> to vector<1x1x32x64xbf16>
    %100 = vector.shape_cast %99 : vector<1x1x32x64xbf16> to vector<32x64xbf16>
    %101 = vector.extract_strided_slice %1 {offsets = [0, 13], sizes = [64, 72], strides = [1, 1]} : vector<64x92xbf16> to vector<64x72xbf16>
    %cst_34 = arith.constant dense<0.000000e+00> : vector<32x72xf32>
    %102 = tpu.matmul %100, %101, %cst_34 {dimension_numbers = #tpu.dot_dimension_numbers<[1], [0], [0], [1], [0, 0, 1, 1], [], []>} : vector<32x64xbf16>, vector<64x72xbf16>, vector<32x72xf32> -> vector<32x72xf32>
    %103 = arith.addf %98, %102 : vector<32x72xf32>
    %104 = vector.extract_strided_slice %2 {offsets = [3, 3, 0, 0], sizes = [1, 1, 32, 64], strides = [1, 1, 1, 1]} : vector<4x4x32x64xbf16> to vector<1x1x32x64xbf16>
    %105 = vector.shape_cast %104 : vector<1x1x32x64xbf16> to vector<32x64xbf16>
    %106 = vector.extract_strided_slice %1 {offsets = [0, 14], sizes = [64, 72], strides = [1, 1]} : vector<64x92xbf16> to vector<64x72xbf16>
    %cst_35 = arith.constant dense<0.000000e+00> : vector<32x72xf32>
    %107 = tpu.matmul %105, %106, %cst_35 {dimension_numbers = #tpu.dot_dimension_numbers<[1], [0], [0], [1], [0, 0, 1, 1], [], []>} : vector<32x64xbf16>, vector<64x72xbf16>, vector<32x72xf32> -> vector<32x72xf32>
    %108 = arith.addf %103, %107 : vector<32x72xf32>
    %109 = vector.broadcast %3 : vector<32x1xf32> to vector<32x72xf32>
    %110 = arith.addf %108, %109 : vector<32x72xf32>
    %cst_36 = arith.constant 0.000000e+00 : f32
    %111 = vector.broadcast %cst_36 : f32 to vector<32x72xf32>
    %112 = arith.maximumf %110, %111 : vector<32x72xf32>
    %c3 = arith.constant 3 : index
    %c0_37 = arith.constant 0 : index
    %c0_38 = arith.constant 0 : index
    %113 = vector.load %arg3[%c3, %c0_37, %c0_38] : memref<4x32x72xf32, #tpu.memory_space<vmem>>, vector<1x32x72xf32>
    %114 = vector.shape_cast %113 : vector<1x32x72xf32> to vector<32x72xf32>
    %115 = vector.shape_cast %112 : vector<32x72xf32> to vector<1x32x72xf32>
    tpu.vector_store %arg3[%c3, %c0_37, %c0_38], %115 {strides = array<i32>} : memref<4x32x72xf32, #tpu.memory_space<vmem>>, vector<1x32x72xf32>,
    return
  }
}

module attributes {stable_mosaic.version = 11 : i64} {
  func.func @_dec_convt_act_kernel(%arg0: memref<32x228xf32, #tpu.memory_space<vmem>>, %arg1: memref<4x4x16x32xbf16, #tpu.memory_space<vmem>>, %arg2: memref<16x1xf32, #tpu.memory_space<vmem>>, %arg3: memref<4x16x200xf32, #tpu.memory_space<vmem>>) attributes {dimension_semantics = [], scalar_prefetch = 0 : i64, scratch_operands = 0 : i64, tpu.core_type = #tpu.core_type<tc>} {
    %c0 = arith.constant 0 : index
    %c0_0 = arith.constant 0 : index
    %0 = vector.load %arg0[%c0, %c0_0] : memref<32x228xf32, #tpu.memory_space<vmem>>, vector<32x228xf32>
    %1 = arith.truncf %0 : vector<32x228xf32> to vector<32x228xbf16>
    %c0_1 = arith.constant 0 : index
    %c0_2 = arith.constant 0 : index
    %c0_3 = arith.constant 0 : index
    %c0_4 = arith.constant 0 : index
    %2 = vector.load %arg1[%c0_1, %c0_2, %c0_3, %c0_4] : memref<4x4x16x32xbf16, #tpu.memory_space<vmem>>, vector<4x4x16x32xbf16>
    %c0_5 = arith.constant 0 : index
    %c0_6 = arith.constant 0 : index
    %3 = vector.load %arg2[%c0_5, %c0_6] : memref<16x1xf32, #tpu.memory_space<vmem>>, vector<16x1xf32>
    %cst = arith.constant 0.000000e+00 : f32
    %4 = vector.broadcast %cst : f32 to vector<16x200xf32>
    %5 = vector.extract_strided_slice %2 {offsets = [0, 0, 0, 0], sizes = [1, 1, 16, 32], strides = [1, 1, 1, 1]} : vector<4x4x16x32xbf16> to vector<1x1x16x32xbf16>
    %6 = vector.shape_cast %5 : vector<1x1x16x32xbf16> to vector<16x32xbf16>
    %7 = vector.extract_strided_slice %1 {offsets = [0, 0], sizes = [32, 200], strides = [1, 1]} : vector<32x228xbf16> to vector<32x200xbf16>
    %cst_7 = arith.constant dense<0.000000e+00> : vector<16x200xf32>
    %8 = tpu.matmul %6, %7, %cst_7 {dimension_numbers = #tpu.dot_dimension_numbers<[1], [0], [0], [1], [0, 0, 1, 1], [], []>} : vector<16x32xbf16>, vector<32x200xbf16>, vector<16x200xf32> -> vector<16x200xf32>
    %9 = arith.addf %4, %8 : vector<16x200xf32>
    %10 = vector.extract_strided_slice %2 {offsets = [0, 1, 0, 0], sizes = [1, 1, 16, 32], strides = [1, 1, 1, 1]} : vector<4x4x16x32xbf16> to vector<1x1x16x32xbf16>
    %11 = vector.shape_cast %10 : vector<1x1x16x32xbf16> to vector<16x32xbf16>
    %12 = vector.extract_strided_slice %1 {offsets = [0, 1], sizes = [32, 200], strides = [1, 1]} : vector<32x228xbf16> to vector<32x200xbf16>
    %cst_8 = arith.constant dense<0.000000e+00> : vector<16x200xf32>
    %13 = tpu.matmul %11, %12, %cst_8 {dimension_numbers = #tpu.dot_dimension_numbers<[1], [0], [0], [1], [0, 0, 1, 1], [], []>} : vector<16x32xbf16>, vector<32x200xbf16>, vector<16x200xf32> -> vector<16x200xf32>
    %14 = arith.addf %9, %13 : vector<16x200xf32>
    %15 = vector.extract_strided_slice %2 {offsets = [0, 2, 0, 0], sizes = [1, 1, 16, 32], strides = [1, 1, 1, 1]} : vector<4x4x16x32xbf16> to vector<1x1x16x32xbf16>
    %16 = vector.shape_cast %15 : vector<1x1x16x32xbf16> to vector<16x32xbf16>
    %17 = vector.extract_strided_slice %1 {offsets = [0, 10], sizes = [32, 200], strides = [1, 1]} : vector<32x228xbf16> to vector<32x200xbf16>
    %cst_9 = arith.constant dense<0.000000e+00> : vector<16x200xf32>
    %18 = tpu.matmul %16, %17, %cst_9 {dimension_numbers = #tpu.dot_dimension_numbers<[1], [0], [0], [1], [0, 0, 1, 1], [], []>} : vector<16x32xbf16>, vector<32x200xbf16>, vector<16x200xf32> -> vector<16x200xf32>
    %19 = arith.addf %14, %18 : vector<16x200xf32>
    %20 = vector.extract_strided_slice %2 {offsets = [0, 3, 0, 0], sizes = [1, 1, 16, 32], strides = [1, 1, 1, 1]} : vector<4x4x16x32xbf16> to vector<1x1x16x32xbf16>
    %21 = vector.shape_cast %20 : vector<1x1x16x32xbf16> to vector<16x32xbf16>
    %22 = vector.extract_strided_slice %1 {offsets = [0, 11], sizes = [32, 200], strides = [1, 1]} : vector<32x228xbf16> to vector<32x200xbf16>
    %cst_10 = arith.constant dense<0.000000e+00> : vector<16x200xf32>
    %23 = tpu.matmul %21, %22, %cst_10 {dimension_numbers = #tpu.dot_dimension_numbers<[1], [0], [0], [1], [0, 0, 1, 1], [], []>} : vector<16x32xbf16>, vector<32x200xbf16>, vector<16x200xf32> -> vector<16x200xf32>
    %24 = arith.addf %19, %23 : vector<16x200xf32>
    %25 = vector.broadcast %3 : vector<16x1xf32> to vector<16x200xf32>
    %26 = arith.addf %24, %25 : vector<16x200xf32>
    %cst_11 = arith.constant 0.000000e+00 : f32
    %27 = vector.broadcast %cst_11 : f32 to vector<16x200xf32>
    %28 = arith.maximumf %26, %27 : vector<16x200xf32>
    %c0_12 = arith.constant 0 : index
    %c0_13 = arith.constant 0 : index
    %c0_14 = arith.constant 0 : index
    %29 = vector.load %arg3[%c0_12, %c0_13, %c0_14] : memref<4x16x200xf32, #tpu.memory_space<vmem>>, vector<1x16x200xf32>
    %30 = vector.shape_cast %29 : vector<1x16x200xf32> to vector<16x200xf32>
    %31 = vector.shape_cast %28 : vector<16x200xf32> to vector<1x16x200xf32>
    tpu.vector_store %arg3[%c0_12, %c0_13, %c0_14], %31 {strides = array<i32>} : memref<4x16x200xf32, #tpu.memory_space<vmem>>, vector<1x16x200xf32>,
    %cst_15 = arith.constant 0.000000e+00 : f32
    %32 = vector.broadcast %cst_15 : f32 to vector<16x200xf32>
    %33 = vector.extract_strided_slice %2 {offsets = [1, 0, 0, 0], sizes = [1, 1, 16, 32], strides = [1, 1, 1, 1]} : vector<4x4x16x32xbf16> to vector<1x1x16x32xbf16>
    %34 = vector.shape_cast %33 : vector<1x1x16x32xbf16> to vector<16x32xbf16>
    %35 = vector.extract_strided_slice %1 {offsets = [0, 1], sizes = [32, 200], strides = [1, 1]} : vector<32x228xbf16> to vector<32x200xbf16>
    %cst_16 = arith.constant dense<0.000000e+00> : vector<16x200xf32>
    %36 = tpu.matmul %34, %35, %cst_16 {dimension_numbers = #tpu.dot_dimension_numbers<[1], [0], [0], [1], [0, 0, 1, 1], [], []>} : vector<16x32xbf16>, vector<32x200xbf16>, vector<16x200xf32> -> vector<16x200xf32>
    %37 = arith.addf %32, %36 : vector<16x200xf32>
    %38 = vector.extract_strided_slice %2 {offsets = [1, 1, 0, 0], sizes = [1, 1, 16, 32], strides = [1, 1, 1, 1]} : vector<4x4x16x32xbf16> to vector<1x1x16x32xbf16>
    %39 = vector.shape_cast %38 : vector<1x1x16x32xbf16> to vector<16x32xbf16>
    %40 = vector.extract_strided_slice %1 {offsets = [0, 2], sizes = [32, 200], strides = [1, 1]} : vector<32x228xbf16> to vector<32x200xbf16>
    %cst_17 = arith.constant dense<0.000000e+00> : vector<16x200xf32>
    %41 = tpu.matmul %39, %40, %cst_17 {dimension_numbers = #tpu.dot_dimension_numbers<[1], [0], [0], [1], [0, 0, 1, 1], [], []>} : vector<16x32xbf16>, vector<32x200xbf16>, vector<16x200xf32> -> vector<16x200xf32>
    %42 = arith.addf %37, %41 : vector<16x200xf32>
    %43 = vector.extract_strided_slice %2 {offsets = [1, 2, 0, 0], sizes = [1, 1, 16, 32], strides = [1, 1, 1, 1]} : vector<4x4x16x32xbf16> to vector<1x1x16x32xbf16>
    %44 = vector.shape_cast %43 : vector<1x1x16x32xbf16> to vector<16x32xbf16>
    %45 = vector.extract_strided_slice %1 {offsets = [0, 11], sizes = [32, 200], strides = [1, 1]} : vector<32x228xbf16> to vector<32x200xbf16>
    %cst_18 = arith.constant dense<0.000000e+00> : vector<16x200xf32>
    %46 = tpu.matmul %44, %45, %cst_18 {dimension_numbers = #tpu.dot_dimension_numbers<[1], [0], [0], [1], [0, 0, 1, 1], [], []>} : vector<16x32xbf16>, vector<32x200xbf16>, vector<16x200xf32> -> vector<16x200xf32>
    %47 = arith.addf %42, %46 : vector<16x200xf32>
    %48 = vector.extract_strided_slice %2 {offsets = [1, 3, 0, 0], sizes = [1, 1, 16, 32], strides = [1, 1, 1, 1]} : vector<4x4x16x32xbf16> to vector<1x1x16x32xbf16>
    %49 = vector.shape_cast %48 : vector<1x1x16x32xbf16> to vector<16x32xbf16>
    %50 = vector.extract_strided_slice %1 {offsets = [0, 12], sizes = [32, 200], strides = [1, 1]} : vector<32x228xbf16> to vector<32x200xbf16>
    %cst_19 = arith.constant dense<0.000000e+00> : vector<16x200xf32>
    %51 = tpu.matmul %49, %50, %cst_19 {dimension_numbers = #tpu.dot_dimension_numbers<[1], [0], [0], [1], [0, 0, 1, 1], [], []>} : vector<16x32xbf16>, vector<32x200xbf16>, vector<16x200xf32> -> vector<16x200xf32>
    %52 = arith.addf %47, %51 : vector<16x200xf32>
    %53 = vector.broadcast %3 : vector<16x1xf32> to vector<16x200xf32>
    %54 = arith.addf %52, %53 : vector<16x200xf32>
    %cst_20 = arith.constant 0.000000e+00 : f32
    %55 = vector.broadcast %cst_20 : f32 to vector<16x200xf32>
    %56 = arith.maximumf %54, %55 : vector<16x200xf32>
    %c1 = arith.constant 1 : index
    %c0_21 = arith.constant 0 : index
    %c0_22 = arith.constant 0 : index
    %57 = vector.load %arg3[%c1, %c0_21, %c0_22] : memref<4x16x200xf32, #tpu.memory_space<vmem>>, vector<1x16x200xf32>
    %58 = vector.shape_cast %57 : vector<1x16x200xf32> to vector<16x200xf32>
    %59 = vector.shape_cast %56 : vector<16x200xf32> to vector<1x16x200xf32>
    tpu.vector_store %arg3[%c1, %c0_21, %c0_22], %59 {strides = array<i32>} : memref<4x16x200xf32, #tpu.memory_space<vmem>>, vector<1x16x200xf32>,
    %cst_23 = arith.constant 0.000000e+00 : f32
    %60 = vector.broadcast %cst_23 : f32 to vector<16x200xf32>
    %61 = vector.extract_strided_slice %2 {offsets = [2, 0, 0, 0], sizes = [1, 1, 16, 32], strides = [1, 1, 1, 1]} : vector<4x4x16x32xbf16> to vector<1x1x16x32xbf16>
    %62 = vector.shape_cast %61 : vector<1x1x16x32xbf16> to vector<16x32xbf16>
    %63 = vector.extract_strided_slice %1 {offsets = [0, 10], sizes = [32, 200], strides = [1, 1]} : vector<32x228xbf16> to vector<32x200xbf16>
    %cst_24 = arith.constant dense<0.000000e+00> : vector<16x200xf32>
    %64 = tpu.matmul %62, %63, %cst_24 {dimension_numbers = #tpu.dot_dimension_numbers<[1], [0], [0], [1], [0, 0, 1, 1], [], []>} : vector<16x32xbf16>, vector<32x200xbf16>, vector<16x200xf32> -> vector<16x200xf32>
    %65 = arith.addf %60, %64 : vector<16x200xf32>
    %66 = vector.extract_strided_slice %2 {offsets = [2, 1, 0, 0], sizes = [1, 1, 16, 32], strides = [1, 1, 1, 1]} : vector<4x4x16x32xbf16> to vector<1x1x16x32xbf16>
    %67 = vector.shape_cast %66 : vector<1x1x16x32xbf16> to vector<16x32xbf16>
    %68 = vector.extract_strided_slice %1 {offsets = [0, 11], sizes = [32, 200], strides = [1, 1]} : vector<32x228xbf16> to vector<32x200xbf16>
    %cst_25 = arith.constant dense<0.000000e+00> : vector<16x200xf32>
    %69 = tpu.matmul %67, %68, %cst_25 {dimension_numbers = #tpu.dot_dimension_numbers<[1], [0], [0], [1], [0, 0, 1, 1], [], []>} : vector<16x32xbf16>, vector<32x200xbf16>, vector<16x200xf32> -> vector<16x200xf32>
    %70 = arith.addf %65, %69 : vector<16x200xf32>
    %71 = vector.extract_strided_slice %2 {offsets = [2, 2, 0, 0], sizes = [1, 1, 16, 32], strides = [1, 1, 1, 1]} : vector<4x4x16x32xbf16> to vector<1x1x16x32xbf16>
    %72 = vector.shape_cast %71 : vector<1x1x16x32xbf16> to vector<16x32xbf16>
    %73 = vector.extract_strided_slice %1 {offsets = [0, 20], sizes = [32, 200], strides = [1, 1]} : vector<32x228xbf16> to vector<32x200xbf16>
    %cst_26 = arith.constant dense<0.000000e+00> : vector<16x200xf32>
    %74 = tpu.matmul %72, %73, %cst_26 {dimension_numbers = #tpu.dot_dimension_numbers<[1], [0], [0], [1], [0, 0, 1, 1], [], []>} : vector<16x32xbf16>, vector<32x200xbf16>, vector<16x200xf32> -> vector<16x200xf32>
    %75 = arith.addf %70, %74 : vector<16x200xf32>
    %76 = vector.extract_strided_slice %2 {offsets = [2, 3, 0, 0], sizes = [1, 1, 16, 32], strides = [1, 1, 1, 1]} : vector<4x4x16x32xbf16> to vector<1x1x16x32xbf16>
    %77 = vector.shape_cast %76 : vector<1x1x16x32xbf16> to vector<16x32xbf16>
    %78 = vector.extract_strided_slice %1 {offsets = [0, 21], sizes = [32, 200], strides = [1, 1]} : vector<32x228xbf16> to vector<32x200xbf16>
    %cst_27 = arith.constant dense<0.000000e+00> : vector<16x200xf32>
    %79 = tpu.matmul %77, %78, %cst_27 {dimension_numbers = #tpu.dot_dimension_numbers<[1], [0], [0], [1], [0, 0, 1, 1], [], []>} : vector<16x32xbf16>, vector<32x200xbf16>, vector<16x200xf32> -> vector<16x200xf32>
    %80 = arith.addf %75, %79 : vector<16x200xf32>
    %81 = vector.broadcast %3 : vector<16x1xf32> to vector<16x200xf32>
    %82 = arith.addf %80, %81 : vector<16x200xf32>
    %cst_28 = arith.constant 0.000000e+00 : f32
    %83 = vector.broadcast %cst_28 : f32 to vector<16x200xf32>
    %84 = arith.maximumf %82, %83 : vector<16x200xf32>
    %c2 = arith.constant 2 : index
    %c0_29 = arith.constant 0 : index
    %c0_30 = arith.constant 0 : index
    %85 = vector.load %arg3[%c2, %c0_29, %c0_30] : memref<4x16x200xf32, #tpu.memory_space<vmem>>, vector<1x16x200xf32>
    %86 = vector.shape_cast %85 : vector<1x16x200xf32> to vector<16x200xf32>
    %87 = vector.shape_cast %84 : vector<16x200xf32> to vector<1x16x200xf32>
    tpu.vector_store %arg3[%c2, %c0_29, %c0_30], %87 {strides = array<i32>} : memref<4x16x200xf32, #tpu.memory_space<vmem>>, vector<1x16x200xf32>,
    %cst_31 = arith.constant 0.000000e+00 : f32
    %88 = vector.broadcast %cst_31 : f32 to vector<16x200xf32>
    %89 = vector.extract_strided_slice %2 {offsets = [3, 0, 0, 0], sizes = [1, 1, 16, 32], strides = [1, 1, 1, 1]} : vector<4x4x16x32xbf16> to vector<1x1x16x32xbf16>
    %90 = vector.shape_cast %89 : vector<1x1x16x32xbf16> to vector<16x32xbf16>
    %91 = vector.extract_strided_slice %1 {offsets = [0, 11], sizes = [32, 200], strides = [1, 1]} : vector<32x228xbf16> to vector<32x200xbf16>
    %cst_32 = arith.constant dense<0.000000e+00> : vector<16x200xf32>
    %92 = tpu.matmul %90, %91, %cst_32 {dimension_numbers = #tpu.dot_dimension_numbers<[1], [0], [0], [1], [0, 0, 1, 1], [], []>} : vector<16x32xbf16>, vector<32x200xbf16>, vector<16x200xf32> -> vector<16x200xf32>
    %93 = arith.addf %88, %92 : vector<16x200xf32>
    %94 = vector.extract_strided_slice %2 {offsets = [3, 1, 0, 0], sizes = [1, 1, 16, 32], strides = [1, 1, 1, 1]} : vector<4x4x16x32xbf16> to vector<1x1x16x32xbf16>
    %95 = vector.shape_cast %94 : vector<1x1x16x32xbf16> to vector<16x32xbf16>
    %96 = vector.extract_strided_slice %1 {offsets = [0, 12], sizes = [32, 200], strides = [1, 1]} : vector<32x228xbf16> to vector<32x200xbf16>
    %cst_33 = arith.constant dense<0.000000e+00> : vector<16x200xf32>
    %97 = tpu.matmul %95, %96, %cst_33 {dimension_numbers = #tpu.dot_dimension_numbers<[1], [0], [0], [1], [0, 0, 1, 1], [], []>} : vector<16x32xbf16>, vector<32x200xbf16>, vector<16x200xf32> -> vector<16x200xf32>
    %98 = arith.addf %93, %97 : vector<16x200xf32>
    %99 = vector.extract_strided_slice %2 {offsets = [3, 2, 0, 0], sizes = [1, 1, 16, 32], strides = [1, 1, 1, 1]} : vector<4x4x16x32xbf16> to vector<1x1x16x32xbf16>
    %100 = vector.shape_cast %99 : vector<1x1x16x32xbf16> to vector<16x32xbf16>
    %101 = vector.extract_strided_slice %1 {offsets = [0, 21], sizes = [32, 200], strides = [1, 1]} : vector<32x228xbf16> to vector<32x200xbf16>
    %cst_34 = arith.constant dense<0.000000e+00> : vector<16x200xf32>
    %102 = tpu.matmul %100, %101, %cst_34 {dimension_numbers = #tpu.dot_dimension_numbers<[1], [0], [0], [1], [0, 0, 1, 1], [], []>} : vector<16x32xbf16>, vector<32x200xbf16>, vector<16x200xf32> -> vector<16x200xf32>
    %103 = arith.addf %98, %102 : vector<16x200xf32>
    %104 = vector.extract_strided_slice %2 {offsets = [3, 3, 0, 0], sizes = [1, 1, 16, 32], strides = [1, 1, 1, 1]} : vector<4x4x16x32xbf16> to vector<1x1x16x32xbf16>
    %105 = vector.shape_cast %104 : vector<1x1x16x32xbf16> to vector<16x32xbf16>
    %106 = vector.extract_strided_slice %1 {offsets = [0, 22], sizes = [32, 200], strides = [1, 1]} : vector<32x228xbf16> to vector<32x200xbf16>
    %cst_35 = arith.constant dense<0.000000e+00> : vector<16x200xf32>
    %107 = tpu.matmul %105, %106, %cst_35 {dimension_numbers = #tpu.dot_dimension_numbers<[1], [0], [0], [1], [0, 0, 1, 1], [], []>} : vector<16x32xbf16>, vector<32x200xbf16>, vector<16x200xf32> -> vector<16x200xf32>
    %108 = arith.addf %103, %107 : vector<16x200xf32>
    %109 = vector.broadcast %3 : vector<16x1xf32> to vector<16x200xf32>
    %110 = arith.addf %108, %109 : vector<16x200xf32>
    %cst_36 = arith.constant 0.000000e+00 : f32
    %111 = vector.broadcast %cst_36 : f32 to vector<16x200xf32>
    %112 = arith.maximumf %110, %111 : vector<16x200xf32>
    %c3 = arith.constant 3 : index
    %c0_37 = arith.constant 0 : index
    %c0_38 = arith.constant 0 : index
    %113 = vector.load %arg3[%c3, %c0_37, %c0_38] : memref<4x16x200xf32, #tpu.memory_space<vmem>>, vector<1x16x200xf32>
    %114 = vector.shape_cast %113 : vector<1x16x200xf32> to vector<16x200xf32>
    %115 = vector.shape_cast %112 : vector<16x200xf32> to vector<1x16x200xf32>
    tpu.vector_store %arg3[%c3, %c0_37, %c0_38], %115 {strides = array<i32>} : memref<4x16x200xf32, #tpu.memory_space<vmem>>, vector<1x16x200xf32>,
    return
  }
}

module attributes {stable_mosaic.version = 11 : i64} {
  func.func @_dec_convt_act_kernel(%arg0: memref<16x692xf32, #tpu.memory_space<vmem>>, %arg1: memref<4x4x3x16xbf16, #tpu.memory_space<vmem>>, %arg2: memref<3x1xf32, #tpu.memory_space<vmem>>, %arg3: memref<4x3x648xf32, #tpu.memory_space<vmem>>) attributes {dimension_semantics = [], scalar_prefetch = 0 : i64, scratch_operands = 0 : i64, tpu.core_type = #tpu.core_type<tc>} {
    %c0 = arith.constant 0 : index
    %c0_0 = arith.constant 0 : index
    %0 = vector.load %arg0[%c0, %c0_0] : memref<16x692xf32, #tpu.memory_space<vmem>>, vector<16x692xf32>
    %1 = arith.truncf %0 : vector<16x692xf32> to vector<16x692xbf16>
    %c0_1 = arith.constant 0 : index
    %c0_2 = arith.constant 0 : index
    %c0_3 = arith.constant 0 : index
    %c0_4 = arith.constant 0 : index
    %2 = vector.load %arg1[%c0_1, %c0_2, %c0_3, %c0_4] : memref<4x4x3x16xbf16, #tpu.memory_space<vmem>>, vector<4x4x3x16xbf16>
    %c0_5 = arith.constant 0 : index
    %c0_6 = arith.constant 0 : index
    %3 = vector.load %arg2[%c0_5, %c0_6] : memref<3x1xf32, #tpu.memory_space<vmem>>, vector<3x1xf32>
    %cst = arith.constant 0.000000e+00 : f32
    %4 = vector.broadcast %cst : f32 to vector<3x648xf32>
    %5 = vector.extract_strided_slice %2 {offsets = [0, 0, 0, 0], sizes = [1, 1, 3, 16], strides = [1, 1, 1, 1]} : vector<4x4x3x16xbf16> to vector<1x1x3x16xbf16>
    %6 = vector.shape_cast %5 : vector<1x1x3x16xbf16> to vector<3x16xbf16>
    %7 = vector.extract_strided_slice %1 {offsets = [0, 0], sizes = [16, 648], strides = [1, 1]} : vector<16x692xbf16> to vector<16x648xbf16>
    %cst_7 = arith.constant dense<0.000000e+00> : vector<3x648xf32>
    %8 = tpu.matmul %6, %7, %cst_7 {dimension_numbers = #tpu.dot_dimension_numbers<[1], [0], [0], [1], [0, 0, 1, 1], [], []>} : vector<3x16xbf16>, vector<16x648xbf16>, vector<3x648xf32> -> vector<3x648xf32>
    %9 = arith.addf %4, %8 : vector<3x648xf32>
    %10 = vector.extract_strided_slice %2 {offsets = [0, 1, 0, 0], sizes = [1, 1, 3, 16], strides = [1, 1, 1, 1]} : vector<4x4x3x16xbf16> to vector<1x1x3x16xbf16>
    %11 = vector.shape_cast %10 : vector<1x1x3x16xbf16> to vector<3x16xbf16>
    %12 = vector.extract_strided_slice %1 {offsets = [0, 1], sizes = [16, 648], strides = [1, 1]} : vector<16x692xbf16> to vector<16x648xbf16>
    %cst_8 = arith.constant dense<0.000000e+00> : vector<3x648xf32>
    %13 = tpu.matmul %11, %12, %cst_8 {dimension_numbers = #tpu.dot_dimension_numbers<[1], [0], [0], [1], [0, 0, 1, 1], [], []>} : vector<3x16xbf16>, vector<16x648xbf16>, vector<3x648xf32> -> vector<3x648xf32>
    %14 = arith.addf %9, %13 : vector<3x648xf32>
    %15 = vector.extract_strided_slice %2 {offsets = [0, 2, 0, 0], sizes = [1, 1, 3, 16], strides = [1, 1, 1, 1]} : vector<4x4x3x16xbf16> to vector<1x1x3x16xbf16>
    %16 = vector.shape_cast %15 : vector<1x1x3x16xbf16> to vector<3x16xbf16>
    %17 = vector.extract_strided_slice %1 {offsets = [0, 18], sizes = [16, 648], strides = [1, 1]} : vector<16x692xbf16> to vector<16x648xbf16>
    %cst_9 = arith.constant dense<0.000000e+00> : vector<3x648xf32>
    %18 = tpu.matmul %16, %17, %cst_9 {dimension_numbers = #tpu.dot_dimension_numbers<[1], [0], [0], [1], [0, 0, 1, 1], [], []>} : vector<3x16xbf16>, vector<16x648xbf16>, vector<3x648xf32> -> vector<3x648xf32>
    %19 = arith.addf %14, %18 : vector<3x648xf32>
    %20 = vector.extract_strided_slice %2 {offsets = [0, 3, 0, 0], sizes = [1, 1, 3, 16], strides = [1, 1, 1, 1]} : vector<4x4x3x16xbf16> to vector<1x1x3x16xbf16>
    %21 = vector.shape_cast %20 : vector<1x1x3x16xbf16> to vector<3x16xbf16>
    %22 = vector.extract_strided_slice %1 {offsets = [0, 19], sizes = [16, 648], strides = [1, 1]} : vector<16x692xbf16> to vector<16x648xbf16>
    %cst_10 = arith.constant dense<0.000000e+00> : vector<3x648xf32>
    %23 = tpu.matmul %21, %22, %cst_10 {dimension_numbers = #tpu.dot_dimension_numbers<[1], [0], [0], [1], [0, 0, 1, 1], [], []>} : vector<3x16xbf16>, vector<16x648xbf16>, vector<3x648xf32> -> vector<3x648xf32>
    %24 = arith.addf %19, %23 : vector<3x648xf32>
    %25 = vector.broadcast %3 : vector<3x1xf32> to vector<3x648xf32>
    %26 = arith.addf %24, %25 : vector<3x648xf32>
    %cst_11 = arith.constant 0.000000e+00 : f32
    %27 = vector.broadcast %cst_11 : f32 to vector<3x648xf32>
    %28 = arith.subf %27, %26 : vector<3x648xf32>
    %29 = math.exp %28 : vector<3x648xf32>
    %cst_12 = arith.constant 1.000000e+00 : f32
    %30 = vector.broadcast %cst_12 : f32 to vector<3x648xf32>
    %31 = arith.addf %30, %29 : vector<3x648xf32>
    %32 = tpu.reciprocal %31 {approx = true} : vector<3x648xf32> -> vector<3x648xf32>
    %c0_13 = arith.constant 0 : index
    %c0_14 = arith.constant 0 : index
    %c0_15 = arith.constant 0 : index
    %33 = vector.load %arg3[%c0_13, %c0_14, %c0_15] : memref<4x3x648xf32, #tpu.memory_space<vmem>>, vector<1x3x648xf32>
    %34 = vector.shape_cast %33 : vector<1x3x648xf32> to vector<3x648xf32>
    %35 = vector.shape_cast %32 : vector<3x648xf32> to vector<1x3x648xf32>
    tpu.vector_store %arg3[%c0_13, %c0_14, %c0_15], %35 {strides = array<i32>} : memref<4x3x648xf32, #tpu.memory_space<vmem>>, vector<1x3x648xf32>,
    %cst_16 = arith.constant 0.000000e+00 : f32
    %36 = vector.broadcast %cst_16 : f32 to vector<3x648xf32>
    %37 = vector.extract_strided_slice %2 {offsets = [1, 0, 0, 0], sizes = [1, 1, 3, 16], strides = [1, 1, 1, 1]} : vector<4x4x3x16xbf16> to vector<1x1x3x16xbf16>
    %38 = vector.shape_cast %37 : vector<1x1x3x16xbf16> to vector<3x16xbf16>
    %39 = vector.extract_strided_slice %1 {offsets = [0, 1], sizes = [16, 648], strides = [1, 1]} : vector<16x692xbf16> to vector<16x648xbf16>
    %cst_17 = arith.constant dense<0.000000e+00> : vector<3x648xf32>
    %40 = tpu.matmul %38, %39, %cst_17 {dimension_numbers = #tpu.dot_dimension_numbers<[1], [0], [0], [1], [0, 0, 1, 1], [], []>} : vector<3x16xbf16>, vector<16x648xbf16>, vector<3x648xf32> -> vector<3x648xf32>
    %41 = arith.addf %36, %40 : vector<3x648xf32>
    %42 = vector.extract_strided_slice %2 {offsets = [1, 1, 0, 0], sizes = [1, 1, 3, 16], strides = [1, 1, 1, 1]} : vector<4x4x3x16xbf16> to vector<1x1x3x16xbf16>
    %43 = vector.shape_cast %42 : vector<1x1x3x16xbf16> to vector<3x16xbf16>
    %44 = vector.extract_strided_slice %1 {offsets = [0, 2], sizes = [16, 648], strides = [1, 1]} : vector<16x692xbf16> to vector<16x648xbf16>
    %cst_18 = arith.constant dense<0.000000e+00> : vector<3x648xf32>
    %45 = tpu.matmul %43, %44, %cst_18 {dimension_numbers = #tpu.dot_dimension_numbers<[1], [0], [0], [1], [0, 0, 1, 1], [], []>} : vector<3x16xbf16>, vector<16x648xbf16>, vector<3x648xf32> -> vector<3x648xf32>
    %46 = arith.addf %41, %45 : vector<3x648xf32>
    %47 = vector.extract_strided_slice %2 {offsets = [1, 2, 0, 0], sizes = [1, 1, 3, 16], strides = [1, 1, 1, 1]} : vector<4x4x3x16xbf16> to vector<1x1x3x16xbf16>
    %48 = vector.shape_cast %47 : vector<1x1x3x16xbf16> to vector<3x16xbf16>
    %49 = vector.extract_strided_slice %1 {offsets = [0, 19], sizes = [16, 648], strides = [1, 1]} : vector<16x692xbf16> to vector<16x648xbf16>
    %cst_19 = arith.constant dense<0.000000e+00> : vector<3x648xf32>
    %50 = tpu.matmul %48, %49, %cst_19 {dimension_numbers = #tpu.dot_dimension_numbers<[1], [0], [0], [1], [0, 0, 1, 1], [], []>} : vector<3x16xbf16>, vector<16x648xbf16>, vector<3x648xf32> -> vector<3x648xf32>
    %51 = arith.addf %46, %50 : vector<3x648xf32>
    %52 = vector.extract_strided_slice %2 {offsets = [1, 3, 0, 0], sizes = [1, 1, 3, 16], strides = [1, 1, 1, 1]} : vector<4x4x3x16xbf16> to vector<1x1x3x16xbf16>
    %53 = vector.shape_cast %52 : vector<1x1x3x16xbf16> to vector<3x16xbf16>
    %54 = vector.extract_strided_slice %1 {offsets = [0, 20], sizes = [16, 648], strides = [1, 1]} : vector<16x692xbf16> to vector<16x648xbf16>
    %cst_20 = arith.constant dense<0.000000e+00> : vector<3x648xf32>
    %55 = tpu.matmul %53, %54, %cst_20 {dimension_numbers = #tpu.dot_dimension_numbers<[1], [0], [0], [1], [0, 0, 1, 1], [], []>} : vector<3x16xbf16>, vector<16x648xbf16>, vector<3x648xf32> -> vector<3x648xf32>
    %56 = arith.addf %51, %55 : vector<3x648xf32>
    %57 = vector.broadcast %3 : vector<3x1xf32> to vector<3x648xf32>
    %58 = arith.addf %56, %57 : vector<3x648xf32>
    %cst_21 = arith.constant 0.000000e+00 : f32
    %59 = vector.broadcast %cst_21 : f32 to vector<3x648xf32>
    %60 = arith.subf %59, %58 : vector<3x648xf32>
    %61 = math.exp %60 : vector<3x648xf32>
    %cst_22 = arith.constant 1.000000e+00 : f32
    %62 = vector.broadcast %cst_22 : f32 to vector<3x648xf32>
    %63 = arith.addf %62, %61 : vector<3x648xf32>
    %64 = tpu.reciprocal %63 {approx = true} : vector<3x648xf32> -> vector<3x648xf32>
    %c1 = arith.constant 1 : index
    %c0_23 = arith.constant 0 : index
    %c0_24 = arith.constant 0 : index
    %65 = vector.load %arg3[%c1, %c0_23, %c0_24] : memref<4x3x648xf32, #tpu.memory_space<vmem>>, vector<1x3x648xf32>
    %66 = vector.shape_cast %65 : vector<1x3x648xf32> to vector<3x648xf32>
    %67 = vector.shape_cast %64 : vector<3x648xf32> to vector<1x3x648xf32>
    tpu.vector_store %arg3[%c1, %c0_23, %c0_24], %67 {strides = array<i32>} : memref<4x3x648xf32, #tpu.memory_space<vmem>>, vector<1x3x648xf32>,
    %cst_25 = arith.constant 0.000000e+00 : f32
    %68 = vector.broadcast %cst_25 : f32 to vector<3x648xf32>
    %69 = vector.extract_strided_slice %2 {offsets = [2, 0, 0, 0], sizes = [1, 1, 3, 16], strides = [1, 1, 1, 1]} : vector<4x4x3x16xbf16> to vector<1x1x3x16xbf16>
    %70 = vector.shape_cast %69 : vector<1x1x3x16xbf16> to vector<3x16xbf16>
    %71 = vector.extract_strided_slice %1 {offsets = [0, 18], sizes = [16, 648], strides = [1, 1]} : vector<16x692xbf16> to vector<16x648xbf16>
    %cst_26 = arith.constant dense<0.000000e+00> : vector<3x648xf32>
    %72 = tpu.matmul %70, %71, %cst_26 {dimension_numbers = #tpu.dot_dimension_numbers<[1], [0], [0], [1], [0, 0, 1, 1], [], []>} : vector<3x16xbf16>, vector<16x648xbf16>, vector<3x648xf32> -> vector<3x648xf32>
    %73 = arith.addf %68, %72 : vector<3x648xf32>
    %74 = vector.extract_strided_slice %2 {offsets = [2, 1, 0, 0], sizes = [1, 1, 3, 16], strides = [1, 1, 1, 1]} : vector<4x4x3x16xbf16> to vector<1x1x3x16xbf16>
    %75 = vector.shape_cast %74 : vector<1x1x3x16xbf16> to vector<3x16xbf16>
    %76 = vector.extract_strided_slice %1 {offsets = [0, 19], sizes = [16, 648], strides = [1, 1]} : vector<16x692xbf16> to vector<16x648xbf16>
    %cst_27 = arith.constant dense<0.000000e+00> : vector<3x648xf32>
    %77 = tpu.matmul %75, %76, %cst_27 {dimension_numbers = #tpu.dot_dimension_numbers<[1], [0], [0], [1], [0, 0, 1, 1], [], []>} : vector<3x16xbf16>, vector<16x648xbf16>, vector<3x648xf32> -> vector<3x648xf32>
    %78 = arith.addf %73, %77 : vector<3x648xf32>
    %79 = vector.extract_strided_slice %2 {offsets = [2, 2, 0, 0], sizes = [1, 1, 3, 16], strides = [1, 1, 1, 1]} : vector<4x4x3x16xbf16> to vector<1x1x3x16xbf16>
    %80 = vector.shape_cast %79 : vector<1x1x3x16xbf16> to vector<3x16xbf16>
    %81 = vector.extract_strided_slice %1 {offsets = [0, 36], sizes = [16, 648], strides = [1, 1]} : vector<16x692xbf16> to vector<16x648xbf16>
    %cst_28 = arith.constant dense<0.000000e+00> : vector<3x648xf32>
    %82 = tpu.matmul %80, %81, %cst_28 {dimension_numbers = #tpu.dot_dimension_numbers<[1], [0], [0], [1], [0, 0, 1, 1], [], []>} : vector<3x16xbf16>, vector<16x648xbf16>, vector<3x648xf32> -> vector<3x648xf32>
    %83 = arith.addf %78, %82 : vector<3x648xf32>
    %84 = vector.extract_strided_slice %2 {offsets = [2, 3, 0, 0], sizes = [1, 1, 3, 16], strides = [1, 1, 1, 1]} : vector<4x4x3x16xbf16> to vector<1x1x3x16xbf16>
    %85 = vector.shape_cast %84 : vector<1x1x3x16xbf16> to vector<3x16xbf16>
    %86 = vector.extract_strided_slice %1 {offsets = [0, 37], sizes = [16, 648], strides = [1, 1]} : vector<16x692xbf16> to vector<16x648xbf16>
    %cst_29 = arith.constant dense<0.000000e+00> : vector<3x648xf32>
    %87 = tpu.matmul %85, %86, %cst_29 {dimension_numbers = #tpu.dot_dimension_numbers<[1], [0], [0], [1], [0, 0, 1, 1], [], []>} : vector<3x16xbf16>, vector<16x648xbf16>, vector<3x648xf32> -> vector<3x648xf32>
    %88 = arith.addf %83, %87 : vector<3x648xf32>
    %89 = vector.broadcast %3 : vector<3x1xf32> to vector<3x648xf32>
    %90 = arith.addf %88, %89 : vector<3x648xf32>
    %cst_30 = arith.constant 0.000000e+00 : f32
    %91 = vector.broadcast %cst_30 : f32 to vector<3x648xf32>
    %92 = arith.subf %91, %90 : vector<3x648xf32>
    %93 = math.exp %92 : vector<3x648xf32>
    %cst_31 = arith.constant 1.000000e+00 : f32
    %94 = vector.broadcast %cst_31 : f32 to vector<3x648xf32>
    %95 = arith.addf %94, %93 : vector<3x648xf32>
    %96 = tpu.reciprocal %95 {approx = true} : vector<3x648xf32> -> vector<3x648xf32>
    %c2 = arith.constant 2 : index
    %c0_32 = arith.constant 0 : index
    %c0_33 = arith.constant 0 : index
    %97 = vector.load %arg3[%c2, %c0_32, %c0_33] : memref<4x3x648xf32, #tpu.memory_space<vmem>>, vector<1x3x648xf32>
    %98 = vector.shape_cast %97 : vector<1x3x648xf32> to vector<3x648xf32>
    %99 = vector.shape_cast %96 : vector<3x648xf32> to vector<1x3x648xf32>
    tpu.vector_store %arg3[%c2, %c0_32, %c0_33], %99 {strides = array<i32>} : memref<4x3x648xf32, #tpu.memory_space<vmem>>, vector<1x3x648xf32>,
    %cst_34 = arith.constant 0.000000e+00 : f32
    %100 = vector.broadcast %cst_34 : f32 to vector<3x648xf32>
    %101 = vector.extract_strided_slice %2 {offsets = [3, 0, 0, 0], sizes = [1, 1, 3, 16], strides = [1, 1, 1, 1]} : vector<4x4x3x16xbf16> to vector<1x1x3x16xbf16>
    %102 = vector.shape_cast %101 : vector<1x1x3x16xbf16> to vector<3x16xbf16>
    %103 = vector.extract_strided_slice %1 {offsets = [0, 19], sizes = [16, 648], strides = [1, 1]} : vector<16x692xbf16> to vector<16x648xbf16>
    %cst_35 = arith.constant dense<0.000000e+00> : vector<3x648xf32>
    %104 = tpu.matmul %102, %103, %cst_35 {dimension_numbers = #tpu.dot_dimension_numbers<[1], [0], [0], [1], [0, 0, 1, 1], [], []>} : vector<3x16xbf16>, vector<16x648xbf16>, vector<3x648xf32> -> vector<3x648xf32>
    %105 = arith.addf %100, %104 : vector<3x648xf32>
    %106 = vector.extract_strided_slice %2 {offsets = [3, 1, 0, 0], sizes = [1, 1, 3, 16], strides = [1, 1, 1, 1]} : vector<4x4x3x16xbf16> to vector<1x1x3x16xbf16>
    %107 = vector.shape_cast %106 : vector<1x1x3x16xbf16> to vector<3x16xbf16>
    %108 = vector.extract_strided_slice %1 {offsets = [0, 20], sizes = [16, 648], strides = [1, 1]} : vector<16x692xbf16> to vector<16x648xbf16>
    %cst_36 = arith.constant dense<0.000000e+00> : vector<3x648xf32>
    %109 = tpu.matmul %107, %108, %cst_36 {dimension_numbers = #tpu.dot_dimension_numbers<[1], [0], [0], [1], [0, 0, 1, 1], [], []>} : vector<3x16xbf16>, vector<16x648xbf16>, vector<3x648xf32> -> vector<3x648xf32>
    %110 = arith.addf %105, %109 : vector<3x648xf32>
    %111 = vector.extract_strided_slice %2 {offsets = [3, 2, 0, 0], sizes = [1, 1, 3, 16], strides = [1, 1, 1, 1]} : vector<4x4x3x16xbf16> to vector<1x1x3x16xbf16>
    %112 = vector.shape_cast %111 : vector<1x1x3x16xbf16> to vector<3x16xbf16>
    %113 = vector.extract_strided_slice %1 {offsets = [0, 37], sizes = [16, 648], strides = [1, 1]} : vector<16x692xbf16> to vector<16x648xbf16>
    %cst_37 = arith.constant dense<0.000000e+00> : vector<3x648xf32>
    %114 = tpu.matmul %112, %113, %cst_37 {dimension_numbers = #tpu.dot_dimension_numbers<[1], [0], [0], [1], [0, 0, 1, 1], [], []>} : vector<3x16xbf16>, vector<16x648xbf16>, vector<3x648xf32> -> vector<3x648xf32>
    %115 = arith.addf %110, %114 : vector<3x648xf32>
    %116 = vector.extract_strided_slice %2 {offsets = [3, 3, 0, 0], sizes = [1, 1, 3, 16], strides = [1, 1, 1, 1]} : vector<4x4x3x16xbf16> to vector<1x1x3x16xbf16>
    %117 = vector.shape_cast %116 : vector<1x1x3x16xbf16> to vector<3x16xbf16>
    %118 = vector.extract_strided_slice %1 {offsets = [0, 38], sizes = [16, 648], strides = [1, 1]} : vector<16x692xbf16> to vector<16x648xbf16>
    %cst_38 = arith.constant dense<0.000000e+00> : vector<3x648xf32>
    %119 = tpu.matmul %117, %118, %cst_38 {dimension_numbers = #tpu.dot_dimension_numbers<[1], [0], [0], [1], [0, 0, 1, 1], [], []>} : vector<3x16xbf16>, vector<16x648xbf16>, vector<3x648xf32> -> vector<3x648xf32>
    %120 = arith.addf %115, %119 : vector<3x648xf32>
    %121 = vector.broadcast %3 : vector<3x1xf32> to vector<3x648xf32>
    %122 = arith.addf %120, %121 : vector<3x648xf32>
    %cst_39 = arith.constant 0.000000e+00 : f32
    %123 = vector.broadcast %cst_39 : f32 to vector<3x648xf32>
    %124 = arith.subf %123, %122 : vector<3x648xf32>
    %125 = math.exp %124 : vector<3x648xf32>
    %cst_40 = arith.constant 1.000000e+00 : f32
    %126 = vector.broadcast %cst_40 : f32 to vector<3x648xf32>
    %127 = arith.addf %126, %125 : vector<3x648xf32>
    %128 = tpu.reciprocal %127 {approx = true} : vector<3x648xf32> -> vector<3x648xf32>
    %c3 = arith.constant 3 : index
    %c0_41 = arith.constant 0 : index
    %c0_42 = arith.constant 0 : index
    %129 = vector.load %arg3[%c3, %c0_41, %c0_42] : memref<4x3x648xf32, #tpu.memory_space<vmem>>, vector<1x3x648xf32>
    %130 = vector.shape_cast %129 : vector<1x3x648xf32> to vector<3x648xf32>
    %131 = vector.shape_cast %128 : vector<3x648xf32> to vector<1x3x648xf32>
    tpu.vector_store %arg3[%c3, %c0_41, %c0_42], %131 {strides = array<i32>} : memref<4x3x648xf32, #tpu.memory_space<vmem>>, vector<1x3x648xf32>,
    return
  }
}

</mosaic_0001>

<bundles_post_ra>
// kernel: _lambda_.7
= control target key start
LH: loop header
LB: loop body
LE: loop exit
PB: predicated region body
PF: predicated region fallthrough
CT: control target
= control target key end

     0   :  { %s3281_s25 = smov 127   ;;  %v3282_v10 = vmov 0   ;;  %s3283_s28 = smov 111   ;;  %vm108_vm0 = vcmask 1040384   ;;  %vm109_vm1 = vcmask 1041408   ;;  %v3285_v43 = vmov 65535   ;;  %s4120_s0 = inlined_call_operand.vmem [shape: f32[4,3,602], index: 0, kind: input, shape index: {}]   ;;  %s4121_s1 = inlined_call_operand.vmem [shape: bf16[4,4,16,3], index: 1, kind: input, shape index: {}]   ;;  %s4122_s2 = inlined_call_operand.vmem [shape: f32[16,1], index: 2, kind: input, shape index: {}]   ;;  %s4123_s5 = inlined_call_operand.vmem [shape: f32[1,578], index: 5, kind: input, shape index: {}]   ;;  %s4124_s3 = inlined_call_operand.vmem [shape: f32[16,1], index: 3, kind: input, shape index: {}]   ;;  %s4125_s4 = inlined_call_operand.vmem [shape: f32[16,1], index: 4, kind: input, shape index: {}]   ;;  %s4126_s6 = inlined_call_operand.vmem [shape: f32[16,578], index: 6, kind: output, shape index: {}]  }
   0x1   :  { %v25_v0 = vld [vmem:[%s4120_s0 + $0x8] sm:$0x77]  ;;  %v24_v1 = vld [vmem:[%s4120_s0] sm:$0x77]  ;;  %v26_v8 = vld [vmem:[%s4120_s0 + $0x10] sm:$0x7]  ;;  %159 = vmatprep.mubr.bf16.mxu0 %v3282_v10  ;;  %202 = vmatprep.mubr.bf16.mxu1 %v3282_v10 }
   0x2   :  { %v3329_v2 = vpack.c.bf16 %v25_v0, %v25_v0  ;;  %v3331_v3 = vpack.c.bf16 %v24_v1, %v24_v1  ;;  %v71_v4 = vcombine.high %v25_v0, %v25_v0  ;;  %v70_v5 = vcombine.high %v24_v1, %v24_v1  ;;  %3251 = vset.pattern.permute.xlu0 %v3282_v10  ;;  %v27_v11 = vld [vmem:[%s4120_s0 + $0x14] sm:$0x77]  ;;  %s3284_s7 = smov 110   ;;  %v28_v14 = vld [vmem:[%s4120_s0 + $0x1c] sm:$0x77]  ;;  %v3259_v54 = vld [vmem:[%s4121_s1 + $0x8] sm:$0xff]  }
   0x3   :  { %v3348_v9 = vpack.c.bf16 %v26_v8, %v26_v8  ;;  %3252 = vset.pattern.permute.xlu1 %v3282_v10  ;;  %v756_v12 = vcombine.high %v27_v11, %v27_v11  ;;  %v3386_v15 = vpack.c.bf16 %v28_v14, %v28_v14  ;;  %v3388_v16 = vpack.c.bf16 %v27_v11, %v27_v11  ;;  %v29_v18 = vld [vmem:[%s4120_s0 + $0x24] sm:$0x7]  ;;  %v30_v21 = vld [vmem:[%s4120_s0 + $0x28] sm:$0x77]  ;;  %v31_v23 = vld [vmem:[%s4120_s0 + $0x30] sm:$0x77] }
   0x4   :  { %93 = vrot.lane.b32.xlu0 %v3329_v2, %s3281_s25  ;;  %89 = vrot.lane.b32.xlu1 %v3331_v3, %s3281_s25  ;;  %v3337_v6 = vpack.c.bf16 %v71_v4, %v71_v4  ;;  %v3339_v7 = vpack.c.bf16 %v70_v5, %v70_v5  ;;  %v757_v17 = vcombine.high %v28_v14, %v28_v14  ;;  %v32_v29 = vld [vmem:[%s4120_s0 + $0x38] sm:$0x7]  ;;  %v33_v31 = vld [vmem:[%s4120_s0 + $0x3c] sm:$0x77]  ;;  %v110_v44 = vsel %vm108_vm0, 4294967295, %v3285_v43 }
   0x5   :  { %v3377_v13 = vpack.c.bf16 %v756_v12, %v756_v12  ;;  %v3399_v20 = vpack.c.bf16 %v29_v18, %v29_v18  ;;  %v1454_v22 = vcombine.high %v30_v21, %v30_v21  ;;  %v3433_v25 = vpack.c.bf16 %v31_v23, %v31_v23  ;;  %v34_v34 = vld [vmem:[%s4120_s0 + $0x44] sm:$0x77]  ;;  %v35_v38 = vld [vmem:[%s4120_s0 + $0x4c] sm:$0x7] }
   0x6   :  { %v3397_v19 = vpack.c.bf16 %v757_v17, %v757_v17  ;;  %v1455_v26 = vcombine.high %v31_v23, %v31_v23  ;;  %v3439_v27 = vpack.c.bf16 %v30_v21, %v30_v21  ;;  %v3450_v30 = vpack.c.bf16 %v32_v29, %v32_v29  ;;  %v3260_v11 = vld [vmem:[%s4121_s1] sm:$0xff]  }
   0x7   :  { %v3431_v24 = vpack.c.bf16 %v1454_v22, %v1454_v22  ;;  %v2152_v32 = vcombine.high %v33_v31, %v33_v31  ;;  %v3484_v35 = vpack.c.bf16 %v34_v34, %v34_v34  ;;  %v3486_v36 = vpack.c.bf16 %v33_v31, %v33_v31 }
   0x8   :  { %95 = vrot.lane.b32.xlu1 %v3337_v6, %s3281_s25  ;;  %91 = vrot.lane.b32.xlu0 %v3339_v7, %s3281_s25  ;;  %v3441_v28 = vpack.c.bf16 %v1455_v26, %v1455_v26  ;;  %v2153_v37 = vcombine.high %v34_v34, %v34_v34  ;;  %v3497_v40 = vpack.c.bf16 %v35_v38, %v35_v38  ;;  %vm99_vm2 = vcmask 1039360  }
   0x9   :  { %v3475_v33 = vpack.c.bf16 %v2152_v32, %v2152_v32  ;;  %v3523_v45 = vsel %vm109_vm1, %v110_v44, 0  ;;  %vm104_vm3 = vcmask 23552   ;;  %v3286_v58 = vmov 0.0  }
   0xa   :  { %v3495_v39 = vpack.c.bf16 %v2153_v37, %v2153_v37  ;;  %v266_v59 = vand.u32 %v3523_v45, %v3339_v7  ;;  %v272_v62 = vand.u32 %v3523_v45, %v3337_v6  ;;  %vm419_vm4 = vcmask 908288   ;;  %v3262_v37 = vld [vmem:[%s4121_s1 + $0x10] sm:$0xff]  }
   0xb   :  { %v263_v1 = vand.u32 %v3523_v45, %v3331_v3  ;;  %vm3287_vm5 = vmmov 0   ;;  %v275_v14 = vand.u32 %v3523_v45, %v3348_v9  ;;  %vm594_vm6 = vcmask 900096  }
   0xc   :  { %97 = vrot.lane.b32.xlu0 %v3348_v9, %s3281_s25  ;;  %411 = vrot.lane.b32.xlu1 %v3339_v7, %s3283_s28  ;;  %vm2910_vm7 = vcmask 539648  }
  0x10   :  { %409 = vrot.lane.b32.xlu1 %v3331_v3, %s3283_s28  ;;  %413 = vrot.lane.b32.xlu0 %v3329_v2, %s3283_s28 }
  0x14   :  { %415 = vrot.lane.b32.xlu0 %v3337_v6, %s3283_s28  ;;  %417 = vrot.lane.b32.xlu1 %v3348_v9, %s3283_s28 }
  0x18   :  { %586 = vrot.lane.b32.xlu0 %v3339_v7, %s3284_s7  ;;  %588 = vrot.lane.b32.xlu1 %v3329_v2, %s3284_s7  ;;  %v269_v7 = vand.u32 %v3523_v45, %v3329_v2 }
  0x1c   :  { %584 = vrot.lane.b32.xlu0 %v3331_v3, %s3284_s7  ;;  %590 = vrot.lane.b32.xlu1 %v3337_v6, %s3284_s7 }
  0x20   :  { %592 = vrot.lane.b32.xlu0 %v3348_v9, %s3284_s7  ;;  %937 = vrot.lane.b32.xlu1 %v3377_v13, %s3281_s25 }
  0x24   :  { %939 = vrot.lane.b32.xlu0 %v3386_v15, %s3281_s25  ;;  %935 = vrot.lane.b32.xlu1 %v3388_v16, %s3281_s25 }
  0x28   :  { %941 = vrot.lane.b32.xlu0 %v3397_v19, %s3281_s25  ;;  %943 = vrot.lane.b32.xlu1 %v3399_v20, %s3281_s25 }
  0x2c   :  { %1111 = vrot.lane.b32.xlu0 %v3377_v13, %s3283_s28  ;;  %1113 = vrot.lane.b32.xlu1 %v3386_v15, %s3283_s28 }
  0x30   :  { %1109 = vrot.lane.b32.xlu0 %v3388_v16, %s3283_s28  ;;  %1115 = vrot.lane.b32.xlu1 %v3397_v19, %s3283_s28 }
  0x34   :  { %1117 = vrot.lane.b32.xlu0 %v3399_v20, %s3283_s28  ;;  %1285 = vrot.lane.b32.xlu1 %v3377_v13, %s3284_s7 }
  0x38   :  { %1287 = vrot.lane.b32.xlu0 %v3386_v15, %s3284_s7  ;;  %1283 = vrot.lane.b32.xlu1 %v3388_v16, %s3284_s7 }
  0x3c   :  { %1289 = vrot.lane.b32.xlu0 %v3397_v19, %s3284_s7  ;;  %1291 = vrot.lane.b32.xlu1 %v3399_v20, %s3284_s7 }
  0x40   :  { %1635 = vrot.lane.b32.xlu0 %v3431_v24, %s3281_s25  ;;  %1637 = vrot.lane.b32.xlu1 %v3433_v25, %s3281_s25 }
  0x44   :  { %1633 = vrot.lane.b32.xlu0 %v3439_v27, %s3281_s25  ;;  %1639 = vrot.lane.b32.xlu1 %v3441_v28, %s3281_s25 }
  0x48   :  { %1641 = vrot.lane.b32.xlu0 %v3450_v30, %s3281_s25  ;;  %1809 = vrot.lane.b32.xlu1 %v3431_v24, %s3283_s28 }
  0x4c   :  { %1807 = vrot.lane.b32.xlu1 %v3439_v27, %s3283_s28  ;;  %1811 = vrot.lane.b32.xlu0 %v3433_v25, %s3283_s28 }
  0x50   :  { %1813 = vrot.lane.b32.xlu0 %v3441_v28, %s3283_s28  ;;  %1815 = vrot.lane.b32.xlu1 %v3450_v30, %s3283_s28 }
  0x54   :  { %1983 = vrot.lane.b32.xlu0 %v3431_v24, %s3284_s7  ;;  %1985 = vrot.lane.b32.xlu1 %v3433_v25, %s3284_s7 }
  0x58   :  { %1981 = vrot.lane.b32.xlu0 %v3439_v27, %s3284_s7  ;;  %1987 = vrot.lane.b32.xlu1 %v3441_v28, %s3284_s7 }
  0x5c   :  { %1989 = vrot.lane.b32.xlu0 %v3450_v30, %s3284_s7  ;;  %2333 = vrot.lane.b32.xlu1 %v3475_v33, %s3281_s25 }
  0x60   :  { %2335 = vrot.lane.b32.xlu0 %v3484_v35, %s3281_s25  ;;  %2331 = vrot.lane.b32.xlu1 %v3486_v36, %s3281_s25 }
  0x64   :  { %2337 = vrot.lane.b32.xlu0 %v3495_v39, %s3281_s25  ;;  %2339 = vrot.lane.b32.xlu1 %v3497_v40, %s3281_s25 }
  0x68   :  { %2507 = vrot.lane.b32.xlu0 %v3475_v33, %s3283_s28  ;;  %2509 = vrot.lane.b32.xlu1 %v3484_v35, %s3283_s28 }
  0x6c   :  { %2505 = vrot.lane.b32.xlu0 %v3486_v36, %s3283_s28  ;;  %2511 = vrot.lane.b32.xlu1 %v3495_v39, %s3283_s28 }
  0x70   :  { %2513 = vrot.lane.b32.xlu0 %v3497_v40, %s3283_s28  ;;  %2681 = vrot.lane.b32.xlu1 %v3475_v33, %s3284_s7 }
  0x74   :  { %2683 = vrot.lane.b32.xlu0 %v3484_v35, %s3284_s7  ;;  %2679 = vrot.lane.b32.xlu1 %v3486_v36, %s3284_s7 }
  0x76   :  { %v94_v41 = vpop.permute.xlu0 %93  ;;  %v90_v42 = vpop.permute.xlu1 %89 }
  0x78   :  { %2685 = vrot.lane.b32.xlu0 %v3495_v39, %s3284_s7  ;;  %2687 = vrot.lane.b32.xlu1 %v3497_v40, %s3284_s7 }
  0x7a   :  { %v96_v46 = vpop.permute.xlu1 %95  ;;  %v92_v47 = vpop.permute.xlu0 %91 }
  0x7b   :  { %v100_v48 = vsel %vm99_vm2, %v90_v42, %v92_v47  ;;  %v101_v49 = vsel %vm99_vm2, %v92_v47, %v94_v41  ;;  %v102_v52 = vsel %vm99_vm2, %v94_v41, %v96_v46 }
  0x7c   :  { %v116_v50 = vand.u32 %v3523_v45, %v101_v49  ;;  %v113_v51 = vand.u32 %v3523_v45, %v100_v48  ;;  %v119_v61 = vand.u32 %v3523_v45, %v102_v52  ;;  %v777_v49 = vand.u32 %v3377_v13, %v3523_v45 }
  0x7e   :  { %141 = vmatprep.subr.bf16.mxu0 %v116_v50  ;;  %v98_v53 = vpop.permute.xlu0 %97  ;;  %v412_v55 = vpop.permute.xlu1 %411 }
  0x7f   :  { %142 = vmatpush1.bf16.msra.mxu0 %v113_v51  ;;  %v103_v56 = vsel %vm99_vm2, %v96_v46, %v98_v53  ;;  %v125_v60 = vand.u32 %v3523_v45, %v98_v53  ;;  %v3264_v51 = vld [vmem:[%s4121_s1 + $0x18] sm:$0xff]   ;;  %v783_v53 = vand.u32 %v3397_v19, %v3523_v45  ;;  %v780_v19 = vand.u32 %v3386_v15, %v3523_v45 }
  0x80   :  { %v122_v57 = vand.u32 %v3523_v45, %v103_v56  ;;  %3148 = vmatprep.subr.bf16.mxu0 %v3286_v58 }
  0x82   :  { %3053 = vmatmul.mubr.msk.bf16.vlgmr.msra.gmra.mxu0 %vm104_vm3, %v3259_v54  ;;  %184 = vmatprep.subr.bf16.mxu1 %v122_v57  ;;  %v410_v63 = vpop.permute.xlu1 %409  ;;  %v414_v0 = vpop.permute.xlu0 %413 }
  0x83   :  { %185 = vmatpush1.bf16.msra.mxu1 %v119_v61  ;;  %3149 = vmatpush3.bf16.msra.mxu0 %v125_v60  ;;  %v421_v4 = vsel %vm419_vm4, %v412_v55, %v414_v0  ;;  %v420_v2 = vsel %vm419_vm4, %v410_v63, %v412_v55  ;;  %v774_v55 = vand.u32 %v3388_v16, %v3523_v45  ;;  %v3265_v61 = vld [vmem:[%s4121_s1 + $0x20] sm:$0xff]  }
  0x84   :  { %291 = vmatprep.subr.bf16.mxu1 %v266_v59  ;;  %3150 = vmatprep.mubr.msk.bf16.mxu0 %vm3287_vm5, %v3286_v58  ;;  %v431_v3 = vand.u32 %v421_v4, %v3523_v45  ;;  %v428_v22 = vand.u32 %v420_v2, %v3523_v45 }
  0x85   :  { %334 = vmatprep.subr.bf16.mxu0 %v272_v62  ;;  %v786_v62 = vand.u32 %v3399_v20, %v3523_v45 }
  0x86   :  { %3054 = vmatmul.mubr.msk.bf16.vlgmr.msra.gmra.mxu1 %vm104_vm3, %v3259_v54  ;;  %v416_v5 = vpop.permute.xlu0 %415  ;;  %v418_v6 = vpop.permute.xlu1 %417 }
  0x87   :  { %292 = vmatpush1.bf16.msra.mxu1 %v263_v1  ;;  %309 = vmatprep.mubr.bf16.mxu1 %v3282_v10  ;;  %v423_v8 = vsel %vm419_vm4, %v416_v5, %v418_v6  ;;  %v422_v9 = vsel %vm419_vm4, %v414_v0, %v416_v5  ;;  %v440_v38 = vand.u32 %v418_v6, %v3523_v45 }
  0x88   :  { %3154 = vmatprep.subr.bf16.mxu1 %v3286_v58  ;;  %v437_v17 = vand.u32 %v423_v8, %v3523_v45  ;;  %v434_v31 = vand.u32 %v422_v9, %v3523_v45 }
  0x8a   :  { %3151 = vmatmul.mubr.msk.bf16.vlgmr.msra.gmra.mxu0 %vm104_vm3, %v3259_v54  ;;  %v587_v12 = vpop.permute.xlu0 %586  ;;  %v589_v18 = vpop.permute.xlu1 %588 }
  0x8b   :  { %335 = vmatpush1.bf16.msra.mxu0 %v269_v7  ;;  %352 = vmatprep.mubr.bf16.mxu0 %v3282_v10  ;;  %v596_v23 = vsel %vm594_vm6, %v587_v12, %v589_v18 }
  0x8c   :  { %456 = vmatprep.subr.bf16.mxu0 %v431_v3  ;;  %v606_v32 = vand.u32 %v596_v23, %v3523_v45 }
  0x8e   :  { %3057 = vmatmul.mubr.msk.bf16.vlgmr.msra.gmra.mxu1 %vm104_vm3, %v3260_v11  ;;  %v585_v21 = vpop.permute.xlu0 %584  ;;  %v591_v26 = vpop.permute.xlu1 %590 }
  0x8f   :  { %3155 = vmatpush3.bf16.msra.mxu1 %v275_v14  ;;  %3156 = vmatprep.mubr.msk.bf16.mxu1 %vm3287_vm5, %v3286_v58  ;;  %v595_v41 = vsel %vm594_vm6, %v585_v21, %v587_v12  ;;  %v597_v46 = vsel %vm594_vm6, %v589_v18, %v591_v26  ;;  %v3266_v12 = vld [vmem:[%s4121_s1 + $0x28] sm:$0xff]  }
  0x90   :  { %499 = vmatprep.subr.bf16.mxu1 %v437_v17  ;;  %v603_v44 = vand.u32 %v595_v41, %v3523_v45  ;;  %v609_v48 = vand.u32 %v597_v46, %v3523_v45 }
  0x92   :  { %3058 = vmatmul.mubr.msk.bf16.vlgmr.msra.gmra.mxu0 %vm104_vm3, %v3260_v11  ;;  %v593_v29 = vpop.permute.xlu0 %592  ;;  %v938_v43 = vpop.permute.xlu1 %937 }
  0x93   :  { %457 = vmatpush1.bf16.msra.mxu0 %v428_v22  ;;  %474 = vmatprep.mubr.bf16.mxu0 %v3282_v10  ;;  %v598_v34 = vsel %vm594_vm6, %v591_v26, %v593_v29  ;;  %v615_v52 = vand.u32 %v593_v29, %v3523_v45 }
  0x94   :  { %3160 = vmatprep.subr.bf16.mxu0 %v3286_v58  ;;  %v612_v42 = vand.u32 %v598_v34, %v3523_v45 }
  0x96   :  { %3157 = vmatmul.mubr.msk.bf16.vlgmr.msra.gmra.mxu1 %vm104_vm3, %v3260_v11  ;;  %v940_v47 = vpop.permute.xlu0 %939  ;;  %v936_v50 = vpop.permute.xlu1 %935 }
  0x97   :  { %500 = vmatpush1.bf16.msra.mxu1 %v434_v31  ;;  %517 = vmatprep.mubr.bf16.mxu1 %v3282_v10  ;;  %v946_v56 = vsel %vm99_vm2, %v938_v43, %v940_v47  ;;  %v945_v15 = vsel %vm99_vm2, %v936_v50, %v938_v43 }
  0x98   :  { %631 = vmatprep.subr.bf16.mxu1 %v606_v32  ;;  %v956_v60 = vand.u32 %v946_v56, %v3523_v45  ;;  %v953_v4 = vand.u32 %v945_v15, %v3523_v45 }
  0x9a   :  { %3061 = vmatmul.mubr.msk.bf16.vlgmr.msra.gmra.mxu0 %vm104_vm3, %v3262_v37  ;;  %v942_v54 = vpop.permute.xlu0 %941  ;;  %v944_v13 = vpop.permute.xlu1 %943 }
  0x9b   :  { %3161 = vmatpush3.bf16.msra.mxu0 %v440_v38  ;;  %3162 = vmatprep.mubr.msk.bf16.mxu0 %vm3287_vm5, %v3286_v58  ;;  %v948_v16 = vsel %vm99_vm2, %v942_v54, %v944_v13  ;;  %v947_v5 = vsel %vm99_vm2, %v940_v47, %v942_v54  ;;  %v965_v14 = vand.u32 %v944_v13, %v3523_v45 }
  0x9c   :  { %674 = vmatprep.subr.bf16.mxu0 %v612_v42  ;;  %v962_v63 = vand.u32 %v948_v16, %v3523_v45  ;;  %v959_v3 = vand.u32 %v947_v5, %v3523_v45  ;;  %v1472_v13 = vand.u32 %v3439_v27, %v3523_v45 }
  0x9e   :  { %3062 = vmatmul.mubr.msk.bf16.vlgmr.msra.gmra.mxu1 %vm104_vm3, %v3262_v37  ;;  %v1112_v57 = vpop.permute.xlu0 %1111  ;;  %v1114_v59 = vpop.permute.xlu1 %1113 }
  0x9f   :  { %632 = vmatpush1.bf16.msra.mxu1 %v603_v44  ;;  %649 = vmatprep.mubr.bf16.mxu1 %v3282_v10  ;;  %v1120_v20 = vsel %vm419_vm4, %v1112_v57, %v1114_v59 }
  0xa0   :  { %3166 = vmatprep.subr.bf16.mxu1 %v3286_v58  ;;  %v1130_v8 = vand.u32 %v1120_v20, %v3523_v45 }
  0xa2   :  { %3163 = vmatmul.mubr.msk.bf16.vlgmr.msra.gmra.mxu0 %vm104_vm3, %v3262_v37  ;;  %v1110_v0 = vpop.permute.xlu0 %1109  ;;  %v1116_v1 = vpop.permute.xlu1 %1115  ;;  %v3267_v37 = vld [vmem:[%s4121_s1 + $0x30] sm:$0xff]  }
  0xa3   :  { %675 = vmatpush1.bf16.msra.mxu0 %v609_v48  ;;  %692 = vmatprep.mubr.bf16.mxu0 %v3282_v10  ;;  %v1119_v2 = vsel %vm419_vm4, %v1110_v0, %v1112_v57  ;;  %v1121_v9 = vsel %vm419_vm4, %v1114_v59, %v1116_v1 }
  0xa4   :  { %802 = vmatprep.subr.bf16.mxu0 %v777_v49  ;;  %v1127_v22 = vand.u32 %v1119_v2, %v3523_v45  ;;  %v1133_v31 = vand.u32 %v1121_v9, %v3523_v45  ;;  %v1475_v49 = vand.u32 %v3431_v24, %v3523_v45 }
  0xa6   :  { %3065 = vmatmul.mubr.msk.bf16.vlgmr.msra.gmra.mxu1 %vm104_vm3, %v3264_v51  ;;  %v1118_v6 = vpop.permute.xlu0 %1117  ;;  %v1286_v7 = vpop.permute.xlu1 %1285 }
  0xa7   :  { %3167 = vmatpush3.bf16.msra.mxu1 %v615_v52  ;;  %3168 = vmatprep.mubr.msk.bf16.mxu1 %vm3287_vm5, %v3286_v58  ;;  %v1122_v11 = vsel %vm419_vm4, %v1116_v1, %v1118_v6  ;;  %v1139_v38 = vand.u32 %v1118_v6, %v3523_v45  ;;  %v3270_v6 = vld [vmem:[%s4121_s1 + $0x48] sm:$0xff]  }
  0xa8   :  { %845 = vmatprep.subr.bf16.mxu1 %v783_v53  ;;  %v1136_v17 = vand.u32 %v1122_v11, %v3523_v45  ;;  %v1481_v53 = vand.u32 %v3441_v28, %v3523_v45  ;;  %v1478_v28 = vand.u32 %v3433_v25, %v3523_v45 }
  0xaa   :  { %3066 = vmatmul.mubr.msk.bf16.vlgmr.msra.gmra.mxu0 %vm104_vm3, %v3264_v51  ;;  %v1288_v18 = vpop.permute.xlu0 %1287  ;;  %v1284_v21 = vpop.permute.xlu1 %1283 }
  0xab   :  { %803 = vmatpush1.bf16.msra.mxu0 %v774_v55  ;;  %820 = vmatprep.mubr.bf16.mxu0 %v3282_v10  ;;  %v1294_v23 = vsel %vm594_vm6, %v1286_v7, %v1288_v18  ;;  %v1293_v41 = vsel %vm594_vm6, %v1284_v21, %v1286_v7 }
  0xac   :  { %3172 = vmatprep.subr.bf16.mxu0 %v3286_v58  ;;  %v1304_v32 = vand.u32 %v1294_v23, %v3523_v45  ;;  %v1301_v44 = vand.u32 %v1293_v41, %v3523_v45  ;;  %v2848_v41 = vld [vmem:[%s4122_s2] sm:$0xff] }
  0xad   :  { %2852 = vperm.xlu0 %3251, %v2848_v41  }
  0xae   :  { %3169 = vmatmul.mubr.msk.bf16.vlgmr.msra.gmra.mxu1 %vm104_vm3, %v3264_v51  ;;  %v1290_v26 = vpop.permute.xlu0 %1289  ;;  %v1292_v29 = vpop.permute.xlu1 %1291  ;;  %v3268_v51 = vld [vmem:[%s4121_s1 + $0x38] sm:$0xff]  }
  0xaf   :  { %846 = vmatpush1.bf16.msra.mxu1 %v780_v19  ;;  %863 = vmatprep.mubr.bf16.mxu1 %v3282_v10  ;;  %v1296_v34 = vsel %vm594_vm6, %v1290_v26, %v1292_v29  ;;  %v1295_v46 = vsel %vm594_vm6, %v1288_v18, %v1290_v26  ;;  %v1313_v52 = vand.u32 %v1292_v29, %v3523_v45  ;;  %v3269_v19 = vld [vmem:[%s4121_s1 + $0x40] sm:$0xff]   ;;  %v3271_v26 = vld [vmem:[%s4121_s1 + $0x50] sm:$0xff]  }
  0xb0   :  { %981 = vmatprep.subr.bf16.mxu1 %v956_v60  ;;  %v1310_v42 = vand.u32 %v1296_v34, %v3523_v45  ;;  %v1307_v48 = vand.u32 %v1295_v46, %v3523_v45  ;;  %v1484_v60 = vand.u32 %v3450_v30, %v3523_v45 }
  0xb2   :  { %3069 = vmatmul.mubr.msk.bf16.vlgmr.msra.gmra.mxu0 %vm104_vm3, %v3265_v61  ;;  %v1636_v43 = vpop.permute.xlu0 %1635  ;;  %v1638_v47 = vpop.permute.xlu1 %1637 }
  0xb3   :  { %3173 = vmatpush3.bf16.msra.mxu0 %v786_v62  ;;  %3174 = vmatprep.mubr.msk.bf16.mxu0 %vm3287_vm5, %v3286_v58  ;;  %v1644_v55 = vsel %vm99_vm2, %v1636_v43, %v1638_v47 }
  0xb4   :  { %1024 = vmatprep.subr.bf16.mxu0 %v962_v63  ;;  %v1654_v59 = vand.u32 %v1644_v55, %v3523_v45  ;;  %v3273_v55 = vld [vmem:[%s4121_s1 + $0x60] sm:$0xff]  }
  0xb6   :  { %3070 = vmatmul.mubr.msk.bf16.vlgmr.msra.gmra.mxu1 %vm104_vm3, %v3265_v61  ;;  %v1634_v50 = vpop.permute.xlu0 %1633  ;;  %v1640_v54 = vpop.permute.xlu1 %1639 }
  0xb7   :  { %982 = vmatpush1.bf16.msra.mxu1 %v953_v4  ;;  %999 = vmatprep.mubr.bf16.mxu1 %v3282_v10  ;;  %v1643_v25 = vsel %vm99_vm2, %v1634_v50, %v1636_v43  ;;  %v1645_v63 = vsel %vm99_vm2, %v1638_v47, %v1640_v54  ;;  %v2849_v47 = vld [vmem:[%s4122_s2 + $0x8] sm:$0xff] }
  0xb8   :  { %3178 = vmatprep.subr.bf16.mxu1 %v3286_v58  ;;  %v1651_v15 = vand.u32 %v1643_v25, %v3523_v45  ;;  %v1657_v4 = vand.u32 %v1645_v63, %v3523_v45  ;;  %2857 = vperm.xlu1 %3252, %v2849_v47  }
  0xba   :  { %3175 = vmatmul.mubr.msk.bf16.vlgmr.msra.gmra.mxu0 %vm104_vm3, %v3265_v61  ;;  %v1642_v24 = vpop.permute.xlu0 %1641  ;;  %v1810_v56 = vpop.permute.xlu1 %1809 }
  0xbb   :  { %1025 = vmatpush1.bf16.msra.mxu0 %v959_v3  ;;  %1042 = vmatprep.mubr.bf16.mxu0 %v3282_v10  ;;  %v1646_v27 = vsel %vm99_vm2, %v1640_v54, %v1642_v24  ;;  %v1663_v7 = vand.u32 %v1642_v24, %v3523_v45 }
  0xbc   :  { %1155 = vmatprep.subr.bf16.mxu0 %v1130_v8  ;;  %v1660_v16 = vand.u32 %v1646_v27, %v3523_v45 }
  0xbe   :  { %3073 = vmatmul.mubr.msk.bf16.vlgmr.msra.gmra.mxu1 %vm104_vm3, %v3266_v12  ;;  %v1812_v57 = vpop.permute.xlu0 %1811  ;;  %v1808_v61 = vpop.permute.xlu1 %1807 }
  0xbf   :  { %3179 = vmatpush3.bf16.msra.mxu1 %v965_v14  ;;  %3180 = vmatprep.mubr.msk.bf16.mxu1 %vm3287_vm5, %v3286_v58  ;;  %v1818_v30 = vsel %vm419_vm4, %v1810_v56, %v1812_v57  ;;  %v1817_v3 = vsel %vm419_vm4, %v1808_v61, %v1810_v56  ;;  %v2182_v56 = vand.u32 %v3497_v40, %v3523_v45 }
  0xc0   :  { %1198 = vmatprep.subr.bf16.mxu1 %v1136_v17  ;;  %v1828_v5 = vand.u32 %v1818_v30, %v3523_v45  ;;  %v1825_v14 = vand.u32 %v1817_v3, %v3523_v45 }
  0xc2   :  { %3074 = vmatmul.mubr.msk.bf16.vlgmr.msra.gmra.mxu0 %vm104_vm3, %v3266_v12  ;;  %v1814_v62 = vpop.permute.xlu0 %1813  ;;  %v1816_v0 = vpop.permute.xlu1 %1815 }
  0xc3   :  { %1156 = vmatpush1.bf16.msra.mxu0 %v1127_v22  ;;  %1173 = vmatprep.mubr.bf16.mxu0 %v3282_v10  ;;  %v1820_v20 = vsel %vm419_vm4, %v1814_v62, %v1816_v0  ;;  %v1819_v2 = vsel %vm419_vm4, %v1812_v57, %v1814_v62  ;;  %v1837_v29 = vand.u32 %v1816_v0, %v3523_v45 }
  0xc4   :  { %3184 = vmatprep.subr.bf16.mxu0 %v3286_v58  ;;  %v1834_v8 = vand.u32 %v1820_v20, %v3523_v45  ;;  %v1831_v22 = vand.u32 %v1819_v2, %v3523_v45 }
  0xc6   :  { %3181 = vmatmul.mubr.msk.bf16.vlgmr.msra.gmra.mxu1 %vm104_vm3, %v3266_v12  ;;  %v1984_v1 = vpop.permute.xlu0 %1983  ;;  %v1986_v11 = vpop.permute.xlu1 %1985 }
  0xc7   :  { %1199 = vmatpush1.bf16.msra.mxu1 %v1133_v31  ;;  %1216 = vmatprep.mubr.bf16.mxu1 %v3282_v10  ;;  %v1992_v17 = vsel %vm594_vm6, %v1984_v1, %v1986_v11 }
  0xc8   :  { %1329 = vmatprep.subr.bf16.mxu1 %v1304_v32  ;;  %v2002_v9 = vand.u32 %v1992_v17, %v3523_v45 }
  0xca   :  { %3077 = vmatmul.mubr.msk.bf16.vlgmr.msra.gmra.mxu0 %vm104_vm3, %v3267_v37  ;;  %v1982_v12 = vpop.permute.xlu0 %1981  ;;  %v1988_v18 = vpop.permute.xlu1 %1987 }
  0xcb   :  { %3185 = vmatpush3.bf16.msra.mxu0 %v1139_v38  ;;  %3186 = vmatprep.mubr.msk.bf16.mxu0 %vm3287_vm5, %v3286_v58  ;;  %v1991_v31 = vsel %vm594_vm6, %v1982_v12, %v1984_v1  ;;  %v1993_v38 = vsel %vm594_vm6, %v1986_v11, %v1988_v18 }
  0xcc   :  { %1372 = vmatprep.subr.bf16.mxu0 %v1310_v42  ;;  %v2005_v43 = vand.u32 %v1993_v38, %v3523_v45 }
  0xce   :  { %3078 = vmatmul.mubr.msk.bf16.vlgmr.msra.gmra.mxu1 %vm104_vm3, %v3267_v37  ;;  %v1990_v21 = vpop.permute.xlu0 %1989  ;;  %v2334_v34 = vpop.permute.xlu1 %2333 }
  0xcf   :  { %1330 = vmatpush1.bf16.msra.mxu1 %v1301_v44  ;;  %1347 = vmatprep.mubr.bf16.mxu1 %v3282_v10  ;;  %v1994_v23 = vsel %vm594_vm6, %v1988_v18, %v1990_v21  ;;  %v2173_v44 = vand.u32 %v3475_v33, %v3523_v45  ;;  %v2179_v33 = vand.u32 %v3495_v39, %v3523_v45 }
  0xd0   :  { %3190 = vmatprep.subr.bf16.mxu1 %v3286_v58  ;;  %v2008_v32 = vand.u32 %v1994_v23, %v3523_v45  ;;  %v2176_v39 = vand.u32 %v3484_v35, %v3523_v45  ;;  %v3276_v23 = vld [vmem:[%s4121_s1 + $0x78] sm:$0xff]  }
  0xd2   :  { %3187 = vmatmul.mubr.msk.bf16.vlgmr.msra.gmra.mxu0 %vm104_vm3, %v3267_v37  ;;  %v1999_v37 = vand.u32 %v1991_v31, %v3523_v45  ;;  %v2336_v42 = vpop.permute.xlu0 %2335  ;;  %v2332_v46 = vpop.permute.xlu1 %2331 }
  0xd3   :  { %1373 = vmatpush1.bf16.msra.mxu0 %v1307_v48  ;;  %1390 = vmatprep.mubr.bf16.mxu0 %v3282_v10  ;;  %v3272_v48 = vld [vmem:[%s4121_s1 + $0x58] sm:$0xff]   ;;  %v2341_v35 = vsel %vm99_vm2, %v2332_v46, %v2334_v34 }
  0xd4   :  { %1500 = vmatprep.subr.bf16.mxu0 %v1475_v49  ;;  %v2011_v49 = vand.u32 %v1990_v21, %v3523_v45  ;;  %v2349_v27 = vand.u32 %v2341_v35, %v3523_v45 }
  0xd6   :  { %3081 = vmatmul.mubr.msk.bf16.vlgmr.msra.gmra.mxu1 %vm104_vm3, %v3268_v51  ;;  %v2338_v50 = vpop.permute.xlu0 %2337 }
  0xd7   :  { %3191 = vmatpush3.bf16.msra.mxu1 %v1313_v52  ;;  %3192 = vmatprep.mubr.msk.bf16.mxu1 %vm3287_vm5, %v3286_v58  ;;  %v2170_v52 = vand.u32 %v3486_v36, %v3523_v45 }
  0xd8   :  { %1543 = vmatprep.subr.bf16.mxu1 %v1481_v53  ;;  %v2342_v53 = vsel %vm99_vm2, %v2334_v34, %v2336_v42 }
  0xda   :  { %3082 = vmatmul.mubr.msk.bf16.vlgmr.msra.gmra.mxu0 %vm104_vm3, %v3268_v51  ;;  %v2508_v54 = vpop.permute.xlu0 %2507 }
  0xdb   :  { %1501 = vmatpush1.bf16.msra.mxu0 %v1472_v13  ;;  %1518 = vmatprep.mubr.bf16.mxu0 %v3282_v10  ;;  %v2352_v13 = vand.u32 %v2342_v53, %v3523_v45 }
  0xdc   :  { %3196 = vmatprep.subr.bf16.mxu0 %v3286_v58 }
  0xde   :  { %3193 = vmatmul.mubr.msk.bf16.vlgmr.msra.gmra.mxu1 %vm104_vm3, %v3268_v51  ;;  %v2340_v51 = vpop.permute.xlu1 %2339 }
  0xdf   :  { %1544 = vmatpush1.bf16.msra.mxu1 %v1478_v28  ;;  %1561 = vmatprep.mubr.bf16.mxu1 %v3282_v10  ;;  %v2344_v36 = vsel %vm99_vm2, %v2338_v50, %v2340_v51  ;;  %v2506_v28 = vpop.permute.xlu0 %2505  ;;  %v2361_v63 = vand.u32 %v2340_v51, %v3523_v45 }
  0xe0   :  { %1679 = vmatprep.subr.bf16.mxu1 %v1654_v59  ;;  %v2358_v57 = vand.u32 %v2344_v36, %v3523_v45  ;;  %v2515_v30 = vsel %vm419_vm4, %v2506_v28, %v2508_v54 }
  0xe2   :  { %3085 = vmatmul.mubr.msk.bf16.vlgmr.msra.gmra.mxu0 %vm104_vm3, %v3269_v19  ;;  %v2510_v24 = vpop.permute.xlu1 %2509 }
  0xe3   :  { %3197 = vmatpush3.bf16.msra.mxu0 %v1484_v60  ;;  %3198 = vmatprep.mubr.msk.bf16.mxu0 %vm3287_vm5, %v3286_v58  ;;  %v2516_v40 = vsel %vm419_vm4, %v2508_v54, %v2510_v24  ;;  %v2514_v60 = vpop.permute.xlu0 %2513 }
  0xe4   :  { %1722 = vmatprep.subr.bf16.mxu0 %v1660_v16  ;;  %v2526_v61 = vand.u32 %v2516_v40, %v3523_v45  ;;  %v2535_v2 = vand.u32 %v2514_v60, %v3523_v45 }
  0xe6   :  { %3086 = vmatmul.mubr.msk.bf16.vlgmr.msra.gmra.mxu1 %vm104_vm3, %v3269_v19  ;;  %v2512_v59 = vpop.permute.xlu1 %2511 }
  0xe7   :  { %1680 = vmatpush1.bf16.msra.mxu1 %v1651_v15  ;;  %1697 = vmatprep.mubr.bf16.mxu1 %v3282_v10  ;;  %v2518_v62 = vsel %vm419_vm4, %v2512_v59, %v2514_v60  ;;  %v3274_v15 = vld [vmem:[%s4121_s1 + $0x68] sm:$0xff]   ;;  %v2684_v1 = vpop.permute.xlu0 %2683  ;;  %v2517_v20 = vsel %vm419_vm4, %v2510_v24, %v2512_v59 }
  0xe8   :  { %3202 = vmatprep.subr.bf16.mxu1 %v3286_v58  ;;  %v2532_v0 = vand.u32 %v2518_v62, %v3523_v45 }
  0xea   :  { %3199 = vmatmul.mubr.msk.bf16.vlgmr.msra.gmra.mxu0 %vm104_vm3, %v3269_v19  ;;  %v2343_v19 = vsel %vm99_vm2, %v2336_v42, %v2338_v50  ;;  %v2682_v25 = vpop.permute.xlu1 %2681 }
  0xeb   :  { %1723 = vmatpush1.bf16.msra.mxu0 %v1657_v4  ;;  %1740 = vmatprep.mubr.bf16.mxu0 %v3282_v10  ;;  %v2355_v16 = vand.u32 %v2343_v19, %v3523_v45 }
  0xec   :  { %1853 = vmatprep.subr.bf16.mxu0 %v1828_v5  ;;  %v2523_v5 = vand.u32 %v2515_v30, %v3523_v45 }
  0xee   :  { %3089 = vmatmul.mubr.msk.bf16.vlgmr.msra.gmra.mxu1 %vm104_vm3, %v3270_v6  ;;  %v2680_v4 = vpop.permute.xlu1 %2679 }
  0xef   :  { %3203 = vmatpush3.bf16.msra.mxu1 %v1663_v7  ;;  %3204 = vmatprep.mubr.msk.bf16.mxu1 %vm3287_vm5, %v3286_v58  ;;  %v2686_v7 = vpop.permute.xlu0 %2685  ;;  %v2689_v17 = vsel %vm594_vm6, %v2680_v4, %v2682_v25 }
  0xf0   :  { %1896 = vmatprep.subr.bf16.mxu1 %v1834_v8  ;;  %v2529_v8 = vand.u32 %v2517_v20, %v3523_v45  ;;  %v2697_v21 = vand.u32 %v2689_v17, %v3523_v45 }
  0xf2   :  { %3090 = vmatmul.mubr.msk.bf16.vlgmr.msra.gmra.mxu0 %vm104_vm3, %v3270_v6  ;;  %v2688_v3 = vpop.permute.xlu1 %2687 }
  0xf3   :  { %1854 = vmatpush1.bf16.msra.mxu0 %v1825_v14  ;;  %1871 = vmatprep.mubr.bf16.mxu0 %v3282_v10  ;;  %v2692_v12 = vsel %vm594_vm6, %v2686_v7, %v2688_v3  ;;  %v3275_v14 = vld [vmem:[%s4121_s1 + $0x70] sm:$0xff]  }
  0xf4   :  { %3208 = vmatprep.subr.bf16.mxu0 %v3286_v58  ;;  %v2706_v18 = vand.u32 %v2692_v12, %v3523_v45 }
  0xf6   :  { %3205 = vmatmul.mubr.msk.bf16.vlgmr.msra.gmra.mxu1 %vm104_vm3, %v3270_v6  ;;  %v2690_v6 = vsel %vm594_vm6, %v2682_v25, %v2684_v1 }
  0xf7   :  { %1897 = vmatpush1.bf16.msra.mxu1 %v1831_v22  ;;  %1914 = vmatprep.mubr.bf16.mxu1 %v3282_v10  ;;  %v2700_v11 = vand.u32 %v2690_v6, %v3523_v45  ;;  %v2691_v22 = vsel %vm594_vm6, %v2684_v1, %v2686_v7 }
  0xf8   :  { %2027 = vmatprep.subr.bf16.mxu1 %v2002_v9  ;;  %v2703_v9 = vand.u32 %v2691_v22, %v3523_v45 }
  0xfa   :  { %3093 = vmatmul.mubr.msk.bf16.vlgmr.msra.gmra.mxu0 %vm104_vm3, %v3271_v26 }
  0xfb   :  { %3209 = vmatpush3.bf16.msra.mxu0 %v1837_v29  ;;  %3210 = vmatprep.mubr.msk.bf16.mxu0 %vm3287_vm5, %v3286_v58 }
  0xfc   :  { %2070 = vmatprep.subr.bf16.mxu0 %v2008_v32 }
  0xfe   :  { %3094 = vmatmul.mubr.msk.bf16.vlgmr.msra.gmra.mxu1 %vm104_vm3, %v3271_v26 }
  0xff   :  { %2028 = vmatpush1.bf16.msra.mxu1 %v1999_v37  ;;  %2045 = vmatprep.mubr.bf16.mxu1 %v3282_v10 }
 0x100   :  { %3214 = vmatprep.subr.bf16.mxu1 %v3286_v58 }
 0x102   :  { %3211 = vmatmul.mubr.msk.bf16.vlgmr.msra.gmra.mxu0 %vm104_vm3, %v3271_v26  ;;  %v2709_v26 = vand.u32 %v2688_v3, %v3523_v45 }
 0x103   :  { %2071 = vmatpush1.bf16.msra.mxu0 %v2005_v43  ;;  %2088 = vmatprep.mubr.bf16.mxu0 %v3282_v10 }
 0x104   :  { %2198 = vmatprep.subr.bf16.mxu0 %v2173_v44 }
 0x106   :  { %3097 = vmatmul.mubr.msk.bf16.vlgmr.msra.gmra.mxu1 %vm104_vm3, %v3272_v48 }
 0x107   :  { %3215 = vmatpush3.bf16.msra.mxu1 %v2011_v49  ;;  %3216 = vmatprep.mubr.msk.bf16.mxu1 %vm3287_vm5, %v3286_v58 }
 0x108   :  { %2241 = vmatprep.subr.bf16.mxu1 %v2179_v33 }
 0x10a   :  { %3098 = vmatmul.mubr.msk.bf16.vlgmr.msra.gmra.mxu0 %vm104_vm3, %v3272_v48 }
 0x10b   :  { %2199 = vmatpush1.bf16.msra.mxu0 %v2170_v52  ;;  %2216 = vmatprep.mubr.bf16.mxu0 %v3282_v10 }
 0x10c   :  { %3220 = vmatprep.subr.bf16.mxu0 %v3286_v58 }
 0x10e   :  { %3217 = vmatmul.mubr.msk.bf16.vlgmr.msra.gmra.mxu1 %vm104_vm3, %v3272_v48 }
 0x10f   :  { %2242 = vmatpush1.bf16.msra.mxu1 %v2176_v39  ;;  %2259 = vmatprep.mubr.bf16.mxu1 %v3282_v10 }
 0x110   :  { %2377 = vmatprep.subr.bf16.mxu1 %v2352_v13 }
 0x112   :  { %3101 = vmatmul.mubr.msk.bf16.vlgmr.msra.gmra.mxu0 %vm104_vm3, %v3273_v55 }
 0x113   :  { %3221 = vmatpush3.bf16.msra.mxu0 %v2182_v56  ;;  %3222 = vmatprep.mubr.msk.bf16.mxu0 %vm3287_vm5, %v3286_v58 }
 0x114   :  { %2420 = vmatprep.subr.bf16.mxu0 %v2358_v57 }
 0x116   :  { %3102 = vmatmul.mubr.msk.bf16.vlgmr.msra.gmra.mxu1 %vm104_vm3, %v3273_v55 }
 0x117   :  { %2378 = vmatpush1.bf16.msra.mxu1 %v2349_v27  ;;  %2395 = vmatprep.mubr.bf16.mxu1 %v3282_v10 }
 0x118   :  { %3226 = vmatprep.subr.bf16.mxu1 %v3286_v58 }
 0x11a   :  { %3223 = vmatmul.mubr.msk.bf16.vlgmr.msra.gmra.mxu0 %vm104_vm3, %v3273_v55 }
 0x11b   :  { %2421 = vmatpush1.bf16.msra.mxu0 %v2355_v16  ;;  %2438 = vmatprep.mubr.bf16.mxu0 %v3282_v10 }
 0x11c   :  { %2551 = vmatprep.subr.bf16.mxu0 %v2526_v61 }
 0x11e   :  { %3105 = vmatmul.mubr.msk.bf16.vlgmr.msra.gmra.mxu1 %vm104_vm3, %v3274_v15 }
 0x11f   :  { %3227 = vmatpush3.bf16.msra.mxu1 %v2361_v63  ;;  %3228 = vmatprep.mubr.msk.bf16.mxu1 %vm3287_vm5, %v3286_v58 }
 0x120   :  { %2594 = vmatprep.subr.bf16.mxu1 %v2532_v0 }
 0x122   :  { %3106 = vmatmul.mubr.msk.bf16.vlgmr.msra.gmra.mxu0 %vm104_vm3, %v3274_v15 }
 0x123   :  { %2552 = vmatpush1.bf16.msra.mxu0 %v2523_v5  ;;  %2569 = vmatprep.mubr.bf16.mxu0 %v3282_v10 }
 0x124   :  { %3232 = vmatprep.subr.bf16.mxu0 %v3286_v58 }
 0x126   :  { %3229 = vmatmul.mubr.msk.bf16.vlgmr.msra.gmra.mxu1 %vm104_vm3, %v3274_v15 }
 0x127   :  { %2595 = vmatpush1.bf16.msra.mxu1 %v2529_v8  ;;  %2612 = vmatprep.mubr.bf16.mxu1 %v3282_v10 }
 0x128   :  { %2725 = vmatprep.subr.bf16.mxu1 %v2700_v11 }
 0x12a   :  { %3109 = vmatmul.mubr.msk.bf16.vlgmr.msra.gmra.mxu0 %vm104_vm3, %v3275_v14 }
 0x12b   :  { %3233 = vmatpush3.bf16.msra.mxu0 %v2535_v2  ;;  %3234 = vmatprep.mubr.msk.bf16.mxu0 %vm3287_vm5, %v3286_v58 }
 0x12c   :  { %2768 = vmatprep.subr.bf16.mxu0 %v2706_v18 }
 0x12e   :  { %3110 = vmatmul.mubr.msk.bf16.vlgmr.msra.gmra.mxu1 %vm104_vm3, %v3275_v14 }
 0x12f   :  { %2726 = vmatpush1.bf16.msra.mxu1 %v2697_v21  ;;  %2743 = vmatprep.mubr.bf16.mxu1 %v3282_v10 }
 0x130   :  { %3238 = vmatprep.subr.bf16.mxu1 %v3286_v58 }
 0x132   :  { %3235 = vmatmul.mubr.msk.bf16.vlgmr.msra.gmra.mxu0 %vm104_vm3, %v3275_v14 }
 0x133   :  { %2769 = vmatpush1.bf16.msra.mxu0 %v2703_v9  ;;  %2786 = vmatprep.mubr.bf16.mxu0 %v3282_v10 }
 0x136   :  { %3113 = vmatmul.mubr.msk.bf16.vlgmr.msra.gmra.mxu1 %vm104_vm3, %v3276_v23 }
 0x137   :  { %3239 = vmatpush3.bf16.msra.mxu1 %v2709_v26  ;;  %3240 = vmatprep.mubr.msk.bf16.mxu1 %vm3287_vm5, %v3286_v58 }
 0x13a   :  { %3114 = vmatmul.mubr.msk.bf16.vlgmr.msra.gmra.mxu0 %vm104_vm3, %v3276_v23 }
 0x13e   :  { %3241 = vmatmul.mubr.msk.bf16.vlgmr.msra.gmra.mxu1 %vm104_vm3, %v3276_v23 }
 0x142   :  { %v161_v29 = vpop.f32.mrf.mxu0 }
 0x144   :  { %v163_v31 = vpop.f32.mrf.mxu0 }
 0x146   :  { %v165_v32 = vpop.f32.mrf.mxu0  ;;  %v204_v34 = vpop.f32.mrf.mxu1 }
 0x148   :  { %v167_v37 = vpop.f32.mrf.mxu0  ;;  %v206_v38 = vpop.f32.mrf.mxu1 }
 0x14a   :  { %v208_v45 = vpop.f32.mrf.mxu1  ;;  %v247_v41 = vpop.f32.mrf.mxu0 }
 0x14c   :  { %v210_v42 = vpop.f32.mrf.mxu1  ;;  %v3152_v10 = vpop.f32.mrf.mxu0 }
 0x14e   :  { %v250_v43 = vpop.f32.mrf.mxu0  ;;  %v311_v44 = vpop.f32.mrf.mxu1 }
 0x14f   :  { %v312_v46 = vadd.f32 %v311_v44, %v161_v29 }
 0x150   :  { %v3153_v47 = vpop.f32.mrf.mxu0  ;;  %v313_v48 = vpop.f32.mrf.mxu1 }
 0x151   :  { %v314_v58 = vadd.f32 %v313_v48, %v163_v31 }
 0x152   :  { %v315_v49 = vpop.f32.mrf.mxu1  ;;  %v354_v33 = vpop.f32.mrf.mxu0 }
 0x153   :  { %v316_v50 = vadd.f32 %v315_v49, %v165_v32  ;;  %v355_v51 = vadd.f32 %v354_v33, %v204_v34 }
 0x154   :  { %v317_v52 = vpop.f32.mrf.mxu1  ;;  %v356_v53 = vpop.f32.mrf.mxu0 }
 0x155   :  { %v318_v54 = vadd.f32 %v317_v52, %v167_v37  ;;  %v357_v24 = vadd.f32 %v356_v53, %v206_v38 }
 0x156   :  { %v358_v39 = vpop.f32.mrf.mxu0  ;;  %v397_v13 = vpop.f32.mrf.mxu1 }
 0x157   :  { %v359_v36 = vadd.f32 %v358_v39, %v208_v45  ;;  %v398_v55 = vadd.f32 %v397_v13, %v247_v41 }
 0x158   :  { %v360_v56 = vpop.f32.mrf.mxu0  ;;  %v3158_v35 = vpop.f32.mrf.mxu1 }
 0x159   :  { %v361_v57 = vadd.f32 %v360_v56, %v210_v42 }
 0x15a   :  { %v400_v28 = vpop.f32.mrf.mxu1  ;;  %v476_v59 = vpop.f32.mrf.mxu0 }
 0x15b   :  { %v401_v27 = vadd.f32 %v400_v28, %v250_v43  ;;  %v569_v19 = vadd.f32 %v476_v59, %v312_v46 }
 0x15c   :  { %v3159_v40 = vpop.f32.mrf.mxu1  ;;  %v478_v60 = vpop.f32.mrf.mxu0 }
 0x15d   :  { %v570_v25 = vadd.f32 %v478_v60, %v314_v58 }
 0x15e   :  { %v480_v16 = vpop.f32.mrf.mxu0  ;;  %v519_v61 = vpop.f32.mrf.mxu1 }
 0x15f   :  { %v574_v62 = vadd.f32 %v480_v16, %v316_v50  ;;  %v571_v15 = vadd.f32 %v519_v61, %v355_v51 }
 0x160   :  { %v482_v63 = vpop.f32.mrf.mxu0  ;;  %v521_v30 = vpop.f32.mrf.mxu1 }
 0x161   :  { %v575_v0 = vadd.f32 %v482_v63, %v318_v54  ;;  %v572_v1 = vadd.f32 %v521_v30, %v357_v24 }
 0x162   :  { %v523_v4 = vpop.f32.mrf.mxu1  ;;  %v562_v5 = vpop.f32.mrf.mxu0 }
 0x163   :  { %v576_v20 = vadd.f32 %v523_v4, %v359_v36  ;;  %v573_v6 = vadd.f32 %v562_v5, %v398_v55 }
 0x164   :  { %v525_v7 = vpop.f32.mrf.mxu1  ;;  %v3164_v3 = vpop.f32.mrf.mxu0 }
 0x165   :  { %v577_v8 = vadd.f32 %v525_v7, %v361_v57 }
 0x166   :  { %v565_v11 = vpop.f32.mrf.mxu0  ;;  %v651_v12 = vpop.f32.mrf.mxu1 }
 0x167   :  { %v578_v14 = vadd.f32 %v565_v11, %v401_v27  ;;  %v744_v2 = vadd.f32 %v651_v12, %v569_v19 }
 0x168   :  { %v3165_v17 = vpop.f32.mrf.mxu0  ;;  %v653_v18 = vpop.f32.mrf.mxu1 }
 0x169   :  { %v745_v21 = vadd.f32 %v653_v18, %v570_v25 }
 0x16a   :  { %v655_v22 = vpop.f32.mrf.mxu1  ;;  %v694_v9 = vpop.f32.mrf.mxu0 }
 0x16b   :  { %v749_v23 = vadd.f32 %v655_v22, %v574_v62  ;;  %v746_v26 = vadd.f32 %v694_v9, %v571_v15 }
 0x16c   :  { %v657_v29 = vpop.f32.mrf.mxu1  ;;  %v696_v31 = vpop.f32.mrf.mxu0 }
 0x16d   :  { %v750_v32 = vadd.f32 %v657_v29, %v575_v0  ;;  %v747_v34 = vadd.f32 %v696_v31, %v572_v1 }
 0x16e   :  { %v698_v37 = vpop.f32.mrf.mxu0  ;;  %v737_v38 = vpop.f32.mrf.mxu1 }
 0x16f   :  { %v751_v45 = vadd.f32 %v698_v37, %v576_v20  ;;  %v748_v41 = vadd.f32 %v737_v38, %v573_v6 }
 0x170   :  { %v700_v42 = vpop.f32.mrf.mxu0  ;;  %v3170_v10 = vpop.f32.mrf.mxu1 }
 0x171   :  { %v752_v43 = vadd.f32 %v700_v42, %v577_v8 }
 0x172   :  { %v740_v44 = vpop.f32.mrf.mxu1  ;;  %v822_v46 = vpop.f32.mrf.mxu0 }
 0x173   :  { %v753_v47 = vadd.f32 %v740_v44, %v578_v14  ;;  %v915_v48 = vadd.f32 %v822_v46, %v744_v2 }
 0x174   :  { %v3171_v58 = vpop.f32.mrf.mxu1  ;;  %v824_v49 = vpop.f32.mrf.mxu0 }
 0x175   :  { %v916_v33 = vadd.f32 %v824_v49, %v745_v21 }
 0x176   :  { %v826_v50 = vpop.f32.mrf.mxu0  ;;  %v865_v51 = vpop.f32.mrf.mxu1 }
 0x177   :  { %v920_v52 = vadd.f32 %v826_v50, %v749_v23  ;;  %v917_v53 = vadd.f32 %v865_v51, %v746_v26 }
 0x178   :  { %v828_v54 = vpop.f32.mrf.mxu0  ;;  %v867_v24 = vpop.f32.mrf.mxu1 }
 0x179   :  { %v921_v39 = vadd.f32 %v828_v54, %v750_v32  ;;  %v918_v13 = vadd.f32 %v867_v24, %v747_v34 }
 0x17a   :  { %v869_v36 = vpop.f32.mrf.mxu1  ;;  %v908_v55 = vpop.f32.mrf.mxu0 }
 0x17b   :  { %v922_v56 = vadd.f32 %v869_v36, %v751_v45  ;;  %v919_v35 = vadd.f32 %v908_v55, %v748_v41 }
 0x17c   :  { %v871_v57 = vpop.f32.mrf.mxu1  ;;  %v3176_v28 = vpop.f32.mrf.mxu0 }
 0x17d   :  { %v923_v59 = vadd.f32 %v871_v57, %v752_v43 }
 0x17e   :  { %v911_v27 = vpop.f32.mrf.mxu0  ;;  %v1001_v19 = vpop.f32.mrf.mxu1 }
 0x17f   :  { %v924_v40 = vadd.f32 %v911_v27, %v753_v47  ;;  %v1094_v60 = vadd.f32 %v1001_v19, %v915_v48 }
 0x180   :  { %v3177_v25 = vpop.f32.mrf.mxu0  ;;  %v1003_v16 = vpop.f32.mrf.mxu1 }
 0x181   :  { %v1095_v61 = vadd.f32 %v1003_v16, %v916_v33 }
 0x182   :  { %v1005_v62 = vpop.f32.mrf.mxu1  ;;  %v1044_v15 = vpop.f32.mrf.mxu0 }
 0x183   :  { %v1099_v63 = vadd.f32 %v1005_v62, %v920_v52  ;;  %v1096_v30 = vadd.f32 %v1044_v15, %v917_v53 }
 0x184   :  { %v1007_v0 = vpop.f32.mrf.mxu1  ;;  %v1046_v1 = vpop.f32.mrf.mxu0 }
 0x185   :  { %v1100_v4 = vadd.f32 %v1007_v0, %v921_v39  ;;  %v1097_v5 = vadd.f32 %v1046_v1, %v918_v13 }
 0x186   :  { %v1048_v20 = vpop.f32.mrf.mxu0  ;;  %v1087_v6 = vpop.f32.mrf.mxu1 }
 0x187   :  { %v1101_v7 = vadd.f32 %v1048_v20, %v922_v56  ;;  %v1098_v3 = vadd.f32 %v1087_v6, %v919_v35 }
 0x188   :  { %v1050_v8 = vpop.f32.mrf.mxu0  ;;  %v3182_v11 = vpop.f32.mrf.mxu1 }
 0x189   :  { %v1102_v12 = vadd.f32 %v1050_v8, %v923_v59 }
 0x18a   :  { %v1090_v14 = vpop.f32.mrf.mxu1  ;;  %v1175_v2 = vpop.f32.mrf.mxu0 }
 0x18b   :  { %v1103_v17 = vadd.f32 %v1090_v14, %v924_v40  ;;  %v1268_v18 = vadd.f32 %v1175_v2, %v1094_v60 }
 0x18c   :  { %v3183_v21 = vpop.f32.mrf.mxu1  ;;  %v1177_v22 = vpop.f32.mrf.mxu0 }
 0x18d   :  { %v1269_v9 = vadd.f32 %v1177_v22, %v1095_v61 }
 0x18e   :  { %v1179_v23 = vpop.f32.mrf.mxu0  ;;  %v1218_v26 = vpop.f32.mrf.mxu1 }
 0x18f   :  { %v1273_v29 = vadd.f32 %v1179_v23, %v1099_v63  ;;  %v1270_v31 = vadd.f32 %v1218_v26, %v1096_v30 }
 0x190   :  { %v1181_v32 = vpop.f32.mrf.mxu0  ;;  %v1220_v34 = vpop.f32.mrf.mxu1 }
 0x191   :  { %v1274_v37 = vadd.f32 %v1181_v32, %v1100_v4  ;;  %v1271_v38 = vadd.f32 %v1220_v34, %v1097_v5 }
 0x192   :  { %v1222_v45 = vpop.f32.mrf.mxu1  ;;  %v1261_v41 = vpop.f32.mrf.mxu0 }
 0x193   :  { %v1275_v42 = vadd.f32 %v1222_v45, %v1101_v7  ;;  %v1272_v10 = vadd.f32 %v1261_v41, %v1098_v3 }
 0x194   :  { %v1224_v43 = vpop.f32.mrf.mxu1  ;;  %v3188_v44 = vpop.f32.mrf.mxu0 }
 0x195   :  { %v1276_v46 = vadd.f32 %v1224_v43, %v1102_v12 }
 0x196   :  { %v1264_v47 = vpop.f32.mrf.mxu0  ;;  %v1349_v48 = vpop.f32.mrf.mxu1 }
 0x197   :  { %v1277_v58 = vadd.f32 %v1264_v47, %v1103_v17  ;;  %v1442_v49 = vadd.f32 %v1349_v48, %v1268_v18 }
 0x198   :  { %v3189_v33 = vpop.f32.mrf.mxu0  ;;  %v1351_v50 = vpop.f32.mrf.mxu1 }
 0x199   :  { %v1443_v51 = vadd.f32 %v1351_v50, %v1269_v9 }
 0x19a   :  { %v1353_v52 = vpop.f32.mrf.mxu1  ;;  %v1392_v53 = vpop.f32.mrf.mxu0 }
 0x19b   :  { %v1447_v54 = vadd.f32 %v1353_v52, %v1273_v29  ;;  %v1444_v24 = vadd.f32 %v1392_v53, %v1270_v31 }
 0x19c   :  { %v1355_v39 = vpop.f32.mrf.mxu1  ;;  %v1394_v13 = vpop.f32.mrf.mxu0 }
 0x19d   :  { %v1448_v36 = vadd.f32 %v1355_v39, %v1274_v37  ;;  %v1445_v55 = vadd.f32 %v1394_v13, %v1271_v38 }
 0x19e   :  { %v1396_v56 = vpop.f32.mrf.mxu0  ;;  %v1435_v35 = vpop.f32.mrf.mxu1 }
 0x19f   :  { %v1449_v57 = vadd.f32 %v1396_v56, %v1275_v42  ;;  %v1446_v28 = vadd.f32 %v1435_v35, %v1272_v10 }
 0x1a0   :  { %v1398_v59 = vpop.f32.mrf.mxu0  ;;  %v3194_v27 = vpop.f32.mrf.mxu1 }
 0x1a1   :  { %v1450_v19 = vadd.f32 %v1398_v59, %v1276_v46 }
 0x1a2   :  { %v1438_v40 = vpop.f32.mrf.mxu1  ;;  %v1520_v60 = vpop.f32.mrf.mxu0 }
 0x1a3   :  { %v1451_v25 = vadd.f32 %v1438_v40, %v1277_v58  ;;  %v1613_v16 = vadd.f32 %v1520_v60, %v1442_v49 }
 0x1a4   :  { %v3195_v61 = vpop.f32.mrf.mxu1  ;;  %v1522_v62 = vpop.f32.mrf.mxu0 }
 0x1a5   :  { %v3853_v15 = vadd.f32 %v1522_v62, %v1443_v51 }
 0x1a6   :  { %v1524_v63 = vpop.f32.mrf.mxu0  ;;  %v1563_v30 = vpop.f32.mrf.mxu1 }
 0x1a7   :  { %v3855_v0 = vadd.f32 %v1524_v63, %v1447_v54  ;;  %v3857_v1 = vadd.f32 %v1563_v30, %v1444_v24 }
 0x1a8   :  { %v1526_v4 = vpop.f32.mrf.mxu0  ;;  %v1565_v5 = vpop.f32.mrf.mxu1 }
 0x1a9   :  { %v3859_v20 = vadd.f32 %v1526_v4, %v1448_v36  ;;  %v3861_v6 = vadd.f32 %v1565_v5, %v1445_v55 }
 0x1aa   :  { %v1567_v7 = vpop.f32.mrf.mxu1  ;;  %v1606_v3 = vpop.f32.mrf.mxu0 }
 0x1ab   :  { %v3863_v8 = vadd.f32 %v1567_v7, %v1449_v57  ;;  %v3865_v11 = vadd.f32 %v1606_v3, %v1446_v28 }
 0x1ac   :  { %v1569_v12 = vpop.f32.mrf.mxu1  ;;  %v3200_v14 = vpop.f32.mrf.mxu0 }
 0x1ad   :  { %v3867_v2 = vadd.f32 %v1569_v12, %v1450_v19  ;;  %v2872_v12 = vlaneseq }
 0x1ae   :  { %v1609_v17 = vpop.f32.mrf.mxu0  ;;  %v1699_v18 = vpop.f32.mrf.mxu1 }
 0x1af   :  { %v3869_v21 = vadd.f32 %v1609_v17, %v1451_v25  ;;  %v3871_v22 = vadd.f32 %v1699_v18, %v1613_v16 }
 0x1b0   :  { %v3201_v9 = vpop.f32.mrf.mxu0  ;;  %v3873_v23 = vpop.f32.mrf.mxu1 }
 0x1b2   :  { %v3875_v26 = vpop.f32.mrf.mxu1  ;;  %v3877_v29 = vpop.f32.mrf.mxu0 }
 0x1b4   :  { %v3879_v31 = vpop.f32.mrf.mxu1  ;;  %v3881_v32 = vpop.f32.mrf.mxu0 }
 0x1b6   :  { %v3883_v34 = vpop.f32.mrf.mxu0  ;;  %v3885_v37 = vpop.f32.mrf.mxu1 }
 0x1b8   :  { %v3887_v38 = vpop.f32.mrf.mxu0  ;;  %v3206_v45 = vpop.f32.mrf.mxu1 }
 0x1b9   :  { %v2873_v45 = vshrl.u32 %v2872_v12, 7 }
 0x1ba   :  { %v3889_v41 = vpop.f32.mrf.mxu1  ;;  %v3891_v42 = vpop.f32.mrf.mxu0 }
 0x1bc   :  { %v3207_v10 = vpop.f32.mrf.mxu1  ;;  %v3893_v43 = vpop.f32.mrf.mxu0 }
 0x1be   :  { %v3895_v44 = vpop.f32.mrf.mxu0  ;;  %v3897_v46 = vpop.f32.mrf.mxu1 }
 0x1c0   :  { %v3899_v47 = vpop.f32.mrf.mxu0  ;;  %v3901_v48 = vpop.f32.mrf.mxu1 }
 0x1c2   :  { %v3903_v58 = vpop.f32.mrf.mxu1  ;;  %v3905_v49 = vpop.f32.mrf.mxu0 }
 0x1c4   :  { %v3907_v33 = vpop.f32.mrf.mxu1  ;;  %v3212_v50 = vpop.f32.mrf.mxu0 }
 0x1c6   :  { %v3909_v51 = vpop.f32.mrf.mxu0  ;;  %v3911_v52 = vpop.f32.mrf.mxu1 }
 0x1c8   :  { %v3213_v53 = vpop.f32.mrf.mxu0  ;;  %v3913_v54 = vpop.f32.mrf.mxu1 }
 0x1ca   :  { %v3915_v24 = vpop.f32.mrf.mxu1  ;;  %v3917_v39 = vpop.f32.mrf.mxu0 }
 0x1cc   :  { %v3919_v13 = vpop.f32.mrf.mxu1  ;;  %v3921_v36 = vpop.f32.mrf.mxu0 }
 0x1ce   :  { %v3923_v55 = vpop.f32.mrf.mxu0  ;;  %v3925_v56 = vpop.f32.mrf.mxu1 }
 0x1d0   :  { %v3927_v35 = vpop.f32.mrf.mxu0  ;;  %v3218_v57 = vpop.f32.mrf.mxu1 }
 0x1d2   :  { %v3929_v28 = vpop.f32.mrf.mxu1  ;;  %v2218_v59 = vpop.f32.mrf.mxu0 }
 0x1d4   :  { %v3219_v27 = vpop.f32.mrf.mxu1  ;;  %v3931_v19 = vpop.f32.mrf.mxu0 }
 0x1d5   :  { %v2874_v27 = vsub.s32 0, %v2873_v45 }
 0x1d6   :  { %v3933_v40 = vpop.f32.mrf.mxu0  ;;  %v3935_v60 = vpop.f32.mrf.mxu1 }
 0x1d8   :  { %v3937_v25 = vpop.f32.mrf.mxu0  ;;  %v3939_v16 = vpop.f32.mrf.mxu1 }
 0x1d9   :  { %4128 = vst [vmem:[#allocation2_spill] sm:$0xff] %v3939_v16 }
 0x1da   :  { %v3941_v61 = vpop.f32.mrf.mxu1  ;;  %v3943_v62 = vpop.f32.mrf.mxu0 }
 0x1db   :  { %4129 = vst [vmem:[#allocation3_spill] sm:$0xff] %v3941_v61  ;;  %4130 = vst [vmem:[#allocation4_spill] sm:$0xff] %v3943_v62 }
 0x1dc   :  { %v3945_v63 = vpop.f32.mrf.mxu1  ;;  %v3224_v30 = vpop.f32.mrf.mxu0 }
 0x1dd   :  { %4131 = vst [vmem:[#allocation5_spill] sm:$0xff] %v3945_v63  ;;  %v2878_v30 = vsub.s32 1, %v2873_v45  ;;  %v2886_v63 = vsub.s32 3, %v2873_v45 }
 0x1de   :  { %v3947_v4 = vpop.f32.mrf.mxu0  ;;  %v2397_v5 = vpop.f32.mrf.mxu1 }
 0x1df   :  { %4132 = vst [vmem:[#allocation6_spill] sm:$0xff] %v3947_v4  ;;  %v2882_v4 = vsub.s32 2, %v2873_v45 }
 0x1e0   :  { %v3225_v7 = vpop.f32.mrf.mxu0  ;;  %v3949_v3 = vpop.f32.mrf.mxu1 }
 0x1e1   :  { %v2870_v7 = vld [vmem:[%s4123_s5] sm:$0x1f] }
 0x1e2   :  { %v3951_v14 = vpop.f32.mrf.mxu1  ;;  %v3953_v17 = vpop.f32.mrf.mxu0  ;;  %v3978_v16 = vrot.slane %v2870_v7, %v2882_v4 }
 0x1e3   :  { %4133 = vst [vmem:[#allocation7_spill] sm:$0xff] %v3953_v17  ;;  %v3980_v17 = vrot.slane %v2870_v7, %v2886_v63  ;;  %v4020_v63 = vpop.permute.xlu0 %2852 }
 0x1e4   :  { %v3955_v18 = vpop.f32.mrf.mxu1  ;;  %v3957_v9 = vpop.f32.mrf.mxu0 }
 0x1e5   :  { %4134 = vst [vmem:[#allocation8_spill] sm:$0xff] %v3955_v18  ;;  %4135 = vst [vmem:[#allocation9_spill] sm:$0xff] %v3957_v9  ;;  %v2890_v9 = vsub.s32 4, %v2873_v45  ;;  %v1794_v45 = vadd.f32 %v3877_v29, %v3857_v1  ;;  %v1796_v1 = vadd.f32 %v3885_v37, %v3865_v11 }
 0x1e6   :  { %v3959_v10 = vpop.f32.mrf.mxu0  ;;  %v3961_v50 = vpop.f32.mrf.mxu1 }
 0x1e7   :  { %4136 = vst [vmem:[#allocation10_spill] sm:$0xff] %v3959_v10  ;;  %4137 = vst [vmem:[#allocation11_spill] sm:$0xff] %v3961_v50  ;;  %v3970_v10 = vrot.slane %v2870_v7, %v2874_v27  ;;  %v3972_v50 = vrot.slane %v2870_v7, %v2878_v30  ;;  %v1798_v27 = vadd.f32 %v3879_v31, %v3859_v20 }
 0x1e8   :  { %v3963_v53 = vpop.f32.mrf.mxu0  ;;  %v3230_v57 = vpop.f32.mrf.mxu1  ;;  %v1800_v20 = vadd.f32 %v3887_v38, %v3867_v2  ;;  %v1970_v2 = vadd.f32 %v3905_v49, %v1796_v1  ;;  %v4146_v1 = vld [vmem:[#allocation5_spill] sm:$0xff] }
 0x1e9   :  { %4138 = vst [vmem:[#allocation12_spill] sm:$0xff] %v3963_v53  ;;  %4140 = vst [vmem:[#allocation14_spill] sm:$0xff] %v3972_v50  ;;  %v1793_v57 = vadd.f32 %v3873_v23, %v3853_v15  ;;  %v1966_v53 = vadd.f32 %v3891_v42, %v3871_v22  ;;  %v3988_v50 = vrot.slane %v2870_v7, %v2890_v9  ;;  %v4143_v7 = vld [vmem:[#allocation3_spill] sm:$0xff] }
 0x1ea   :  { %v3968_v62 = vpop.f32.mrf.mxu1  ;;  %v2571_v18 = vpop.f32.mrf.mxu0  ;;  %v1795_v15 = vadd.f32 %v3881_v32, %v3861_v6  ;;  %v1799_v22 = vadd.f32 %v3883_v34, %v3863_v8  ;;  %v1968_v32 = vadd.f32 %v3897_v46, %v1794_v45  ;;  %v1972_v8 = vadd.f32 %v3899_v47, %v1798_v27  ;;  %v4144_v45 = vld [vmem:[#allocation4_spill] sm:$0xff] }
 0x1eb   :  { %4139 = vst [vmem:[#allocation13_spill] sm:$0xff] %v3968_v62  ;;  %v1797_v62 = vadd.f32 %v3875_v26, %v3855_v0  ;;  %v1967_v23 = vadd.f32 %v3893_v43, %v1793_v57  ;;  %v2140_v0 = vadd.f32 %v3911_v52, %v1966_v53  ;;  %v1801_v26 = vadd.f32 %v3889_v41, %v3869_v21 }
 0x1ec   :  { %v3231_v12 = vpop.f32.mrf.mxu1  ;;  %v2573_v61 = vpop.f32.mrf.mxu0  ;;  %v1969_v43 = vadd.f32 %v3901_v48, %v1795_v15  ;;  %v1973_v11 = vadd.f32 %v3903_v58, %v1799_v22  ;;  %v1974_v37 = vadd.f32 %v3907_v33, %v1800_v20  ;;  %v4145_v27 = vld [vmem:[#allocation8_spill] sm:$0xff]  ;;  %v4147_v20 = vld [vmem:[#allocation6_spill] sm:$0xff] }
 0x1ed   :  { %v1971_v29 = vadd.f32 %v3895_v44, %v1797_v62  ;;  %v2141_v34 = vadd.f32 %v3913_v54, %v1967_v23  ;;  %v2311_v42 = vadd.f32 %v2218_v59, %v2140_v0  ;;  %v2142_v44 = vadd.f32 %v3917_v39, %v1968_v32  ;;  %v2858_v0 = vpop.permute.xlu1 %2857 }
 0x1ee   :  { %v2575_v30 = vpop.f32.mrf.mxu0  ;;  %v2614_v12 = vpop.f32.mrf.mxu1  ;;  %v1975_v52 = vadd.f32 %v3909_v51, %v1801_v26  ;;  %v2146_v54 = vadd.f32 %v3919_v13, %v1972_v8  ;;  %v2143_v48 = vadd.f32 %v3921_v36, %v1969_v43  ;;  %v2147_v58 = vadd.f32 %v3923_v55, %v1973_v11  ;;  %v4149_v8 = vld [vmem:[#allocation10_spill] sm:$0xff] }
 0x1ef   :  { %v2145_v41 = vadd.f32 %v3915_v24, %v1971_v29  ;;  %v2312_v46 = vadd.f32 %v3931_v19, %v2141_v34  ;;  %v2490_v47 = vadd.f32 %v2397_v5, %v2311_v42  ;;  %v2313_v62 = vadd.f32 %v3935_v60, %v2142_v44  ;;  %v4148_v29 = vld [vmem:[#allocation9_spill] sm:$0xff] }
 0x1f0   :  { %v2577_v31 = vpop.f32.mrf.mxu0  ;;  %v2616_v6 = vpop.f32.mrf.mxu1  ;;  %v2144_v19 = vadd.f32 %v3925_v56, %v1970_v2  ;;  %v2148_v51 = vadd.f32 %v3927_v35, %v1974_v37  ;;  %v2149_v13 = vadd.f32 %v3929_v28, %v1975_v52  ;;  %v2317_v36 = vadd.f32 %v3937_v25, %v2146_v54  ;;  %v4150_v37 = vld [vmem:[#allocation11_spill] sm:$0xff]  ;;  %v4151_v44 = vld [vmem:[#allocation12_spill] sm:$0xff] }
 0x1f1   :  { %v2316_v33 = vadd.f32 %v3933_v40, %v2145_v41  ;;  %v2491_v24 = vadd.f32 %v3949_v3, %v2312_v46  ;;  %v2664_v39 = vadd.f32 %v2571_v18, %v2490_v47  ;;  %v4141_v40 = vld [vmem:[#allocation7_spill] sm:$0xff]  ;;  %v4142_v3 = vld [vmem:[#allocation2_spill] sm:$0xff]  ;;  %v2318_v57 = vadd.f32 %v4143_v7, %v2147_v58 }
 0x1f2   :  { %v2618_v21 = vpop.f32.mrf.mxu1  ;;  %v2657_v38 = vpop.f32.mrf.mxu0  ;;  %v2492_v9 = vadd.f32 %v4141_v40, %v2313_v62  ;;  %v2314_v18 = vadd.f32 %v4142_v3, %v2143_v48  ;;  %v2315_v56 = vadd.f32 %v4144_v45, %v2144_v19  ;;  %v2496_v35 = vadd.f32 %v4145_v27, %v2317_v36  ;;  %v4152_v58 = vld [vmem:[#allocation14_spill] sm:$0xff] }
 0x1f3   :  { %v2495_v5 = vadd.f32 %v3951_v14, %v2316_v33  ;;  %v2665_v60 = vadd.f32 %v2573_v61, %v2491_v24  ;;  %v2319_v61 = vadd.f32 %v4146_v1, %v2148_v51  ;;  %v2320_v26 = vadd.f32 %v4147_v20, %v2149_v13  ;;  %v4153_v24 = vld [vmem:[#allocation13_spill] sm:$0xff] }
 0x1f4   :  { %v2620_v49 = vpop.f32.mrf.mxu1  ;;  %v3236_v59 = vpop.f32.mrf.mxu0  ;;  %v2666_v25 = vadd.f32 %v2614_v12, %v2492_v9  ;;  %v2493_v32 = vadd.f32 %v4148_v29, %v2314_v18  ;;  %v2497_v34 = vadd.f32 %v4149_v8, %v2318_v57  ;;  %v2670_v11 = vadd.f32 %v2577_v31, %v2496_v35 }
 0x1f5   :  { %v2669_v22 = vadd.f32 %v2575_v30, %v2495_v5  ;;  %v2494_v41 = vadd.f32 %v4150_v37, %v2315_v56  ;;  %v2498_v46 = vadd.f32 %v4151_v44, %v2319_v61 }
 0x1f6   :  { %v2660_v55 = vpop.f32.mrf.mxu0  ;;  %v2745_v4 = vpop.f32.mrf.mxu1  ;;  %v2667_v47 = vadd.f32 %v2616_v6, %v2493_v32  ;;  %v2671_v19 = vadd.f32 %v2618_v21, %v2497_v34 }
 0x1f7   :  { %v2838_v53 = vadd.f32 %v2745_v4, %v2664_v39  ;;  %v2499_v39 = vadd.f32 %v4153_v24, %v2320_v26  ;;  %v2668_v51 = vadd.f32 %v2657_v38, %v2494_v41  ;;  %v2672_v6 = vadd.f32 %v2620_v49, %v2498_v46 }
 0x1f8   :  { %v3237_v15 = vpop.f32.mrf.mxu0  ;;  %v2747_v28 = vpop.f32.mrf.mxu1 }
 0x1f9   :  { %v4033_v23 = vadd.f32 %v4020_v63, %v2838_v53  ;;  %v2839_v14 = vadd.f32 %v2747_v28, %v2665_v60  ;;  %v2673_v60 = vadd.f32 %v2660_v55, %v2499_v39 }
 0x1fa   :  { %v2749_v42 = vpop.f32.mrf.mxu1  ;;  %v2788_v43 = vpop.f32.mrf.mxu0 }
 0x1fb   :  { %v4040_v2 = vadd.f32 %v4020_v63, %v2839_v14  ;;  %v2843_v30 = vadd.f32 %v2749_v42, %v2669_v22  ;;  %v2840_v12 = vadd.f32 %v2788_v43, %v2666_v25  ;;  %v2897_v52 = vmul.f32 %v3970_v10, %v4033_v23 }
 0x1fc   :  { %v2751_v54 = vpop.f32.mrf.mxu1  ;;  %v2790_v48 = vpop.f32.mrf.mxu0 }
 0x1fd   :  { %v2898_v59 = vmul.f32 %v4152_v58, %v4040_v2  ;;  %v2862_v31 = vadd.f32 %v4020_v63, %v2840_v12  ;;  %v2865_v33 = vadd.f32 %v2858_v0, %v2843_v30  ;;  %v2844_v62 = vadd.f32 %v2751_v54, %v2670_v11  ;;  %v2985_v11 = vld [vmem:[%s4124_s3 + $0x8] sm:$0xff] }
 0x1fe   :  { %v2841_v13 = vadd.f32 %v2790_v48, %v2667_v47  ;;  %v2792_v36 = vpop.f32.mrf.mxu0  ;;  %v2831_v4 = vpop.f32.mrf.mxu1 }
 0x1ff   :  { %v2907_v5 = vadd.f32 %v2898_v59, %v2897_v52  ;;  %v2899_v40 = vmul.f32 %v3978_v16, %v2862_v31  ;;  %v2866_v9 = vadd.f32 %v2858_v0, %v2844_v62  ;;  %v2845_v3 = vadd.f32 %v2792_v36, %v2671_v19 }
 0x200   :  { %v2863_v53 = vadd.f32 %v4020_v63, %v2841_v13  ;;  %v2842_v18 = vadd.f32 %v2831_v4, %v2668_v51  ;;  %v2794_v7 = vpop.f32.mrf.mxu0  ;;  %v3242_v57 = vpop.f32.mrf.mxu1  ;;  %v2902_v45 = vmul.f32 %v3970_v10, %v2865_v33 }
 0x201   :  { %v2903_v21 = vmul.f32 %v4152_v58, %v2866_v9  ;;  %v2846_v38 = vadd.f32 %v2794_v7, %v2672_v6  ;;  %v2908_v56 = vadd.f32 %v2907_v5, %v2899_v40  ;;  %v2867_v49 = vadd.f32 %v2858_v0, %v2845_v3 }
 0x202   :  { %v2900_v27 = vmul.f32 %v3980_v17, %v2863_v53  ;;  %v2864_v35 = vadd.f32 %v4020_v63, %v2842_v18  ;;  %v2834_v15 = vpop.f32.mrf.mxu1 }
 0x203   :  { %v2915_v28 = vadd.f32 %v2903_v21, %v2902_v45  ;;  %v2868_v55 = vadd.f32 %v2858_v0, %v2846_v38  ;;  %v2847_v22 = vadd.f32 %v2834_v15, %v2673_v60  ;;  %v2904_v25 = vmul.f32 %v3978_v16, %v2867_v49 }
 0x204   :  { %v3243_v14 = vpop.f32.mrf.mxu1  ;;  %v2901_v1 = vmul.f32 %v3988_v50, %v2864_v35  ;;  %v2909_v61 = vadd.f32 %v2908_v56, %v2900_v27 }
 0x205   :  { %v2905_v20 = vmul.f32 %v3980_v17, %v2868_v55  ;;  %v2869_v26 = vadd.f32 %v2858_v0, %v2847_v22  ;;  %v2916_v32 = vadd.f32 %v2915_v28, %v2904_v25  ;;  %v2984_v0 = vld [vmem:[%s4124_s3] sm:$0xff] }
 0x206   :  { %v2911_v29 = vsel %vm2910_vm7, %v2901_v1, 0.0 }
 0x207   :  { %v2912_v8 = vadd.f32 %v2911_v29, %v2909_v61  ;;  %v2906_v63 = vmul.f32 %v3988_v50, %v2869_v26  ;;  %v2917_v34 = vadd.f32 %v2916_v32, %v2905_v20 }
 0x209   :  { %2913 = vadd.xlane.f32.xlu1 %v2912_v8  ;;  %v2918_v42 = vsel %vm2910_vm7, %v2906_v63, 0.0 }
 0x20a   :  { %v2919_v43 = vadd.f32 %v2918_v42, %v2917_v34 }
 0x20c   :  { %2920 = vadd.xlane.f32.xlu0 %v2919_v43 }
 0x21a   :  { %2993 = vperm.xlu1 %3252, %v2985_v11  }
 0x222   :  { %2988 = vperm.xlu0 %3251, %v2984_v0  }
 0x292   :  { %v2914_v30 = vpop.xlane.xlu1 %2913 }
 0x293   :  { %v2922_v12 = vmul.f32 0.001953125, %v2914_v30 }
 0x295   :  { %v2924_v37 = vsub.f32 %v4033_v23, %v2922_v12  ;;  %v2925_v41 = vsub.f32 %v4040_v2, %v2922_v12  ;;  %v2921_v44 = vpop.xlane.xlu0 %2920  ;;  %v2926_v46 = vsub.f32 %v2862_v31, %v2922_v12  ;;  %v2927_v47 = vsub.f32 %v2863_v53, %v2922_v12 }
 0x296   :  { %v2923_v52 = vmul.f32 0.001953125, %v2921_v44  ;;  %v2928_v54 = vsub.f32 %v2864_v35, %v2922_v12  ;;  %v2994_v22 = vpop.permute.xlu1 %2993 }
 0x297   :  { %v2934_v48 = vmul.f32 %v2924_v37, %v2924_v37  ;;  %v2935_v59 = vmul.f32 %v2925_v41, %v2925_v41  ;;  %v2936_v62 = vmul.f32 %v2926_v46, %v2926_v46  ;;  %v2937_v13 = vmul.f32 %v2927_v47, %v2927_v47 }
 0x298   :  { %v2929_v24 = vsub.f32 %v2865_v33, %v2923_v52  ;;  %v2930_v39 = vsub.f32 %v2866_v9, %v2923_v52  ;;  %v2938_v19 = vmul.f32 %v2928_v54, %v2928_v54  ;;  %v2931_v51 = vsub.f32 %v2867_v49, %v2923_v52 }
 0x299   :  { %v2944_v36 = vmul.f32 %v2934_v48, %v3970_v10  ;;  %v2945_v4 = vmul.f32 %v2935_v59, %v4152_v58  ;;  %v2932_v23 = vsub.f32 %v2868_v55, %v2923_v52  ;;  %v2933_v6 = vsub.f32 %v2869_v26, %v2923_v52 }
 0x29a   :  { %v2939_v2 = vmul.f32 %v2929_v24, %v2929_v24  ;;  %v2946_v31 = vmul.f32 %v2936_v62, %v3978_v16  ;;  %v2940_v40 = vmul.f32 %v2930_v39, %v2930_v39  ;;  %v2941_v60 = vmul.f32 %v2931_v51, %v2931_v51 }
 0x29b   :  { %v2954_v5 = vadd.f32 %v2945_v4, %v2944_v36  ;;  %v2948_v53 = vmul.f32 %v2938_v19, %v3988_v50  ;;  %v2943_v3 = vmul.f32 %v2933_v6, %v2933_v6  ;;  %v2947_v9 = vmul.f32 %v2937_v13, %v3980_v17 }
 0x29c   :  { %v2949_v33 = vmul.f32 %v2939_v2, %v3970_v10  ;;  %v2942_v7 = vmul.f32 %v2932_v23, %v2932_v23  ;;  %v2950_v57 = vmul.f32 %v2940_v40, %v4152_v58  ;;  %v2951_v21 = vmul.f32 %v2941_v60, %v3978_v16  ;;  %v3006_v58 = vld [vmem:[%s4125_s4] sm:$0xff]  ;;  %v3007_v16 = vld [vmem:[%s4125_s4 + $0x8] sm:$0xff] }
 0x29d   :  { %v2955_v18 = vadd.f32 %v2954_v5, %v2946_v31  ;;  %v2957_v56 = vsel %vm2910_vm7, %v2948_v53, 0.0  ;;  %v2953_v27 = vmul.f32 %v2943_v3, %v3988_v50  ;;  %v2989_v50 = vpop.permute.xlu0 %2988 }
 0x29e   :  { %v2961_v38 = vadd.f32 %v2950_v57, %v2949_v33  ;;  %v2952_v35 = vmul.f32 %v2942_v7, %v3980_v17 }
 0x29f   :  { %v2956_v45 = vadd.f32 %v2955_v18, %v2947_v9  ;;  %v2964_v28 = vsel %vm2910_vm7, %v2953_v27, 0.0 }
 0x2a0   :  { %v2962_v15 = vadd.f32 %v2961_v38, %v2951_v21 }
 0x2a1   :  { %v2958_v49 = vadd.f32 %v2957_v56, %v2956_v45 }
 0x2a2   :  { %v2963_v10 = vadd.f32 %v2962_v15, %v2952_v35 }
 0x2a3   :  { %2959 = vadd.xlane.f32.xlu0 %v2958_v49 }
 0x2a4   :  { %v2965_v55 = vadd.f32 %v2964_v28, %v2963_v10 }
 0x2a6   :  { %2966 = vadd.xlane.f32.xlu1 %v2965_v55 }
 0x2b7   :  { %3010 = vperm.xlu1 %3252, %v3006_v58  }
 0x2b9   :  { %3015 = vperm.xlu0 %3251, %v3007_v16  }
 0x32c   :  { %v2960_v17 = vpop.xlane.xlu0 %2959 }
 0x32d   :  { %v2968_v25 = vmul.f32 0.001953125, %v2960_v17 }
 0x32f   :  { %v2970_v14 = vadd.f32 1e-05, %v2968_v25  ;;  %v2967_v1 = vpop.xlane.xlu1 %2966 }
 0x330   :  { %v2969_v61 = vmul.f32 0.001953125, %v2967_v1 }
 0x331   :  { %3277 = vrsqrt.f32 %v2970_v14 }
 0x332   :  { %v2971_v20 = vadd.f32 1e-05, %v2969_v61 }
 0x333   :  { %v3011_v62 = vpop.permute.xlu1 %3010 }
 0x334   :  { %3279 = vrsqrt.f32 %v2971_v20 }
 0x33e   :  { %v3278_v26 = vpop.eup %3277 }
 0x33f   :  { %v2974_v29 = vmul.f32 %v3278_v26, %v2924_v37  ;;  %v2975_v32 = vmul.f32 %v3278_v26, %v2925_v41  ;;  %v2976_v8 = vmul.f32 %v3278_v26, %v2926_v46  ;;  %v2977_v63 = vmul.f32 %v3278_v26, %v2927_v47 }
 0x340   :  { %v2978_v34 = vmul.f32 %v3278_v26, %v2928_v54  ;;  %v3016_v54 = vpop.permute.xlu0 %3015 }
 0x341   :  { %v2996_v42 = vmul.f32 %v2989_v50, %v2974_v29  ;;  %v2997_v43 = vmul.f32 %v2989_v50, %v2975_v32  ;;  %v2998_v11 = vmul.f32 %v2989_v50, %v2976_v8  ;;  %v3280_v0 = vpop.eup %3279  ;;  %v2999_v30 = vmul.f32 %v2989_v50, %v2977_v63 }
 0x342   :  { %v3000_v12 = vmul.f32 %v2989_v50, %v2978_v34  ;;  %v2979_v44 = vmul.f32 %v3280_v0, %v2929_v24  ;;  %v2980_v52 = vmul.f32 %v3280_v0, %v2930_v39  ;;  %v2981_v48 = vmul.f32 %v3280_v0, %v2931_v51 }
 0x343   :  { %v2982_v59 = vmul.f32 %v3280_v0, %v2932_v23  ;;  %v2983_v19 = vmul.f32 %v3280_v0, %v2933_v6  ;;  %v3018_v13 = vadd.f32 %v3011_v62, %v2996_v42  ;;  %v3019_v36 = vadd.f32 %v3011_v62, %v2997_v43 }
 0x344   :  { %v3020_v4 = vadd.f32 %v3011_v62, %v2998_v11  ;;  %v3001_v37 = vmul.f32 %v2994_v22, %v2979_v44  ;;  %v3002_v41 = vmul.f32 %v2994_v22, %v2980_v52  ;;  %v3003_v46 = vmul.f32 %v2994_v22, %v2981_v48 }
 0x345   :  { %v3004_v47 = vmul.f32 %v2994_v22, %v2982_v59  ;;  %v3005_v2 = vmul.f32 %v2994_v22, %v2983_v19  ;;  %v3021_v31 = vadd.f32 %v3011_v62, %v2999_v30  ;;  %v3022_v5 = vadd.f32 %v3011_v62, %v3000_v12 }
 0x346   :  { %v3028_v40 = vmax.f32 %v3018_v13, 0.0  ;;  %v3023_v60 = vadd.f32 %v3016_v54, %v3001_v37  ;;  %v3024_v53 = vadd.f32 %v3016_v54, %v3002_v41  ;;  %v3025_v24 = vadd.f32 %v3016_v54, %v3003_v46 }
 0x347   :  { %v3026_v39 = vadd.f32 %v3016_v54, %v3004_v47  ;;  %v3027_v51 = vadd.f32 %v3016_v54, %v3005_v2  ;;  %v3029_v23 = vmax.f32 %v3019_v36, 0.0  ;;  %v3030_v3 = vmax.f32 %v3020_v4, 0.0 }
 0x348   :  { %v3031_v6 = vmax.f32 %v3021_v31, 0.0  ;;  %3038 = vst [vmem:[%s4126_s6] sm:$0xff] %v3028_v40  ;;  %v3033_v33 = vmax.f32 %v3023_v60, 0.0  ;;  %v3034_v9 = vmax.f32 %v3024_v53, 0.0  ;;  %v3035_v18 = vmax.f32 %v3025_v24, 0.0 }
 0x349   :  { %v3036_v7 = vmax.f32 %v3026_v39, 0.0  ;;  %v3037_v57 = vmax.f32 %v3027_v51, 0.0  ;;  %v3032_v45 = vmax.f32 %v3022_v5, 0.0  ;;  %3039 = vst [vmem:[%s4126_s6 + $0x8] sm:$0xff] %v3029_v23  ;;  %3040 = vst [vmem:[%s4126_s6 + $0x10] sm:$0xff] %v3030_v3 }
 0x34a   :  { %3041 = vst [vmem:[%s4126_s6 + $0x18] sm:$0xff] %v3031_v6  ;;  %3043 = vst [vmem:[%s4126_s6 + $0x28] sm:$0xff] %v3033_v33 }
 0x34b   :  { %3044 = vst [vmem:[%s4126_s6 + $0x30] sm:$0xff] %v3034_v9  ;;  %3045 = vst [vmem:[%s4126_s6 + $0x38] sm:$0xff] %v3035_v18 }
 0x34c   :  { %3046 = vst [vmem:[%s4126_s6 + $0x40] sm:$0xff] %v3036_v7  ;;  %3047 = vst.msk [vmem:[%s4126_s6 + $0x48] sm:$0xff] %vm2910_vm7, %v3037_v57 }
 0x34d   :  { %3042 = vst.msk [vmem:[%s4126_s6 + $0x20] sm:$0xff] %vm2910_vm7, %v3032_v45 }

// kernel: _lambda_.8
= control target key start
LH: loop header
LB: loop body
LE: loop exit
PB: predicated region body
PF: predicated region fallthrough
CT: control target
= control target key end

     0   :  { %v1751_v3 = vmov 0   ;;  %s1752_s29 = smov 119   ;;  %s1753_s30 = smov 127   ;;  %vm126_vm0 = vcmask 130048   ;;  %vm122_vm1 = vcmask 1039360   ;;  %vm269_vm2 = vcmask 973824   ;;  %s2405_s0 = inlined_call_operand.vmem [shape: f32[4,16,178], index: 0, kind: input, shape index: {}]   ;;  %s2406_s1 = inlined_call_operand.vmem [shape: bf16[4,4,32,16], index: 1, kind: input, shape index: {}]   ;;  %s2407_s2 = inlined_call_operand.vmem [shape: f32[32,1], index: 2, kind: input, shape index: {}]   ;;  %s2408_s5 = inlined_call_operand.vmem [shape: f32[1,162], index: 5, kind: input, shape index: {}]   ;;  %s2409_s3 = inlined_call_operand.vmem [shape: f32[32,1], index: 3, kind: input, shape index: {}]   ;;  %s2410_s4 = inlined_call_operand.vmem [shape: f32[32,1], index: 4, kind: input, shape index: {}]   ;;  %s2411_s6 = inlined_call_operand.vmem [shape: f32[32,162], index: 6, kind: output, shape index: {}]  }
   0x1   :  { %v24_v0 = vld [vmem:[%s2405_s0] sm:$0xff]  ;;  %v26_v1 = vld [vmem:[%s2405_s0 + $0x10] sm:$0xff]  ;;  %v25_v2 = vld [vmem:[%s2405_s0 + $0x8] sm:$0xff]  ;;  %234 = vmatprep.mubr.bf16.mxu1 %v1751_v3  ;;  %165 = vmatprep.mubr.bf16.mxu0 %v1751_v3  ;;  %s1754_s17 = smov 118   ;;  %vm354_vm3 = vcmask 965632   ;;  %vm1476_vm4 = vcmask 277504  }
   0x2   :  { %v104_v4 = vpack.c.bf16 %v26_v1, %v24_v0  ;;  %v27_v5 = vld [vmem:[%s2405_s0 + $0x18] sm:$0xff]  ;;  %1709 = vset.pattern.permute.xlu0 %v1751_v3  ;;  %1710 = vset.pattern.permute.xlu1 %v1751_v3  ;;  %v29_v7 = vld [vmem:[%s2405_s0 + $0x28] sm:$0xff]  ;;  %v1711_v9 = vld [vmem:[%s2406_s1] sm:$0xff]  }
   0x3   :  { %v105_v6 = vpack.c.bf16 %v27_v5, %v25_v2  ;;  %v31_v8 = vld [vmem:[%s2405_s0 + $0x38] sm:$0xff]  ;;  %v28_v10 = vld [vmem:[%s2405_s0 + $0x20] sm:$0xff]  ;;  %v30_v11 = vld [vmem:[%s2405_s0 + $0x30] sm:$0xff] }
   0x4   :  { %265 = vrot.lane.b32.xlu1 %v104_v4, %s1752_s29  ;;  %118 = vrot.lane.b32.xlu0 %v104_v4, %s1753_s30  ;;  %v426_v12 = vpack.c.bf16 %v31_v8, %v29_v7  ;;  %v1829_v13 = vpack.c.bf16 %v30_v11, %v28_v10  ;;  %v1713_v14 = vld [vmem:[%s2406_s1 + $0x8] sm:$0xff]   ;;  %v35_v16 = vld [vmem:[%s2405_s0 + $0x58] sm:$0xff] }
   0x5   :  { %216 = vmatprep.subr.bf16.mxu1 %v105_v6  ;;  %v33_v15 = vld [vmem:[%s2405_s0 + $0x48] sm:$0xff]  ;;  %v32_v17 = vld [vmem:[%s2405_s0 + $0x40] sm:$0xff]  ;;  %v34_v18 = vld [vmem:[%s2405_s0 + $0x50] sm:$0xff] }
   0x6   :  { %217 = vmatpush1.bf16.msra.mxu1 %v104_v4  ;;  %v1857_v19 = vpack.c.bf16 %v35_v16, %v33_v15  ;;  %v1859_v20 = vpack.c.bf16 %v34_v18, %v32_v17  ;;  %v37_v21 = vld [vmem:[%s2405_s0 + $0x68] sm:$0xff]  ;;  %v39_v22 = vld [vmem:[%s2405_s0 + $0x78] sm:$0xff]  ;;  %v36_v23 = vld [vmem:[%s2405_s0 + $0x60] sm:$0xff] }
   0x7   :  { %v38_v24 = vld [vmem:[%s2405_s0 + $0x70] sm:$0xff]  ;;  %v1885_v25 = vpack.c.bf16 %v39_v22, %v37_v21  ;;  %v1424_v29 = vld [vmem:[%s2407_s2] sm:$0xff]  ;;  %v1425_v30 = vld [vmem:[%s2407_s2 + $0x8] sm:$0xff] }
   0x8   :  { %267 = vrot.lane.b32.xlu1 %v105_v6, %s1752_s29  ;;  %120 = vrot.lane.b32.xlu0 %v105_v6, %s1753_s30  ;;  %v1887_v26 = vpack.c.bf16 %v38_v24, %v36_v23  ;;  %v1712_v34 = vld [vmem:[%s2406_s1 + $0x10] sm:$0xff]   ;;  %v1714_v42 = vld [vmem:[%s2406_s1 + $0x18] sm:$0xff]  }
   0x9   :  { %1647 = vmatmul.mubr.msk.bf16.vlgmr.msra.gmra.mxu1 %vm126_vm0, %v1711_v9  ;;  %v1715_v39 = vld [vmem:[%s2406_s1 + $0x30] sm:$0xff]   ;;  %v1717_v45 = vld [vmem:[%s2406_s1 + $0x38] sm:$0xff]   ;;  %v1716_v48 = vld [vmem:[%s2406_s1 + $0x20] sm:$0xff]  }
   0xa   :  { %244 = vmatprep.mubr.bf16.mxu1 %v1751_v3  ;;  %v1719_v50 = vld [vmem:[%s2406_s1 + $0x50] sm:$0xff]   ;;  %v1718_v53 = vld [vmem:[%s2406_s1 + $0x28] sm:$0xff]   ;;  %v1721_v54 = vld [vmem:[%s2406_s1 + $0x58] sm:$0xff]  }
   0xb   :  { %v1720_v55 = vld [vmem:[%s2406_s1 + $0x40] sm:$0xff]   ;;  %v1723_v59 = vld [vmem:[%s2406_s1 + $0x70] sm:$0xff]   ;;  %v1722_v62 = vld [vmem:[%s2406_s1 + $0x48] sm:$0xff]  }
   0xc   :  { %352 = vrot.lane.b32.xlu1 %v105_v6, %s1754_s17  ;;  %350 = vrot.lane.b32.xlu0 %v104_v4, %s1754_s17  ;;  %v1725_v63 = vld [vmem:[%s2406_s1 + $0x78] sm:$0xff]   ;;  %v1724_v1 = vld [vmem:[%s2406_s1 + $0x60] sm:$0xff]  }
   0xd   :  { %v1727_v4 = vld [vmem:[%s2406_s1 + $0x90] sm:$0xff]   ;;  %v1726_v7 = vld [vmem:[%s2406_s1 + $0x68] sm:$0xff]   ;;  %v1729_v8 = vld [vmem:[%s2406_s1 + $0x98] sm:$0xff]  }
   0xe   :  { %v1728_v9 = vld [vmem:[%s2406_s1 + $0x80] sm:$0xff]   ;;  %v1427_v16 = vld [vmem:[%s2407_s2 + $0x18] sm:$0xff]  ;;  %v1730_v18 = vld [vmem:[%s2406_s1 + $0x88] sm:$0xff]  }
   0xf   :  { %v1732_v21 = vld [vmem:[%s2406_s1 + $0xa0] sm:$0xff]   ;;  %v1735_v23 = vld [vmem:[%s2406_s1 + $0xd0] sm:$0xff]  }
  0x10   :  { %518 = vrot.lane.b32.xlu1 %v426_v12, %s1753_s30  ;;  %516 = vrot.lane.b32.xlu0 %v1829_v13, %s1753_s30 }
  0x11   :  { %1648 = vmatmul.mubr.msk.bf16.gmra.mxu1 %vm126_vm0, %v1713_v14  ;;  %v1426_v14 = vld [vmem:[%s2407_s2 + $0x10] sm:$0xff] }
  0x12   :  { %396 = vmatprep.mubr.bf16.mxu1 %v1751_v3 }
  0x14   :  { %602 = vrot.lane.b32.xlu1 %v426_v12, %s1752_s29  ;;  %600 = vrot.lane.b32.xlu0 %v1829_v13, %s1752_s29 }
  0x18   :  { %686 = vrot.lane.b32.xlu1 %v426_v12, %s1754_s17  ;;  %684 = vrot.lane.b32.xlu0 %v1829_v13, %s1754_s17 }
  0x1c   :  { %851 = vrot.lane.b32.xlu1 %v1857_v19, %s1753_s30  ;;  %849 = vrot.lane.b32.xlu0 %v1859_v20, %s1753_s30 }
  0x20   :  { %935 = vrot.lane.b32.xlu1 %v1857_v19, %s1752_s29  ;;  %933 = vrot.lane.b32.xlu0 %v1859_v20, %s1752_s29 }
  0x24   :  { %1019 = vrot.lane.b32.xlu1 %v1857_v19, %s1754_s17  ;;  %1017 = vrot.lane.b32.xlu0 %v1859_v20, %s1754_s17 }
  0x28   :  { %1184 = vrot.lane.b32.xlu1 %v1885_v25, %s1753_s30  ;;  %1182 = vrot.lane.b32.xlu0 %v1887_v26, %s1753_s30 }
  0x2c   :  { %1268 = vrot.lane.b32.xlu1 %v1885_v25, %s1752_s29  ;;  %1266 = vrot.lane.b32.xlu0 %v1887_v26, %s1752_s29 }
  0x30   :  { %1352 = vrot.lane.b32.xlu1 %v1885_v25, %s1754_s17  ;;  %1350 = vrot.lane.b32.xlu0 %v1887_v26, %s1754_s17 }
  0x34   :  { %1430 = vperm.xlu0 %1709, %v1424_v29   ;;  %1435 = vperm.xlu1 %1710, %v1425_v30   ;;  %v1739_v29 = vld [vmem:[%s2406_s1 + $0xf0] sm:$0xff]   ;;  %v1738_v30 = vld [vmem:[%s2406_s1 + $0xc8] sm:$0xff]  }
  0x38   :  { %1440 = vperm.xlu1 %1710, %v1426_v14   ;;  %1445 = vperm.xlu0 %1709, %v1427_v16  }
  0x76   :  { %v266_v27 = vpop.permute.xlu1 %265  ;;  %v119_v28 = vpop.permute.xlu0 %118 }
  0x7a   :  { %v268_v31 = vpop.permute.xlu1 %267  ;;  %v121_v32 = vpop.permute.xlu0 %120 }
  0x7b   :  { %147 = vmatprep.subr.bf16.mxu0 %v121_v32  ;;  %v123_v33 = vsel %vm122_vm1, %v119_v28, %v121_v32  ;;  %v270_v35 = vsel %vm269_vm2, %v266_v27, %v268_v31  ;;  %v1736_v27 = vld [vmem:[%s2406_s1 + $0xc0] sm:$0xff]  }
  0x7c   :  { %148 = vmatpush1.bf16.msra.mxu0 %v123_v33  ;;  %v1740_v32 = vld [vmem:[%s2406_s1 + $0xe0] sm:$0xff]   ;;  %v1742_v33 = vld [vmem:[%s2406_s1 + $0xe8] sm:$0xff]  }
  0x7d   :  { %293 = vmatprep.subr.bf16.mxu0 %v268_v31  ;;  %v1741_v31 = vld [vmem:[%s2406_s1 + $0xf8] sm:$0xff]  }
  0x7e   :  { %v353_v36 = vpop.permute.xlu1 %352  ;;  %v351_v37 = vpop.permute.xlu0 %350 }
  0x7f   :  { %1643 = vmatmul.mubr.msk.bf16.vlgmr.msra.gmra.mxu0 %vm126_vm0, %v1712_v34  ;;  %v355_v38 = vsel %vm354_vm3, %v351_v37, %v353_v36  ;;  %378 = vmatprep.subr.bf16.mxu1 %v353_v36 }
  0x80   :  { %294 = vmatpush1.bf16.msra.mxu0 %v270_v35  ;;  %379 = vmatpush1.bf16.msra.mxu1 %v355_v38 }
  0x81   :  { %175 = vmatprep.mubr.bf16.mxu0 %v1751_v3  ;;  %457 = vmatprep.subr.bf16.mxu0 %v426_v12 }
  0x82   :  { %v519_v40 = vpop.permute.xlu1 %518  ;;  %v517_v41 = vpop.permute.xlu0 %516 }
  0x83   :  { %1655 = vmatmul.mubr.msk.bf16.vlgmr.msra.gmra.mxu1 %vm126_vm0, %v1715_v39  ;;  %v520_v43 = vsel %vm122_vm1, %v517_v41, %v519_v40  ;;  %543 = vmatprep.subr.bf16.mxu1 %v519_v40 }
  0x84   :  { %544 = vmatpush1.bf16.msra.mxu1 %v520_v43  ;;  %406 = vmatprep.mubr.bf16.mxu1 %v1751_v3 }
  0x86   :  { %v603_v44 = vpop.permute.xlu1 %602  ;;  %v601_v46 = vpop.permute.xlu0 %600 }
  0x87   :  { %1644 = vmatmul.mubr.msk.bf16.gmra.mxu0 %vm126_vm0, %v1714_v42  ;;  %v604_v57 = vsel %vm269_vm2, %v601_v46, %v603_v44 }
  0x88   :  { %311 = vmatprep.mubr.bf16.mxu0 %v1751_v3 }
  0x8a   :  { %v687_v47 = vpop.permute.xlu1 %686  ;;  %v685_v49 = vpop.permute.xlu0 %684 }
  0x8b   :  { %1656 = vmatmul.mubr.msk.bf16.gmra.mxu1 %vm126_vm0, %v1717_v45  ;;  %711 = vmatprep.subr.bf16.mxu1 %v687_v47  ;;  %v688_v51 = vsel %vm354_vm3, %v685_v49, %v687_v47 }
  0x8c   :  { %561 = vmatprep.mubr.bf16.mxu1 %v1751_v3 }
  0x8e   :  { %v852_v52 = vpop.permute.xlu1 %851  ;;  %v850_v58 = vpop.permute.xlu0 %849 }
  0x8f   :  { %1651 = vmatmul.mubr.msk.bf16.vlgmr.msra.gmra.mxu0 %vm126_vm0, %v1716_v48  ;;  %v853_v60 = vsel %vm122_vm1, %v850_v58, %v852_v52 }
  0x90   :  { %458 = vmatpush1.bf16.msra.mxu0 %v1829_v13  ;;  %321 = vmatprep.mubr.bf16.mxu0 %v1751_v3  ;;  %v1731_v13 = vld [vmem:[%s2406_s1 + $0xb0] sm:$0xff]  }
  0x91   :  { %627 = vmatprep.subr.bf16.mxu0 %v603_v44 }
  0x92   :  { %v936_v56 = vpop.permute.xlu1 %935  ;;  %v934_v0 = vpop.permute.xlu0 %933 }
  0x93   :  { %1663 = vmatmul.mubr.msk.bf16.vlgmr.msra.gmra.mxu1 %vm126_vm0, %v1719_v50  ;;  %v937_v11 = vsel %vm269_vm2, %v934_v0, %v936_v56 }
  0x94   :  { %712 = vmatpush1.bf16.msra.mxu1 %v688_v51  ;;  %571 = vmatprep.mubr.bf16.mxu1 %v1751_v3 }
  0x95   :  { %876 = vmatprep.subr.bf16.mxu1 %v852_v52 }
  0x96   :  { %v1020_v61 = vpop.permute.xlu1 %1019  ;;  %v1018_v2 = vpop.permute.xlu0 %1017 }
  0x97   :  { %1652 = vmatmul.mubr.msk.bf16.gmra.mxu0 %vm126_vm0, %v1718_v53  ;;  %v1021_v5 = vsel %vm354_vm3, %v1018_v2, %v1020_v61 }
  0x98   :  { %475 = vmatprep.mubr.bf16.mxu0 %v1751_v3 }
  0x9a   :  { %v1185_v6 = vpop.permute.xlu1 %1184  ;;  %v1183_v12 = vpop.permute.xlu0 %1182 }
  0x9b   :  { %1664 = vmatmul.mubr.msk.bf16.gmra.mxu1 %vm126_vm0, %v1721_v54  ;;  %v1186_v15 = vsel %vm122_vm1, %v1183_v12, %v1185_v6 }
  0x9c   :  { %729 = vmatprep.mubr.bf16.mxu1 %v1751_v3 }
  0x9e   :  { %v1269_v10 = vpop.permute.xlu1 %1268 }
  0x9f   :  { %1659 = vmatmul.mubr.msk.bf16.vlgmr.msra.gmra.mxu0 %vm126_vm0, %v1720_v55 }
  0xa0   :  { %628 = vmatpush1.bf16.msra.mxu0 %v604_v57  ;;  %485 = vmatprep.mubr.bf16.mxu0 %v1751_v3 }
  0xa1   :  { %790 = vmatprep.subr.bf16.mxu0 %v1857_v19  ;;  %v1733_v19 = vld [vmem:[%s2406_s1 + $0xb8] sm:$0xff]  }
  0xa2   :  { %v1353_v17 = vpop.permute.xlu1 %1352 }
  0xa3   :  { %1671 = vmatmul.mubr.msk.bf16.vlgmr.msra.gmra.mxu1 %vm126_vm0, %v1723_v59 }
  0xa4   :  { %877 = vmatpush1.bf16.msra.mxu1 %v853_v60  ;;  %739 = vmatprep.mubr.bf16.mxu1 %v1751_v3 }
  0xa5   :  { %1044 = vmatprep.subr.bf16.mxu1 %v1020_v61 }
  0xa7   :  { %1660 = vmatmul.mubr.msk.bf16.gmra.mxu0 %vm126_vm0, %v1722_v62 }
  0xa8   :  { %645 = vmatprep.mubr.bf16.mxu0 %v1751_v3 }
  0xab   :  { %1672 = vmatmul.mubr.msk.bf16.gmra.mxu1 %vm126_vm0, %v1725_v63 }
  0xac   :  { %894 = vmatprep.mubr.bf16.mxu1 %v1751_v3 }
  0xaf   :  { %1667 = vmatmul.mubr.msk.bf16.vlgmr.msra.gmra.mxu0 %vm126_vm0, %v1724_v1 }
  0xb0   :  { %791 = vmatpush1.bf16.msra.mxu0 %v1859_v20  ;;  %655 = vmatprep.mubr.bf16.mxu0 %v1751_v3  ;;  %v1267_v20 = vpop.permute.xlu0 %1266 }
  0xb1   :  { %960 = vmatprep.subr.bf16.mxu0 %v936_v56  ;;  %v1270_v28 = vsel %vm269_vm2, %v1267_v20, %v1269_v10 }
  0xb3   :  { %1679 = vmatmul.mubr.msk.bf16.vlgmr.msra.gmra.mxu1 %vm126_vm0, %v1727_v4 }
  0xb4   :  { %1045 = vmatpush1.bf16.msra.mxu1 %v1021_v5  ;;  %904 = vmatprep.mubr.bf16.mxu1 %v1751_v3  ;;  %v1351_v22 = vpop.permute.xlu0 %1350 }
  0xb5   :  { %1209 = vmatprep.subr.bf16.mxu1 %v1185_v6  ;;  %v1354_v24 = vsel %vm354_vm3, %v1351_v22, %v1353_v17 }
  0xb7   :  { %1668 = vmatmul.mubr.msk.bf16.gmra.mxu0 %vm126_vm0, %v1726_v7 }
  0xb8   :  { %808 = vmatprep.mubr.bf16.mxu0 %v1751_v3 }
  0xbb   :  { %1680 = vmatmul.mubr.msk.bf16.gmra.mxu1 %vm126_vm0, %v1729_v8 }
  0xbc   :  { %1062 = vmatprep.mubr.bf16.mxu1 %v1751_v3 }
  0xbf   :  { %1675 = vmatmul.mubr.msk.bf16.vlgmr.msra.gmra.mxu0 %vm126_vm0, %v1728_v9 }
  0xc0   :  { %961 = vmatpush1.bf16.msra.mxu0 %v937_v11  ;;  %818 = vmatprep.mubr.bf16.mxu0 %v1751_v3 }
  0xc1   :  { %1123 = vmatprep.subr.bf16.mxu0 %v1885_v25  ;;  %v1734_v25 = vld [vmem:[%s2406_s1 + $0xa8] sm:$0xff]  }
  0xc3   :  { %1687 = vmatmul.mubr.msk.bf16.vlgmr.msra.gmra.mxu1 %vm126_vm0, %v1731_v13 }
  0xc4   :  { %1210 = vmatpush1.bf16.msra.mxu1 %v1186_v15  ;;  %1072 = vmatprep.mubr.bf16.mxu1 %v1751_v3 }
  0xc5   :  { %1377 = vmatprep.subr.bf16.mxu1 %v1353_v17 }
  0xc7   :  { %1676 = vmatmul.mubr.msk.bf16.gmra.mxu0 %vm126_vm0, %v1730_v18 }
  0xc8   :  { %978 = vmatprep.mubr.bf16.mxu0 %v1751_v3 }
  0xc9   :  { %v236_v34 = vpop.f32.mrf.mxu1 }
  0xcb   :  { %1688 = vmatmul.mubr.msk.bf16.gmra.mxu1 %vm126_vm0, %v1733_v19  ;;  %v238_v35 = vpop.f32.mrf.mxu1 }
  0xcc   :  { %1227 = vmatprep.mubr.bf16.mxu1 %v1751_v3 }
  0xcd   :  { %v240_v36 = vpop.f32.mrf.mxu1 }
  0xcf   :  { %1683 = vmatmul.mubr.msk.bf16.vlgmr.msra.gmra.mxu0 %vm126_vm0, %v1732_v21  ;;  %v242_v37 = vpop.f32.mrf.mxu1 }
  0xd0   :  { %1124 = vmatpush1.bf16.msra.mxu0 %v1887_v26  ;;  %988 = vmatprep.mubr.bf16.mxu0 %v1751_v3  ;;  %v1737_v26 = vld [vmem:[%s2406_s1 + $0xd8] sm:$0xff]  }
  0xd1   :  { %1293 = vmatprep.subr.bf16.mxu0 %v1269_v10  ;;  %v246_v38 = vpop.f32.mrf.mxu1 }
  0xd3   :  { %1695 = vmatmul.mubr.msk.bf16.vlgmr.msra.gmra.mxu1 %vm126_vm0, %v1735_v23  ;;  %v248_v39 = vpop.f32.mrf.mxu1 }
  0xd4   :  { %1378 = vmatpush1.bf16.msra.mxu1 %v1354_v24  ;;  %1237 = vmatprep.mubr.bf16.mxu1 %v1751_v3 }
  0xd5   :  { %v250_v40 = vpop.f32.mrf.mxu1 }
  0xd7   :  { %1684 = vmatmul.mubr.msk.bf16.gmra.mxu0 %vm126_vm0, %v1734_v25  ;;  %v252_v42 = vpop.f32.mrf.mxu1 }
  0xd8   :  { %1141 = vmatprep.mubr.bf16.mxu0 %v1751_v3 }
  0xdb   :  { %1696 = vmatmul.mubr.msk.bf16.gmra.mxu1 %vm126_vm0, %v1737_v26 }
  0xdc   :  { %1395 = vmatprep.mubr.bf16.mxu1 %v1751_v3 }
  0xdf   :  { %1691 = vmatmul.mubr.msk.bf16.vlgmr.msra.gmra.mxu0 %vm126_vm0, %v1736_v27 }
  0xe0   :  { %1294 = vmatpush1.bf16.msra.mxu0 %v1270_v28  ;;  %1151 = vmatprep.mubr.bf16.mxu0 %v1751_v3 }
  0xe3   :  { %1703 = vmatmul.mubr.msk.bf16.vlgmr.msra.gmra.mxu1 %vm126_vm0, %v1739_v29 }
  0xe4   :  { %1405 = vmatprep.mubr.bf16.mxu1 %v1751_v3 }
  0xe7   :  { %1692 = vmatmul.mubr.msk.bf16.gmra.mxu0 %vm126_vm0, %v1738_v30 }
  0xe8   :  { %1311 = vmatprep.mubr.bf16.mxu0 %v1751_v3 }
  0xeb   :  { %1704 = vmatmul.mubr.msk.bf16.gmra.mxu1 %vm126_vm0, %v1741_v31 }
  0xef   :  { %1699 = vmatmul.mubr.msk.bf16.vlgmr.msra.gmra.mxu0 %vm126_vm0, %v1740_v32 }
  0xf0   :  { %1321 = vmatprep.mubr.bf16.mxu0 %v1751_v3 }
  0xf7   :  { %1700 = vmatmul.mubr.msk.bf16.gmra.mxu0 %vm126_vm0, %v1742_v33 }
 0x13f   :  { %v167_v41 = vpop.f32.mrf.mxu0 }
 0x140   :  { %v237_v55 = vadd.f32 %v236_v34, %v167_v41 }
 0x141   :  { %v169_v43 = vpop.f32.mrf.mxu0 }
 0x142   :  { %v239_v59 = vadd.f32 %v238_v35, %v169_v43 }
 0x143   :  { %v171_v44 = vpop.f32.mrf.mxu0  ;;  %v398_v45 = vpop.f32.mrf.mxu1 }
 0x144   :  { %v241_v63 = vadd.f32 %v240_v36, %v171_v44 }
 0x145   :  { %v173_v46 = vpop.f32.mrf.mxu0  ;;  %v400_v3 = vpop.f32.mrf.mxu1 }
 0x146   :  { %v243_v5 = vadd.f32 %v242_v37, %v173_v46 }
 0x147   :  { %v177_v47 = vpop.f32.mrf.mxu0  ;;  %v402_v48 = vpop.f32.mrf.mxu1 }
 0x148   :  { %v247_v10 = vadd.f32 %v246_v38, %v177_v47 }
 0x149   :  { %v179_v49 = vpop.f32.mrf.mxu0  ;;  %v404_v50 = vpop.f32.mrf.mxu1 }
 0x14a   :  { %v249_v15 = vadd.f32 %v248_v39, %v179_v49 }
 0x14b   :  { %v181_v51 = vpop.f32.mrf.mxu0  ;;  %v408_v52 = vpop.f32.mrf.mxu1 }
 0x14c   :  { %v251_v20 = vadd.f32 %v250_v40, %v181_v51 }
 0x14d   :  { %v183_v53 = vpop.f32.mrf.mxu0  ;;  %v410_v54 = vpop.f32.mrf.mxu1 }
 0x14e   :  { %v253_v56 = vadd.f32 %v252_v42, %v183_v53 }
 0x14f   :  { %v313_v57 = vpop.f32.mrf.mxu0  ;;  %v412_v58 = vpop.f32.mrf.mxu1 }
 0x150   :  { %v332_v60 = vadd.f32 %v313_v57, %v237_v55 }
 0x151   :  { %v315_v61 = vpop.f32.mrf.mxu0  ;;  %v414_v62 = vpop.f32.mrf.mxu1 }
 0x152   :  { %v333_v0 = vadd.f32 %v315_v61, %v239_v59  ;;  %v2078_v1 = vadd.f32 %v398_v45, %v332_v60 }
 0x153   :  { %v317_v2 = vpop.f32.mrf.mxu0  ;;  %v2080_v4 = vpop.f32.mrf.mxu1 }
 0x154   :  { %v334_v6 = vadd.f32 %v317_v2, %v241_v63  ;;  %v2082_v7 = vadd.f32 %v400_v3, %v333_v0 }
 0x155   :  { %v319_v8 = vpop.f32.mrf.mxu0  ;;  %v2084_v9 = vpop.f32.mrf.mxu1 }
 0x156   :  { %v335_v11 = vadd.f32 %v319_v8, %v243_v5  ;;  %v2086_v12 = vadd.f32 %v402_v48, %v334_v6 }
 0x157   :  { %v323_v13 = vpop.f32.mrf.mxu0  ;;  %v2088_v14 = vpop.f32.mrf.mxu1 }
 0x158   :  { %v336_v16 = vadd.f32 %v323_v13, %v247_v10  ;;  %v2090_v17 = vadd.f32 %v404_v50, %v335_v11 }
 0x159   :  { %v325_v18 = vpop.f32.mrf.mxu0  ;;  %v2092_v19 = vpop.f32.mrf.mxu1 }
 0x15a   :  { %v337_v21 = vadd.f32 %v325_v18, %v249_v15  ;;  %v2094_v22 = vadd.f32 %v408_v52, %v336_v16 }
 0x15b   :  { %v327_v23 = vpop.f32.mrf.mxu0  ;;  %v2096_v24 = vpop.f32.mrf.mxu1 }
 0x15c   :  { %v338_v25 = vadd.f32 %v327_v23, %v251_v20  ;;  %v2098_v26 = vadd.f32 %v410_v54, %v337_v21 }
 0x15d   :  { %v329_v27 = vpop.f32.mrf.mxu0  ;;  %v2100_v28 = vpop.f32.mrf.mxu1 }
 0x15e   :  { %v339_v29 = vadd.f32 %v329_v27, %v253_v56  ;;  %v2102_v30 = vadd.f32 %v412_v58, %v338_v25 }
 0x15f   :  { %v477_v31 = vpop.f32.mrf.mxu0  ;;  %v2104_v32 = vpop.f32.mrf.mxu1 }
 0x160   :  { %v2106_v33 = vadd.f32 %v414_v62, %v339_v29 }
 0x161   :  { %v479_v34 = vpop.f32.mrf.mxu0  ;;  %v2108_v35 = vpop.f32.mrf.mxu1 }
 0x163   :  { %v481_v36 = vpop.f32.mrf.mxu0  ;;  %v2110_v37 = vpop.f32.mrf.mxu1 }
 0x165   :  { %v483_v38 = vpop.f32.mrf.mxu0  ;;  %v2112_v39 = vpop.f32.mrf.mxu1 }
 0x167   :  { %v487_v40 = vpop.f32.mrf.mxu0  ;;  %v2114_v41 = vpop.f32.mrf.mxu1 }
 0x169   :  { %v489_v42 = vpop.f32.mrf.mxu0  ;;  %v2116_v43 = vpop.f32.mrf.mxu1 }
 0x16b   :  { %v2118_v44 = vpop.f32.mrf.mxu0  ;;  %v2120_v45 = vpop.f32.mrf.mxu1 }
 0x16d   :  { %v2122_v46 = vpop.f32.mrf.mxu0  ;;  %v2124_v3 = vpop.f32.mrf.mxu1 }
 0x16f   :  { %v647_v47 = vpop.f32.mrf.mxu0  ;;  %v2126_v48 = vpop.f32.mrf.mxu1 }
 0x171   :  { %v649_v49 = vpop.f32.mrf.mxu0  ;;  %v2128_v50 = vpop.f32.mrf.mxu1 }
 0x172   :  { %2412 = vst [vmem:[#allocation2_spill] sm:$0xff] %v2128_v50 }
 0x173   :  { %v651_v51 = vpop.f32.mrf.mxu0  ;;  %v2130_v52 = vpop.f32.mrf.mxu1 }
 0x175   :  { %v653_v53 = vpop.f32.mrf.mxu0  ;;  %v2132_v54 = vpop.f32.mrf.mxu1 }
 0x177   :  { %v2134_v55 = vpop.f32.mrf.mxu0  ;;  %v2136_v56 = vpop.f32.mrf.mxu1 }
 0x179   :  { %v2138_v57 = vpop.f32.mrf.mxu0  ;;  %v2140_v58 = vpop.f32.mrf.mxu1 }
 0x17b   :  { %v2142_v59 = vpop.f32.mrf.mxu0  ;;  %v2144_v60 = vpop.f32.mrf.mxu1 }
 0x17c   :  { %2413 = vst [vmem:[#allocation3_spill] sm:$0xff] %v2144_v60 }
 0x17d   :  { %v2146_v61 = vpop.f32.mrf.mxu0  ;;  %v2148_v62 = vpop.f32.mrf.mxu1 }
 0x17e   :  { %2414 = vst [vmem:[#allocation4_spill] sm:$0xff] %v2148_v62 }
 0x17f   :  { %v810_v63 = vpop.f32.mrf.mxu0  ;;  %v2150_v0 = vpop.f32.mrf.mxu1 }
 0x180   :  { %2415 = vst [vmem:[#allocation5_spill] sm:$0xff] %v2150_v0 }
 0x181   :  { %v812_v2 = vpop.f32.mrf.mxu0  ;;  %v2152_v5 = vpop.f32.mrf.mxu1 }
 0x182   :  { %2416 = vst [vmem:[#allocation6_spill] sm:$0xff] %v2152_v5 }
 0x183   :  { %v814_v6 = vpop.f32.mrf.mxu0  ;;  %v2154_v8 = vpop.f32.mrf.mxu1 }
 0x185   :  { %v2156_v10 = vpop.f32.mrf.mxu0  ;;  %v2158_v11 = vpop.f32.mrf.mxu1 }
 0x186   :  { %2417 = vst [vmem:[#allocation7_spill] sm:$0xff] %v2158_v11 }
 0x187   :  { %v2160_v13 = vpop.f32.mrf.mxu0  ;;  %v2162_v15 = vpop.f32.mrf.mxu1 }
 0x188   :  { %2418 = vst [vmem:[#allocation8_spill] sm:$0xff] %v2162_v15  ;;  %v496_v15 = vadd.f32 %v477_v31, %v2078_v1 }
 0x189   :  { %v2164_v16 = vpop.f32.mrf.mxu0  ;;  %v2166_v18 = vpop.f32.mrf.mxu1 }
 0x18a   :  { %2419 = vst [vmem:[#allocation9_spill] sm:$0xff] %v2166_v18  ;;  %v497_v18 = vadd.f32 %v479_v34, %v2082_v7  ;;  %v500_v34 = vadd.f32 %v487_v40, %v2094_v22 }
 0x18b   :  { %v2168_v20 = vpop.f32.mrf.mxu0  ;;  %v2170_v21 = vpop.f32.mrf.mxu1 }
 0x18c   :  { %2420 = vst [vmem:[#allocation10_spill] sm:$0xff] %v2170_v21  ;;  %v583_v31 = vadd.f32 %v2084_v9, %v497_v18 }
 0x18d   :  { %v2172_v23 = vpop.f32.mrf.mxu0  ;;  %v2174_v25 = vpop.f32.mrf.mxu1 }
 0x18e   :  { %2421 = vst [vmem:[#allocation11_spill] sm:$0xff] %v2172_v23  ;;  %2422 = vst [vmem:[#allocation12_spill] sm:$0xff] %v2174_v25  ;;  %v498_v23 = vadd.f32 %v481_v36, %v2086_v12  ;;  %v582_v25 = vadd.f32 %v2080_v4, %v496_v15  ;;  %v501_v4 = vadd.f32 %v489_v42, %v2098_v26 }
 0x18f   :  { %v980_v27 = vpop.f32.mrf.mxu0  ;;  %v2176_v29 = vpop.f32.mrf.mxu1 }
 0x190   :  { %2423 = vst [vmem:[#allocation13_spill] sm:$0xff] %v2176_v29  ;;  %v666_v1 = vadd.f32 %v647_v47, %v582_v25  ;;  %v584_v12 = vadd.f32 %v2088_v14, %v498_v23  ;;  %v586_v14 = vadd.f32 %v2096_v24, %v500_v34 }
 0x191   :  { %v982_v5 = vpop.f32.mrf.mxu0  ;;  %v2178_v0 = vpop.f32.mrf.mxu1 }
 0x192   :  { %2424 = vst [vmem:[#allocation14_spill] sm:$0xff] %v2178_v0  ;;  %v499_v0 = vadd.f32 %v483_v38, %v2090_v17  ;;  %v750_v9 = vadd.f32 %v2110_v37, %v666_v1  ;;  %v502_v38 = vadd.f32 %v2118_v44, %v2102_v30  ;;  %v670_v30 = vadd.f32 %v2134_v55, %v586_v14 }
 0x193   :  { %v984_v62 = vpop.f32.mrf.mxu0  ;;  %v2181_v11 = vpop.f32.mrf.mxu1 }
 0x194   :  { %2425 = vst [vmem:[#allocation15_spill] sm:$0xff] %v2181_v11  ;;  %v585_v17 = vadd.f32 %v2092_v19, %v499_v0  ;;  %v829_v26 = vadd.f32 %v810_v63, %v750_v9  ;;  %v587_v19 = vadd.f32 %v2100_v28, %v501_v4  ;;  %v588_v24 = vadd.f32 %v2104_v32, %v502_v38 }
 0x195   :  { %v2184_v60 = vpop.f32.mrf.mxu0  ;;  %v2186_v21 = vpop.f32.mrf.mxu1  ;;  %v2431_v9 = vld [vmem:[#allocation11_spill] sm:$0xff] }
 0x196   :  { %2426 = vst [vmem:[#allocation16_spill] sm:$0xff] %v2186_v21  ;;  %v667_v21 = vadd.f32 %v649_v49, %v583_v31  ;;  %v669_v40 = vadd.f32 %v653_v53, %v585_v17  ;;  %v503_v49 = vadd.f32 %v2122_v46, %v2106_v33  ;;  %v671_v53 = vadd.f32 %v2138_v57, %v587_v19  ;;  %v2430_v17 = vld [vmem:[#allocation7_spill] sm:$0xff]  ;;  %v2434_v19 = vld [vmem:[#allocation5_spill] sm:$0xff] }
 0x197   :  { %v2190_v50 = vpop.f32.mrf.mxu0  ;;  %v2192_v29 = vpop.f32.mrf.mxu1  ;;  %v915_v28 = vadd.f32 %v2130_v52, %v829_v26  ;;  %v672_v46 = vadd.f32 %v2142_v59, %v588_v24  ;;  %v754_v57 = vadd.f32 %v2120_v45, %v670_v30  ;;  %v2433_v26 = vld [vmem:[#allocation8_spill] sm:$0xff] }
 0x198   :  { %2427 = vst [vmem:[#allocation17_spill] sm:$0xff] %v2192_v29  ;;  %v668_v29 = vadd.f32 %v651_v51, %v584_v12  ;;  %v751_v42 = vadd.f32 %v2112_v39, %v667_v21  ;;  %v753_v33 = vadd.f32 %v2116_v43, %v669_v40  ;;  %v589_v21 = vadd.f32 %v2108_v35, %v503_v49 }
 0x199   :  { %v2196_v11 = vpop.f32.mrf.mxu0  ;;  %v2198_v7 = vpop.f32.mrf.mxu1  ;;  %v999_v23 = vadd.f32 %v980_v27, %v915_v28  ;;  %v833_v52 = vadd.f32 %v2160_v13, %v754_v57  ;;  %v756_v1 = vadd.f32 %v2126_v48, %v672_v46  ;;  %v1458_v13 = vlaneseq  ;;  %v2437_v28 = vld [vmem:[#allocation6_spill] sm:$0xff] }
 0x19a   :  { %v830_v44 = vadd.f32 %v812_v2, %v751_v42  ;;  %v752_v0 = vadd.f32 %v2114_v41, %v668_v29  ;;  %v832_v41 = vadd.f32 %v2156_v10, %v753_v33  ;;  %v673_v25 = vadd.f32 %v2146_v61, %v589_v21  ;;  %v2438_v57 = vld [vmem:[#allocation10_spill] sm:$0xff] }
 0x19b   :  { %v2203_v36 = vpop.f32.mrf.mxu0  ;;  %v2205_v15 = vpop.f32.mrf.mxu1  ;;  %v835_v61 = vadd.f32 %v2168_v20, %v756_v1  ;;  %v2436_v24 = vld [vmem:[#allocation15_spill] sm:$0xff] }
 0x19c   :  { %v831_v39 = vadd.f32 %v814_v6, %v752_v0  ;;  %v916_v32 = vadd.f32 %v2132_v54, %v830_v44  ;;  %v755_v6 = vadd.f32 %v2124_v3, %v671_v53  ;;  %v918_v27 = vadd.f32 %v2140_v58, %v832_v41  ;;  %v2428_v3 = vld [vmem:[#allocation2_spill] sm:$0xff]  ;;  %v2435_v0 = vld [vmem:[#allocation9_spill] sm:$0xff] }
 0x19d   :  { %v2211_v47 = vpop.f32.mrf.mxu0  ;;  %v2213_v22 = vpop.f32.mrf.mxu1  ;;  %v1083_v54 = vadd.f32 %v2154_v8, %v999_v23  ;;  %v757_v34 = vadd.f32 %v2428_v3, %v673_v25  ;;  %v1459_v44 = vshrl.u32 %v1458_v13, 7  ;;  %v2442_v3 = vld [vmem:[#allocation13_spill] sm:$0xff] }
 0x19e   :  { %v1000_v29 = vadd.f32 %v982_v5, %v916_v32  ;;  %v917_v59 = vadd.f32 %v2136_v56, %v831_v39  ;;  %v834_v35 = vadd.f32 %v2164_v16, %v755_v6  ;;  %v1002_v5 = vadd.f32 %v2184_v60, %v918_v27  ;;  %v2429_v56 = vld [vmem:[#allocation3_spill] sm:$0xff]  ;;  %v2439_v32 = vld [vmem:[#allocation16_spill] sm:$0xff] }
 0x19f   :  { %v1143_v51 = vpop.f32.mrf.mxu0  ;;  %v2220_v37 = vpop.f32.mrf.mxu1  ;;  %v919_v4 = vadd.f32 %v2429_v56, %v833_v52  ;;  %v836_v38 = vadd.f32 %v2431_v9, %v757_v34  ;;  %v921_v60 = vadd.f32 %v2434_v19, %v835_v61 }
 0x1a0   :  { %v1001_v45 = vadd.f32 %v984_v62, %v917_v59  ;;  %v1162_v16 = vadd.f32 %v1143_v51, %v1083_v54  ;;  %v1084_v48 = vadd.f32 %v2430_v17, %v1000_v29  ;;  %v2432_v62 = vld [vmem:[#allocation4_spill] sm:$0xff]  ;;  %v1086_v53 = vadd.f32 %v2435_v0, %v1002_v5  ;;  %v1431_v54 = vpop.permute.xlu0 %1430  ;;  %v2443_v17 = vld [vmem:[#allocation14_spill] sm:$0xff] }
 0x1a1   :  { %v1145_v63 = vpop.f32.mrf.mxu0  ;;  %v2226_v18 = vpop.f32.mrf.mxu1  ;;  %v920_v40 = vadd.f32 %v2432_v62, %v834_v35  ;;  %v1003_v8 = vadd.f32 %v2190_v50, %v919_v4  ;;  %v1005_v33 = vadd.f32 %v2203_v36, %v921_v60  ;;  %v922_v46 = vadd.f32 %v2437_v28, %v836_v38 }
 0x1a2   :  { %v1163_v20 = vadd.f32 %v1145_v63, %v1084_v48  ;;  %v1085_v42 = vadd.f32 %v2433_v26, %v1001_v45  ;;  %v1248_v39 = vadd.f32 %v2436_v24, %v1162_v16  ;;  %v1464_v63 = vsub.s32 1, %v1459_v44  ;;  %v2441_v45 = vld [vmem:[#allocation17_spill] sm:$0xff] }
 0x1a3   :  { %v1147_v55 = vpop.f32.mrf.mxu0  ;;  %v1397_v2 = vpop.f32.mrf.mxu1  ;;  %v1004_v49 = vadd.f32 %v2196_v11, %v920_v40  ;;  %v1087_v23 = vadd.f32 %v2438_v57, %v1003_v8  ;;  %v1006_v6 = vadd.f32 %v2211_v47, %v922_v46  ;;  %v1460_v59 = vsub.s32 0, %v1459_v44 }
 0x1a4   :  { %v1164_v51 = vadd.f32 %v1147_v55, %v1085_v42  ;;  %v1249_v25 = vadd.f32 %v2439_v32, %v1163_v20  ;;  %v2440_v55 = vld [vmem:[#allocation12_spill] sm:$0xff]  ;;  %v1089_v34 = vadd.f32 %v2442_v3, %v1005_v33  ;;  %v1557_v3 = vld [vmem:[%s2409_s3] sm:$0xff] }
 0x1a5   :  { %v1149_v43 = vpop.f32.mrf.mxu0  ;;  %v1399_v31 = vpop.f32.mrf.mxu1  ;;  %v1088_v52 = vadd.f32 %v2440_v55, %v1004_v49  ;;  %v1090_v48 = vadd.f32 %v2443_v17, %v1006_v6 }
 0x1a6   :  { %v1165_v41 = vadd.f32 %v1149_v43, %v1086_v53  ;;  %v1250_v27 = vadd.f32 %v2441_v45, %v1164_v51  ;;  %v1456_v43 = vld [vmem:[%s2408_s5] sm:$0x3] }
 0x1a7   :  { %v1153_v10 = vpop.f32.mrf.mxu0  ;;  %v1401_v14 = vpop.f32.mrf.mxu1  ;;  %v2267_v4 = vrot.slane %v1456_v43, %v1464_v63  ;;  %v2273_v62 = vrot.slane %v1456_v43, %v1460_v59 }
 0x1a8   :  { %v1166_v35 = vadd.f32 %v1153_v10, %v1087_v23  ;;  %v1251_v10 = vadd.f32 %v2198_v7, %v1165_v41 }
 0x1a9   :  { %v1155_v12 = vpop.f32.mrf.mxu0  ;;  %v1403_v50 = vpop.f32.mrf.mxu1 }
 0x1aa   :  { %v1167_v61 = vadd.f32 %v1155_v12, %v1088_v52 }
 0x1ab   :  { %v1157_v58 = vpop.f32.mrf.mxu0  ;;  %v1407_v5 = vpop.f32.mrf.mxu1 }
 0x1ac   :  { %v1168_v16 = vadd.f32 %v1157_v58, %v1089_v34  ;;  %v1253_v42 = vadd.f32 %v2213_v22, %v1167_v61  ;;  %v1558_v61 = vld [vmem:[%s2409_s3 + $0x8] sm:$0xff]  ;;  %v1559_v34 = vld [vmem:[%s2409_s3 + $0x10] sm:$0xff] }
 0x1ad   :  { %v1159_v30 = vpop.f32.mrf.mxu0  ;;  %v1409_v20 = vpop.f32.mrf.mxu1 }
 0x1ae   :  { %v1169_v7 = vadd.f32 %v1159_v30, %v1090_v48 }
 0x1af   :  { %v1313_v21 = vpop.f32.mrf.mxu0  ;;  %v1411_v30 = vpop.f32.mrf.mxu1 }
 0x1b0   :  { %v1332_v11 = vadd.f32 %v1313_v21, %v1248_v39 }
 0x1b1   :  { %v1315_v29 = vpop.f32.mrf.mxu0 }
 0x1b2   :  { %v1416_v1 = vadd.f32 %v1397_v2, %v1332_v11  ;;  %v1333_v36 = vadd.f32 %v1315_v29, %v1249_v25  ;;  %v1436_v2 = vpop.permute.xlu1 %1435  ;;  %v1413_v25 = vpop.f32.mrf.mxu1 }
 0x1b3   :  { %v1317_v13 = vpop.f32.mrf.mxu0  ;;  %v1446_v29 = vpop.permute.xlu0 %1445 }
 0x1b4   :  { %v1417_v47 = vadd.f32 %v1399_v31, %v1333_v36  ;;  %v1334_v56 = vadd.f32 %v1317_v13, %v1250_v27  ;;  %v2271_v9 = vadd.f32 %v1431_v54, %v1416_v1  ;;  %v1252_v31 = vadd.f32 %v2205_v15, %v1166_v35  ;;  %v1560_v13 = vld [vmem:[%s2409_s3 + $0x18] sm:$0xff] }
 0x1b5   :  { %v1319_v38 = vpop.f32.mrf.mxu0 }
 0x1b6   :  { %v1418_v12 = vadd.f32 %v1401_v14, %v1334_v56  ;;  %v2275_v40 = vadd.f32 %v1431_v54, %v1417_v47  ;;  %v1335_v8 = vadd.f32 %v1319_v38, %v1251_v10  ;;  %v1254_v14 = vadd.f32 %v2220_v37, %v1168_v16  ;;  %v1441_v24 = vpop.permute.xlu1 %1440  ;;  %v1590_v47 = vld [vmem:[%s2410_s4 + $0x8] sm:$0xff] }
 0x1b7   :  { %v1323_v26 = vpop.f32.mrf.mxu0  ;;  %v1468_v51 = vmul.f32 %v2273_v62, %v2271_v9 }
 0x1b8   :  { %v1469_v58 = vmul.f32 %v2267_v4, %v2275_v40  ;;  %v1419_v49 = vadd.f32 %v1403_v50, %v1335_v8  ;;  %v1336_v19 = vadd.f32 %v1323_v26, %v1252_v31  ;;  %v2281_v60 = vadd.f32 %v1436_v2, %v1418_v12 }
 0x1b9   :  { %v1325_v44 = vpop.f32.mrf.mxu0  ;;  %v1255_v50 = vadd.f32 %v2226_v18, %v1169_v7 }
 0x1ba   :  { %v1451_v15 = vadd.f32 %v1436_v2, %v1419_v49  ;;  %v1420_v0 = vadd.f32 %v1407_v5, %v1336_v19  ;;  %v1337_v53 = vadd.f32 %v1325_v44, %v1253_v42  ;;  %v1477_v22 = vsel %vm1476_vm4, %v1469_v58, 0.0  ;;  %v1589_v5 = vld [vmem:[%s2410_s4] sm:$0xff] }
 0x1bb   :  { %v1327_v39 = vpop.f32.mrf.mxu0  ;;  %v1478_v33 = vadd.f32 %v1477_v22, %v1468_v51  ;;  %v1470_v41 = vmul.f32 %v2273_v62, %v2281_v60 }
 0x1bc   :  { %v1471_v28 = vmul.f32 %v2267_v4, %v1451_v15  ;;  %v1421_v46 = vadd.f32 %v1409_v20, %v1337_v53  ;;  %v1338_v21 = vadd.f32 %v1327_v39, %v1254_v14  ;;  %v1452_v63 = vadd.f32 %v1441_v24, %v1420_v0 }
 0x1bd   :  { %v1329_v37 = vpop.f32.mrf.mxu0  ;;  %1479 = vadd.xlane.f32.xlu1 %v1478_v33 }
 0x1be   :  { %v1453_v57 = vadd.f32 %v1441_v24, %v1421_v46  ;;  %v1422_v23 = vadd.f32 %v1411_v30, %v1338_v21  ;;  %v1339_v11 = vadd.f32 %v1329_v37, %v1255_v50  ;;  %v1481_v32 = vsel %vm1476_vm4, %v1471_v28, 0.0 }
 0x1bf   :  { %v1482_v6 = vadd.f32 %v1481_v32, %v1470_v41  ;;  %v1472_v18 = vmul.f32 %v2273_v62, %v1452_v63  ;;  %v1592_v32 = vld [vmem:[%s2410_s4 + $0x18] sm:$0xff] }
 0x1c0   :  { %v1473_v55 = vmul.f32 %v2267_v4, %v1453_v57  ;;  %v1423_v52 = vadd.f32 %v1413_v25, %v1339_v11  ;;  %v1454_v59 = vadd.f32 %v1446_v29, %v1422_v23  ;;  %v1591_v11 = vld [vmem:[%s2410_s4 + $0x10] sm:$0xff] }
 0x1c1   :  { %1483 = vadd.xlane.f32.xlu0 %v1482_v6 }
 0x1c2   :  { %v1455_v35 = vadd.f32 %v1446_v29, %v1423_v52  ;;  %v1485_v1 = vsel %vm1476_vm4, %v1473_v55, 0.0  ;;  %v1474_v27 = vmul.f32 %v2273_v62, %v1454_v59 }
 0x1c3   :  { %v1486_v36 = vadd.f32 %v1485_v1, %v1472_v18 }
 0x1c4   :  { %v1475_v45 = vmul.f32 %v2267_v4, %v1455_v35 }
 0x1c5   :  { %1487 = vadd.xlane.f32.xlu0 %v1486_v36 }
 0x1c6   :  { %v1489_v43 = vsel %vm1476_vm4, %v1475_v45, 0.0 }
 0x1c7   :  { %v1490_v54 = vadd.f32 %v1489_v43, %v1474_v27 }
 0x1c9   :  { %1491 = vadd.xlane.f32.xlu1 %v1490_v54 }
 0x1da   :  { %1568 = vperm.xlu1 %1710, %v1558_v61  }
 0x1db   :  { %1563 = vperm.xlu0 %1709, %v1557_v3  }
 0x1de   :  { %1573 = vperm.xlu1 %1710, %v1559_v34  }
 0x1df   :  { %1578 = vperm.xlu0 %1709, %v1560_v13  }
 0x1e2   :  { %1595 = vperm.xlu1 %1710, %v1589_v5  }
 0x1e3   :  { %1600 = vperm.xlu0 %1709, %v1590_v47  }
 0x246   :  { %v1480_v56 = vpop.xlane.xlu1 %1479 }
 0x247   :  { %v1493_v10 = vmul.f32 0.0078125, %v1480_v56 }
 0x249   :  { %v2317_v2 = vsub.f32 %v2271_v9, %v1493_v10  ;;  %v2320_v16 = vsub.f32 %v2275_v40, %v1493_v10 }
 0x24a   :  { %v1484_v17 = vpop.xlane.xlu0 %1483 }
 0x24b   :  { %v1505_v48 = vmul.f32 %v2317_v2, %v2317_v2  ;;  %v1506_v38 = vmul.f32 %v2320_v16, %v2320_v16  ;;  %v1494_v12 = vmul.f32 0.0078125, %v1484_v17 }
 0x24d   :  { %v2327_v8 = vsub.f32 %v2281_v60, %v1494_v12  ;;  %v2329_v31 = vsub.f32 %v1451_v15, %v1494_v12  ;;  %v1513_v20 = vmul.f32 %v1505_v48, %v2273_v62  ;;  %v1514_v9 = vmul.f32 %v1506_v38, %v2267_v4 }
 0x24e   :  { %v1488_v26 = vpop.xlane.xlu0 %1487 }
 0x24f   :  { %v1507_v40 = vmul.f32 %v2327_v8, %v2327_v8  ;;  %v1508_v42 = vmul.f32 %v2329_v31, %v2329_v31  ;;  %v1495_v7 = vmul.f32 0.0078125, %v1488_v26  ;;  %v1521_v58 = vsel %vm1476_vm4, %v1514_v9, 0.0 }
 0x250   :  { %v1522_v49 = vadd.f32 %v1521_v58, %v1513_v20 }
 0x251   :  { %v2338_v19 = vsub.f32 %v1452_v63, %v1495_v7  ;;  %v2340_v60 = vsub.f32 %v1453_v57, %v1495_v7  ;;  %v1515_v44 = vmul.f32 %v1507_v40, %v2273_v62  ;;  %v1516_v14 = vmul.f32 %v1508_v42, %v2267_v4 }
 0x252   :  { %1523 = vadd.xlane.f32.xlu0 %v1522_v49  ;;  %v1492_v51 = vpop.xlane.xlu1 %1491 }
 0x253   :  { %v1509_v15 = vmul.f32 %v2338_v19, %v2338_v19  ;;  %v1510_v0 = vmul.f32 %v2340_v60, %v2340_v60  ;;  %v1496_v53 = vmul.f32 0.0078125, %v1492_v51  ;;  %v1525_v24 = vsel %vm1476_vm4, %v1516_v14, 0.0 }
 0x254   :  { %v1526_v22 = vadd.f32 %v1525_v24, %v1515_v44 }
 0x255   :  { %v2349_v30 = vsub.f32 %v1454_v59, %v1496_v53  ;;  %v2351_v39 = vsub.f32 %v1455_v35, %v1496_v53  ;;  %v1517_v33 = vmul.f32 %v1509_v15, %v2273_v62  ;;  %v1518_v28 = vmul.f32 %v1510_v0, %v2267_v4 }
 0x256   :  { %1527 = vadd.xlane.f32.xlu1 %v1526_v22  ;;  %v1564_v25 = vpop.permute.xlu0 %1563  ;;  %v1569_v6 = vpop.permute.xlu1 %1568 }
 0x257   :  { %v1511_v46 = vmul.f32 %v2349_v30, %v2349_v30  ;;  %v1512_v21 = vmul.f32 %v2351_v39, %v2351_v39  ;;  %v1529_v50 = vsel %vm1476_vm4, %v1518_v28, 0.0 }
 0x258   :  { %v1530_v63 = vadd.f32 %v1529_v50, %v1517_v33 }
 0x259   :  { %v1519_v37 = vmul.f32 %v1511_v46, %v2273_v62  ;;  %v1520_v41 = vmul.f32 %v1512_v21, %v2267_v4 }
 0x25a   :  { %1531 = vadd.xlane.f32.xlu0 %v1530_v63  ;;  %v1579_v62 = vpop.permute.xlu0 %1578  ;;  %v1574_v55 = vpop.permute.xlu1 %1573 }
 0x25b   :  { %v1533_v57 = vsel %vm1476_vm4, %v1520_v41, 0.0 }
 0x25c   :  { %v1534_v23 = vadd.f32 %v1533_v57, %v1519_v37 }
 0x25e   :  { %1535 = vadd.xlane.f32.xlu1 %v1534_v23  ;;  %v1601_v4 = vpop.permute.xlu0 %1600  ;;  %v1596_v52 = vpop.permute.xlu1 %1595 }
 0x26f   :  { %1605 = vperm.xlu1 %1710, %v1591_v11  }
 0x270   :  { %1610 = vperm.xlu0 %1709, %v1592_v32  }
 0x2db   :  { %v1524_v29 = vpop.xlane.xlu0 %1523 }
 0x2dc   :  { %v1537_v59 = vmul.f32 0.0078125, %v1524_v29 }
 0x2de   :  { %v1541_v18 = vadd.f32 1e-05, %v1537_v59 }
 0x2df   :  { %v1528_v35 = vpop.xlane.xlu1 %1527 }
 0x2e0   :  { %1743 = vrsqrt.f32 %v1541_v18  ;;  %v1538_v1 = vmul.f32 0.0078125, %v1528_v35 }
 0x2e2   :  { %v1542_v36 = vadd.f32 1e-05, %v1538_v1 }
 0x2e3   :  { %v1532_v45 = vpop.xlane.xlu0 %1531 }
 0x2e4   :  { %1745 = vrsqrt.f32 %v1542_v36  ;;  %v1539_v27 = vmul.f32 0.0078125, %v1532_v45 }
 0x2e6   :  { %v1543_v43 = vadd.f32 1e-05, %v1539_v27 }
 0x2e7   :  { %v1536_v54 = vpop.xlane.xlu1 %1535 }
 0x2e8   :  { %1747 = vrsqrt.f32 %v1543_v43  ;;  %v1540_v61 = vmul.f32 0.0078125, %v1536_v54 }
 0x2ea   :  { %v1544_v3 = vadd.f32 1e-05, %v1540_v61 }
 0x2eb   :  { %v1606_v51 = vpop.permute.xlu1 %1605  ;;  %v1611_v28 = vpop.permute.xlu0 %1610 }
 0x2ec   :  { %1749 = vrsqrt.f32 %v1544_v3 }
 0x2ed   :  { %v1744_v34 = vpop.eup %1743 }
 0x2ee   :  { %v1549_v13 = vmul.f32 %v1744_v34, %v2317_v2  ;;  %v1550_v5 = vmul.f32 %v1744_v34, %v2320_v16 }
 0x2f0   :  { %v1581_v47 = vmul.f32 %v1564_v25, %v1549_v13  ;;  %v1582_v56 = vmul.f32 %v1564_v25, %v1550_v5 }
 0x2f1   :  { %v1746_v10 = vpop.eup %1745 }
 0x2f2   :  { %v1613_v17 = vadd.f32 %v1596_v52, %v1581_v47  ;;  %v1614_v48 = vadd.f32 %v1596_v52, %v1582_v56  ;;  %v1551_v38 = vmul.f32 %v1746_v10, %v2327_v8  ;;  %v1552_v12 = vmul.f32 %v1746_v10, %v2329_v31 }
 0x2f4   :  { %v1621_v20 = vmax.f32 %v1613_v17, 0.0  ;;  %v1622_v9 = vmax.f32 %v1614_v48, 0.0  ;;  %v1583_v26 = vmul.f32 %v1569_v6, %v1551_v38  ;;  %v1584_v40 = vmul.f32 %v1569_v6, %v1552_v12 }
 0x2f5   :  { %v1748_v42 = vpop.eup %1747 }
 0x2f6   :  { %v1615_v7 = vadd.f32 %v1601_v4, %v1583_v26  ;;  %v1616_v58 = vadd.f32 %v1601_v4, %v1584_v40  ;;  %1629 = vst [vmem:[%s2411_s6] sm:$0xff] %v1621_v20  ;;  %1630 = vst.msk [vmem:[%s2411_s6 + $0x8] sm:$0xff] %vm1476_vm4, %v1622_v9  ;;  %v1553_v2 = vmul.f32 %v1748_v42, %v2338_v19 }
 0x2f7   :  { %v1554_v16 = vmul.f32 %v1748_v42, %v2340_v60 }
 0x2f8   :  { %v1623_v8 = vmax.f32 %v1615_v7, 0.0  ;;  %v1624_v31 = vmax.f32 %v1616_v58, 0.0  ;;  %v1585_v49 = vmul.f32 %v1574_v55, %v1553_v2 }
 0x2f9   :  { %v1586_v44 = vmul.f32 %v1574_v55, %v1554_v16  ;;  %v1750_v14 = vpop.eup %1749 }
 0x2fa   :  { %v1555_v15 = vmul.f32 %v1750_v14, %v2349_v30  ;;  %v1556_v0 = vmul.f32 %v1750_v14, %v2351_v39  ;;  %1631 = vst [vmem:[%s2411_s6 + $0x10] sm:$0xff] %v1623_v8  ;;  %1632 = vst.msk [vmem:[%s2411_s6 + $0x18] sm:$0xff] %vm1476_vm4, %v1624_v31  ;;  %v1617_v19 = vadd.f32 %v1606_v51, %v1585_v49 }
 0x2fb   :  { %v1618_v60 = vadd.f32 %v1606_v51, %v1586_v44 }
 0x2fc   :  { %v1587_v53 = vmul.f32 %v1579_v62, %v1555_v15  ;;  %v1588_v24 = vmul.f32 %v1579_v62, %v1556_v0  ;;  %v1625_v22 = vmax.f32 %v1617_v19, 0.0 }
 0x2fd   :  { %v1626_v33 = vmax.f32 %v1618_v60, 0.0 }
 0x2fe   :  { %v1619_v46 = vadd.f32 %v1611_v28, %v1587_v53  ;;  %v1620_v30 = vadd.f32 %v1611_v28, %v1588_v24  ;;  %1633 = vst [vmem:[%s2411_s6 + $0x20] sm:$0xff] %v1625_v22 }
 0x2ff   :  { %1634 = vst.msk [vmem:[%s2411_s6 + $0x28] sm:$0xff] %vm1476_vm4, %v1626_v33 }
 0x300   :  { %v1627_v39 = vmax.f32 %v1619_v46, 0.0  ;;  %v1628_v21 = vmax.f32 %v1620_v30, 0.0 }
 0x302   :  { %1635 = vst [vmem:[%s2411_s6 + $0x30] sm:$0xff] %v1627_v39  ;;  %1636 = vst.msk [vmem:[%s2411_s6 + $0x38] sm:$0xff] %vm1476_vm4, %v1628_v21 }

// kernel: _lambda_.9
= control target key start
LH: loop header
LB: loop body
LE: loop exit
PB: predicated region body
PF: predicated region fallthrough
CT: control target
= control target key end

     0   :  { %s2740_s29 = smov 127   ;;  %s2741_s30 = smov 123   ;;  %vm198_vm0 = vcmask 261120   ;;  %v2743_v32 = vmov 0   ;;  %vm1992_vm1 = vcmask 408576   ;;  %s3578_s0 = inlined_call_operand.vmem [shape: f32[4,32,62], index: 0, kind: input, shape index: {}]   ;;  %s3579_s1 = inlined_call_operand.vmem [shape: bf16[4,4,64,32], index: 1, kind: input, shape index: {}]   ;;  %s3580_s2 = inlined_call_operand.vmem [shape: f32[64,1], index: 2, kind: input, shape index: {}]   ;;  %s3581_s3 = inlined_call_operand.vmem [shape: f32[64,1], index: 3, kind: input, shape index: {}]   ;;  %s3582_s5 = inlined_call_operand.vmem [shape: f32[1,50], index: 5, kind: input, shape index: {}]   ;;  %s3583_s4 = inlined_call_operand.vmem [shape: f32[64,1], index: 4, kind: input, shape index: {}]   ;;  %s3584_s6 = inlined_call_operand.vmem [shape: f32[64,50], index: 6, kind: output, shape index: {}]  }
   0x1   :  { %v26_v0 = vld [vmem:[%s3578_s0 + $0x10] sm:$0xff]  ;;  %v27_v1 = vld [vmem:[%s3578_s0 + $0x18] sm:$0xff]  ;;  %v24_v2 = vld [vmem:[%s3578_s0] sm:$0xff]  ;;  %s2742_s17 = smov 122   ;;  %2659 = vset.pattern.permute.xlu1 %v2743_v32  ;;  %2658 = vset.pattern.permute.xlu0 %v2743_v32 }
   0x2   :  { %v169_v3 = vpack.c.bf16 %v27_v1, %v26_v0  ;;  %v25_v4 = vld [vmem:[%s3578_s0 + $0x8] sm:$0xff]  ;;  %v30_v6 = vld [vmem:[%s3578_s0 + $0x30] sm:$0xff]  ;;  %v31_v7 = vld [vmem:[%s3578_s0 + $0x38] sm:$0xff] }
   0x3   :  { %v168_v5 = vpack.c.bf16 %v25_v4, %v24_v2  ;;  %v28_v8 = vld [vmem:[%s3578_s0 + $0x20] sm:$0xff]  ;;  %v29_v9 = vld [vmem:[%s3578_s0 + $0x28] sm:$0xff]  ;;  %v2664_v13 = vld [vmem:[%s3579_s1 + $0x10] sm:$0xff]   ;;  %v2823_v14 = vpack.c.bf16 %v31_v7, %v30_v6 }
   0x4   :  { %194 = vrot.lane.b32.xlu0 %v169_v3, %s2740_s29  ;;  %395 = vrot.lane.b32.xlu1 %v169_v3, %s2741_s30  ;;  %v2660_v10 = vld [vmem:[%s3579_s1] sm:$0xff]   ;;  %v2661_v11 = vld [vmem:[%s3579_s1 + $0x8] sm:$0xff]   ;;  %v2825_v15 = vpack.c.bf16 %v29_v9, %v28_v8 }
   0x5   :  { %2474 = vmatprep.subr.bf16.mxu1 %v169_v3  ;;  %2478 = vmatprep.mubr.msk.bf16.mxu1 %vm198_vm0, %v2660_v10  ;;  %v2662_v12 = vld [vmem:[%s3579_s1 + $0x20] sm:$0xff]   ;;  %v2665_v16 = vld [vmem:[%s3579_s1 + $0x18] sm:$0xff]   ;;  %v34_v18 = vld [vmem:[%s3578_s0 + $0x50] sm:$0xff] }
   0x6   :  { %2475 = vmatpush3.bf16.msra.mxu1 %v169_v3  ;;  %2466 = vmatprep.mubr.msk.bf16.mxu0 %vm198_vm0, %v2662_v12  ;;  %v2668_v17 = vld [vmem:[%s3579_s1 + $0x60] sm:$0xff]   ;;  %v35_v19 = vld [vmem:[%s3578_s0 + $0x58] sm:$0xff]  ;;  %v33_v21 = vld [vmem:[%s3578_s0 + $0x48] sm:$0xff] }
   0x7   :  { %2476 = vmatprep.subr.bf16.mxu1 %v168_v5  ;;  %v32_v20 = vld [vmem:[%s3578_s0 + $0x40] sm:$0xff]  ;;  %v2861_v22 = vpack.c.bf16 %v35_v19, %v34_v18  ;;  %v38_v24 = vld [vmem:[%s3578_s0 + $0x70] sm:$0xff]  ;;  %v39_v25 = vld [vmem:[%s3578_s0 + $0x78] sm:$0xff] }
   0x8   :  { %192 = vrot.lane.b32.xlu0 %v168_v5, %s2740_s29  ;;  %506 = vrot.lane.b32.xlu1 %v169_v3, %s2742_s17  ;;  %v2863_v23 = vpack.c.bf16 %v33_v21, %v32_v20  ;;  %v36_v26 = vld [vmem:[%s3578_s0 + $0x60] sm:$0xff]  ;;  %v37_v27 = vld [vmem:[%s3578_s0 + $0x68] sm:$0xff]  ;;  %v2889_v28 = vpack.c.bf16 %v39_v25, %v38_v24 }
   0x9   :  { %v2891_v29 = vpack.c.bf16 %v37_v27, %v36_v26  ;;  %v1922_v33 = vld [vmem:[%s3580_s2 + $0x8] sm:$0xff]  ;;  %v1921_v34 = vld [vmem:[%s3580_s2] sm:$0xff]  ;;  %v1923_v37 = vld [vmem:[%s3580_s2 + $0x10] sm:$0xff] }
   0xa   :  { %2477 = vmatpush3.bf16.msra.mxu1 %v168_v5  ;;  %v2663_v38 = vld [vmem:[%s3579_s1 + $0x28] sm:$0xff]   ;;  %v1924_v39 = vld [vmem:[%s3580_s2 + $0x18] sm:$0xff]  ;;  %v2666_v40 = vld [vmem:[%s3579_s1 + $0x30] sm:$0xff]  }
   0xb   :  { %v1925_v43 = vld [vmem:[%s3580_s2 + $0x20] sm:$0xff]  ;;  %v1926_v44 = vld [vmem:[%s3580_s2 + $0x28] sm:$0xff]  ;;  %v2672_v47 = vld [vmem:[%s3579_s1 + $0x70] sm:$0xff]  }
   0xc   :  { %393 = vrot.lane.b32.xlu0 %v168_v5, %s2741_s30  ;;  %504 = vrot.lane.b32.xlu1 %v168_v5, %s2742_s17  ;;  %v2669_v45 = vld [vmem:[%s3579_s1 + $0x68] sm:$0xff]   ;;  %v2667_v48 = vld [vmem:[%s3579_s1 + $0x38] sm:$0xff]  }
   0xd   :  { %2479 = vmatmul.mubr.msk.bf16.vlgmr.msra.gmra.mxu1 %vm198_vm0, %v2661_v11  ;;  %v2670_v50 = vld [vmem:[%s3579_s1 + $0x40] sm:$0xff]   ;;  %v1927_v51 = vld [vmem:[%s3580_s2 + $0x30] sm:$0xff]  ;;  %v1928_v52 = vld [vmem:[%s3580_s2 + $0x38] sm:$0xff] }
   0xe   :  { %2482 = vmatprep.mubr.msk.bf16.mxu1 %vm198_vm0, %v2664_v13  ;;  %v2673_v54 = vld [vmem:[%s3579_s1 + $0x78] sm:$0xff]   ;;  %v2106_v55 = vld [vmem:[%s3581_s3 + $0x8] sm:$0xff]  ;;  %v2676_v56 = vld [vmem:[%s3579_s1 + $0xa0] sm:$0xff]  }
   0xf   :  { %v2105_v57 = vld [vmem:[%s3581_s3] sm:$0xff]  ;;  %v2671_v58 = vld [vmem:[%s3579_s1 + $0x48] sm:$0xff]   ;;  %v2674_v59 = vld [vmem:[%s3579_s1 + $0x50] sm:$0xff]  }
  0x10   :  { %726 = vrot.lane.b32.xlu0 %v2823_v14, %s2740_s29  ;;  %724 = vrot.lane.b32.xlu1 %v2825_v15, %s2740_s29  ;;  %v2107_v60 = vld [vmem:[%s3581_s3 + $0x10] sm:$0xff]  ;;  %v2108_v62 = vld [vmem:[%s3581_s3 + $0x18] sm:$0xff] }
  0x11   :  { %v2677_v63 = vld [vmem:[%s3579_s1 + $0xa8] sm:$0xff]   ;;  %v2109_v0 = vld [vmem:[%s3581_s3 + $0x20] sm:$0xff]  ;;  %v2680_v1 = vld [vmem:[%s3579_s1 + $0xb0] sm:$0xff]  }
  0x12   :  { %v2675_v2 = vld [vmem:[%s3579_s1 + $0x58] sm:$0xff]   ;;  %v2678_v5 = vld [vmem:[%s3579_s1 + $0x80] sm:$0xff]   ;;  %v2111_v6 = vld [vmem:[%s3581_s3 + $0x30] sm:$0xff] }
  0x13   :  { %v2110_v7 = vld [vmem:[%s3581_s3 + $0x28] sm:$0xff]  ;;  %v2681_v9 = vld [vmem:[%s3579_s1 + $0xb8] sm:$0xff]   ;;  %v2684_v10 = vld [vmem:[%s3579_s1 + $0xe0] sm:$0xff]  }
  0x14   :  { %837 = vrot.lane.b32.xlu0 %v2823_v14, %s2741_s30  ;;  %948 = vrot.lane.b32.xlu1 %v2823_v14, %s2742_s17  ;;  %v2679_v11 = vld [vmem:[%s3579_s1 + $0x88] sm:$0xff]   ;;  %v2682_v12 = vld [vmem:[%s3579_s1 + $0x90] sm:$0xff]  }
  0x15   :  { %2483 = vmatmul.mubr.msk.bf16.gmra.mxu1 %vm198_vm0, %v2665_v16  ;;  %v2685_v13 = vld [vmem:[%s3579_s1 + $0xe8] sm:$0xff]   ;;  %v2689_v19 = vld [vmem:[%s3579_s1 + $0xf8] sm:$0xff]   ;;  %v2692_v20 = vld [vmem:[%s3579_s1 + $0x120] sm:$0xff]  }
  0x16   :  { %2502 = vmatprep.mubr.msk.bf16.mxu1 %vm198_vm0, %v2668_v17  ;;  %v2686_v17 = vld [vmem:[%s3579_s1 + $0xc0] sm:$0xff]   ;;  %v2687_v21 = vld [vmem:[%s3579_s1 + $0xc8] sm:$0xff]   ;;  %v2690_v24 = vld [vmem:[%s3579_s1 + $0xd0] sm:$0xff]  }
  0x17   :  { %v2693_v26 = vld [vmem:[%s3579_s1 + $0x128] sm:$0xff]   ;;  %v2696_v27 = vld [vmem:[%s3579_s1 + $0x130] sm:$0xff]  }
  0x18   :  { %835 = vrot.lane.b32.xlu0 %v2825_v15, %s2741_s30  ;;  %946 = vrot.lane.b32.xlu1 %v2825_v15, %s2742_s17 }
  0x1c   :  { %1168 = vrot.lane.b32.xlu0 %v2861_v22, %s2740_s29  ;;  %1166 = vrot.lane.b32.xlu1 %v2863_v23, %s2740_s29 }
  0x20   :  { %1279 = vrot.lane.b32.xlu0 %v2861_v22, %s2741_s30  ;;  %1390 = vrot.lane.b32.xlu1 %v2861_v22, %s2742_s17 }
  0x24   :  { %1277 = vrot.lane.b32.xlu0 %v2863_v23, %s2741_s30  ;;  %1388 = vrot.lane.b32.xlu1 %v2863_v23, %s2742_s17 }
  0x28   :  { %1610 = vrot.lane.b32.xlu0 %v2889_v28, %s2740_s29  ;;  %1608 = vrot.lane.b32.xlu1 %v2891_v29, %s2740_s29 }
  0x2c   :  { %1721 = vrot.lane.b32.xlu0 %v2889_v28, %s2741_s30  ;;  %1832 = vrot.lane.b32.xlu1 %v2889_v28, %s2742_s17 }
  0x30   :  { %1719 = vrot.lane.b32.xlu0 %v2891_v29, %s2741_s30  ;;  %1830 = vrot.lane.b32.xlu1 %v2891_v29, %s2742_s17 }
  0x34   :  { %1936 = vperm.xlu1 %2659, %v1922_v33   ;;  %1931 = vperm.xlu0 %2658, %v1921_v34   ;;  %v2700_v34 = vld [vmem:[%s3579_s1 + $0x160] sm:$0xff]  }
  0x38   :  { %1941 = vperm.xlu1 %2659, %v1923_v37   ;;  %1946 = vperm.xlu0 %2658, %v1924_v39   ;;  %v2701_v37 = vld [vmem:[%s3579_s1 + $0x168] sm:$0xff]   ;;  %v2699_v39 = vld [vmem:[%s3579_s1 + $0x118] sm:$0xff]  }
  0x3c   :  { %1951 = vperm.xlu1 %2659, %v1925_v43   ;;  %1956 = vperm.xlu0 %2658, %v1926_v44   ;;  %v2705_v43 = vld [vmem:[%s3579_s1 + $0x178] sm:$0xff]   ;;  %v2708_v44 = vld [vmem:[%s3579_s1 + $0x1a0] sm:$0xff]  }
  0x40   :  { %1961 = vperm.xlu1 %2659, %v1927_v51   ;;  %1966 = vperm.xlu0 %2658, %v1928_v52   ;;  %v2713_v52 = vld [vmem:[%s3579_s1 + $0x1b8] sm:$0xff]  }
  0x44   :  { %2120 = vperm.xlu1 %2659, %v2106_v55   ;;  %2115 = vperm.xlu0 %2658, %v2105_v57   ;;  %v2720_v57 = vld [vmem:[%s3579_s1 + $0x1f0] sm:$0xff]  }
  0x48   :  { %2125 = vperm.xlu1 %2659, %v2107_v60   ;;  %2130 = vperm.xlu0 %2658, %v2108_v62   ;;  %v2722_v60 = vld [vmem:[%s3579_s1 + $0x1f8] sm:$0xff]   ;;  %v2721_v62 = vld [vmem:[%s3579_s1 + $0x1d0] sm:$0xff]  }
  0x4c   :  { %2135 = vperm.xlu1 %2659, %v2109_v0   ;;  %2140 = vperm.xlu0 %2658, %v2110_v7  }
  0x50   :  { %2145 = vperm.xlu1 %2659, %v2111_v6  }
  0x76   :  { %v195_v30 = vpop.permute.xlu0 %194  ;;  %v396_v31 = vpop.permute.xlu1 %395 }
  0x77   :  { %2462 = vmatprep.subr.bf16.mxu0 %v195_v30 }
  0x78   :  { %2463 = vmatpush3.bf16.msra.mxu0 %v195_v30  ;;  %v2691_v30 = vld [vmem:[%s3579_s1 + $0xd8] sm:$0xff]  }
  0x7a   :  { %v193_v35 = vpop.permute.xlu0 %192  ;;  %v507_v36 = vpop.permute.xlu1 %506 }
  0x7b   :  { %2464 = vmatprep.subr.bf16.mxu0 %v193_v35  ;;  %2498 = vmatprep.subr.bf16.mxu1 %v507_v36 }
  0x7c   :  { %2465 = vmatpush3.bf16.msra.mxu0 %v193_v35  ;;  %2499 = vmatpush3.bf16.msra.mxu1 %v507_v36  ;;  %v2695_v35 = vld [vmem:[%s3579_s1 + $0x108] sm:$0xff]   ;;  %v2698_v36 = vld [vmem:[%s3579_s1 + $0x110] sm:$0xff]  }
  0x7d   :  { %2486 = vmatprep.subr.bf16.mxu0 %v396_v31 }
  0x7e   :  { %v394_v41 = vpop.permute.xlu0 %393  ;;  %v505_v42 = vpop.permute.xlu1 %504 }
  0x7f   :  { %2467 = vmatmul.mubr.msk.bf16.vlgmr.msra.gmra.mxu0 %vm198_vm0, %v2663_v38  ;;  %2500 = vmatprep.subr.bf16.mxu1 %v505_v42  ;;  %v2704_v38 = vld [vmem:[%s3579_s1 + $0x170] sm:$0xff]  }
  0x80   :  { %2487 = vmatpush3.bf16.msra.mxu0 %v396_v31  ;;  %2470 = vmatprep.mubr.msk.bf16.mxu0 %vm198_vm0, %v2666_v40 }
  0x81   :  { %2488 = vmatprep.subr.bf16.mxu0 %v394_v41  ;;  %2501 = vmatpush3.bf16.msra.mxu1 %v505_v42 }
  0x82   :  { %v727_v46 = vpop.permute.xlu0 %726  ;;  %v725_v49 = vpop.permute.xlu1 %724 }
  0x83   :  { %2522 = vmatprep.subr.bf16.mxu1 %v727_v46 }
  0x84   :  { %2489 = vmatpush3.bf16.msra.mxu0 %v394_v41  ;;  %2503 = vmatmul.mubr.msk.bf16.vlgmr.msra.gmra.mxu1 %vm198_vm0, %v2669_v45  ;;  %v2702_v41 = vld [vmem:[%s3579_s1 + $0x140] sm:$0xff]   ;;  %v2703_v45 = vld [vmem:[%s3579_s1 + $0x148] sm:$0xff]  }
  0x85   :  { %2510 = vmatprep.subr.bf16.mxu0 %v2823_v14  ;;  %2523 = vmatpush3.bf16.msra.mxu1 %v727_v46  ;;  %v2706_v46 = vld [vmem:[%s3579_s1 + $0x150] sm:$0xff]  }
  0x86   :  { %2506 = vmatprep.mubr.msk.bf16.mxu1 %vm198_vm0, %v2672_v47  ;;  %2524 = vmatprep.subr.bf16.mxu1 %v725_v49  ;;  %v949_v53 = vpop.permute.xlu1 %948  ;;  %v838_v61 = vpop.permute.xlu0 %837  ;;  %v2709_v47 = vld [vmem:[%s3579_s1 + $0x1a8] sm:$0xff]  }
  0x87   :  { %2471 = vmatmul.mubr.msk.bf16.gmra.mxu0 %vm198_vm0, %v2667_v48 }
  0x88   :  { %2490 = vmatprep.mubr.msk.bf16.mxu0 %vm198_vm0, %v2670_v50  ;;  %v2707_v50 = vld [vmem:[%s3579_s1 + $0x158] sm:$0xff]  }
  0x89   :  { %2525 = vmatpush3.bf16.msra.mxu1 %v725_v49  ;;  %v2712_v49 = vld [vmem:[%s3579_s1 + $0x1b0] sm:$0xff]  }
  0x8a   :  { %2546 = vmatprep.subr.bf16.mxu1 %v949_v53  ;;  %v836_v3 = vpop.permute.xlu0 %835  ;;  %v947_v4 = vpop.permute.xlu1 %946 }
  0x8c   :  { %2507 = vmatmul.mubr.msk.bf16.gmra.mxu1 %vm198_vm0, %v2673_v54  ;;  %v2714_v54 = vld [vmem:[%s3579_s1 + $0x190] sm:$0xff]  }
  0x8d   :  { %2526 = vmatprep.mubr.msk.bf16.mxu1 %vm198_vm0, %v2676_v56  ;;  %v2717_v56 = vld [vmem:[%s3579_s1 + $0x1e8] sm:$0xff]  }
  0x8e   :  { %v1169_v8 = vpop.permute.xlu0 %1168  ;;  %v1167_v16 = vpop.permute.xlu1 %1166 }
  0x8f   :  { %2491 = vmatmul.mubr.msk.bf16.vlgmr.msra.gmra.mxu0 %vm198_vm0, %v2671_v58  ;;  %v2715_v58 = vld [vmem:[%s3579_s1 + $0x198] sm:$0xff]  }
  0x90   :  { %2511 = vmatpush3.bf16.msra.mxu0 %v2823_v14  ;;  %2494 = vmatprep.mubr.msk.bf16.mxu0 %vm198_vm0, %v2674_v59  ;;  %v2688_v14 = vld [vmem:[%s3579_s1 + $0xf0] sm:$0xff]   ;;  %v2718_v59 = vld [vmem:[%s3579_s1 + $0x1c0] sm:$0xff]  }
  0x91   :  { %2512 = vmatprep.subr.bf16.mxu0 %v2825_v15 }
  0x92   :  { %v1391_v18 = vpop.permute.xlu1 %1390  ;;  %v1280_v25 = vpop.permute.xlu0 %1279 }
  0x94   :  { %2513 = vmatpush3.bf16.msra.mxu0 %v2825_v15  ;;  %2527 = vmatmul.mubr.msk.bf16.vlgmr.msra.gmra.mxu1 %vm198_vm0, %v2677_v63  ;;  %v2683_v15 = vld [vmem:[%s3579_s1 + $0x98] sm:$0xff]  }
  0x95   :  { %2534 = vmatprep.subr.bf16.mxu0 %v838_v61  ;;  %2547 = vmatpush3.bf16.msra.mxu1 %v949_v53  ;;  %v2711_v53 = vld [vmem:[%s3579_s1 + $0x188] sm:$0xff]   ;;  %v2723_v63 = vld [vmem:[%s3579_s1 + $0x1d8] sm:$0xff]  }
  0x96   :  { %2530 = vmatprep.mubr.msk.bf16.mxu1 %vm198_vm0, %v2680_v1  ;;  %2548 = vmatprep.subr.bf16.mxu1 %v947_v4  ;;  %v1278_v31 = vpop.permute.xlu0 %1277  ;;  %v1389_v32 = vpop.permute.xlu1 %1388 }
  0x97   :  { %2495 = vmatmul.mubr.msk.bf16.gmra.mxu0 %vm198_vm0, %v2675_v2 }
  0x98   :  { %2514 = vmatprep.mubr.msk.bf16.mxu0 %vm198_vm0, %v2678_v5 }
  0x99   :  { %2549 = vmatpush3.bf16.msra.mxu1 %v947_v4 }
  0x9a   :  { %2570 = vmatprep.subr.bf16.mxu1 %v1169_v8  ;;  %v1611_v33 = vpop.permute.xlu0 %1610  ;;  %v1609_v40 = vpop.permute.xlu1 %1608 }
  0x9c   :  { %2531 = vmatmul.mubr.msk.bf16.gmra.mxu1 %vm198_vm0, %v2681_v9 }
  0x9d   :  { %2550 = vmatprep.mubr.msk.bf16.mxu1 %vm198_vm0, %v2684_v10 }
  0x9e   :  { %v1833_v42 = vpop.permute.xlu1 %1832  ;;  %v1722_v48 = vpop.permute.xlu0 %1721 }
  0x9f   :  { %2515 = vmatmul.mubr.msk.bf16.vlgmr.msra.gmra.mxu0 %vm198_vm0, %v2679_v11 }
  0xa0   :  { %2535 = vmatpush3.bf16.msra.mxu0 %v838_v61  ;;  %2518 = vmatprep.mubr.msk.bf16.mxu0 %vm198_vm0, %v2682_v12  ;;  %v2719_v61 = vld [vmem:[%s3579_s1 + $0x1c8] sm:$0xff]  }
  0xa1   :  { %2536 = vmatprep.subr.bf16.mxu0 %v836_v3 }
  0xa2   :  { %v1831_v51 = vpop.permute.xlu1 %1830  ;;  %v1720_v55 = vpop.permute.xlu0 %1719 }
  0xa4   :  { %2537 = vmatpush3.bf16.msra.mxu0 %v836_v3  ;;  %2551 = vmatmul.mubr.msk.bf16.vlgmr.msra.gmra.mxu1 %vm198_vm0, %v2685_v13 }
  0xa5   :  { %2558 = vmatprep.subr.bf16.mxu0 %v2861_v22  ;;  %2571 = vmatpush3.bf16.msra.mxu1 %v1169_v8 }
  0xa6   :  { %2554 = vmatprep.mubr.msk.bf16.mxu1 %vm198_vm0, %v2688_v14  ;;  %2572 = vmatprep.subr.bf16.mxu1 %v1167_v16 }
  0xa7   :  { %2519 = vmatmul.mubr.msk.bf16.gmra.mxu0 %vm198_vm0, %v2683_v15 }
  0xa8   :  { %2538 = vmatprep.mubr.msk.bf16.mxu0 %vm198_vm0, %v2686_v17 }
  0xa9   :  { %2573 = vmatpush3.bf16.msra.mxu1 %v1167_v16 }
  0xaa   :  { %2594 = vmatprep.subr.bf16.mxu1 %v1391_v18 }
  0xac   :  { %2555 = vmatmul.mubr.msk.bf16.gmra.mxu1 %vm198_vm0, %v2689_v19 }
  0xad   :  { %2574 = vmatprep.mubr.msk.bf16.mxu1 %vm198_vm0, %v2692_v20 }
  0xaf   :  { %2539 = vmatmul.mubr.msk.bf16.vlgmr.msra.gmra.mxu0 %vm198_vm0, %v2687_v21 }
  0xb0   :  { %2559 = vmatpush3.bf16.msra.mxu0 %v2861_v22  ;;  %2542 = vmatprep.mubr.msk.bf16.mxu0 %vm198_vm0, %v2690_v24  ;;  %v2694_v22 = vld [vmem:[%s3579_s1 + $0x100] sm:$0xff]  }
  0xb1   :  { %2560 = vmatprep.subr.bf16.mxu0 %v2863_v23 }
  0xb4   :  { %2561 = vmatpush3.bf16.msra.mxu0 %v2863_v23  ;;  %2575 = vmatmul.mubr.msk.bf16.vlgmr.msra.gmra.mxu1 %vm198_vm0, %v2693_v26  ;;  %v2697_v23 = vld [vmem:[%s3579_s1 + $0x138] sm:$0xff]  }
  0xb5   :  { %2582 = vmatprep.subr.bf16.mxu0 %v1280_v25  ;;  %2595 = vmatpush3.bf16.msra.mxu1 %v1391_v18 }
  0xb6   :  { %2578 = vmatprep.mubr.msk.bf16.mxu1 %vm198_vm0, %v2696_v27  ;;  %2596 = vmatprep.subr.bf16.mxu1 %v1389_v32 }
  0xb7   :  { %2543 = vmatmul.mubr.msk.bf16.gmra.mxu0 %vm198_vm0, %v2691_v30 }
  0xb8   :  { %2562 = vmatprep.mubr.msk.bf16.mxu0 %vm198_vm0, %v2694_v22 }
  0xb9   :  { %2597 = vmatpush3.bf16.msra.mxu1 %v1389_v32 }
  0xba   :  { %2618 = vmatprep.subr.bf16.mxu1 %v1611_v33 }
  0xbc   :  { %2579 = vmatmul.mubr.msk.bf16.gmra.mxu1 %vm198_vm0, %v2697_v23 }
  0xbd   :  { %2598 = vmatprep.mubr.msk.bf16.mxu1 %vm198_vm0, %v2700_v34 }
  0xbf   :  { %2563 = vmatmul.mubr.msk.bf16.vlgmr.msra.gmra.mxu0 %vm198_vm0, %v2695_v35 }
  0xc0   :  { %2583 = vmatpush3.bf16.msra.mxu0 %v1280_v25  ;;  %2566 = vmatprep.mubr.msk.bf16.mxu0 %vm198_vm0, %v2698_v36 }
  0xc1   :  { %2584 = vmatprep.subr.bf16.mxu0 %v1278_v31 }
  0xc4   :  { %2585 = vmatpush3.bf16.msra.mxu0 %v1278_v31  ;;  %2599 = vmatmul.mubr.msk.bf16.vlgmr.msra.gmra.mxu1 %vm198_vm0, %v2701_v37 }
  0xc5   :  { %2606 = vmatprep.subr.bf16.mxu0 %v2889_v28  ;;  %2619 = vmatpush3.bf16.msra.mxu1 %v1611_v33 }
  0xc6   :  { %2602 = vmatprep.mubr.msk.bf16.mxu1 %vm198_vm0, %v2704_v38  ;;  %2620 = vmatprep.subr.bf16.mxu1 %v1609_v40 }
  0xc7   :  { %2567 = vmatmul.mubr.msk.bf16.gmra.mxu0 %vm198_vm0, %v2699_v39 }
  0xc8   :  { %2586 = vmatprep.mubr.msk.bf16.mxu0 %vm198_vm0, %v2702_v41 }
  0xc9   :  { %2621 = vmatpush3.bf16.msra.mxu1 %v1609_v40 }
  0xca   :  { %2642 = vmatprep.subr.bf16.mxu1 %v1833_v42 }
  0xcc   :  { %2603 = vmatmul.mubr.msk.bf16.gmra.mxu1 %vm198_vm0, %v2705_v43 }
  0xcd   :  { %2622 = vmatprep.mubr.msk.bf16.mxu1 %vm198_vm0, %v2708_v44  ;;  %v2480_v0 = vpop.f32.mrf.mxu1 }
  0xcf   :  { %2587 = vmatmul.mubr.msk.bf16.vlgmr.msra.gmra.mxu0 %vm198_vm0, %v2703_v45  ;;  %v342_v1 = vpop.f32.mrf.mxu1 }
  0xd0   :  { %2607 = vmatpush3.bf16.msra.mxu0 %v2889_v28  ;;  %2590 = vmatprep.mubr.msk.bf16.mxu0 %vm198_vm0, %v2706_v46  ;;  %v2710_v28 = vld [vmem:[%s3579_s1 + $0x180] sm:$0xff]  }
  0xd1   :  { %2608 = vmatprep.subr.bf16.mxu0 %v2891_v29  ;;  %v2481_v2 = vpop.f32.mrf.mxu1 }
  0xd3   :  { %v345_v3 = vpop.f32.mrf.mxu1 }
  0xd4   :  { %2609 = vmatpush3.bf16.msra.mxu0 %v2891_v29  ;;  %2623 = vmatmul.mubr.msk.bf16.vlgmr.msra.gmra.mxu1 %vm198_vm0, %v2709_v47  ;;  %v2716_v29 = vld [vmem:[%s3579_s1 + $0x1e0] sm:$0xff]  }
  0xd5   :  { %2630 = vmatprep.subr.bf16.mxu0 %v1722_v48  ;;  %2643 = vmatpush3.bf16.msra.mxu1 %v1833_v42  ;;  %v2484_v4 = vpop.f32.mrf.mxu1 }
  0xd6   :  { %2626 = vmatprep.mubr.msk.bf16.mxu1 %vm198_vm0, %v2712_v49  ;;  %2644 = vmatprep.subr.bf16.mxu1 %v1831_v51 }
  0xd7   :  { %2591 = vmatmul.mubr.msk.bf16.gmra.mxu0 %vm198_vm0, %v2707_v50  ;;  %v358_v5 = vpop.f32.mrf.mxu1 }
  0xd8   :  { %2610 = vmatprep.mubr.msk.bf16.mxu0 %vm198_vm0, %v2710_v28 }
  0xd9   :  { %2645 = vmatpush3.bf16.msra.mxu1 %v1831_v51  ;;  %v2485_v6 = vpop.f32.mrf.mxu1 }
  0xdb   :  { %v361_v8 = vpop.f32.mrf.mxu1 }
  0xdc   :  { %2627 = vmatmul.mubr.msk.bf16.gmra.mxu1 %vm198_vm0, %v2713_v52 }
  0xdd   :  { %2646 = vmatprep.mubr.msk.bf16.mxu1 %vm198_vm0, %v2716_v29 }
  0xdf   :  { %2611 = vmatmul.mubr.msk.bf16.vlgmr.msra.gmra.mxu0 %vm198_vm0, %v2711_v53 }
  0xe0   :  { %2631 = vmatpush3.bf16.msra.mxu0 %v1722_v48  ;;  %2614 = vmatprep.mubr.msk.bf16.mxu0 %vm198_vm0, %v2714_v54 }
  0xe1   :  { %2632 = vmatprep.subr.bf16.mxu0 %v1720_v55 }
  0xe4   :  { %2633 = vmatpush3.bf16.msra.mxu0 %v1720_v55  ;;  %2647 = vmatmul.mubr.msk.bf16.vlgmr.msra.gmra.mxu1 %vm198_vm0, %v2717_v56 }
  0xe5   :  { %2650 = vmatprep.mubr.msk.bf16.mxu1 %vm198_vm0, %v2720_v57 }
  0xe7   :  { %2615 = vmatmul.mubr.msk.bf16.gmra.mxu0 %vm198_vm0, %v2715_v58 }
  0xe8   :  { %2634 = vmatprep.mubr.msk.bf16.mxu0 %vm198_vm0, %v2718_v59 }
  0xec   :  { %2651 = vmatmul.mubr.msk.bf16.gmra.mxu1 %vm198_vm0, %v2722_v60 }
  0xef   :  { %2635 = vmatmul.mubr.msk.bf16.vlgmr.msra.gmra.mxu0 %vm198_vm0, %v2719_v61 }
  0xf0   :  { %2638 = vmatprep.mubr.msk.bf16.mxu0 %vm198_vm0, %v2721_v62 }
  0xf7   :  { %2639 = vmatmul.mubr.msk.bf16.gmra.mxu0 %vm198_vm0, %v2723_v63 }
 0x13f   :  { %v2468_v7 = vpop.f32.mrf.mxu0 }
 0x140   :  { %v351_v21 = vadd.f32 %v2480_v0, %v2468_v7 }
 0x141   :  { %v245_v9 = vpop.f32.mrf.mxu0 }
 0x142   :  { %v343_v27 = vadd.f32 %v342_v1, %v245_v9 }
 0x143   :  { %v2469_v10 = vpop.f32.mrf.mxu0 }
 0x144   :  { %v2504_v11 = vpop.f32.mrf.mxu1  ;;  %v354_v22 = vadd.f32 %v2481_v2, %v2469_v10 }
 0x145   :  { %v248_v12 = vpop.f32.mrf.mxu0 }
 0x146   :  { %v556_v13 = vpop.f32.mrf.mxu1  ;;  %v346_v36 = vadd.f32 %v345_v3, %v248_v12 }
 0x147   :  { %v2472_v14 = vpop.f32.mrf.mxu0 }
 0x148   :  { %v2505_v15 = vpop.f32.mrf.mxu1  ;;  %v367_v41 = vadd.f32 %v2484_v4, %v2472_v14 }
 0x149   :  { %v261_v16 = vpop.f32.mrf.mxu0 }
 0x14a   :  { %v559_v17 = vpop.f32.mrf.mxu1  ;;  %v359_v46 = vadd.f32 %v358_v5, %v261_v16 }
 0x14b   :  { %v2473_v18 = vpop.f32.mrf.mxu0 }
 0x14c   :  { %v2508_v19 = vpop.f32.mrf.mxu1  ;;  %v370_v51 = vadd.f32 %v2485_v6, %v2473_v18 }
 0x14d   :  { %v264_v20 = vpop.f32.mrf.mxu0 }
 0x14e   :  { %v362_v24 = vadd.f32 %v361_v8, %v264_v20  ;;  %v572_v25 = vpop.f32.mrf.mxu1 }
 0x14f   :  { %v2492_v26 = vpop.f32.mrf.mxu0 }
 0x150   :  { %v478_v30 = vadd.f32 %v2492_v26, %v351_v21  ;;  %v2509_v31 = vpop.f32.mrf.mxu1 }
 0x151   :  { %v445_v32 = vpop.f32.mrf.mxu0 }
 0x152   :  { %v476_v33 = vadd.f32 %v445_v32, %v343_v27  ;;  %v575_v23 = vpop.f32.mrf.mxu1  ;;  %v3194_v34 = vadd.f32 %v2504_v11, %v478_v30 }
 0x153   :  { %v2493_v35 = vpop.f32.mrf.mxu0 }
 0x154   :  { %v479_v37 = vadd.f32 %v2493_v35, %v354_v22  ;;  %v3196_v38 = vpop.f32.mrf.mxu1  ;;  %v3198_v39 = vadd.f32 %v556_v13, %v476_v33 }
 0x155   :  { %v448_v40 = vpop.f32.mrf.mxu0 }
 0x156   :  { %v477_v42 = vadd.f32 %v448_v40, %v346_v36  ;;  %v3200_v43 = vpop.f32.mrf.mxu1  ;;  %v3202_v44 = vadd.f32 %v2505_v15, %v479_v37 }
 0x157   :  { %v2496_v45 = vpop.f32.mrf.mxu0 }
 0x158   :  { %v482_v47 = vadd.f32 %v2496_v45, %v367_v41  ;;  %v3204_v48 = vpop.f32.mrf.mxu1  ;;  %v3206_v49 = vadd.f32 %v559_v17, %v477_v42 }
 0x159   :  { %v461_v50 = vpop.f32.mrf.mxu0 }
 0x15a   :  { %v480_v28 = vadd.f32 %v461_v50, %v359_v46  ;;  %v3208_v52 = vpop.f32.mrf.mxu1  ;;  %v3210_v29 = vadd.f32 %v2508_v19, %v482_v47 }
 0x15b   :  { %v2497_v53 = vpop.f32.mrf.mxu0 }
 0x15c   :  { %v483_v54 = vadd.f32 %v2497_v53, %v370_v51  ;;  %v3212_v55 = vpop.f32.mrf.mxu1  ;;  %v591_v56 = vadd.f32 %v572_v25, %v480_v28 }
 0x15d   :  { %v464_v57 = vpop.f32.mrf.mxu0 }
 0x15e   :  { %v481_v58 = vadd.f32 %v464_v57, %v362_v24  ;;  %v792_v59 = vpop.f32.mrf.mxu1  ;;  %v3214_v60 = vadd.f32 %v2509_v31, %v483_v54 }
 0x15f   :  { %v2516_v61 = vpop.f32.mrf.mxu0 }
 0x160   :  { %v3216_v62 = vpop.f32.mrf.mxu1  ;;  %v3218_v63 = vadd.f32 %v575_v23, %v481_v58 }
 0x161   :  { %v663_v0 = vpop.f32.mrf.mxu0 }
 0x162   :  { %v3220_v1 = vpop.f32.mrf.mxu1 }
 0x163   :  { %v2517_v2 = vpop.f32.mrf.mxu0 }
 0x164   :  { %v3222_v3 = vpop.f32.mrf.mxu1 }
 0x165   :  { %v666_v4 = vpop.f32.mrf.mxu0 }
 0x166   :  { %v3224_v5 = vpop.f32.mrf.mxu1 }
 0x167   :  { %v2520_v6 = vpop.f32.mrf.mxu0 }
 0x168   :  { %v3226_v7 = vpop.f32.mrf.mxu1 }
 0x169   :  { %v679_v8 = vpop.f32.mrf.mxu0 }
 0x16a   :  { %v698_v9 = vadd.f32 %v679_v8, %v591_v56  ;;  %v3228_v10 = vpop.f32.mrf.mxu1 }
 0x16b   :  { %v3230_v11 = vpop.f32.mrf.mxu0 }
 0x16c   :  { %v3232_v12 = vpop.f32.mrf.mxu1  ;;  %v3234_v13 = vadd.f32 %v792_v59, %v698_v9  ;;  %v696_v9 = vadd.f32 %v2516_v61, %v3194_v34 }
 0x16d   :  { %v3236_v14 = vpop.f32.mrf.mxu0 }
 0x16e   :  { %v3238_v15 = vpop.f32.mrf.mxu1 }
 0x16f   :  { %v2540_v16 = vpop.f32.mrf.mxu0 }
 0x170   :  { %v3240_v17 = vpop.f32.mrf.mxu1 }
 0x171   :  { %v887_v18 = vpop.f32.mrf.mxu0 }
 0x172   :  { %v3242_v19 = vpop.f32.mrf.mxu1 }
 0x173   :  { %v2541_v20 = vpop.f32.mrf.mxu0 }
 0x174   :  { %v3244_v21 = vpop.f32.mrf.mxu1 }
 0x175   :  { %v890_v24 = vpop.f32.mrf.mxu0 }
 0x176   :  { %v3246_v25 = vpop.f32.mrf.mxu1 }
 0x177   :  { %v2544_v26 = vpop.f32.mrf.mxu0 }
 0x178   :  { %v3248_v27 = vpop.f32.mrf.mxu1 }
 0x179   :  { %v903_v30 = vpop.f32.mrf.mxu0 }
 0x17a   :  { %v3250_v31 = vpop.f32.mrf.mxu1 }
 0x17b   :  { %v3252_v32 = vpop.f32.mrf.mxu0 }
 0x17c   :  { %v3254_v22 = vpop.f32.mrf.mxu1 }
 0x17d   :  { %v3256_v33 = vpop.f32.mrf.mxu0 }
 0x17e   :  { %v3258_v23 = vpop.f32.mrf.mxu1 }
 0x17f   :  { %3585 = vst [vmem:[#allocation2_spill] sm:$0xff] %v3258_v23  ;;  %v2564_v35 = vpop.f32.mrf.mxu0 }
 0x180   :  { %v3260_v36 = vpop.f32.mrf.mxu1 }
 0x181   :  { %3586 = vst [vmem:[#allocation3_spill] sm:$0xff] %v3260_v36  ;;  %v1105_v37 = vpop.f32.mrf.mxu0 }
 0x182   :  { %v3262_v40 = vpop.f32.mrf.mxu1 }
 0x183   :  { %3587 = vst [vmem:[#allocation4_spill] sm:$0xff] %v3262_v40  ;;  %v2565_v41 = vpop.f32.mrf.mxu0 }
 0x184   :  { %v3264_v42 = vpop.f32.mrf.mxu1 }
 0x185   :  { %v1108_v45 = vpop.f32.mrf.mxu0 }
 0x186   :  { %v3266_v46 = vpop.f32.mrf.mxu1 }
 0x187   :  { %3588 = vst [vmem:[#allocation5_spill] sm:$0xff] %v3266_v46  ;;  %v3268_v47 = vpop.f32.mrf.mxu0 }
 0x188   :  { %v3270_v50 = vpop.f32.mrf.mxu1 }
 0x189   :  { %3589 = vst [vmem:[#allocation6_spill] sm:$0xff] %v3270_v50  ;;  %v3272_v51 = vpop.f32.mrf.mxu0  ;;  %v694_v50 = vadd.f32 %v663_v0, %v3198_v39  ;;  %v700_v39 = vadd.f32 %v2520_v6, %v3210_v29 }
 0x18a   :  { %v3274_v28 = vpop.f32.mrf.mxu1 }
 0x18b   :  { %3590 = vst [vmem:[#allocation7_spill] sm:$0xff] %v3274_v28  ;;  %v3276_v53 = vpop.f32.mrf.mxu0  ;;  %v807_v61 = vadd.f32 %v3200_v43, %v694_v50  ;;  %v701_v43 = vadd.f32 %v3230_v11, %v3214_v60  ;;  %v813_v29 = vadd.f32 %v3212_v55, %v700_v39  ;;  %v922_v55 = vadd.f32 %v903_v30, %v3234_v13 }
 0x18c   :  { %v3278_v54 = vpop.f32.mrf.mxu1 }
 0x18d   :  { %3591 = vst [vmem:[#allocation8_spill] sm:$0xff] %v3278_v54  ;;  %v3280_v56 = vpop.f32.mrf.mxu0  ;;  %v697_v54 = vadd.f32 %v2517_v2, %v3202_v44  ;;  %v814_v60 = vadd.f32 %v3216_v62, %v701_v43  ;;  %v3600_v43 = vld [vmem:[#allocation2_spill] sm:$0xff] }
 0x18e   :  { %3592 = vst [vmem:[#allocation9_spill] sm:$0xff] %v3280_v56  ;;  %v3282_v57 = vpop.f32.mrf.mxu1  ;;  %v809_v56 = vadd.f32 %v3196_v38, %v696_v9 }
 0x18f   :  { %3593 = vst [vmem:[#allocation10_spill] sm:$0xff] %v3282_v57  ;;  %v2588_v58 = vpop.f32.mrf.mxu0  ;;  %v810_v44 = vadd.f32 %v3204_v48, %v697_v54 }
 0x190   :  { %v3284_v59 = vpop.f32.mrf.mxu1  ;;  %v920_v34 = vadd.f32 %v2540_v16, %v809_v56 }
 0x191   :  { %3594 = vst [vmem:[#allocation11_spill] sm:$0xff] %v3284_v59  ;;  %v1329_v8 = vpop.f32.mrf.mxu0  ;;  %v695_v59 = vadd.f32 %v666_v4, %v3206_v49  ;;  %v921_v9 = vadd.f32 %v2541_v20, %v810_v44  ;;  %v924_v20 = vadd.f32 %v2544_v26, %v813_v29 }
 0x192   :  { %v3287_v40 = vpop.f32.mrf.mxu1  ;;  %v1031_v49 = vadd.f32 %v3222_v3, %v920_v34 }
 0x193   :  { %3595 = vst [vmem:[#allocation12_spill] sm:$0xff] %v3287_v40  ;;  %v2589_v36 = vpop.f32.mrf.mxu0  ;;  %v1032_v56 = vadd.f32 %v3226_v7, %v921_v9  ;;  %v1035_v7 = vadd.f32 %v3232_v12, %v924_v20 }
 0x194   :  { %v3290_v28 = vpop.f32.mrf.mxu1  ;;  %v1138_v48 = vadd.f32 %v2564_v35, %v1031_v49 }
 0x195   :  { %3596 = vst [vmem:[#allocation13_spill] sm:$0xff] %v3290_v28  ;;  %v3292_v23 = vpop.f32.mrf.mxu0  ;;  %v918_v28 = vadd.f32 %v887_v18, %v807_v61  ;;  %v1142_v30 = vadd.f32 %v3268_v47, %v1035_v7 }
 0x196   :  { %v3296_v57 = vpop.f32.mrf.mxu1  ;;  %v1251_v35 = vadd.f32 %v3244_v21, %v1138_v48  ;;  %v3601_v48 = vld [vmem:[#allocation6_spill] sm:$0xff] }
 0x197   :  { %3597 = vst [vmem:[#allocation14_spill] sm:$0xff] %v3296_v57  ;;  %v3298_v46 = vpop.f32.mrf.mxu0  ;;  %v808_v57 = vadd.f32 %v3208_v52, %v695_v59  ;;  %v1029_v18 = vadd.f32 %v3224_v5, %v918_v28  ;;  %v699_v52 = vadd.f32 %v3236_v14, %v3218_v63  ;;  %v925_v63 = vadd.f32 %v3252_v32, %v814_v60 }
 0x198   :  { %v3302_v40 = vpop.f32.mrf.mxu1 }
 0x199   :  { %v3305_v0 = vpop.f32.mrf.mxu0  ;;  %v919_v16 = vadd.f32 %v890_v24, %v808_v57  ;;  %v1136_v54 = vadd.f32 %v1105_v37, %v1029_v18  ;;  %v1139_v24 = vadd.f32 %v2565_v41, %v1032_v56  ;;  %v812_v14 = vadd.f32 %v3220_v1, %v699_v52  ;;  %v3602_v18 = vld [vmem:[#allocation3_spill] sm:$0xff] }
 0x19a   :  { %v3308_v2 = vpop.f32.mrf.mxu1  ;;  %v1362_v57 = vadd.f32 %v2588_v58, %v1251_v35  ;;  %v1036_v12 = vadd.f32 %v3240_v17, %v925_v63  ;;  %v3598_v17 = vld [vmem:[#allocation5_spill] sm:$0xff]  ;;  %v3603_v56 = vld [vmem:[#allocation7_spill] sm:$0xff]  ;;  %v3606_v63 = vld [vmem:[#allocation8_spill] sm:$0xff] }
 0x19b   :  { %v3310_v38 = vpop.f32.mrf.mxu0  ;;  %v1030_v5 = vadd.f32 %v3228_v10, %v919_v16  ;;  %v1249_v13 = vadd.f32 %v3246_v25, %v1136_v54  ;;  %v923_v62 = vadd.f32 %v3256_v33, %v812_v14  ;;  %v1033_v10 = vadd.f32 %v3238_v15, %v922_v55  ;;  %v3346_v25 = vpop.permute.xlu1 %1936 }
 0x19c   :  { %v3314_v4 = vpop.f32.mrf.mxu1  ;;  %v1252_v32 = vadd.f32 %v3248_v27, %v1139_v24  ;;  %v1473_v33 = vadd.f32 %v3264_v42, %v1362_v57  ;;  %v1143_v47 = vadd.f32 %v3276_v53, %v1036_v12  ;;  %v1932_v16 = vpop.permute.xlu0 %1931  ;;  %v3604_v60 = vld [vmem:[#allocation13_spill] sm:$0xff] }
 0x19d   :  { %v3319_v6 = vpop.f32.mrf.mxu0  ;;  %v1137_v37 = vadd.f32 %v1108_v45, %v1030_v5  ;;  %v1360_v34 = vadd.f32 %v1329_v8, %v1249_v13  ;;  %v1140_v1 = vadd.f32 %v3272_v51, %v1033_v10  ;;  %v1034_v15 = vadd.f32 %v3242_v19, %v923_v62  ;;  %v3605_v5 = vld [vmem:[#allocation4_spill] sm:$0xff] }
 0x19e   :  { %v3322_v50 = vpop.f32.mrf.mxu1  ;;  %v1363_v45 = vadd.f32 %v2589_v36, %v1252_v32  ;;  %v1255_v8 = vadd.f32 %v3254_v22, %v1142_v30  ;;  %v3599_v36 = vld [vmem:[#allocation9_spill] sm:$0xff]  ;;  %v1256_v52 = vadd.f32 %v3602_v18, %v1143_v47  ;;  %v3608_v30 = vld [vmem:[#allocation10_spill] sm:$0xff] }
 0x19f   :  { %v2612_v3 = vpop.f32.mrf.mxu0  ;;  %v1250_v58 = vadd.f32 %v3250_v31, %v1137_v37  ;;  %v1471_v9 = vadd.f32 %v3598_v17, %v1360_v34  ;;  %v1141_v49 = vadd.f32 %v3599_v36, %v1034_v15  ;;  %v1253_v29 = vadd.f32 %v3600_v43, %v1140_v1  ;;  %v3373_v15 = vld [vmem:[%s3582_s5] ss:$0 sm:$0xff]  ;;  %v3610_v17 = vld [vmem:[#allocation12_spill] sm:$0xff] }
 0x1a0   :  { %v3327_v59 = vpop.f32.mrf.mxu1  ;;  %v1580_v44 = vadd.f32 %v2612_v3, %v1473_v33  ;;  %v1366_v31 = vadd.f32 %v3298_v46, %v1255_v8  ;;  %v1474_v19 = vadd.f32 %v3601_v48, %v1363_v45  ;;  %v1942_v3 = vpop.permute.xlu1 %1941  ;;  %v1367_v46 = vadd.f32 %v3310_v38, %v1256_v52 }
 0x1a1   :  { %v1547_v11 = vpop.f32.mrf.mxu0  ;;  %v1361_v51 = vadd.f32 %v3292_v23, %v1250_v58  ;;  %v1364_v22 = vadd.f32 %v3305_v0, %v1253_v29  ;;  %v1254_v35 = vadd.f32 %v3605_v5, %v1141_v49  ;;  %v3607_v0 = vld [vmem:[#allocation14_spill] sm:$0xff]  ;;  %v1947_v32 = vpop.permute.xlu0 %1946  ;;  %v3609_v58 = vld [vmem:[#allocation11_spill] sm:$0xff] }
 0x1a2   :  { %v3333_v28 = vpop.f32.mrf.mxu1  ;;  %v1578_v53 = vadd.f32 %v1547_v11, %v1471_v9  ;;  %v1693_v24 = vadd.f32 %v3604_v60, %v1580_v44  ;;  %v1477_v11 = vadd.f32 %v3606_v63, %v1366_v31  ;;  %v1478_v33 = vadd.f32 %v3609_v58, %v1367_v46  ;;  %v2112_v58 = vld [vmem:[%s3581_s3 + $0x38] sm:$0xff] }
 0x1a3   :  { %v2613_v26 = vpop.f32.mrf.mxu0  ;;  %v1472_v55 = vadd.f32 %v3603_v56, %v1361_v51  ;;  %v1365_v13 = vadd.f32 %v3319_v6, %v1254_v35 }
 0x1a4   :  { %v2648_v41 = vpop.f32.mrf.mxu1  ;;  %v1581_v54 = vadd.f32 %v2613_v26, %v1474_v19  ;;  %v1691_v57 = vadd.f32 %v3607_v0, %v1578_v53  ;;  %v1475_v26 = vadd.f32 %v3608_v30, %v1364_v22  ;;  %v1952_v6 = vpop.permute.xlu1 %1951 }
 0x1a5   :  { %v1550_v21 = vpop.f32.mrf.mxu0  ;;  %v1957_v22 = vpop.permute.xlu0 %1956 }
 0x1a6   :  { %v1882_v27 = vpop.f32.mrf.mxu1  ;;  %v1579_v7 = vadd.f32 %v1550_v21, %v1472_v55  ;;  %v1694_v38 = vadd.f32 %v3302_v40, %v1581_v54  ;;  %v1476_v40 = vadd.f32 %v3610_v17, %v1365_v13 }
 0x1a7   :  { %v2616_v61 = vpop.f32.mrf.mxu0 }
 0x1a8   :  { %v2649_v23 = vpop.f32.mrf.mxu1  ;;  %v1584_v62 = vadd.f32 %v2616_v61, %v1477_v11  ;;  %v1692_v51 = vadd.f32 %v3308_v2, %v1579_v7 }
 0x1a9   :  { %v1563_v39 = vpop.f32.mrf.mxu0 }
 0x1aa   :  { %v1885_v34 = vpop.f32.mrf.mxu1  ;;  %v1582_v45 = vadd.f32 %v1563_v39, %v1475_v26  ;;  %v1697_v9 = vadd.f32 %v3314_v4, %v1584_v62 }
 0x1ab   :  { %v2617_v42 = vpop.f32.mrf.mxu0 }
 0x1ac   :  { %v2652_v21 = vpop.f32.mrf.mxu1  ;;  %v1695_v2 = vadd.f32 %v3322_v50, %v1582_v45  ;;  %v2161_v45 = vld [vmem:[%s3583_s4] sm:$0xff] }
 0x1ad   :  { %v1566_v20 = vpop.f32.mrf.mxu0 }
 0x1ae   :  { %v1898_v53 = vpop.f32.mrf.mxu1 }
 0x1af   :  { %v2636_v14 = vpop.f32.mrf.mxu0 }
 0x1b0   :  { %v1804_v37 = vadd.f32 %v2636_v14, %v1693_v24  ;;  %v2653_v56 = vpop.f32.mrf.mxu1 }
 0x1b1   :  { %v1771_v10 = vpop.f32.mrf.mxu0 }
 0x1b2   :  { %v1915_v1 = vadd.f32 %v2648_v41, %v1804_v37  ;;  %v1802_v12 = vadd.f32 %v1771_v10, %v1691_v57  ;;  %v1585_v41 = vadd.f32 %v2617_v42, %v1478_v33  ;;  %v1967_v37 = vpop.permute.xlu0 %1966  ;;  %v1901_v0 = vpop.f32.mrf.mxu1  ;;  %v2163_v33 = vld [vmem:[%s3583_s4 + $0x10] sm:$0xff] }
 0x1b3   :  { %v2637_v47 = vpop.f32.mrf.mxu0 }
 0x1b4   :  { %v1913_v61 = vadd.f32 %v1882_v27, %v1802_v12  ;;  %v1805_v8 = vadd.f32 %v2637_v47, %v1694_v38  ;;  %v3376_v44 = vadd.f32 %v1942_v3, %v1915_v1  ;;  %v1583_v27 = vadd.f32 %v1566_v20, %v1476_v40  ;;  %v2162_v47 = vld [vmem:[%s3583_s4 + $0x8] sm:$0xff] }
 0x1b5   :  { %v1774_v39 = vpop.f32.mrf.mxu0  ;;  %v1698_v52 = vadd.f32 %v3327_v59, %v1585_v41 }
 0x1b6   :  { %v1916_v36 = vadd.f32 %v2649_v23, %v1805_v8  ;;  %v1803_v49 = vadd.f32 %v1774_v39, %v1692_v51  ;;  %v1986_v31 = vmul.f32 %v3373_v15, %v3376_v44  ;;  %v3382_v43 = vadd.f32 %v1932_v16, %v1913_v61  ;;  %v1962_v16 = vpop.permute.xlu1 %1961  ;;  %v2166_v61 = vld [vmem:[%s3583_s4 + $0x28] sm:$0xff]  ;;  %v3445_v51 = vpop.permute.xlu0 %2115 }
 0x1b7   :  { %v2640_v29 = vpop.f32.mrf.mxu0  ;;  %v1696_v60 = vadd.f32 %v3333_v28, %v1583_v27 }
 0x1b8   :  { %v1914_v48 = vadd.f32 %v1885_v34, %v1803_v49  ;;  %v1808_v42 = vadd.f32 %v2640_v29, %v1697_v9  ;;  %v1999_v19 = vsel %vm1992_vm1, %v1986_v31, 0.0  ;;  %v1984_v4 = vmul.f32 %v3373_v15, %v3382_v43 }
 0x1b9   :  { %v1787_v18 = vpop.f32.mrf.mxu0  ;;  %2000 = vadd.xlane.f32.xlu0 %v1999_v19  ;;  %v3389_v23 = vadd.f32 %v1947_v32, %v1916_v36 }
 0x1ba   :  { %v1919_v20 = vadd.f32 %v2652_v21, %v1808_v42  ;;  %v1806_v3 = vadd.f32 %v1787_v18, %v1695_v2  ;;  %v1993_v54 = vsel %vm1992_vm1, %v1984_v4, 0.0  ;;  %v3393_v50 = vadd.f32 %v3346_v25, %v1914_v48  ;;  %v2165_v21 = vld [vmem:[%s3583_s4 + $0x20] sm:$0xff]  ;;  %v3443_v8 = vpop.permute.xlu1 %2120  ;;  %v3449_v17 = vpop.permute.xlu0 %2130 }
 0x1bb   :  { %v2641_v55 = vpop.f32.mrf.mxu0  ;;  %1994 = vadd.xlane.f32.xlu1 %v1993_v54  ;;  %v1987_v24 = vmul.f32 %v3373_v15, %v3389_v23 }
 0x1bc   :  { %v1917_v46 = vadd.f32 %v1898_v53, %v1806_v3  ;;  %v1809_v59 = vadd.f32 %v2641_v55, %v1698_v52  ;;  %v1985_v5 = vmul.f32 %v3373_v15, %v3393_v50  ;;  %v3400_v35 = vadd.f32 %v1962_v16, %v1919_v20 }
 0x1bd   :  { %v1790_v63 = vpop.f32.mrf.mxu0  ;;  %v2002_v11 = vsel %vm1992_vm1, %v1987_v24, 0.0 }
 0x1be   :  { %v1920_v25 = vadd.f32 %v2653_v56, %v1809_v59  ;;  %v1807_v14 = vadd.f32 %v1790_v63, %v1696_v60  ;;  %v1996_v7 = vsel %vm1992_vm1, %v1985_v5, 0.0  ;;  %v1990_v28 = vmul.f32 %v3373_v15, %v3400_v35  ;;  %v3447_v41 = vpop.permute.xlu1 %2125  ;;  %v3453_v39 = vpop.permute.xlu0 %2140 }
 0x1bf   :  { %1997 = vadd.xlane.f32.xlu0 %v1996_v7  ;;  %2003 = vadd.xlane.f32.xlu1 %v2002_v11  ;;  %v3406_v57 = vadd.f32 %v1952_v6, %v1917_v46  ;;  %v2164_v6 = vld [vmem:[%s3583_s4 + $0x18] sm:$0xff] }
 0x1c0   :  { %v1918_v13 = vadd.f32 %v1901_v0, %v1807_v14  ;;  %v3408_v62 = vadd.f32 %v1967_v37, %v1920_v25  ;;  %v2011_v30 = vsel %vm1992_vm1, %v1990_v28, 0.0 }
 0x1c1   :  { %v1988_v10 = vmul.f32 %v3373_v15, %v3406_v57 }
 0x1c2   :  { %v1991_v26 = vmul.f32 %v3373_v15, %v3408_v62  ;;  %v3415_v34 = vadd.f32 %v1957_v22, %v1918_v13  ;;  %v3451_v40 = vpop.permute.xlu1 %2135 }
 0x1c3   :  { %2012 = vadd.xlane.f32.xlu0 %v2011_v30  ;;  %v2005_v12 = vsel %vm1992_vm1, %v1988_v10, 0.0 }
 0x1c4   :  { %v2014_v32 = vsel %vm1992_vm1, %v1991_v26, 0.0  ;;  %v1989_v1 = vmul.f32 %v3373_v15, %v3415_v34 }
 0x1c5   :  { %2015 = vadd.xlane.f32.xlu1 %v2014_v32 }
 0x1c6   :  { %v2008_v38 = vsel %vm1992_vm1, %v1989_v1, 0.0  ;;  %v3455_v9 = vpop.permute.xlu1 %2145 }
 0x1c7   :  { %2006 = vadd.xlane.f32.xlu0 %v2005_v12 }
 0x1c9   :  { %2009 = vadd.xlane.f32.xlu1 %v2008_v38  ;;  %v2167_v38 = vld [vmem:[%s3583_s4 + $0x30] sm:$0xff] }
 0x1da   :  { %2171 = vperm.xlu1 %2659, %v2161_v45   ;;  %v2168_v45 = vld [vmem:[%s3583_s4 + $0x38] sm:$0xff] }
 0x1dd   :  { %2150 = vperm.xlu0 %2658, %v2112_v58  }
 0x1de   :  { %2181 = vperm.xlu1 %2659, %v2163_v33  }
 0x1e1   :  { %2176 = vperm.xlu0 %2658, %v2162_v47  }
 0x1e2   :  { %2191 = vperm.xlu1 %2659, %v2165_v21  }
 0x1e5   :  { %2186 = vperm.xlu0 %2658, %v2164_v6  }
 0x1e9   :  { %2196 = vperm.xlu0 %2658, %v2166_v61  }
 0x242   :  { %v2001_v36 = vpop.xlane.xlu0 %2000 }
 0x243   :  { %v2019_v49 = vmul.f32 0.03125, %v2001_v36 }
 0x244   :  { %v1995_v31 = vpop.xlane.xlu1 %1994 }
 0x245   :  { %v3458_v27 = vsub.f32 %v3376_v44, %v2019_v49  ;;  %v2017_v29 = vmul.f32 0.03125, %v1995_v31 }
 0x247   :  { %v3461_v53 = vsub.f32 %v3382_v43, %v2017_v29  ;;  %v2035_v2 = vmul.f32 %v3458_v27, %v3458_v27 }
 0x248   :  { %v1998_v48 = vpop.xlane.xlu0 %1997  ;;  %v2004_v42 = vpop.xlane.xlu1 %2003 }
 0x249   :  { %v2018_v19 = vmul.f32 0.03125, %v1998_v48  ;;  %v2020_v4 = vmul.f32 0.03125, %v2004_v42  ;;  %v2043_v22 = vmul.f32 %v3373_v15, %v2035_v2  ;;  %v2033_v18 = vmul.f32 %v3461_v53, %v3461_v53 }
 0x24b   :  { %v3469_v52 = vsub.f32 %v3393_v50, %v2018_v19  ;;  %v3472_v44 = vsub.f32 %v3389_v23, %v2020_v4  ;;  %v2055_v43 = vsel %vm1992_vm1, %v2043_v22, 0.0  ;;  %v2041_v16 = vmul.f32 %v3373_v15, %v2033_v18 }
 0x24c   :  { %2056 = vadd.xlane.f32.xlu0 %v2055_v43  ;;  %v2013_v20 = vpop.xlane.xlu0 %2012 }
 0x24d   :  { %v2023_v3 = vmul.f32 0.03125, %v2013_v20  ;;  %v2036_v54 = vmul.f32 %v3472_v44, %v3472_v44  ;;  %v2034_v56 = vmul.f32 %v3469_v52, %v3469_v52  ;;  %v2049_v23 = vsel %vm1992_vm1, %v2041_v16, 0.0 }
 0x24e   :  { %v2016_v55 = vpop.xlane.xlu1 %2015 }
 0x24f   :  { %v3481_v50 = vsub.f32 %v3400_v35, %v2023_v3  ;;  %v2024_v60 = vmul.f32 0.03125, %v2016_v55  ;;  %v2044_v24 = vmul.f32 %v3373_v15, %v2036_v54  ;;  %v2042_v59 = vmul.f32 %v3373_v15, %v2034_v56 }
 0x250   :  { %v2007_v46 = vpop.xlane.xlu0 %2006  ;;  %2050 = vadd.xlane.f32.xlu0 %v2049_v23 }
 0x251   :  { %v3487_v5 = vsub.f32 %v3408_v62, %v2024_v60  ;;  %v2021_v63 = vmul.f32 0.03125, %v2007_v46  ;;  %v2058_v11 = vsel %vm1992_vm1, %v2044_v24, 0.0  ;;  %v2039_v25 = vmul.f32 %v3481_v50, %v3481_v50 }
 0x252   :  { %2059 = vadd.xlane.f32.xlu1 %v2058_v11  ;;  %v2010_v35 = vpop.xlane.xlu1 %2009  ;;  %v2052_v0 = vsel %vm1992_vm1, %v2042_v59, 0.0 }
 0x253   :  { %v3493_v14 = vsub.f32 %v3406_v57, %v2021_v63  ;;  %v2022_v7 = vmul.f32 0.03125, %v2010_v35  ;;  %v2047_v28 = vmul.f32 %v3373_v15, %v2039_v25  ;;  %v2040_v37 = vmul.f32 %v3487_v5, %v3487_v5 }
 0x255   :  { %v3500_v13 = vsub.f32 %v3415_v34, %v2022_v7  ;;  %v2067_v62 = vsel %vm1992_vm1, %v2047_v28, 0.0  ;;  %v2037_v30 = vmul.f32 %v3493_v14, %v3493_v14  ;;  %v2048_v26 = vmul.f32 %v3373_v15, %v2040_v37 }
 0x256   :  { %2068 = vadd.xlane.f32.xlu0 %v2067_v62  ;;  %2053 = vadd.xlane.f32.xlu1 %v2052_v0 }
 0x257   :  { %v2045_v57 = vmul.f32 %v3373_v15, %v2037_v30  ;;  %v2038_v10 = vmul.f32 %v3500_v13, %v3500_v13  ;;  %v2070_v1 = vsel %vm1992_vm1, %v2048_v26, 0.0 }
 0x258   :  { %v3519_v58 = vpop.permute.xlu0 %2150 }
 0x259   :  { %v2061_v32 = vsel %vm1992_vm1, %v2045_v57, 0.0  ;;  %v2046_v34 = vmul.f32 %v3373_v15, %v2038_v10  ;;  %v2172_v15 = vpop.permute.xlu1 %2171 }
 0x25a   :  { %2062 = vadd.xlane.f32.xlu0 %v2061_v32  ;;  %2071 = vadd.xlane.f32.xlu1 %v2070_v1 }
 0x25b   :  { %v2064_v12 = vsel %vm1992_vm1, %v2046_v34, 0.0 }
 0x25c   :  { %v3521_v33 = vpop.permute.xlu0 %2176 }
 0x25d   :  { %v2182_v21 = vpop.permute.xlu1 %2181 }
 0x25e   :  { %2065 = vadd.xlane.f32.xlu1 %v2064_v12 }
 0x260   :  { %v2187_v47 = vpop.permute.xlu0 %2186 }
 0x261   :  { %v3525_v49 = vpop.permute.xlu1 %2191 }
 0x264   :  { %v3523_v6 = vpop.permute.xlu0 %2196 }
 0x26f   :  { %2201 = vperm.xlu1 %2659, %v2167_v38  }
 0x270   :  { %2206 = vperm.xlu0 %2658, %v2168_v45  }
 0x2d5   :  { %v2057_v61 = vpop.xlane.xlu0 %2056 }
 0x2d6   :  { %v2075_v36 = vmul.f32 0.03125, %v2057_v61 }
 0x2d8   :  { %v2083_v31 = vadd.f32 1e-05, %v2075_v36 }
 0x2d9   :  { %v2051_v29 = vpop.xlane.xlu0 %2050 }
 0x2da   :  { %2724 = vrsqrt.f32 %v2083_v31  ;;  %v2073_v2 = vmul.f32 0.03125, %v2051_v29 }
 0x2db   :  { %v2060_v48 = vpop.xlane.xlu1 %2059 }
 0x2dc   :  { %v2081_v42 = vadd.f32 1e-05, %v2073_v2  ;;  %v2076_v19 = vmul.f32 0.03125, %v2060_v48 }
 0x2de   :  { %2726 = vrsqrt.f32 %v2081_v42  ;;  %v2084_v4 = vadd.f32 1e-05, %v2076_v19 }
 0x2df   :  { %v2069_v22 = vpop.xlane.xlu0 %2068  ;;  %v2054_v18 = vpop.xlane.xlu1 %2053 }
 0x2e0   :  { %2728 = vrsqrt.f32 %v2084_v4  ;;  %v2079_v43 = vmul.f32 0.03125, %v2069_v22  ;;  %v2074_v16 = vmul.f32 0.03125, %v2054_v18 }
 0x2e2   :  { %v2087_v20 = vadd.f32 1e-05, %v2079_v43  ;;  %v2082_v3 = vadd.f32 1e-05, %v2074_v16 }
 0x2e3   :  { %v2063_v54 = vpop.xlane.xlu0 %2062  ;;  %v2072_v56 = vpop.xlane.xlu1 %2071 }
 0x2e4   :  { %2730 = vrsqrt.f32 %v2087_v20  ;;  %v2077_v55 = vmul.f32 0.03125, %v2063_v54  ;;  %v2080_v60 = vmul.f32 0.03125, %v2072_v56 }
 0x2e5   :  { %2732 = vrsqrt.f32 %v2082_v3 }
 0x2e6   :  { %v2085_v23 = vadd.f32 1e-05, %v2077_v55  ;;  %v2088_v24 = vadd.f32 1e-05, %v2080_v60 }
 0x2e7   :  { %v2725_v46 = vpop.eup %2724  ;;  %v2066_v59 = vpop.xlane.xlu1 %2065 }
 0x2e8   :  { %v2099_v63 = vmul.f32 %v2725_v46, %v3458_v27  ;;  %2734 = vrsqrt.f32 %v2085_v23  ;;  %v2078_v11 = vmul.f32 0.03125, %v2066_v59 }
 0x2e9   :  { %2736 = vrsqrt.f32 %v2088_v24 }
 0x2ea   :  { %v2155_v25 = vmul.f32 %v3447_v41, %v2099_v63  ;;  %v2086_v35 = vadd.f32 1e-05, %v2078_v11 }
 0x2eb   :  { %v2727_v7 = vpop.eup %2726  ;;  %v2202_v38 = vpop.permute.xlu1 %2201 }
 0x2ec   :  { %v2211_v28 = vadd.f32 %v2182_v21, %v2155_v25  ;;  %v2097_v37 = vmul.f32 %v2727_v7, %v3461_v53  ;;  %2738 = vrsqrt.f32 %v2086_v35  ;;  %v2207_v29 = vpop.permute.xlu0 %2206 }
 0x2ed   :  { %v2729_v0 = vpop.eup %2728 }
 0x2ee   :  { %v2219_v62 = vmax.f32 %v2211_v28, 0.0  ;;  %v2153_v30 = vmul.f32 %v3445_v51, %v2097_v37  ;;  %v2100_v26 = vmul.f32 %v2729_v0, %v3472_v44 }
 0x2f0   :  { %v2209_v57 = vadd.f32 %v2172_v15, %v2153_v30  ;;  %v2156_v27 = vmul.f32 %v3449_v17, %v2100_v26  ;;  %2227 = vst.msk [vmem:[%s3584_s6 + $0x10] sm:$0xff] %vm1992_vm1, %v2219_v62 }
 0x2f1   :  { %v2731_v41 = vpop.eup %2730 }
 0x2f2   :  { %v2733_v10 = vpop.eup %2732  ;;  %v2217_v32 = vmax.f32 %v2209_v57, 0.0  ;;  %v2212_v1 = vadd.f32 %v2187_v47, %v2156_v27  ;;  %v2103_v53 = vmul.f32 %v2731_v41, %v3481_v50 }
 0x2f3   :  { %v2098_v34 = vmul.f32 %v2733_v10, %v3469_v52 }
 0x2f4   :  { %v2220_v12 = vmax.f32 %v2212_v1, 0.0  ;;  %2225 = vst.msk [vmem:[%s3584_s6] sm:$0xff] %vm1992_vm1, %v2217_v32  ;;  %v2159_v51 = vmul.f32 %v3455_v9, %v2103_v53 }
 0x2f5   :  { %v2735_v17 = vpop.eup %2734  ;;  %v2154_v44 = vmul.f32 %v3443_v8, %v2098_v34 }
 0x2f6   :  { %v2737_v45 = vpop.eup %2736  ;;  %v2101_v15 = vmul.f32 %v2735_v17, %v3493_v14  ;;  %2228 = vst.msk [vmem:[%s3584_s6 + $0x18] sm:$0xff] %vm1992_vm1, %v2220_v12  ;;  %v2215_v52 = vadd.f32 %v2202_v38, %v2159_v51 }
 0x2f7   :  { %v2210_v50 = vadd.f32 %v3521_v33, %v2154_v44  ;;  %v2104_v47 = vmul.f32 %v2737_v45, %v3487_v5 }
 0x2f8   :  { %v2157_v21 = vmul.f32 %v3451_v40, %v2101_v15  ;;  %v2223_v9 = vmax.f32 %v2215_v52, 0.0 }
 0x2f9   :  { %v2739_v61 = vpop.eup %2738  ;;  %v2218_v36 = vmax.f32 %v2210_v50, 0.0  ;;  %v2160_v8 = vmul.f32 %v3519_v58, %v2104_v47 }
 0x2fa   :  { %v2213_v31 = vadd.f32 %v3525_v49, %v2157_v21  ;;  %v2102_v14 = vmul.f32 %v2739_v61, %v3500_v13  ;;  %2231 = vst.msk [vmem:[%s3584_s6 + $0x30] sm:$0xff] %vm1992_vm1, %v2223_v9 }
 0x2fb   :  { %v2216_v33 = vadd.f32 %v2207_v29, %v2160_v8  ;;  %2226 = vst.msk [vmem:[%s3584_s6 + $0x8] sm:$0xff] %vm1992_vm1, %v2218_v36 }
 0x2fc   :  { %v2221_v40 = vmax.f32 %v2213_v31, 0.0  ;;  %v2158_v5 = vmul.f32 %v3453_v39, %v2102_v14 }
 0x2fd   :  { %v2224_v58 = vmax.f32 %v2216_v33, 0.0 }
 0x2fe   :  { %v2214_v49 = vadd.f32 %v3523_v6, %v2158_v5  ;;  %2229 = vst.msk [vmem:[%s3584_s6 + $0x20] sm:$0xff] %vm1992_vm1, %v2221_v40 }
 0x2ff   :  { %2232 = vst.msk [vmem:[%s3584_s6 + $0x38] sm:$0xff] %vm1992_vm1, %v2224_v58 }
 0x300   :  { %v2222_v13 = vmax.f32 %v2214_v49, 0.0 }
 0x302   :  { %2230 = vst.msk [vmem:[%s3584_s6 + $0x28] sm:$0xff] %vm1992_vm1, %v2222_v13 }

// kernel: _lambda_.10
= control target key start
LH: loop header
LB: loop body
LE: loop exit
PB: predicated region body
PF: predicated region fallthrough
CT: control target
= control target key end

     0   :  { %17 = vsyncpa [#allocation3], 0  ;;  %v44_v28 = vlaneseq  ;;  %v2495_v36 = vmov 1983009808   ;;  %s3159_s0 = inlined_call_operand.vmem [shape: f32[2,1024], index: 0, kind: input, shape index: {}]   ;;  %s3160_s1 = inlined_call_operand.vmem [shape: bf16[1024,64], index: 1, kind: input, shape index: {}]   ;;  %s3161_s2 = inlined_call_operand.vmem [shape: f32[1,64], index: 2, kind: input, shape index: {}]   ;;  %s3162_s3 = inlined_call_operand.vmem [shape: bf16[1024,64], index: 3, kind: input, shape index: {}]   ;;  %s3163_s4 = inlined_call_operand.vmem [shape: f32[1,64], index: 4, kind: input, shape index: {}]   ;;  %s3164_s5 = inlined_call_operand.vmem [shape: bf16[64,1024], index: 5, kind: input, shape index: {}]   ;;  %s3165_s6 = inlined_call_operand.vmem [shape: f32[1,1024], index: 6, kind: input, shape index: {}]   ;;  %s3166_s7 = inlined_call_operand.vmem [shape: f32[2,64], index: 7, kind: input, shape index: {}]   ;;  %s3167_s8 = inlined_call_operand.hbm [shape: f32[2,64], index: 8, kind: output, shape index: {0}]   ;;  %s3168_s9 = inlined_call_operand.hbm [shape: f32[2,64], index: 9, kind: output, shape index: {1}]   ;;  %s3169_s10 = inlined_call_operand.hbm [shape: f32[2,64], index: 10, kind: output, shape index: {2}]   ;;  %s3170_s11 = inlined_call_operand.vmem [shape: f32[2,1024], index: 11, kind: output, shape index: {3}]  }
   0x1   :  { %v2299_v0 = vld [vmem:[%s3160_s1 + $0x78] sm:$0xff]   ;;  %v2303_v4 = vld [vmem:[%s3160_s1 + $0x70] sm:$0xff]   ;;  %v2307_v8 = vld [vmem:[%s3160_s1 + $0x68] sm:$0xff]   ;;  %v42_v37 = vunpack.c.l.s4 %v2495_v36 }
   0x2   :  { %v2300_v1 = vld [vmem:[%s3160_s1 + $0xf8] sm:$0xff]   ;;  %2118 = vmatprep.subr.bf16.mxu0 %v2299_v0  ;;  %v2304_v5 = vld [vmem:[%s3160_s1 + $0xf0] sm:$0xff]   ;;  %v2308_v9 = vld [vmem:[%s3160_s1 + $0xe8] sm:$0xff]   ;;  %v2656_v33 = vshrl.u32 %v44_v28, 7 }
   0x3   :  { %v2301_v2 = vld [vmem:[%s3160_s1 + $0x38] sm:$0xff]   ;;  %2140 = vmatprep.subr.bf16.mxu1 %v2300_v1  ;;  %v2305_v6 = vld [vmem:[%s3160_s1 + $0x30] sm:$0xff]   ;;  %v2309_v10 = vld [vmem:[%s3160_s1 + $0x28] sm:$0xff]   ;;  %v43_v39 = vunpack.c.0.s8 %v42_v37 }
   0x4   :  { %v2302_v3 = vld [vmem:[%s3160_s1 + $0xb8] sm:$0xff]   ;;  %2119 = vmatpush3.bf16.msra.mxu0 %v2301_v2  ;;  %v2306_v7 = vld [vmem:[%s3160_s1 + $0xb0] sm:$0xff]   ;;  %v2310_v11 = vld [vmem:[%s3160_s1 + $0xa8] sm:$0xff]  }
   0x5   :  { %2141 = vmatpush3.bf16.msra.mxu1 %v2302_v3  ;;  %2120 = vmatprep.subr.bf16.mxu0 %v2303_v4  ;;  %v2311_v12 = vld [vmem:[%s3160_s1 + $0x60] sm:$0xff]   ;;  %v2315_v16 = vld [vmem:[%s3160_s1 + $0x58] sm:$0xff]   ;;  %v2319_v20 = vld [vmem:[%s3160_s1 + $0x50] sm:$0xff]   ;;  %v2668_v41 = vsub.s32 %v43_v39, %v2656_v33 }
   0x6   :  { %2142 = vmatprep.subr.bf16.mxu1 %v2304_v5  ;;  %v2312_v13 = vld [vmem:[%s3160_s1 + $0xe0] sm:$0xff]   ;;  %v2316_v17 = vld [vmem:[%s3160_s1 + $0xd8] sm:$0xff]   ;;  %v2320_v21 = vld [vmem:[%s3160_s1 + $0xd0] sm:$0xff]  }
   0x7   :  { %v2313_v14 = vld [vmem:[%s3160_s1 + $0x20] sm:$0xff]   ;;  %v2317_v18 = vld [vmem:[%s3160_s1 + $0x18] sm:$0xff]   ;;  %v2321_v22 = vld [vmem:[%s3160_s1 + $0x10] sm:$0xff]  }
   0x8   :  { %2121 = vmatpush3.bf16.msra.mxu0 %v2305_v6  ;;  %v2314_v15 = vld [vmem:[%s3160_s1 + $0xa0] sm:$0xff]   ;;  %v2318_v19 = vld [vmem:[%s3160_s1 + $0x98] sm:$0xff]   ;;  %v2322_v23 = vld [vmem:[%s3160_s1 + $0x90] sm:$0xff]  }
   0x9   :  { %2143 = vmatpush3.bf16.msra.mxu1 %v2306_v7  ;;  %2122 = vmatprep.subr.bf16.mxu0 %v2307_v8  ;;  %v2323_v24 = vld [vmem:[%s3160_s1 + $0x48] sm:$0xff]   ;;  %v2327_v29 = vld [vmem:[%s3160_s1 + $0x40] sm:$0xff]   ;;  %v2332_v35 = vld [vmem:[%s3160_s1 + $0x178] sm:$0xff]  }
   0xa   :  { %2144 = vmatprep.subr.bf16.mxu1 %v2308_v9  ;;  %v2324_v25 = vld [vmem:[%s3160_s1 + $0xc8] sm:$0xff]   ;;  %v2328_v30 = vld [vmem:[%s3160_s1 + $0xc0] sm:$0xff]   ;;  %v2333_v38 = vld [vmem:[%s3160_s1 + $0x1f8] sm:$0xff]  }
   0xb   :  { %v2325_v26 = vld [vmem:[%s3160_s1 + $0x8] sm:$0xff]   ;;  %v2329_v31 = vld [vmem:[%s3160_s1] sm:$0xff]   ;;  %v2334_v46 = vld [vmem:[%s3160_s1 + $0x138] sm:$0xff]  }
   0xc   :  { %2123 = vmatpush3.bf16.msra.mxu0 %v2309_v10  ;;  %v2326_v27 = vld [vmem:[%s3160_s1 + $0x88] sm:$0xff]   ;;  %v2330_v32 = vld [vmem:[%s3160_s1 + $0x80] sm:$0xff]   ;;  %v2335_v49 = vld [vmem:[%s3160_s1 + $0x1b8] sm:$0xff]  }
   0xd   :  { %2145 = vmatpush3.bf16.msra.mxu1 %v2310_v11  ;;  %2124 = vmatprep.subr.bf16.mxu0 %v2311_v12  ;;  %v36_v34 = vld [vmem:[%s3159_s0] sm:$0xff]  ;;  %v2336_v52 = vld [vmem:[%s3160_s1 + $0x170] sm:$0xff]   ;;  %v2340_v56 = vld [vmem:[%s3160_s1 + $0x168] sm:$0xff]  }
   0xe   :  { %2146 = vmatprep.subr.bf16.mxu1 %v2312_v13  ;;  %v40_v40 = vcombine.high %v36_v34, %v36_v34  ;;  %v47_v42 = vrot.slane %v36_v34, %v2668_v41  ;;  %v2337_v53 = vld [vmem:[%s3160_s1 + $0x1f0] sm:$0xff]   ;;  %v2341_v57 = vld [vmem:[%s3160_s1 + $0x1e8] sm:$0xff]   ;;  %v2344_v60 = vld [vmem:[%s3160_s1 + $0x160] sm:$0xff]  }
   0xf   :  { %v2338_v54 = vld [vmem:[%s3160_s1 + $0x130] sm:$0xff]   ;;  %v2342_v58 = vld [vmem:[%s3160_s1 + $0x128] sm:$0xff]   ;;  %v2345_v61 = vld [vmem:[%s3160_s1 + $0x1e0] sm:$0xff]  }
  0x10   :  { %2125 = vmatpush3.bf16.msra.mxu0 %v2313_v14  ;;  %v54_v43 = vrot.slane %v40_v40, %v2668_v41  ;;  %v55_v44 = vcombine.high %v47_v42, %v47_v42  ;;  %v2675_v47 = vpack.c.bf16 %v47_v42, %v47_v42  ;;  %v2339_v55 = vld [vmem:[%s3160_s1 + $0x1b0] sm:$0xff]   ;;  %v2343_v59 = vld [vmem:[%s3160_s1 + $0x1a8] sm:$0xff]   ;;  %v2346_v62 = vld [vmem:[%s3160_s1 + $0x120] sm:$0xff]  }
  0x11   :  { %2147 = vmatpush3.bf16.msra.mxu1 %v2314_v15  ;;  %2126 = vmatprep.subr.bf16.mxu0 %v2315_v16  ;;  %v2347_v63 = vld [vmem:[%s3160_s1 + $0x1a0] sm:$0xff]   ;;  %v2348_v0 = vld [vmem:[%s3160_s1 + $0x158] sm:$0xff]   ;;  %v2352_v4 = vld [vmem:[%s3160_s1 + $0x150] sm:$0xff]  }
  0x12   :  { %2148 = vmatprep.subr.bf16.mxu1 %v2316_v17  ;;  %v56_v45 = vcombine.high %v54_v43, %v54_v43  ;;  %v2677_v48 = vpack.c.bf16 %v54_v43, %v54_v43  ;;  %v2682_v50 = vpack.c.bf16 %v55_v44, %v55_v44  ;;  %v2349_v1 = vld [vmem:[%s3160_s1 + $0x1d8] sm:$0xff]   ;;  %v2353_v5 = vld [vmem:[%s3160_s1 + $0x1d0] sm:$0xff]   ;;  %v2356_v8 = vld [vmem:[%s3160_s1 + $0x148] sm:$0xff]  }
  0x13   :  { %v2350_v2 = vld [vmem:[%s3160_s1 + $0x118] sm:$0xff]   ;;  %v2354_v6 = vld [vmem:[%s3160_s1 + $0x110] sm:$0xff]   ;;  %v2357_v9 = vld [vmem:[%s3160_s1 + $0x1c8] sm:$0xff]  }
  0x14   :  { %2127 = vmatpush3.bf16.msra.mxu0 %v2317_v18  ;;  %v2684_v51 = vpack.c.bf16 %v56_v45, %v56_v45  ;;  %641 = vmatprep.mubr.bf16.mxu0 %v2682_v50  ;;  %v2351_v3 = vld [vmem:[%s3160_s1 + $0x198] sm:$0xff]   ;;  %v2355_v7 = vld [vmem:[%s3160_s1 + $0x190] sm:$0xff]   ;;  %v37_v10 = vld [vmem:[%s3159_s0 + $0x8] sm:$0xff] }
  0x15   :  { %2149 = vmatpush3.bf16.msra.mxu1 %v2318_v19  ;;  %2128 = vmatprep.subr.bf16.mxu0 %v2319_v20  ;;  %v2358_v11 = vld [vmem:[%s3160_s1 + $0x108] sm:$0xff]   ;;  %v64_v12 = vrot.slane %v37_v10, %v2668_v41  ;;  %v57_v13 = vcombine.high %v37_v10, %v37_v10  ;;  %v2360_v15 = vld [vmem:[%s3160_s1 + $0x140] sm:$0xff]   ;;  %v2372_v34 = vld [vmem:[%s3162_s3 + $0xb0] sm:$0xff]  }
  0x16   :  { %2150 = vmatprep.subr.bf16.mxu1 %v2320_v21  ;;  %681 = vmatprep.mubr.bf16.mxu1 %v2684_v51  ;;  %v2359_v14 = vld [vmem:[%s3160_s1 + $0x188] sm:$0xff]   ;;  %v2361_v18 = vld [vmem:[%s3160_s1 + $0x1c0] sm:$0xff]   ;;  %v2381_v44 = vld [vmem:[%s3162_s3 + $0x58] sm:$0xff]  }
  0x17   :  { %v72_v16 = vcombine.high %v64_v12, %v64_v12  ;;  %v71_v17 = vrot.slane %v57_v13, %v2668_v41  ;;  %v2362_v19 = vld [vmem:[%s3160_s1 + $0x100] sm:$0xff]   ;;  %v2374_v36 = vld [vmem:[%s3162_s3 + $0xe8] sm:$0xff]   ;;  %v2382_v45 = vld [vmem:[%s3162_s3 + $0xd8] sm:$0xff]  }
  0x18   :  { %2129 = vmatpush3.bf16.msra.mxu0 %v2321_v22  ;;  %v2363_v22 = vld [vmem:[%s3160_s1 + $0x180] sm:$0xff]   ;;  %v2375_v37 = vld [vmem:[%s3162_s3 + $0x28] sm:$0xff]   ;;  %v2414_v13 = vld [vmem:[%s3162_s3 + $0x1d8] sm:$0xff]  }
  0x19   :  { %2151 = vmatpush3.bf16.msra.mxu1 %v2322_v23  ;;  %2130 = vmatprep.subr.bf16.mxu0 %v2323_v24  ;;  %v2776_v20 = vpack.c.bf16 %v72_v16, %v72_v16  ;;  %v73_v21 = vcombine.high %v71_v17, %v71_v17  ;;  %v2365_v24 = vld [vmem:[%s3162_s3 + $0x78] sm:$0xff]   ;;  %v2796_v28 = vpack.c.bf16 %v71_v17, %v71_v17  ;;  %v2377_v39 = vld [vmem:[%s3162_s3 + $0x60] sm:$0xff]   ;;  %v2417_v16 = vld [vmem:[%s3162_s3 + $0x150] sm:$0xff]  }
  0x1a   :  { %2152 = vmatprep.subr.bf16.mxu1 %v2324_v25  ;;  %v2366_v25 = vld [vmem:[%s3162_s3 + $0xf8] sm:$0xff]   ;;  %v2378_v40 = vld [vmem:[%s3162_s3 + $0xe0] sm:$0xff]   ;;  %v2418_v17 = vld [vmem:[%s3162_s3 + $0x1d0] sm:$0xff]  }
  0x1b   :  { %v2781_v23 = vpack.c.bf16 %v73_v21, %v73_v21  ;;  %v2379_v42 = vld [vmem:[%s3162_s3 + $0x20] sm:$0xff]   ;;  %v2422_v21 = vld [vmem:[%s3162_s3 + $0x1c8] sm:$0xff]  }
  0x1c   :  { %2131 = vmatpush3.bf16.msra.mxu0 %v2325_v26  ;;  %v2367_v26 = vld [vmem:[%s3162_s3 + $0x38] sm:$0xff]   ;;  %v2380_v43 = vld [vmem:[%s3162_s3 + $0xa0] sm:$0xff]  }
  0x1d   :  { %2153 = vmatpush3.bf16.msra.mxu1 %v2326_v27  ;;  %2132 = vmatprep.subr.bf16.mxu0 %v2327_v29  ;;  %v2794_v27 = vpack.c.bf16 %v64_v12, %v64_v12  ;;  %v2368_v29 = vld [vmem:[%s3162_s3 + $0xb8] sm:$0xff]   ;;  %v2411_v10 = vld [vmem:[%s3162_s3 + $0x120] sm:$0xff]  }
  0x1e   :  { %2154 = vmatprep.subr.bf16.mxu1 %v2328_v30  ;;  %v2369_v30 = vld [vmem:[%s3162_s3 + $0x70] sm:$0xff]   ;;  %v2413_v12 = vld [vmem:[%s3162_s3 + $0x158] sm:$0xff]  }
  0x20   :  { %2133 = vmatpush3.bf16.msra.mxu0 %v2329_v31  ;;  %v2370_v31 = vld [vmem:[%s3162_s3 + $0xf0] sm:$0xff]  }
  0x21   :  { %2155 = vmatpush3.bf16.msra.mxu1 %v2330_v32  ;;  %2162 = vmatprep.subr.bf16.mxu0 %v2332_v35  ;;  %v2371_v32 = vld [vmem:[%s3162_s3 + $0x30] sm:$0xff]   ;;  %v2373_v35 = vld [vmem:[%s3162_s3 + $0x68] sm:$0xff]  }
  0x22   :  { %2184 = vmatprep.subr.bf16.mxu1 %v2333_v38  ;;  %v2376_v38 = vld [vmem:[%s3162_s3 + $0xa8] sm:$0xff]  }
  0x23   :  { %642 = vmatmul.mubr.bf16.vlgmr.msra.gmra.mxu0 %v2675_v47 }
  0x24   :  { %682 = vmatmul.mubr.bf16.vlgmr.msra.gmra.mxu1 %v2677_v48  ;;  %2163 = vmatpush3.bf16.msra.mxu0 %v2334_v46  ;;  %v2383_v46 = vld [vmem:[%s3162_s3 + $0x18] sm:$0xff]  }
  0x25   :  { %2185 = vmatpush3.bf16.msra.mxu1 %v2335_v49  ;;  %2164 = vmatprep.subr.bf16.mxu0 %v2336_v52  ;;  %v2384_v49 = vld [vmem:[%s3162_s3 + $0x98] sm:$0xff]   ;;  %v2387_v52 = vld [vmem:[%s3162_s3 + $0x10] sm:$0xff]  }
  0x26   :  { %2186 = vmatprep.subr.bf16.mxu1 %v2337_v53  ;;  %721 = vmatprep.mubr.bf16.mxu0 %v2776_v20  ;;  %v2388_v53 = vld [vmem:[%s3162_s3 + $0x90] sm:$0xff]  }
  0x27   :  { %761 = vmatprep.mubr.bf16.mxu1 %v2781_v23 }
  0x28   :  { %2165 = vmatpush3.bf16.msra.mxu0 %v2338_v54  ;;  %v2389_v54 = vld [vmem:[%s3162_s3 + $0x48] sm:$0xff]  }
  0x29   :  { %2187 = vmatpush3.bf16.msra.mxu1 %v2339_v55  ;;  %2166 = vmatprep.subr.bf16.mxu0 %v2340_v56  ;;  %v2390_v55 = vld [vmem:[%s3162_s3 + $0xc8] sm:$0xff]  }
  0x2a   :  { %2188 = vmatprep.subr.bf16.mxu1 %v2341_v57  ;;  %v2391_v56 = vld [vmem:[%s3162_s3 + $0x8] sm:$0xff]  }
  0x2b   :  { %v2392_v57 = vld [vmem:[%s3162_s3 + $0x88] sm:$0xff]  }
  0x2c   :  { %2167 = vmatpush3.bf16.msra.mxu0 %v2342_v58  ;;  %v2393_v58 = vld [vmem:[%s3162_s3 + $0x40] sm:$0xff]  }
  0x2d   :  { %2189 = vmatpush3.bf16.msra.mxu1 %v2343_v59  ;;  %2168 = vmatprep.subr.bf16.mxu0 %v2344_v60  ;;  %v2394_v59 = vld [vmem:[%s3162_s3 + $0xc0] sm:$0xff]  }
  0x2e   :  { %2190 = vmatprep.subr.bf16.mxu1 %v2345_v61  ;;  %v2395_v60 = vld [vmem:[%s3162_s3] sm:$0xff]  }
  0x2f   :  { %v2396_v61 = vld [vmem:[%s3162_s3 + $0x80] sm:$0xff]  }
  0x30   :  { %2169 = vmatpush3.bf16.msra.mxu0 %v2346_v62  ;;  %v2397_v62 = vld [vmem:[%s3162_s3 + $0x178] sm:$0xff]  }
  0x31   :  { %2191 = vmatpush3.bf16.msra.mxu1 %v2347_v63  ;;  %2170 = vmatprep.subr.bf16.mxu0 %v2348_v0  ;;  %v2398_v63 = vld [vmem:[%s3162_s3 + $0x1f8] sm:$0xff]  }
  0x32   :  { %2192 = vmatprep.subr.bf16.mxu1 %v2349_v1  ;;  %v2399_v0 = vld [vmem:[%s3162_s3 + $0x138] sm:$0xff]  }
  0x33   :  { %v2400_v1 = vld [vmem:[%s3162_s3 + $0x1b8] sm:$0xff]  }
  0x34   :  { %2171 = vmatpush3.bf16.msra.mxu0 %v2350_v2  ;;  %v2401_v2 = vld [vmem:[%s3162_s3 + $0x170] sm:$0xff]  }
  0x35   :  { %2193 = vmatpush3.bf16.msra.mxu1 %v2351_v3  ;;  %2172 = vmatprep.subr.bf16.mxu0 %v2352_v4  ;;  %v2402_v3 = vld [vmem:[%s3162_s3 + $0x1f0] sm:$0xff]  }
  0x36   :  { %2194 = vmatprep.subr.bf16.mxu1 %v2353_v5  ;;  %v2403_v4 = vld [vmem:[%s3162_s3 + $0x130] sm:$0xff]  }
  0x37   :  { %v2404_v5 = vld [vmem:[%s3162_s3 + $0x1b0] sm:$0xff]  }
  0x38   :  { %2173 = vmatpush3.bf16.msra.mxu0 %v2354_v6  ;;  %v2405_v6 = vld [vmem:[%s3162_s3 + $0x168] sm:$0xff]  }
  0x39   :  { %2195 = vmatpush3.bf16.msra.mxu1 %v2355_v7  ;;  %2174 = vmatprep.subr.bf16.mxu0 %v2356_v8  ;;  %v2406_v7 = vld [vmem:[%s3162_s3 + $0x1e8] sm:$0xff]   ;;  %v2409_v8 = vld [vmem:[%s3162_s3 + $0x160] sm:$0xff]  }
  0x3a   :  { %2196 = vmatprep.subr.bf16.mxu1 %v2357_v9  ;;  %v2410_v9 = vld [vmem:[%s3162_s3 + $0x1e0] sm:$0xff]  }
  0x3c   :  { %2175 = vmatpush3.bf16.msra.mxu0 %v2358_v11  ;;  %v2412_v11 = vld [vmem:[%s3162_s3 + $0x1a0] sm:$0xff]  }
  0x3d   :  { %2197 = vmatpush3.bf16.msra.mxu1 %v2359_v14  ;;  %2176 = vmatprep.subr.bf16.mxu0 %v2360_v15  ;;  %v2415_v14 = vld [vmem:[%s3162_s3 + $0x118] sm:$0xff]  }
  0x3e   :  { %2198 = vmatprep.subr.bf16.mxu1 %v2361_v18  ;;  %v2416_v15 = vld [vmem:[%s3162_s3 + $0x198] sm:$0xff]   ;;  %v2419_v18 = vld [vmem:[%s3162_s3 + $0x110] sm:$0xff]  }
  0x40   :  { %2177 = vmatpush3.bf16.msra.mxu0 %v2362_v19  ;;  %v2420_v19 = vld [vmem:[%s3162_s3 + $0x190] sm:$0xff]  }
  0x41   :  { %2199 = vmatpush3.bf16.msra.mxu1 %v2363_v22  ;;  %2206 = vmatprep.subr.bf16.mxu0 %v2365_v24 }
  0x42   :  { %2228 = vmatprep.subr.bf16.mxu1 %v2366_v25 }
  0x43   :  { %722 = vmatmul.mubr.bf16.vlgmr.msra.gmra.mxu0 %v2794_v27 }
  0x44   :  { %762 = vmatmul.mubr.bf16.vlgmr.msra.gmra.mxu1 %v2796_v28  ;;  %2207 = vmatpush3.bf16.msra.mxu0 %v2367_v26 }
  0x45   :  { %2229 = vmatpush3.bf16.msra.mxu1 %v2368_v29  ;;  %2208 = vmatprep.subr.bf16.mxu0 %v2369_v30 }
  0x46   :  { %2230 = vmatprep.subr.bf16.mxu1 %v2370_v31  ;;  %1320 = vmatprep.mubr.bf16.mxu0 %v2682_v50  ;;  %v2385_v50 = vld [vmem:[%s3162_s3 + $0x50] sm:$0xff]  }
  0x47   :  { %1360 = vmatprep.mubr.bf16.mxu1 %v2684_v51  ;;  %v2386_v51 = vld [vmem:[%s3162_s3 + $0xd0] sm:$0xff]  }
  0x48   :  { %2209 = vmatpush3.bf16.msra.mxu0 %v2371_v32 }
  0x49   :  { %2231 = vmatpush3.bf16.msra.mxu1 %v2372_v34  ;;  %2210 = vmatprep.subr.bf16.mxu0 %v2373_v35 }
  0x4a   :  { %2232 = vmatprep.subr.bf16.mxu1 %v2374_v36 }
  0x4c   :  { %2211 = vmatpush3.bf16.msra.mxu0 %v2375_v37 }
  0x4d   :  { %2233 = vmatpush3.bf16.msra.mxu1 %v2376_v38  ;;  %2212 = vmatprep.subr.bf16.mxu0 %v2377_v39 }
  0x4e   :  { %2234 = vmatprep.subr.bf16.mxu1 %v2378_v40 }
  0x50   :  { %2213 = vmatpush3.bf16.msra.mxu0 %v2379_v42 }
  0x51   :  { %2235 = vmatpush3.bf16.msra.mxu1 %v2380_v43  ;;  %2214 = vmatprep.subr.bf16.mxu0 %v2381_v44 }
  0x52   :  { %2236 = vmatprep.subr.bf16.mxu1 %v2382_v45 }
  0x54   :  { %2215 = vmatpush3.bf16.msra.mxu0 %v2383_v46 }
  0x55   :  { %2237 = vmatpush3.bf16.msra.mxu1 %v2384_v49  ;;  %2216 = vmatprep.subr.bf16.mxu0 %v2385_v50 }
  0x56   :  { %2238 = vmatprep.subr.bf16.mxu1 %v2386_v51 }
  0x58   :  { %2217 = vmatpush3.bf16.msra.mxu0 %v2387_v52 }
  0x59   :  { %2239 = vmatpush3.bf16.msra.mxu1 %v2388_v53  ;;  %2218 = vmatprep.subr.bf16.mxu0 %v2389_v54 }
  0x5a   :  { %2240 = vmatprep.subr.bf16.mxu1 %v2390_v55 }
  0x5c   :  { %2219 = vmatpush3.bf16.msra.mxu0 %v2391_v56 }
  0x5d   :  { %2241 = vmatpush3.bf16.msra.mxu1 %v2392_v57  ;;  %2220 = vmatprep.subr.bf16.mxu0 %v2393_v58 }
  0x5e   :  { %2242 = vmatprep.subr.bf16.mxu1 %v2394_v59 }
  0x60   :  { %2221 = vmatpush3.bf16.msra.mxu0 %v2395_v60 }
  0x61   :  { %2243 = vmatpush3.bf16.msra.mxu1 %v2396_v61  ;;  %2250 = vmatprep.subr.bf16.mxu0 %v2397_v62 }
  0x62   :  { %2272 = vmatprep.subr.bf16.mxu1 %v2398_v63 }
  0x63   :  { %1321 = vmatmul.mubr.bf16.vlgmr.msra.gmra.mxu0 %v2675_v47  ;;  %v2407_v47 = vld [vmem:[%s3162_s3 + $0x128] sm:$0xff]  }
  0x64   :  { %1361 = vmatmul.mubr.bf16.vlgmr.msra.gmra.mxu1 %v2677_v48  ;;  %2251 = vmatpush3.bf16.msra.mxu0 %v2399_v0  ;;  %v2408_v48 = vld [vmem:[%s3162_s3 + $0x1a8] sm:$0xff]  }
  0x65   :  { %2273 = vmatpush3.bf16.msra.mxu1 %v2400_v1  ;;  %2252 = vmatprep.subr.bf16.mxu0 %v2401_v2 }
  0x66   :  { %2274 = vmatprep.subr.bf16.mxu1 %v2402_v3  ;;  %1400 = vmatprep.mubr.bf16.mxu0 %v2776_v20  ;;  %v2421_v20 = vld [vmem:[%s3162_s3 + $0x148] sm:$0xff]  }
  0x67   :  { %1440 = vmatprep.mubr.bf16.mxu1 %v2781_v23 }
  0x68   :  { %2253 = vmatpush3.bf16.msra.mxu0 %v2403_v4 }
  0x69   :  { %2275 = vmatpush3.bf16.msra.mxu1 %v2404_v5  ;;  %2254 = vmatprep.subr.bf16.mxu0 %v2405_v6 }
  0x6a   :  { %2276 = vmatprep.subr.bf16.mxu1 %v2406_v7 }
  0x6c   :  { %2255 = vmatpush3.bf16.msra.mxu0 %v2407_v47 }
  0x6d   :  { %2277 = vmatpush3.bf16.msra.mxu1 %v2408_v48  ;;  %2256 = vmatprep.subr.bf16.mxu0 %v2409_v8 }
  0x6e   :  { %2278 = vmatprep.subr.bf16.mxu1 %v2410_v9 }
  0x70   :  { %2257 = vmatpush3.bf16.msra.mxu0 %v2411_v10 }
  0x71   :  { %2279 = vmatpush3.bf16.msra.mxu1 %v2412_v11  ;;  %2258 = vmatprep.subr.bf16.mxu0 %v2413_v12 }
  0x72   :  { %2280 = vmatprep.subr.bf16.mxu1 %v2414_v13 }
  0x74   :  { %2259 = vmatpush3.bf16.msra.mxu0 %v2415_v14 }
  0x75   :  { %2281 = vmatpush3.bf16.msra.mxu1 %v2416_v15  ;;  %2260 = vmatprep.subr.bf16.mxu0 %v2417_v16 }
  0x76   :  { %2282 = vmatprep.subr.bf16.mxu1 %v2418_v17 }
  0x77   :  { %18 = vsyncpa [#allocation5], 0  ;;  %v2423_v22 = vld [vmem:[%s3162_s3 + $0x108] sm:$0xff]   ;;  %v2425_v24 = vld [vmem:[%s3162_s3 + $0x140] sm:$0xff]   ;;  %v2496_v37 = vmov 0   ;;  %vm1857_vm0 = vcmask 517120  }
  0x78   :  { %2261 = vmatpush3.bf16.msra.mxu0 %v2419_v18  ;;  %v2424_v23 = vld [vmem:[%s3162_s3 + $0x188] sm:$0xff]   ;;  %v2426_v25 = vld [vmem:[%s3162_s3 + $0x1c0] sm:$0xff]   ;;  %v3035_v55 = vld [vmem:[%s3164_s5 + $0xd0] sm:$0xff]  ;;  %vm1689_vm1 = vcmask 523264   ;;  %s2498_s17 = smov [#allocation2]  }
  0x79   :  { %2283 = vmatpush3.bf16.msra.mxu1 %v2420_v19  ;;  %2262 = vmatprep.subr.bf16.mxu0 %v2421_v20  ;;  %v2427_v26 = vld [vmem:[%s3162_s3 + $0x100] sm:$0xff]   ;;  %v1480_v32 = vld [vmem:[%s3164_s5 + $0xc8] sm:$0xff]  ;;  %v3040_v56 = vld [vmem:[%s3164_s5 + $0xf0] sm:$0xff]  ;;  %s1913_s18 = sshll.u32 %s2498_s17, 4  ;;  %s1914_s18 = int_to_ptr.vmem [resolvable:$true] %s1913_s18 }
  0x7a   :  { %2284 = vmatprep.subr.bf16.mxu1 %v2422_v21  ;;  %v2428_v29 = vld [vmem:[%s3162_s3 + $0x180] sm:$0xff]   ;;  %v1472_v42 = vld [vmem:[%s3164_s5 + $0x88] sm:$0xff]  ;;  %v2110_v59 = vcombine.low %v3035_v55, %v3040_v56  ;;  %v3050_v60 = vld [vmem:[%s3164_s5 + $0xd8] sm:$0xff]  ;;  %v2111_v7 = vcombine.high %v3035_v55, %v3040_v56 }
  0x7b   :  { %v1479_v30 = vld [vmem:[%s3164_s5 + $0xc0] sm:$0xff]  ;;  %v1476_v43 = vld [vmem:[%s3164_s5 + $0xa8] sm:$0xff]  ;;  %v3055_v61 = vld [vmem:[%s3164_s5 + $0xf8] sm:$0xff] }
  0x7c   :  { %2263 = vmatpush3.bf16.msra.mxu0 %v2423_v22  ;;  %v1483_v31 = vld [vmem:[%s3164_s5 + $0xe0] sm:$0xff]  ;;  %v2101_v45 = vcombine.high %v1472_v42, %v1476_v43  ;;  %v1464_v49 = vld [vmem:[%s3164_s5 + $0x48] sm:$0xff]  ;;  %v2100_v52 = vcombine.low %v1472_v42, %v1476_v43  ;;  %v2112_v0 = vcombine.low %v3050_v60, %v3055_v61  ;;  %v2113_v47 = vcombine.high %v3050_v60, %v3055_v61  ;;  %v1458_v55 = vld [vmem:[%s3164_s5 + $0x18] sm:$0xff] }
  0x7d   :  { %2285 = vmatpush3.bf16.msra.mxu1 %v2424_v23  ;;  %2264 = vmatprep.subr.bf16.mxu0 %v2425_v24  ;;  %v2106_v34 = vcombine.low %v1479_v30, %v1483_v31  ;;  %v2107_v35 = vcombine.high %v1479_v30, %v1483_v31  ;;  %v1475_v36 = vld [vmem:[%s3164_s5 + $0xa0] sm:$0xff]  ;;  %v1468_v50 = vld [vmem:[%s3164_s5 + $0x68] sm:$0xff]  ;;  %v1462_v56 = vld [vmem:[%s3164_s5 + $0x38] sm:$0xff] }
  0x7e   :  { %2286 = vmatprep.subr.bf16.mxu1 %v2426_v25  ;;  %v1463_v44 = vld [vmem:[%s3164_s5 + $0x40] sm:$0xff]  ;;  %v2093_v57 = vcombine.high %v1464_v49, %v1468_v50  ;;  %v1456_v62 = vld [vmem:[%s3164_s5 + $0x8] sm:$0xff]  ;;  %v2092_v2 = vcombine.low %v1464_v49, %v1468_v50 }
  0x7f   :  { %v1467_v46 = vld [vmem:[%s3164_s5 + $0x60] sm:$0xff]  ;;  %v1460_v63 = vld [vmem:[%s3164_s5 + $0x28] sm:$0xff] }
  0x80   :  { %2265 = vmatpush3.bf16.msra.mxu0 %v2427_v26  ;;  %v2091_v53 = vcombine.high %v1463_v44, %v1467_v46  ;;  %v1455_v54 = vld [vmem:[%s3164_s5] sm:$0xff]  ;;  %v2090_v1 = vcombine.low %v1463_v44, %v1467_v46  ;;  %v2085_v4 = vcombine.high %v1456_v62, %v1460_v63  ;;  %v2084_v6 = vcombine.low %v1456_v62, %v1460_v63 }
  0x81   :  { %2287 = vmatpush3.bf16.msra.mxu1 %v2428_v29  ;;  %1701 = vmatprep.subr.bf16.mxu0 %v2107_v35  ;;  %v1459_v58 = vld [vmem:[%s3164_s5 + $0x20] sm:$0xff] }
  0x82   :  { %v2083_v3 = vcombine.high %v1455_v54, %v1459_v58  ;;  %v2082_v5 = vcombine.low %v1455_v54, %v1459_v58  ;;  %v1952_v16 = vld [vmem:[%s3161_s2] ss:$0 sm:$0xff] }
  0x83   :  { %1401 = vmatmul.mubr.bf16.vlgmr.msra.gmra.mxu0 %v2794_v27  ;;  %v1484_v27 = vld [vmem:[%s3164_s5 + $0xe8] sm:$0xff]  ;;  %v2017_v44 = vld [vmem:[%s3163_s4] ss:$0 sm:$0xff] }
  0x84   :  { %1441 = vmatmul.mubr.bf16.vlgmr.msra.gmra.mxu1 %v2796_v28  ;;  %v1471_v28 = vld [vmem:[%s3164_s5 + $0x80] sm:$0xff]  ;;  %1725 = vmatprep.mubr.bf16.mxu0 %v2496_v37  ;;  %v2108_v38 = vcombine.low %v1480_v32, %v1484_v27  ;;  %v2109_v39 = vcombine.high %v1480_v32, %v1484_v27 }
  0x85   :  { %1766 = vmatprep.mubr.bf16.mxu1 %v2496_v37  ;;  %v2099_v40 = vcombine.high %v1471_v28, %v1475_v36  ;;  %1702 = vmatpush1.bf16.msra.mxu0 %v2106_v34  ;;  %v2098_v51 = vcombine.low %v1471_v28, %v1475_v36 }
  0x86   :  { %1742 = vmatprep.subr.bf16.mxu1 %v2109_v39 }
  0x87   :  { %1743 = vmatpush1.bf16.msra.mxu1 %v2108_v38  ;;  %1703 = vmatprep.subr.bf16.mxu0 %v2099_v40 }
  0x88   :  { %1744 = vmatprep.subr.bf16.mxu1 %v2101_v45 }
  0x89   :  { %1704 = vmatpush1.bf16.msra.mxu0 %v2098_v51 }
  0x8a   :  { %1705 = vmatprep.subr.bf16.mxu0 %v2091_v53 }
  0x8b   :  { %1745 = vmatpush1.bf16.msra.mxu1 %v2100_v52 }
  0x8c   :  { %1746 = vmatprep.subr.bf16.mxu1 %v2093_v57 }
  0x8d   :  { %1706 = vmatpush1.bf16.msra.mxu0 %v2090_v1 }
  0x8e   :  { %1707 = vmatprep.subr.bf16.mxu0 %v2083_v3 }
  0x8f   :  { %1747 = vmatpush1.bf16.msra.mxu1 %v2092_v2 }
  0x90   :  { %1748 = vmatprep.subr.bf16.mxu1 %v2085_v4 }
  0x91   :  { %1708 = vmatpush1.bf16.msra.mxu0 %v2082_v5 }
  0x92   :  { %1783 = vmatprep.subr.bf16.mxu0 %v2111_v7 }
  0x93   :  { %1749 = vmatpush1.bf16.msra.mxu1 %v2084_v6  ;;  %v1448_v6 = vld [vmem:[%s3166_s7] sm:$0x3] }
  0x94   :  { %1824 = vmatprep.subr.bf16.mxu1 %v2113_v47 }
  0xe3   :  { %v2134_v48 = vpop.f32.mrf.mxu0 }
  0xe4   :  { %v2156_v8 = vpop.f32.mrf.mxu1 }
  0xe5   :  { %v2135_v9 = vpop.f32.mrf.mxu0 }
  0xe6   :  { %v2157_v10 = vpop.f32.mrf.mxu1  ;;  %v2136_v15 = vadd.f32 %v2135_v9, %v2134_v48  ;;  %v1473_v48 = vld [vmem:[%s3164_s5 + $0x90] sm:$0xff]  ;;  %v1474_v9 = vld [vmem:[%s3164_s5 + $0x98] sm:$0xff] }
  0xe7   :  { %v2137_v11 = vpop.f32.mrf.mxu0  ;;  %v2158_v18 = vadd.f32 %v2157_v10, %v2156_v8  ;;  %v1477_v8 = vld [vmem:[%s3164_s5 + $0xb0] sm:$0xff]  ;;  %v1478_v10 = vld [vmem:[%s3164_s5 + $0xb8] sm:$0xff] }
  0xe8   :  { %v2159_v12 = vpop.f32.mrf.mxu1  ;;  %v644_v17 = vadd.f32 %v2136_v15, %v1952_v16  ;;  %v1465_v15 = vld [vmem:[%s3164_s5 + $0x50] sm:$0xff] }
  0xe9   :  { %v2138_v13 = vpop.f32.mrf.mxu0  ;;  %v1469_v16 = vld [vmem:[%s3164_s5 + $0x70] sm:$0xff] }
  0xea   :  { %v2160_v14 = vpop.f32.mrf.mxu1  ;;  %v684_v23 = vadd.f32 %v2158_v18, %v644_v17  ;;  %v2103_v13 = vcombine.high %v1473_v48, %v1477_v8  ;;  %v1466_v17 = vld [vmem:[%s3164_s5 + $0x58] sm:$0xff] }
  0xeb   :  { %v2105_v14 = vcombine.high %v1474_v9, %v1478_v10  ;;  %v1470_v18 = vld [vmem:[%s3164_s5 + $0x78] sm:$0xff] }
  0xec   :  { %v2096_v60 = vcombine.low %v1466_v17, %v1470_v18 }
 0x103   :  { %v2178_v19 = vpop.f32.mrf.mxu0 }
 0x104   :  { %v2200_v20 = vpop.f32.mrf.mxu1 }
 0x105   :  { %v2179_v21 = vpop.f32.mrf.mxu0 }
 0x106   :  { %v2201_v22 = vpop.f32.mrf.mxu1  ;;  %v2180_v24 = vadd.f32 %v2179_v21, %v2178_v19  ;;  %v2102_v19 = vcombine.low %v1473_v48, %v1477_v8  ;;  %v2095_v21 = vcombine.high %v1465_v15, %v1469_v16 }
 0x107   :  { %v2202_v25 = vadd.f32 %v2201_v22, %v2200_v20  ;;  %v2181_v26 = vpop.f32.mrf.mxu0  ;;  %v2104_v20 = vcombine.low %v1474_v9, %v1478_v10  ;;  %v2097_v22 = vcombine.high %v1466_v17, %v1470_v18 }
 0x108   :  { %v2203_v29 = vpop.f32.mrf.mxu1  ;;  %v724_v30 = vadd.f32 %v2180_v24, %v684_v23  ;;  %v1457_v23 = vld [vmem:[%s3164_s5 + $0x10] sm:$0xff]  ;;  %v2088_v26 = vcombine.low %v1458_v55, %v1462_v56 }
 0x109   :  { %v2182_v31 = vpop.f32.mrf.mxu0  ;;  %v1461_v24 = vld [vmem:[%s3164_s5 + $0x30] sm:$0xff]  ;;  %s2497_s5 = smov [#allocation4]  }
 0x10a   :  { %v2204_v32 = vpop.f32.mrf.mxu1  ;;  %v764_v34 = vadd.f32 %v2202_v25, %v724_v30  ;;  %v2087_v61 = vcombine.high %v1457_v23, %v1461_v24  ;;  %v2086_v25 = vcombine.low %v1457_v23, %v1461_v24  ;;  %s1923_s16 = sshll.u32 %s2497_s5, 4  ;;  %s1924_s16 = int_to_ptr.vmem [resolvable:$true] %s1923_s16 }
 0x10b   :  { %s2431_s19 = scalar_lea.vmem %s1924_s16, 32  ;;  %p2436_p1 = scmp.lt.s32.totalorder %s1924_s16, %s1924_s16 }
 0x10c   :  { %1858 = vst.msk [vmem:[#allocation2] sm:$0x3] %vm1857_vm0, %v764_v34  ;;  %p2432_p0 = scmp.ne.s32.totalorder %s1924_s16, %s2431_s19  ;;  %p2437_p2 = scmp.lt.s32.totalorder %s2431_s19, %s2431_s19 }
 0x10e   :  { %p2438_p3 = por %p2437_p2, %p2436_p1 }
 0x110   :  { %p2439_p4 = pnand %p2438_p3, %p2432_p0 }
 0x123   :  { %v2222_v35 = vpop.f32.mrf.mxu0 }
 0x124   :  { %v2244_v27 = vpop.f32.mrf.mxu1 }
 0x125   :  { %v2223_v28 = vpop.f32.mrf.mxu0 }
 0x126   :  { %v2245_v36 = vpop.f32.mrf.mxu1  ;;  %v2224_v43 = vadd.f32 %v2223_v28, %v2222_v35 }
 0x127   :  { %v2225_v38 = vpop.f32.mrf.mxu0  ;;  %v2246_v46 = vadd.f32 %v2245_v36, %v2244_v27 }
 0x128   :  { %v2247_v39 = vpop.f32.mrf.mxu1  ;;  %v1323_v45 = vadd.f32 %v2224_v43, %v2017_v44 }
 0x129   :  { %v2226_v40 = vpop.f32.mrf.mxu0 }
 0x12a   :  { %v2248_v42 = vpop.f32.mrf.mxu1  ;;  %v1363_v53 = vadd.f32 %v2246_v46, %v1323_v45 }
 0x143   :  { %v2266_v49 = vpop.f32.mrf.mxu0 }
 0x144   :  { %v2288_v50 = vpop.f32.mrf.mxu1 }
 0x145   :  { %v2267_v51 = vpop.f32.mrf.mxu0 }
 0x146   :  { %v2289_v52 = vpop.f32.mrf.mxu1  ;;  %v2268_v54 = vadd.f32 %v2267_v51, %v2266_v49 }
 0x147   :  { %v2269_v57 = vpop.f32.mrf.mxu0  ;;  %v2290_v63 = vadd.f32 %v2289_v52, %v2288_v50 }
 0x148   :  { %v2291_v58 = vpop.f32.mrf.mxu1  ;;  %v1403_v62 = vadd.f32 %v2268_v54, %v1363_v53 }
 0x149   :  { %v2270_v1 = vpop.f32.mrf.mxu0 }
 0x14a   :  { %v2292_v2 = vpop.f32.mrf.mxu1  ;;  %v1443_v3 = vadd.f32 %v2290_v63, %v1403_v62 }
 0x14c   :  { %v1449_v4 = vmul.f32 0.5, %v1443_v3  ;;  %1859 = vst.msk [vmem:[#allocation4] sm:$0x3] %vm1857_vm0, %v1443_v3 }
 0x14e   :  { %v1450_v5 = vmul.f32 1.442695, %v1449_v4 }
 0x150   :  { %2429 = vpow2.f32 %v1450_v5 }
 0x15d   :  { %v2430_v7 = vpop.eup %2429 }
 0x15e   :  { %v1452_v47 = vmul.f32 %v2430_v7, %v1448_v6 }
 0x160   :  { %v1453_v11 = vadd.f32 %v1452_v47, %v764_v34 }
 0x162   :  { %v1454_v12 = vpack.c.bf16 %v1453_v11, %v1453_v11  ;;  %1860 = vst.msk [vmem:[#allocation6] sm:$0x3] %vm1857_vm0, %v1453_v11 }
 0x164   :  { %2114 = vmatmul.mubr.msk.bf16.vlgmr.msra.gmra.mxu0 %vm1689_vm1, %v1454_v12  ;;  %2115 = vmatmul.mubr.msk.bf16.vlgmr.msra.gmra.mxu1 %vm1689_vm1, %v1454_v12 }
 0x165   :  { %1784 = vmatpush1.bf16.msra.mxu0 %v2110_v59  ;;  %1825 = vmatpush1.bf16.msra.mxu1 %v2112_v0  ;;  %v2094_v59 = vcombine.low %v1465_v15, %v1469_v16  ;;  %v2089_v0 = vcombine.high %v1458_v55, %v1462_v56 }
 0x166   :  { %1785 = vmatprep.subr.bf16.mxu0 %v2103_v13  ;;  %1826 = vmatprep.subr.bf16.mxu1 %v2105_v14 }
 0x167   :  { %1807 = vmatprep.mubr.bf16.mxu0 %v2496_v37  ;;  %1848 = vmatprep.mubr.bf16.mxu1 %v2496_v37 }
 0x169   :  { %1786 = vmatpush1.bf16.msra.mxu0 %v2102_v19  ;;  %1827 = vmatpush1.bf16.msra.mxu1 %v2104_v20 }
 0x16a   :  { %1787 = vmatprep.subr.bf16.mxu0 %v2095_v21  ;;  %1828 = vmatprep.subr.bf16.mxu1 %v2097_v22 }
 0x16d   :  { %1788 = vmatpush1.bf16.msra.mxu0 %v2094_v59  ;;  %1829 = vmatpush1.bf16.msra.mxu1 %v2096_v60 }
 0x16e   :  { %1789 = vmatprep.subr.bf16.mxu0 %v2087_v61  ;;  %1830 = vmatprep.subr.bf16.mxu1 %v2089_v0 }
 0x171   :  { %1790 = vmatpush1.bf16.msra.mxu0 %v2086_v25  ;;  %1831 = vmatpush1.bf16.msra.mxu1 %v2088_v26 }
 0x174   :  { %2116 = vmatmul.mubr.msk.bf16.vlgmr.msra.gmra.mxu0 %vm1689_vm1, %v1454_v12  ;;  %2117 = vmatmul.mubr.msk.bf16.vlgmr.msra.gmra.mxu1 %vm1689_vm1, %v1454_v12 }
 0x175   :  { %2442 = shalt.err (!%p2439_p4)
}
 0x176   :  { %1926 = dma.vmem_to_hbm [thread:$0]  %s1924_s16, 32, %s3168_s9, [#allocation5]  }
 0x177   :  { %s2451_s21 = scalar_lea.vmem %s1914_s18, 32  ;;  %p2456_p6 = scmp.lt.s32.totalorder %s1914_s18, %s1914_s18 }
 0x178   :  { %p2452_p5 = scmp.ne.s32.totalorder %s1914_s18, %s2451_s21  ;;  %p2457_p7 = scmp.lt.s32.totalorder %s2451_s21, %s2451_s21 }
 0x17a   :  { %p2458_p8 = por %p2457_p7, %p2456_p6 }
 0x17c   :  { %p2459_p9 = pnand %p2458_p8, %p2452_p5 }
 0x17e   :  { %2462 = shalt.err (!%p2459_p9)
}
 0x17f   :  { %1916 = dma.vmem_to_hbm [thread:$0]  %s1914_s18, 32, %s3167_s8, [#allocation3]  }
 0x180   :  { %s2499_s7 = smov [#allocation6]  }
 0x181   :  { %s1933_s23 = sshll.u32 %s2499_s7, 4  ;;  %s1934_s23 = int_to_ptr.vmem [resolvable:$true] %s1933_s23 }
 0x182   :  { %s2471_s24 = scalar_lea.vmem %s1934_s23, 32  ;;  %p2476_p11 = scmp.lt.s32.totalorder %s1934_s23, %s1934_s23 }
 0x183   :  { %p2472_p10 = scmp.ne.s32.totalorder %s1934_s23, %s2471_s24  ;;  %p2477_p12 = scmp.lt.s32.totalorder %s2471_s24, %s2471_s24 }
 0x185   :  { %p2478_p13 = por %p2477_p12, %p2476_p11 }
 0x187   :  { %p2479_p0 = pnand %p2478_p13, %p2472_p10 }
 0x189   :  { %2482 = shalt.err (!%p2479_p0)
}
 0x18a   :  { %1936 = dma.vmem_to_hbm [thread:$0]  %s1934_s23, 32, %s3169_s10, [#allocation5]   ;;  %v1491_v37 = vsub.s32 0, %v2656_v33  ;;  %v1499_v29 = vsub.s32 2, %v2656_v33  ;;  %v1495_v30 = vsub.s32 1, %v2656_v33  ;;  %v1503_v31 = vsub.s32 3, %v2656_v33 }
 0x18b   :  { %v1487_v32 = vld [vmem:[%s3165_s6] sm:$0xff]  ;;  %v1507_v62 = vsub.s32 4, %v2656_v33  ;;  %v1515_v63 = vsub.s32 6, %v2656_v33  ;;  %v1511_v1 = vsub.s32 5, %v2656_v33  ;;  %v1519_v2 = vsub.s32 7, %v2656_v33 }
 0x18c   :  { %v1492_v34 = vrot.slane %v1487_v32, %v1491_v37  ;;  %v1500_v35 = vrot.slane %v1487_v32, %v1499_v29  ;;  %v1496_v27 = vrot.slane %v1487_v32, %v1495_v30  ;;  %v1504_v28 = vrot.slane %v1487_v32, %v1503_v31 }
 0x18d   :  { %v1508_v3 = vrot.slane %v1487_v32, %v1507_v62  ;;  %v1516_v4 = vrot.slane %v1487_v32, %v1515_v63  ;;  %v1512_v5 = vrot.slane %v1487_v32, %v1511_v1  ;;  %v1520_v6 = vrot.slane %v1487_v32, %v1519_v2 }
 0x224   :  { %v1727_v36 = vpop.f32.mrf.mxu0  ;;  %v1768_v38 = vpop.f32.mrf.mxu1 }
 0x225   :  { %v1728_v42 = vadd.f32 %v1727_v36, %v1492_v34  ;;  %v1769_v43 = vadd.f32 %v1768_v38, %v1500_v35 }
 0x226   :  { %v1729_v39 = vpop.f32.mrf.mxu0  ;;  %v1770_v40 = vpop.f32.mrf.mxu1 }
 0x227   :  { %v1730_v44 = vadd.f32 %v1729_v39, %v1496_v27  ;;  %v1771_v45 = vadd.f32 %v1770_v40, %v1504_v28 }
 0x228   :  { %v1731_v46 = vpop.f32.mrf.mxu0  ;;  %v1772_v49 = vpop.f32.mrf.mxu1 }
 0x229   :  { %v1869_v50 = vcombine.low %v1728_v42, %v1730_v44  ;;  %v1870_v51 = vcombine.low %v1769_v43, %v1771_v45 }
 0x22a   :  { %v1732_v52 = vpop.f32.mrf.mxu0  ;;  %v1773_v53 = vpop.f32.mrf.mxu1 }
 0x22b   :  { %v1877_v54 = vrot.slane %v1869_v50, %v2668_v41  ;;  %v1884_v57 = vrot.slane %v1870_v51, %v2668_v41 }
 0x22d   :  { %v1885_v58 = vcombine.low %v1877_v54, %v1884_v57 }
 0x22f   :  { %1905 = vst [vmem:[%s3170_s11] sm:$0xff] %v1885_v58 }
 0x234   :  { %v1809_v7 = vpop.f32.mrf.mxu0  ;;  %v1850_v47 = vpop.f32.mrf.mxu1 }
 0x235   :  { %v1810_v9 = vadd.f32 %v1809_v7, %v1508_v3  ;;  %v1851_v10 = vadd.f32 %v1850_v47, %v1516_v4 }
 0x236   :  { %v1811_v48 = vpop.f32.mrf.mxu0  ;;  %v1852_v8 = vpop.f32.mrf.mxu1 }
 0x237   :  { %v1812_v11 = vadd.f32 %v1811_v48, %v1512_v5  ;;  %v1853_v12 = vadd.f32 %v1852_v8, %v1520_v6 }
 0x238   :  { %v1813_v13 = vpop.f32.mrf.mxu0  ;;  %v1854_v14 = vpop.f32.mrf.mxu1 }
 0x239   :  { %v1886_v15 = vcombine.low %v1810_v9, %v1812_v11  ;;  %v1887_v16 = vcombine.low %v1851_v10, %v1853_v12 }
 0x23a   :  { %v1814_v17 = vpop.f32.mrf.mxu0  ;;  %v1855_v18 = vpop.f32.mrf.mxu1 }
 0x23b   :  { %v1894_v33 = vrot.slane %v1886_v15, %v2668_v41  ;;  %v1901_v19 = vrot.slane %v1887_v16, %v2668_v41 }
 0x23d   :  { %v1902_v20 = vcombine.low %v1894_v33, %v1901_v19 }
 0x23f   :  { %1906 = vst [vmem:[%s3170_s11 + $0x8] sm:$0xff] %v1902_v20 }
 0x240   :  { %2491 = dma.done.wait [#allocation3], 32  }
 0x241   :  { %2492 = vsyncadd [#allocation3], 4294967264 }
 0x242   :  { %2493 = dma.done.wait [#allocation5], 64  }
 0x243   :  { %2494 = vsyncadd [#allocation5], 4294967232 }
 0x244   :  { %1950 = vsyncpa [#allocation3], 1 }
 0x245   :  { %1951 = vsyncpa [#allocation5], 1 }

// kernel: _lambda_.11
= control target key start
LH: loop header
LB: loop body
LE: loop exit
PB: predicated region body
PF: predicated region fallthrough
CT: control target
= control target key end

     0   :  { %vm121_vm0 = vcmask 523264   ;;  %s1751_s28 = smov 127   ;;  %s1753_s6 = smov 121   ;;  %v1759_v16 = vmov 0   ;;  %vm432_vm1 = vcmask 588800   ;;  %s2144_s0 = inlined_call_operand.vmem [shape: f32[64,92], index: 0, kind: input, shape index: {}]   ;;  %s2145_s1 = inlined_call_operand.vmem [shape: bf16[4,4,32,64], index: 1, kind: input, shape index: {}]   ;;  %s2146_s2 = inlined_call_operand.vmem [shape: f32[32,1], index: 2, kind: input, shape index: {}]   ;;  %s2147_s3 = inlined_call_operand.vmem [shape: f32[4,32,72], index: 3, kind: output, shape index: {}]  }
   0x1   :  { %v21_v0 = vld [vmem:[%s2144_s0 + $0x30] sm:$0xff]  ;;  %v22_v1 = vld [vmem:[%s2144_s0 + $0x38] sm:$0xff]  ;;  %v19_v5 = vld [vmem:[%s2144_s0 + $0x20] sm:$0xff]  ;;  %s1754_s11 = smov 126   ;;  %s1755_s12 = smov 120   ;;  %1718 = vset.pattern.permute.xlu1 %v1759_v16  ;;  %1717 = vset.pattern.permute.xlu0 %v1759_v16 }
   0x2   :  { %v17_v2 = vld [vmem:[%s2144_s0 + $0x10] sm:$0xff]  ;;  %v26_v3 = vpack.c.bf16 %v22_v1, %v21_v0  ;;  %v18_v4 = vld [vmem:[%s2144_s0 + $0x18] sm:$0xff]  ;;  %v20_v6 = vld [vmem:[%s2144_s0 + $0x28] sm:$0xff]  ;;  %s1756_s13 = smov 116   ;;  %s1757_s14 = smov 115  }
   0x3   :  { %v24_v7 = vpack.c.bf16 %v18_v4, %v17_v2  ;;  %v15_v8 = vld [vmem:[%s2144_s0] sm:$0xff]  ;;  %v16_v9 = vld [vmem:[%s2144_s0 + $0x8] sm:$0xff]  ;;  %v25_v10 = vpack.c.bf16 %v20_v6, %v19_v5  ;;  %v1721_v13 = vld [vmem:[%s2145_s1 + $0x10] sm:$0xff]   ;;  %s1752_s0 = smov 122   ;;  %s1758_s15 = smov 114  }
   0x4   :  { %115 = vrot.lane.b32.xlu0 %v26_v3, %s1751_s28  ;;  %1528 = vmatprep.subr.bf16.mxu1 %v26_v3  ;;  %v1719_v11 = vld [vmem:[%s2145_s1] sm:$0xff]   ;;  %v23_v12 = vpack.c.bf16 %v16_v9, %v15_v8  ;;  %v1720_v14 = vld [vmem:[%s2145_s1 + $0x8] sm:$0xff]   ;;  %v1723_v15 = vld [vmem:[%s2145_s1 + $0x30] sm:$0xff]  }
   0x5   :  { %111 = vrot.lane.b32.xlu1 %v24_v7, %s1751_s28  ;;  %1529 = vmatpush3.bf16.msra.mxu1 %v26_v3  ;;  %v92_v17 = vld [vmem:[%s2146_s2 + $0x8] sm:$0xff]  ;;  %v91_v18 = vld [vmem:[%s2146_s2] sm:$0xff]  ;;  %v93_v19 = vld [vmem:[%s2146_s2 + $0x10] sm:$0xff] }
   0x6   :  { %1530 = vmatprep.subr.bf16.mxu1 %v25_v10  ;;  %1536 = vmatprep.mubr.msk.bf16.mxu1 %vm121_vm0, %v1719_v11  ;;  %v94_v20 = vld [vmem:[%s2146_s2 + $0x18] sm:$0xff]  ;;  %v1725_v31 = vld [vmem:[%s2145_s1 + $0x20] sm:$0xff]   ;;  %v1726_v38 = vld [vmem:[%s2145_s1 + $0x28] sm:$0xff]  }
   0x7   :  { %1524 = vmatprep.mubr.msk.bf16.mxu0 %vm121_vm0, %v1721_v13  ;;  %v1722_v29 = vld [vmem:[%s2145_s1 + $0x18] sm:$0xff]   ;;  %v1727_v36 = vld [vmem:[%s2145_s1 + $0x40] sm:$0xff]   ;;  %v1729_v40 = vld [vmem:[%s2145_s1 + $0x50] sm:$0xff]  }
   0x8   :  { %113 = vrot.lane.b32.xlu0 %v25_v10, %s1751_s28  ;;  %v1724_v35 = vld [vmem:[%s2145_s1 + $0x38] sm:$0xff]   ;;  %v1728_v44 = vld [vmem:[%s2145_s1 + $0x48] sm:$0xff]   ;;  %v1731_v45 = vld [vmem:[%s2145_s1 + $0x70] sm:$0xff]  }
   0x9   :  { %109 = vrot.lane.b32.xlu1 %v23_v12, %s1751_s28  ;;  %1531 = vmatpush3.bf16.msra.mxu1 %v25_v10  ;;  %v1730_v48 = vld [vmem:[%s2145_s1 + $0x58] sm:$0xff]   ;;  %v1733_v49 = vld [vmem:[%s2145_s1 + $0x60] sm:$0xff]   ;;  %v1734_v53 = vld [vmem:[%s2145_s1 + $0x68] sm:$0xff]  }
   0xa   :  { %1532 = vmatprep.subr.bf16.mxu1 %v24_v7  ;;  %v1732_v51 = vld [vmem:[%s2145_s1 + $0x78] sm:$0xff]   ;;  %v1735_v52 = vld [vmem:[%s2145_s1 + $0x80] sm:$0xff]   ;;  %v1737_v54 = vld [vmem:[%s2145_s1 + $0x90] sm:$0xff]  }
   0xb   :  { %v1736_v57 = vld [vmem:[%s2145_s1 + $0x88] sm:$0xff]   ;;  %v1739_v59 = vld [vmem:[%s2145_s1 + $0xb0] sm:$0xff]   ;;  %v1738_v62 = vld [vmem:[%s2145_s1 + $0x98] sm:$0xff]  }
   0xc   :  { %258 = vrot.lane.b32.xlu0 %v26_v3, %s1752_s0  ;;  %v1741_v63 = vld [vmem:[%s2145_s1 + $0xa0] sm:$0xff]   ;;  %v1740_v2 = vld [vmem:[%s2145_s1 + $0xb8] sm:$0xff]   ;;  %v1742_v5 = vld [vmem:[%s2145_s1 + $0xa8] sm:$0xff]  }
   0xd   :  { %339 = vrot.lane.b32.xlu1 %v26_v3, %s1753_s6  ;;  %1533 = vmatpush3.bf16.msra.mxu1 %v24_v7  ;;  %v1743_v4 = vld [vmem:[%s2145_s1 + $0xc0] sm:$0xff]   ;;  %v1745_v6 = vld [vmem:[%s2145_s1 + $0xd0] sm:$0xff]   ;;  %v1744_v8 = vld [vmem:[%s2145_s1 + $0xc8] sm:$0xff]  }
   0xe   :  { %1534 = vmatprep.subr.bf16.mxu1 %v23_v12  ;;  %v1747_v9 = vld [vmem:[%s2145_s1 + $0xf0] sm:$0xff]   ;;  %v1746_v11 = vld [vmem:[%s2145_s1 + $0xd8] sm:$0xff]   ;;  %v1749_v13 = vld [vmem:[%s2145_s1 + $0xe0] sm:$0xff]  }
   0xf   :  { %v1750_v16 = vld [vmem:[%s2145_s1 + $0xe8] sm:$0xff]  }
  0x10   :  { %256 = vrot.lane.b32.xlu0 %v25_v10, %s1752_s0 }
  0x11   :  { %337 = vrot.lane.b32.xlu1 %v25_v10, %s1753_s6  ;;  %1535 = vmatpush3.bf16.msra.mxu1 %v23_v12 }
  0x14   :  { %254 = vrot.lane.b32.xlu0 %v24_v7, %s1752_s0  ;;  %1537 = vmatmul.mubr.msk.bf16.vlgmr.msra.gmra.mxu1 %vm121_vm0, %v1720_v14 }
  0x15   :  { %335 = vrot.lane.b32.xlu1 %v24_v7, %s1753_s6  ;;  %1560 = vmatprep.mubr.msk.bf16.mxu1 %vm121_vm0, %v1723_v15  ;;  %v1748_v15 = vld [vmem:[%s2145_s1 + $0xf8] sm:$0xff]  }
  0x18   :  { %252 = vrot.lane.b32.xlu0 %v23_v12, %s1752_s0 }
  0x19   :  { %333 = vrot.lane.b32.xlu1 %v23_v12, %s1753_s6 }
  0x1c   :  { %453 = vrot.lane.b32.xlu0 %v26_v3, %s1754_s11 }
  0x1d   :  { %451 = vrot.lane.b32.xlu1 %v25_v10, %s1754_s11 }
  0x20   :  { %449 = vrot.lane.b32.xlu0 %v24_v7, %s1754_s11 }
  0x21   :  { %447 = vrot.lane.b32.xlu1 %v23_v12, %s1754_s11 }
  0x24   :  { %664 = vrot.lane.b32.xlu0 %v26_v3, %s1755_s12 }
  0x25   :  { %662 = vrot.lane.b32.xlu1 %v25_v10, %s1755_s12 }
  0x28   :  { %660 = vrot.lane.b32.xlu0 %v24_v7, %s1755_s12 }
  0x29   :  { %658 = vrot.lane.b32.xlu1 %v23_v12, %s1755_s12 }
  0x2c   :  { %888 = vrot.lane.b32.xlu0 %v26_v3, %s1756_s13 }
  0x2d   :  { %969 = vrot.lane.b32.xlu1 %v26_v3, %s1757_s14 }
  0x30   :  { %886 = vrot.lane.b32.xlu0 %v25_v10, %s1756_s13 }
  0x31   :  { %967 = vrot.lane.b32.xlu1 %v25_v10, %s1757_s14 }
  0x34   :  { %884 = vrot.lane.b32.xlu0 %v24_v7, %s1756_s13 }
  0x35   :  { %965 = vrot.lane.b32.xlu1 %v24_v7, %s1757_s14 }
  0x38   :  { %882 = vrot.lane.b32.xlu0 %v23_v12, %s1756_s13 }
  0x39   :  { %963 = vrot.lane.b32.xlu1 %v23_v12, %s1757_s14 }
  0x3c   :  { %1262 = vrot.lane.b32.xlu0 %v26_v3, %s1758_s15 }
  0x3d   :  { %1260 = vrot.lane.b32.xlu1 %v25_v10, %s1758_s15 }
  0x40   :  { %1258 = vrot.lane.b32.xlu0 %v24_v7, %s1758_s15 }
  0x41   :  { %1256 = vrot.lane.b32.xlu1 %v23_v12, %s1758_s15 }
  0x44   :  { %406 = vperm.xlu0 %1717, %v91_v18  }
  0x45   :  { %411 = vperm.xlu1 %1718, %v92_v17  }
  0x48   :  { %421 = vperm.xlu0 %1717, %v94_v20  }
  0x49   :  { %416 = vperm.xlu1 %1718, %v93_v19  }
  0x76   :  { %v116_v21 = vpop.permute.xlu0 %115 }
  0x77   :  { %v112_v22 = vpop.permute.xlu1 %111  ;;  %1516 = vmatprep.subr.bf16.mxu0 %v116_v21 }
  0x78   :  { %1517 = vmatpush3.bf16.msra.mxu0 %v116_v21 }
  0x7a   :  { %v114_v23 = vpop.permute.xlu0 %113 }
  0x7b   :  { %v110_v24 = vpop.permute.xlu1 %109  ;;  %1518 = vmatprep.subr.bf16.mxu0 %v114_v23 }
  0x7c   :  { %1519 = vmatpush3.bf16.msra.mxu0 %v114_v23 }
  0x7d   :  { %1520 = vmatprep.subr.bf16.mxu0 %v112_v22 }
  0x7e   :  { %v1832_v25 = vpop.permute.xlu0 %258 }
  0x7f   :  { %v1834_v26 = vpop.permute.xlu1 %339 }
  0x80   :  { %1552 = vmatprep.subr.bf16.mxu1 %v1834_v26  ;;  %1521 = vmatpush3.bf16.msra.mxu0 %v112_v22 }
  0x81   :  { %1553 = vmatpush3.bf16.msra.mxu1 %v1834_v26  ;;  %1522 = vmatprep.subr.bf16.mxu0 %v110_v24 }
  0x82   :  { %v1838_v27 = vpop.permute.xlu0 %256 }
  0x83   :  { %v1840_v28 = vpop.permute.xlu1 %337 }
  0x84   :  { %1554 = vmatprep.subr.bf16.mxu1 %v1840_v28  ;;  %1523 = vmatpush3.bf16.msra.mxu0 %v110_v24 }
  0x85   :  { %1555 = vmatpush3.bf16.msra.mxu1 %v1840_v28  ;;  %1540 = vmatprep.subr.bf16.mxu0 %v1832_v25 }
  0x86   :  { %v1848_v30 = vpop.permute.xlu0 %254 }
  0x87   :  { %v1853_v32 = vpop.permute.xlu1 %335  ;;  %1525 = vmatmul.mubr.msk.bf16.vlgmr.msra.gmra.mxu0 %vm121_vm0, %v1722_v29 }
  0x88   :  { %1556 = vmatprep.subr.bf16.mxu1 %v1853_v32  ;;  %1541 = vmatpush3.bf16.msra.mxu0 %v1832_v25 }
  0x89   :  { %1557 = vmatpush3.bf16.msra.mxu1 %v1853_v32  ;;  %1542 = vmatprep.subr.bf16.mxu0 %v1838_v27 }
  0x8a   :  { %v1860_v33 = vpop.permute.xlu0 %252  ;;  %1548 = vmatprep.mubr.msk.bf16.mxu0 %vm121_vm0, %v1725_v31 }
  0x8b   :  { %v1863_v34 = vpop.permute.xlu1 %333 }
  0x8c   :  { %1558 = vmatprep.subr.bf16.mxu1 %v1863_v34  ;;  %1543 = vmatpush3.bf16.msra.mxu0 %v1838_v27 }
  0x8d   :  { %1559 = vmatpush3.bf16.msra.mxu1 %v1863_v34  ;;  %1544 = vmatprep.subr.bf16.mxu0 %v1848_v30 }
  0x8e   :  { %1576 = vmatprep.subr.bf16.mxu1 %v116_v21  ;;  %v454_v37 = vpop.permute.xlu0 %453 }
  0x8f   :  { %v452_v39 = vpop.permute.xlu1 %451 }
  0x90   :  { %1545 = vmatpush3.bf16.msra.mxu0 %v1848_v30  ;;  %1561 = vmatmul.mubr.msk.bf16.vlgmr.msra.gmra.mxu1 %vm121_vm0, %v1724_v35 }
  0x91   :  { %1577 = vmatpush3.bf16.msra.mxu1 %v116_v21  ;;  %1546 = vmatprep.subr.bf16.mxu0 %v1860_v33 }
  0x92   :  { %1578 = vmatprep.subr.bf16.mxu1 %v114_v23  ;;  %1584 = vmatprep.mubr.msk.bf16.mxu1 %vm121_vm0, %v1727_v36  ;;  %v450_v41 = vpop.permute.xlu0 %449 }
  0x93   :  { %v448_v42 = vpop.permute.xlu1 %447 }
  0x94   :  { %1547 = vmatpush3.bf16.msra.mxu0 %v1860_v33 }
  0x95   :  { %1579 = vmatpush3.bf16.msra.mxu1 %v114_v23  ;;  %1564 = vmatprep.subr.bf16.mxu0 %v454_v37 }
  0x96   :  { %1580 = vmatprep.subr.bf16.mxu1 %v112_v22  ;;  %v1888_v43 = vpop.permute.xlu0 %664 }
  0x97   :  { %1549 = vmatmul.mubr.msk.bf16.vlgmr.msra.gmra.mxu0 %vm121_vm0, %v1726_v38  ;;  %v1897_v46 = vpop.permute.xlu1 %662 }
  0x98   :  { %1565 = vmatpush3.bf16.msra.mxu0 %v454_v37  ;;  %1572 = vmatprep.mubr.msk.bf16.mxu0 %vm121_vm0, %v1729_v40 }
  0x99   :  { %1581 = vmatpush3.bf16.msra.mxu1 %v112_v22  ;;  %1566 = vmatprep.subr.bf16.mxu0 %v452_v39 }
  0x9a   :  { %1582 = vmatprep.subr.bf16.mxu1 %v110_v24  ;;  %v1903_v47 = vpop.permute.xlu0 %660 }
  0x9b   :  { %v1915_v50 = vpop.permute.xlu1 %658 }
  0x9c   :  { %1567 = vmatpush3.bf16.msra.mxu0 %v452_v39 }
  0x9d   :  { %1583 = vmatpush3.bf16.msra.mxu1 %v110_v24  ;;  %1568 = vmatprep.subr.bf16.mxu0 %v450_v41 }
  0x9e   :  { %1600 = vmatprep.subr.bf16.mxu1 %v1888_v43  ;;  %v889_v58 = vpop.permute.xlu0 %888 }
  0x9f   :  { %v1947_v55 = vpop.permute.xlu1 %969 }
  0xa0   :  { %1569 = vmatpush3.bf16.msra.mxu0 %v450_v41  ;;  %1585 = vmatmul.mubr.msk.bf16.vlgmr.msra.gmra.mxu1 %vm121_vm0, %v1728_v44 }
  0xa1   :  { %1601 = vmatpush3.bf16.msra.mxu1 %v1888_v43  ;;  %1570 = vmatprep.subr.bf16.mxu0 %v448_v42 }
  0xa2   :  { %1602 = vmatprep.subr.bf16.mxu1 %v1897_v46  ;;  %1608 = vmatprep.mubr.msk.bf16.mxu1 %vm121_vm0, %v1731_v45  ;;  %v887_v61 = vpop.permute.xlu0 %886 }
  0xa3   :  { %v1956_v56 = vpop.permute.xlu1 %967 }
  0xa4   :  { %1571 = vmatpush3.bf16.msra.mxu0 %v448_v42 }
  0xa5   :  { %1603 = vmatpush3.bf16.msra.mxu1 %v1897_v46  ;;  %1588 = vmatprep.subr.bf16.mxu0 %v1834_v26 }
  0xa6   :  { %1604 = vmatprep.subr.bf16.mxu1 %v1903_v47  ;;  %v885_v1 = vpop.permute.xlu0 %884 }
  0xa7   :  { %1573 = vmatmul.mubr.msk.bf16.vlgmr.msra.gmra.mxu0 %vm121_vm0, %v1730_v48  ;;  %v1972_v60 = vpop.permute.xlu1 %965 }
  0xa8   :  { %1589 = vmatpush3.bf16.msra.mxu0 %v1834_v26  ;;  %1596 = vmatprep.mubr.msk.bf16.mxu0 %vm121_vm0, %v1733_v49 }
  0xa9   :  { %1605 = vmatpush3.bf16.msra.mxu1 %v1903_v47  ;;  %1590 = vmatprep.subr.bf16.mxu0 %v1840_v28 }
  0xaa   :  { %1606 = vmatprep.subr.bf16.mxu1 %v1915_v50  ;;  %v883_v3 = vpop.permute.xlu0 %882 }
  0xab   :  { %v1986_v0 = vpop.permute.xlu1 %963 }
  0xac   :  { %1591 = vmatpush3.bf16.msra.mxu0 %v1840_v28 }
  0xad   :  { %1607 = vmatpush3.bf16.msra.mxu1 %v1915_v50  ;;  %1592 = vmatprep.subr.bf16.mxu0 %v1853_v32 }
  0xae   :  { %1624 = vmatprep.subr.bf16.mxu1 %v1832_v25  ;;  %v1263_v7 = vpop.permute.xlu0 %1262 }
  0xaf   :  { %v1261_v10 = vpop.permute.xlu1 %1260 }
  0xb0   :  { %1593 = vmatpush3.bf16.msra.mxu0 %v1853_v32  ;;  %1609 = vmatmul.mubr.msk.bf16.vlgmr.msra.gmra.mxu1 %vm121_vm0, %v1732_v51 }
  0xb1   :  { %1625 = vmatpush3.bf16.msra.mxu1 %v1832_v25  ;;  %1594 = vmatprep.subr.bf16.mxu0 %v1863_v34 }
  0xb2   :  { %1626 = vmatprep.subr.bf16.mxu1 %v1838_v27  ;;  %1632 = vmatprep.mubr.msk.bf16.mxu1 %vm121_vm0, %v1735_v52  ;;  %v1259_v12 = vpop.permute.xlu0 %1258 }
  0xb3   :  { %v1257_v14 = vpop.permute.xlu1 %1256 }
  0xb4   :  { %1595 = vmatpush3.bf16.msra.mxu0 %v1863_v34 }
  0xb5   :  { %1627 = vmatpush3.bf16.msra.mxu1 %v1838_v27  ;;  %1612 = vmatprep.subr.bf16.mxu0 %v1834_v26 }
  0xb6   :  { %1628 = vmatprep.subr.bf16.mxu1 %v1848_v30 }
  0xb7   :  { %1597 = vmatmul.mubr.msk.bf16.vlgmr.msra.gmra.mxu0 %vm121_vm0, %v1734_v53 }
  0xb8   :  { %1613 = vmatpush3.bf16.msra.mxu0 %v1834_v26  ;;  %1620 = vmatprep.mubr.msk.bf16.mxu0 %vm121_vm0, %v1737_v54 }
  0xb9   :  { %1629 = vmatpush3.bf16.msra.mxu1 %v1848_v30  ;;  %1614 = vmatprep.subr.bf16.mxu0 %v1840_v28 }
  0xba   :  { %1630 = vmatprep.subr.bf16.mxu1 %v1860_v33 }
  0xbc   :  { %1615 = vmatpush3.bf16.msra.mxu0 %v1840_v28 }
  0xbd   :  { %1631 = vmatpush3.bf16.msra.mxu1 %v1860_v33  ;;  %1616 = vmatprep.subr.bf16.mxu0 %v1853_v32 }
  0xbe   :  { %1648 = vmatprep.subr.bf16.mxu1 %v1947_v55 }
  0xc0   :  { %1617 = vmatpush3.bf16.msra.mxu0 %v1853_v32  ;;  %1633 = vmatmul.mubr.msk.bf16.vlgmr.msra.gmra.mxu1 %vm121_vm0, %v1736_v57  ;;  %v2056_v25 = vpop.permute.xlu1 %411 }
  0xc1   :  { %1649 = vmatpush3.bf16.msra.mxu1 %v1947_v55  ;;  %1618 = vmatprep.subr.bf16.mxu0 %v1863_v34 }
  0xc2   :  { %1650 = vmatprep.subr.bf16.mxu1 %v1956_v56  ;;  %1656 = vmatprep.mubr.msk.bf16.mxu1 %vm121_vm0, %v1739_v59 }
  0xc4   :  { %1619 = vmatpush3.bf16.msra.mxu0 %v1863_v34 }
  0xc5   :  { %1651 = vmatpush3.bf16.msra.mxu1 %v1956_v56  ;;  %1636 = vmatprep.subr.bf16.mxu0 %v889_v58 }
  0xc6   :  { %1652 = vmatprep.subr.bf16.mxu1 %v1972_v60 }
  0xc7   :  { %1621 = vmatmul.mubr.msk.bf16.vlgmr.msra.gmra.mxu0 %vm121_vm0, %v1738_v62 }
  0xc8   :  { %1637 = vmatpush3.bf16.msra.mxu0 %v889_v58  ;;  %1644 = vmatprep.mubr.msk.bf16.mxu0 %vm121_vm0, %v1741_v63 }
  0xc9   :  { %1653 = vmatpush3.bf16.msra.mxu1 %v1972_v60  ;;  %1638 = vmatprep.subr.bf16.mxu0 %v887_v61 }
  0xca   :  { %1654 = vmatprep.subr.bf16.mxu1 %v1986_v0 }
  0xcc   :  { %1639 = vmatpush3.bf16.msra.mxu0 %v887_v61 }
  0xcd   :  { %1655 = vmatpush3.bf16.msra.mxu1 %v1986_v0  ;;  %1640 = vmatprep.subr.bf16.mxu0 %v885_v1 }
  0xce   :  { %1672 = vmatprep.subr.bf16.mxu1 %v1834_v26 }
  0xd0   :  { %1641 = vmatpush3.bf16.msra.mxu0 %v885_v1  ;;  %1657 = vmatmul.mubr.msk.bf16.vlgmr.msra.gmra.mxu1 %vm121_vm0, %v1740_v2 }
  0xd1   :  { %1673 = vmatpush3.bf16.msra.mxu1 %v1834_v26  ;;  %1642 = vmatprep.subr.bf16.mxu0 %v883_v3 }
  0xd2   :  { %1674 = vmatprep.subr.bf16.mxu1 %v1840_v28  ;;  %1680 = vmatprep.mubr.msk.bf16.mxu1 %vm121_vm0, %v1743_v4 }
  0xd4   :  { %1643 = vmatpush3.bf16.msra.mxu0 %v883_v3  ;;  %v1538_v17 = vpop.f32.mrf.mxu1 }
  0xd5   :  { %1675 = vmatpush3.bf16.msra.mxu1 %v1840_v28  ;;  %1660 = vmatprep.subr.bf16.mxu0 %v1888_v43  ;;  %v2058_v28 = vpop.permute.xlu0 %406 }
  0xd6   :  { %1676 = vmatprep.subr.bf16.mxu1 %v1853_v32  ;;  %v227_v18 = vpop.f32.mrf.mxu1 }
  0xd7   :  { %1645 = vmatmul.mubr.msk.bf16.vlgmr.msra.gmra.mxu0 %vm121_vm0, %v1742_v5 }
  0xd8   :  { %1661 = vmatpush3.bf16.msra.mxu0 %v1888_v43  ;;  %1668 = vmatprep.mubr.msk.bf16.mxu0 %vm121_vm0, %v1745_v6  ;;  %v1539_v20 = vpop.f32.mrf.mxu1 }
  0xd9   :  { %1677 = vmatpush3.bf16.msra.mxu1 %v1853_v32  ;;  %1662 = vmatprep.subr.bf16.mxu0 %v1897_v46  ;;  %v2063_v45 = vpop.permute.xlu0 %421 }
  0xda   :  { %1678 = vmatprep.subr.bf16.mxu1 %v1863_v34  ;;  %v230_v22 = vpop.f32.mrf.mxu1 }
  0xdc   :  { %1663 = vmatpush3.bf16.msra.mxu0 %v1897_v46 }
  0xdd   :  { %1679 = vmatpush3.bf16.msra.mxu1 %v1863_v34  ;;  %1664 = vmatprep.subr.bf16.mxu0 %v1903_v47  ;;  %v2060_v34 = vpop.permute.xlu1 %416 }
  0xde   :  { %1696 = vmatprep.subr.bf16.mxu1 %v1263_v7 }
  0xe0   :  { %1665 = vmatpush3.bf16.msra.mxu0 %v1903_v47  ;;  %1681 = vmatmul.mubr.msk.bf16.vlgmr.msra.gmra.mxu1 %vm121_vm0, %v1744_v8 }
  0xe1   :  { %1666 = vmatprep.subr.bf16.mxu0 %v1915_v50  ;;  %1697 = vmatpush3.bf16.msra.mxu1 %v1263_v7 }
  0xe2   :  { %1698 = vmatprep.subr.bf16.mxu1 %v1261_v10  ;;  %1704 = vmatprep.mubr.msk.bf16.mxu1 %vm121_vm0, %v1747_v9 }
  0xe4   :  { %1667 = vmatpush3.bf16.msra.mxu0 %v1915_v50 }
  0xe5   :  { %1684 = vmatprep.subr.bf16.mxu0 %v1947_v55  ;;  %1699 = vmatpush3.bf16.msra.mxu1 %v1261_v10 }
  0xe6   :  { %1700 = vmatprep.subr.bf16.mxu1 %v1259_v12 }
  0xe7   :  { %1669 = vmatmul.mubr.msk.bf16.vlgmr.msra.gmra.mxu0 %vm121_vm0, %v1746_v11 }
  0xe8   :  { %1685 = vmatpush3.bf16.msra.mxu0 %v1947_v55  ;;  %1692 = vmatprep.mubr.msk.bf16.mxu0 %vm121_vm0, %v1749_v13 }
  0xe9   :  { %1686 = vmatprep.subr.bf16.mxu0 %v1956_v56  ;;  %1701 = vmatpush3.bf16.msra.mxu1 %v1259_v12 }
  0xea   :  { %1702 = vmatprep.subr.bf16.mxu1 %v1257_v14 }
  0xec   :  { %1687 = vmatpush3.bf16.msra.mxu0 %v1956_v56 }
  0xed   :  { %1688 = vmatprep.subr.bf16.mxu0 %v1972_v60  ;;  %1703 = vmatpush3.bf16.msra.mxu1 %v1257_v14 }
  0xf0   :  { %1689 = vmatpush3.bf16.msra.mxu0 %v1972_v60  ;;  %1705 = vmatmul.mubr.msk.bf16.vlgmr.msra.gmra.mxu1 %vm121_vm0, %v1748_v15 }
  0xf1   :  { %1690 = vmatprep.subr.bf16.mxu0 %v1986_v0 }
  0xf4   :  { %1691 = vmatpush3.bf16.msra.mxu0 %v1986_v0 }
  0xf7   :  { %1693 = vmatmul.mubr.msk.bf16.vlgmr.msra.gmra.mxu0 %vm121_vm0, %v1750_v16 }
 0x147   :  { %v1526_v19 = vpop.f32.mrf.mxu0 }
 0x148   :  { %v236_v27 = vadd.f32 %v1538_v17, %v1526_v19 }
 0x149   :  { %v162_v21 = vpop.f32.mrf.mxu0 }
 0x14a   :  { %v228_v31 = vadd.f32 %v227_v18, %v162_v21 }
 0x14b   :  { %v1527_v23 = vpop.f32.mrf.mxu0 }
 0x14c   :  { %v239_v35 = vadd.f32 %v1539_v20, %v1527_v23 }
 0x14d   :  { %v165_v26 = vpop.f32.mrf.mxu0 }
 0x14e   :  { %v231_v40 = vadd.f32 %v230_v22, %v165_v26 }
 0x150   :  { %v1562_v24 = vpop.f32.mrf.mxu1 }
 0x152   :  { %v385_v29 = vpop.f32.mrf.mxu1 }
 0x154   :  { %v1563_v38 = vpop.f32.mrf.mxu1 }
 0x156   :  { %v388_v50 = vpop.f32.mrf.mxu1 }
 0x157   :  { %v1550_v30 = vpop.f32.mrf.mxu0 }
 0x158   :  { %v321_v32 = vadd.f32 %v1550_v30, %v236_v27 }
 0x159   :  { %v304_v33 = vpop.f32.mrf.mxu0 }
 0x15a   :  { %v402_v36 = vadd.f32 %v1562_v24, %v321_v32  ;;  %v319_v37 = vadd.f32 %v304_v33, %v228_v31 }
 0x15b   :  { %v1551_v39 = vpop.f32.mrf.mxu0 }
 0x15c   :  { %v400_v41 = vadd.f32 %v385_v29, %v319_v37  ;;  %v322_v42 = vadd.f32 %v1551_v39, %v239_v35  ;;  %v426_v43 = vadd.f32 %v2060_v34, %v402_v36 }
 0x15d   :  { %v307_v44 = vpop.f32.mrf.mxu0 }
 0x15e   :  { %v424_v46 = vadd.f32 %v2058_v28, %v400_v41  ;;  %v403_v47 = vadd.f32 %v1563_v38, %v322_v42  ;;  %v430_v48 = vmax.f32 %v426_v43, 0.0  ;;  %v320_v49 = vadd.f32 %v307_v44, %v231_v40 }
 0x160   :  { %v428_v51 = vmax.f32 %v424_v46, 0.0  ;;  %435 = vst.msk [vmem:[%s2147_s3 + $0x10] sm:$0xff] %vm432_vm1, %v430_v48  ;;  %v401_v52 = vadd.f32 %v388_v50, %v320_v49  ;;  %v427_v53 = vadd.f32 %v2063_v45, %v403_v47  ;;  %v1586_v57 = vpop.f32.mrf.mxu1 }
 0x162   :  { %433 = vst.msk [vmem:[%s2147_s3] sm:$0xff] %vm432_vm1, %v428_v51  ;;  %v425_v54 = vadd.f32 %v2056_v25, %v401_v52  ;;  %v431_v55 = vmax.f32 %v427_v53, 0.0  ;;  %v564_v58 = vpop.f32.mrf.mxu1 }
 0x164   :  { %v429_v56 = vmax.f32 %v425_v54, 0.0  ;;  %436 = vst.msk [vmem:[%s2147_s3 + $0x18] sm:$0xff] %vm432_vm1, %v431_v55  ;;  %v1587_v60 = vpop.f32.mrf.mxu1 }
 0x166   :  { %434 = vst.msk [vmem:[%s2147_s3 + $0x8] sm:$0xff] %vm432_vm1, %v429_v56  ;;  %v567_v62 = vpop.f32.mrf.mxu1 }
 0x167   :  { %v1574_v59 = vpop.f32.mrf.mxu0 }
 0x168   :  { %v573_v2 = vadd.f32 %v1586_v57, %v1574_v59 }
 0x169   :  { %v499_v61 = vpop.f32.mrf.mxu0 }
 0x16a   :  { %v565_v5 = vadd.f32 %v564_v58, %v499_v61 }
 0x16b   :  { %v1575_v63 = vpop.f32.mrf.mxu0 }
 0x16c   :  { %v576_v8 = vadd.f32 %v1587_v60, %v1575_v63 }
 0x16d   :  { %v502_v1 = vpop.f32.mrf.mxu0 }
 0x16e   :  { %v568_v13 = vadd.f32 %v567_v62, %v502_v1 }
 0x170   :  { %v1610_v0 = vpop.f32.mrf.mxu1 }
 0x172   :  { %v710_v3 = vpop.f32.mrf.mxu1 }
 0x174   :  { %v1611_v11 = vpop.f32.mrf.mxu1 }
 0x176   :  { %v713_v22 = vpop.f32.mrf.mxu1 }
 0x177   :  { %v1598_v4 = vpop.f32.mrf.mxu0 }
 0x178   :  { %v646_v6 = vadd.f32 %v1598_v4, %v573_v2 }
 0x179   :  { %v629_v7 = vpop.f32.mrf.mxu0 }
 0x17a   :  { %v727_v9 = vadd.f32 %v1610_v0, %v646_v6  ;;  %v644_v10 = vadd.f32 %v629_v7, %v565_v5 }
 0x17b   :  { %v1599_v12 = vpop.f32.mrf.mxu0 }
 0x17c   :  { %v731_v14 = vadd.f32 %v727_v9, %v2060_v34  ;;  %v725_v15 = vadd.f32 %v710_v3, %v644_v10  ;;  %v647_v16 = vadd.f32 %v1599_v12, %v576_v8 }
 0x17d   :  { %v632_v17 = vpop.f32.mrf.mxu0 }
 0x17e   :  { %v735_v18 = vmax.f32 %v731_v14, 0.0  ;;  %v729_v19 = vadd.f32 %v725_v15, %v2058_v28  ;;  %v728_v20 = vadd.f32 %v1611_v11, %v647_v16  ;;  %v645_v21 = vadd.f32 %v632_v17, %v568_v13 }
 0x180   :  { %1378 = vst.msk [vmem:[%s2147_s3 + $0x30] sm:$0xff] %vm432_vm1, %v735_v18  ;;  %v733_v23 = vmax.f32 %v729_v19, 0.0  ;;  %v732_v24 = vadd.f32 %v728_v20, %v2063_v45  ;;  %v726_v26 = vadd.f32 %v713_v22, %v645_v21  ;;  %v1634_v31 = vpop.f32.mrf.mxu1 }
 0x182   :  { %1376 = vst.msk [vmem:[%s2147_s3 + $0x20] sm:$0xff] %vm432_vm1, %v733_v23  ;;  %v736_v27 = vmax.f32 %v732_v24, 0.0  ;;  %v730_v29 = vadd.f32 %v726_v26, %v2056_v25  ;;  %v857_v32 = vpop.f32.mrf.mxu1 }
 0x184   :  { %1379 = vst.msk [vmem:[%s2147_s3 + $0x38] sm:$0xff] %vm432_vm1, %v736_v27  ;;  %v734_v30 = vmax.f32 %v730_v29, 0.0  ;;  %v1635_v35 = vpop.f32.mrf.mxu1 }
 0x186   :  { %1377 = vst.msk [vmem:[%s2147_s3 + $0x28] sm:$0xff] %vm432_vm1, %v734_v30  ;;  %v860_v37 = vpop.f32.mrf.mxu1 }
 0x187   :  { %v1622_v33 = vpop.f32.mrf.mxu0 }
 0x188   :  { %v866_v41 = vadd.f32 %v1634_v31, %v1622_v33 }
 0x189   :  { %v792_v36 = vpop.f32.mrf.mxu0 }
 0x18a   :  { %v858_v44 = vadd.f32 %v857_v32, %v792_v36 }
 0x18b   :  { %v1623_v38 = vpop.f32.mrf.mxu0 }
 0x18c   :  { %v869_v48 = vadd.f32 %v1635_v35, %v1623_v38 }
 0x18d   :  { %v795_v40 = vpop.f32.mrf.mxu0 }
 0x18e   :  { %v861_v53 = vadd.f32 %v860_v37, %v795_v40 }
 0x190   :  { %v1658_v39 = vpop.f32.mrf.mxu1 }
 0x192   :  { %v1015_v42 = vpop.f32.mrf.mxu1 }
 0x194   :  { %v1659_v51 = vpop.f32.mrf.mxu1 }
 0x196   :  { %v1018_v62 = vpop.f32.mrf.mxu1 }
 0x197   :  { %v1646_v43 = vpop.f32.mrf.mxu0 }
 0x198   :  { %v951_v46 = vadd.f32 %v1646_v43, %v866_v41 }
 0x199   :  { %v934_v47 = vpop.f32.mrf.mxu0 }
 0x19a   :  { %v1032_v49 = vadd.f32 %v1658_v39, %v951_v46  ;;  %v949_v50 = vadd.f32 %v934_v47, %v858_v44 }
 0x19b   :  { %v1647_v52 = vpop.f32.mrf.mxu0 }
 0x19c   :  { %v1036_v54 = vadd.f32 %v1032_v49, %v2060_v34  ;;  %v1030_v55 = vadd.f32 %v1015_v42, %v949_v50  ;;  %v952_v56 = vadd.f32 %v1647_v52, %v869_v48 }
 0x19d   :  { %v937_v57 = vpop.f32.mrf.mxu0 }
 0x19e   :  { %v1040_v58 = vmax.f32 %v1036_v54, 0.0  ;;  %v1034_v59 = vadd.f32 %v1030_v55, %v2058_v28  ;;  %v1033_v60 = vadd.f32 %v1659_v51, %v952_v56  ;;  %v950_v61 = vadd.f32 %v937_v57, %v861_v53 }
 0x1a0   :  { %1398 = vst.msk [vmem:[%s2147_s3 + $0x50] sm:$0xff] %vm432_vm1, %v1040_v58  ;;  %v1038_v63 = vmax.f32 %v1034_v59, 0.0  ;;  %v1037_v0 = vadd.f32 %v1033_v60, %v2063_v45  ;;  %v1031_v1 = vadd.f32 %v1018_v62, %v950_v61  ;;  %v1682_v5 = vpop.f32.mrf.mxu1 }
 0x1a2   :  { %1396 = vst.msk [vmem:[%s2147_s3 + $0x40] sm:$0xff] %vm432_vm1, %v1038_v63  ;;  %v1041_v2 = vmax.f32 %v1037_v0, 0.0  ;;  %v1035_v3 = vadd.f32 %v1031_v1, %v2056_v25  ;;  %v1162_v6 = vpop.f32.mrf.mxu1 }
 0x1a4   :  { %1399 = vst.msk [vmem:[%s2147_s3 + $0x58] sm:$0xff] %vm432_vm1, %v1041_v2  ;;  %v1039_v4 = vmax.f32 %v1035_v3, 0.0  ;;  %v1683_v8 = vpop.f32.mrf.mxu1 }
 0x1a6   :  { %1397 = vst.msk [vmem:[%s2147_s3 + $0x48] sm:$0xff] %vm432_vm1, %v1039_v4  ;;  %v1165_v10 = vpop.f32.mrf.mxu1 }
 0x1a7   :  { %v1670_v7 = vpop.f32.mrf.mxu0 }
 0x1a8   :  { %v1171_v14 = vadd.f32 %v1682_v5, %v1670_v7 }
 0x1a9   :  { %v1097_v9 = vpop.f32.mrf.mxu0 }
 0x1aa   :  { %v1163_v17 = vadd.f32 %v1162_v6, %v1097_v9 }
 0x1ab   :  { %v1671_v11 = vpop.f32.mrf.mxu0 }
 0x1ac   :  { %v1174_v20 = vadd.f32 %v1683_v8, %v1671_v11 }
 0x1ad   :  { %v1100_v13 = vpop.f32.mrf.mxu0 }
 0x1ae   :  { %v1166_v26 = vadd.f32 %v1165_v10, %v1100_v13 }
 0x1b0   :  { %v1706_v12 = vpop.f32.mrf.mxu1 }
 0x1b2   :  { %v1308_v15 = vpop.f32.mrf.mxu1 }
 0x1b4   :  { %v1707_v23 = vpop.f32.mrf.mxu1 }
 0x1b6   :  { %v1311_v37 = vpop.f32.mrf.mxu1 }
 0x1b7   :  { %v1694_v16 = vpop.f32.mrf.mxu0 }
 0x1b8   :  { %v1244_v18 = vadd.f32 %v1694_v16, %v1171_v14 }
 0x1b9   :  { %v1227_v19 = vpop.f32.mrf.mxu0 }
 0x1ba   :  { %v1325_v21 = vadd.f32 %v1706_v12, %v1244_v18  ;;  %v1242_v22 = vadd.f32 %v1227_v19, %v1163_v17 }
 0x1bb   :  { %v1695_v24 = vpop.f32.mrf.mxu0 }
 0x1bc   :  { %v1329_v27 = vadd.f32 %v1325_v21, %v2060_v34  ;;  %v1323_v29 = vadd.f32 %v1308_v15, %v1242_v22  ;;  %v1245_v30 = vadd.f32 %v1695_v24, %v1174_v20 }
 0x1bd   :  { %v1230_v31 = vpop.f32.mrf.mxu0 }
 0x1be   :  { %v1333_v32 = vmax.f32 %v1329_v27, 0.0  ;;  %v1327_v33 = vadd.f32 %v1323_v29, %v2058_v28  ;;  %v1326_v35 = vadd.f32 %v1707_v23, %v1245_v30  ;;  %v1243_v36 = vadd.f32 %v1230_v31, %v1166_v26 }
 0x1c0   :  { %1418 = vst.msk [vmem:[%s2147_s3 + $0x70] sm:$0xff] %vm432_vm1, %v1333_v32  ;;  %v1331_v38 = vmax.f32 %v1327_v33, 0.0  ;;  %v1330_v39 = vadd.f32 %v1326_v35, %v2063_v45  ;;  %v1324_v40 = vadd.f32 %v1311_v37, %v1243_v36 }
 0x1c2   :  { %1416 = vst.msk [vmem:[%s2147_s3 + $0x60] sm:$0xff] %vm432_vm1, %v1331_v38  ;;  %v1334_v34 = vmax.f32 %v1330_v39, 0.0  ;;  %v1328_v28 = vadd.f32 %v1324_v40, %v2056_v25 }
 0x1c4   :  { %1419 = vst.msk [vmem:[%s2147_s3 + $0x78] sm:$0xff] %vm432_vm1, %v1334_v34  ;;  %v1332_v41 = vmax.f32 %v1328_v28, 0.0 }
 0x1c6   :  { %1417 = vst.msk [vmem:[%s2147_s3 + $0x68] sm:$0xff] %vm432_vm1, %v1332_v41 }

// kernel: _lambda_.12
= control target key start
LH: loop header
LB: loop body
LE: loop exit
PB: predicated region body
PF: predicated region fallthrough
CT: control target
= control target key end

     0   :  { %v1171_v7 = vmov 0   ;;  %s1172_s28 = smov 127   ;;  %vm85_vm0 = vcmask 261120   ;;  %s1174_s4 = smov 117   ;;  %vm78_vm1 = vcmask 1039360   ;;  %vm196_vm2 = vcmask 965632   ;;  %s1437_s0 = inlined_call_operand.vmem [shape: f32[32,228], index: 0, kind: input, shape index: {}]   ;;  %s1438_s1 = inlined_call_operand.vmem [shape: bf16[4,4,16,32], index: 1, kind: input, shape index: {}]   ;;  %s1439_s2 = inlined_call_operand.vmem [shape: f32[16,1], index: 2, kind: input, shape index: {}]   ;;  %s1440_s3 = inlined_call_operand.vmem [shape: f32[4,16,200], index: 3, kind: output, shape index: {}]  }
   0x1   :  { %v19_v0 = vld [vmem:[%s1437_s0 + $0x20] sm:$0xff]  ;;  %v21_v1 = vld [vmem:[%s1437_s0 + $0x30] sm:$0xff]  ;;  %v20_v5 = vld [vmem:[%s1437_s0 + $0x28] sm:$0xff]  ;;  %121 = vmatprep.mubr.bf16.mxu0 %v1171_v7  ;;  %172 = vmatprep.mubr.bf16.mxu1 %v1171_v7  ;;  %s1175_s5 = smov 126   ;;  %s1176_s6 = smov 116   ;;  %vm266_vm3 = vcmask 957440  }
   0x2   :  { %v15_v2 = vld [vmem:[%s1437_s0] sm:$0xff]  ;;  %v25_v3 = vpack.c.bf16 %v21_v1, %v19_v0  ;;  %v17_v4 = vld [vmem:[%s1437_s0 + $0x10] sm:$0xff]  ;;  %v22_v6 = vld [vmem:[%s1437_s0 + $0x38] sm:$0xff]  ;;  %1153 = vset.pattern.permute.xlu0 %v1171_v7  ;;  %1154 = vset.pattern.permute.xlu1 %v1171_v7  ;;  %s1177_s7 = smov 108   ;;  %s1178_s8 = smov 107   ;;  %vm359_vm4 = vcmask 1031168  }
   0x3   :  { %v23_v8 = vpack.c.bf16 %v17_v4, %v15_v2  ;;  %v26_v9 = vpack.c.bf16 %v22_v6, %v20_v5  ;;  %v16_v10 = vld [vmem:[%s1437_s0 + $0x8] sm:$0xff]  ;;  %v18_v11 = vld [vmem:[%s1437_s0 + $0x18] sm:$0xff]  ;;  %v1156_v13 = vld [vmem:[%s1438_s1] sm:$0xff]   ;;  %s1173_s0 = smov 118   ;;  %s1179_s9 = smov 106   ;;  %vm531_vm5 = vcmask 949248  }
   0x4   :  { %74 = vrot.lane.b32.xlu0 %v25_v3, %s1172_s28  ;;  %v24_v12 = vpack.c.bf16 %v18_v11, %v16_v10  ;;  %v59_v14 = vld [vmem:[%s1439_s2] sm:$0xff]  ;;  %v60_v15 = vld [vmem:[%s1439_s2 + $0x8] sm:$0xff]  ;;  %v1157_v32 = vld [vmem:[%s1438_s1 + $0x10] sm:$0xff]   ;;  %vm716_vm6 = vcmask 883712   ;;  %vm786_vm7 = vcmask 875520   ;;  %vm1026_vm8 = vcmask 867328  }
   0x5   :  { %70 = vrot.lane.b32.xlu1 %v23_v8, %s1172_s28  ;;  %152 = vmatprep.subr.bf16.mxu1 %v26_v9  ;;  %v1155_v24 = vld [vmem:[%s1438_s1 + $0x8] sm:$0xff]   ;;  %v1158_v36 = vld [vmem:[%s1438_s1 + $0x18] sm:$0xff]   ;;  %v1160_v44 = vld [vmem:[%s1438_s1 + $0x20] sm:$0xff]   ;;  %vm342_vm9 = vcmask 588800  }
   0x6   :  { %153 = vmatpush1.bf16.msra.mxu1 %v25_v3  ;;  %v1159_v43 = vld [vmem:[%s1438_s1 + $0x28] sm:$0xff]   ;;  %v1161_v51 = vld [vmem:[%s1438_s1 + $0x30] sm:$0xff]   ;;  %v1162_v52 = vld [vmem:[%s1438_s1 + $0x38] sm:$0xff]  }
   0x7   :  { %154 = vmatprep.subr.bf16.mxu1 %v24_v12  ;;  %v1163_v57 = vld [vmem:[%s1438_s1 + $0x48] sm:$0xff]   ;;  %v1164_v58 = vld [vmem:[%s1438_s1 + $0x40] sm:$0xff]   ;;  %v1166_v4 = vld [vmem:[%s1438_s1 + $0x58] sm:$0xff]  }
   0x8   :  { %76 = vrot.lane.b32.xlu0 %v26_v9, %s1172_s28 }
   0x9   :  { %72 = vrot.lane.b32.xlu1 %v24_v12, %s1172_s28 }
   0xa   :  { %155 = vmatpush1.bf16.msra.mxu1 %v23_v8 }
   0xc   :  { %192 = vrot.lane.b32.xlu0 %v25_v3, %s1173_s0 }
   0xd   :  { %194 = vrot.lane.b32.xlu1 %v26_v9, %s1173_s0  ;;  %1103 = vmatmul.mubr.msk.bf16.vlgmr.msra.gmra.mxu1 %vm85_vm0, %v1156_v13 }
   0xe   :  { %308 = vmatprep.mubr.bf16.mxu1 %v1171_v7 }
  0x10   :  { %262 = vrot.lane.b32.xlu0 %v25_v3, %s1174_s4 }
  0x11   :  { %264 = vrot.lane.b32.xlu1 %v26_v9, %s1174_s4 }
  0x14   :  { %188 = vrot.lane.b32.xlu0 %v23_v8, %s1173_s0 }
  0x15   :  { %190 = vrot.lane.b32.xlu1 %v24_v12, %s1173_s0 }
  0x18   :  { %258 = vrot.lane.b32.xlu0 %v23_v8, %s1174_s4 }
  0x19   :  { %260 = vrot.lane.b32.xlu1 %v24_v12, %s1174_s4 }
  0x1c   :  { %355 = vrot.lane.b32.xlu0 %v25_v3, %s1175_s5 }
  0x1d   :  { %357 = vrot.lane.b32.xlu1 %v26_v9, %s1175_s5 }
  0x20   :  { %351 = vrot.lane.b32.xlu0 %v23_v8, %s1175_s5 }
  0x21   :  { %353 = vrot.lane.b32.xlu1 %v24_v12, %s1175_s5 }
  0x24   :  { %527 = vrot.lane.b32.xlu0 %v25_v3, %s1176_s6 }
  0x25   :  { %529 = vrot.lane.b32.xlu1 %v26_v9, %s1176_s6 }
  0x28   :  { %523 = vrot.lane.b32.xlu0 %v23_v8, %s1176_s6 }
  0x29   :  { %525 = vrot.lane.b32.xlu1 %v24_v12, %s1176_s6 }
  0x2c   :  { %712 = vrot.lane.b32.xlu0 %v25_v3, %s1177_s7 }
  0x2d   :  { %714 = vrot.lane.b32.xlu1 %v26_v9, %s1177_s7 }
  0x30   :  { %782 = vrot.lane.b32.xlu0 %v25_v3, %s1178_s8 }
  0x31   :  { %784 = vrot.lane.b32.xlu1 %v26_v9, %s1178_s8 }
  0x34   :  { %708 = vrot.lane.b32.xlu0 %v23_v8, %s1177_s7 }
  0x35   :  { %710 = vrot.lane.b32.xlu1 %v24_v12, %s1177_s7 }
  0x38   :  { %778 = vrot.lane.b32.xlu0 %v23_v8, %s1178_s8 }
  0x39   :  { %780 = vrot.lane.b32.xlu1 %v24_v12, %s1178_s8 }
  0x3c   :  { %1022 = vrot.lane.b32.xlu0 %v25_v3, %s1179_s9  ;;  %v1165_v3 = vld [vmem:[%s1438_s1 + $0x50] sm:$0xff]  }
  0x3d   :  { %1024 = vrot.lane.b32.xlu1 %v26_v9, %s1179_s9  ;;  %v1168_v9 = vld [vmem:[%s1438_s1 + $0x60] sm:$0xff]  }
  0x40   :  { %1018 = vrot.lane.b32.xlu0 %v23_v8, %s1179_s9  ;;  %v1167_v8 = vld [vmem:[%s1438_s1 + $0x68] sm:$0xff]  }
  0x41   :  { %1020 = vrot.lane.b32.xlu1 %v24_v12, %s1179_s9 }
  0x44   :  { %325 = vperm.xlu0 %1153, %v59_v14   ;;  %v1169_v14 = vld [vmem:[%s1438_s1 + $0x70] sm:$0xff]  }
  0x45   :  { %330 = vperm.xlu1 %1154, %v60_v15   ;;  %v1170_v15 = vld [vmem:[%s1438_s1 + $0x78] sm:$0xff]  }
  0x76   :  { %v75_v16 = vpop.permute.xlu0 %74 }
  0x77   :  { %v71_v17 = vpop.permute.xlu1 %70 }
  0x7a   :  { %v77_v18 = vpop.permute.xlu0 %76 }
  0x7b   :  { %v73_v19 = vpop.permute.xlu1 %72  ;;  %101 = vmatprep.subr.bf16.mxu0 %v77_v18  ;;  %v80_v20 = vsel %vm78_vm1, %v75_v16, %v77_v18 }
  0x7c   :  { %102 = vmatpush1.bf16.msra.mxu0 %v80_v20  ;;  %v79_v23 = vsel %vm78_vm1, %v71_v17, %v73_v19 }
  0x7d   :  { %103 = vmatprep.subr.bf16.mxu0 %v73_v19 }
  0x7e   :  { %v193_v21 = vpop.permute.xlu0 %192 }
  0x7f   :  { %v1239_v22 = vpop.permute.xlu1 %194 }
  0x80   :  { %104 = vmatpush1.bf16.msra.mxu0 %v79_v23  ;;  %v1249_v27 = vsel %vm196_vm2, %v193_v21, %v1239_v22 }
  0x81   :  { %218 = vmatprep.subr.bf16.mxu0 %v1239_v22 }
  0x82   :  { %v263_v25 = vpop.permute.xlu0 %262 }
  0x83   :  { %v1245_v26 = vpop.permute.xlu1 %264  ;;  %1101 = vmatmul.mubr.msk.bf16.vlgmr.msra.gmra.mxu0 %vm85_vm0, %v1155_v24 }
  0x84   :  { %288 = vmatprep.subr.bf16.mxu1 %v1245_v26  ;;  %219 = vmatpush1.bf16.msra.mxu0 %v1249_v27  ;;  %v1255_v28 = vsel %vm266_vm3, %v263_v25, %v1245_v26 }
  0x85   :  { %289 = vmatpush1.bf16.msra.mxu1 %v1255_v28  ;;  %238 = vmatprep.mubr.bf16.mxu0 %v1171_v7 }
  0x86   :  { %v189_v29 = vpop.permute.xlu0 %188 }
  0x87   :  { %v191_v30 = vpop.permute.xlu1 %190 }
  0x88   :  { %220 = vmatprep.subr.bf16.mxu0 %v191_v30  ;;  %v1259_v31 = vsel %vm196_vm2, %v189_v29, %v191_v30 }
  0x89   :  { %221 = vmatpush1.bf16.msra.mxu0 %v1259_v31 }
  0x8a   :  { %v259_v33 = vpop.permute.xlu0 %258 }
  0x8b   :  { %v1265_v34 = vpop.permute.xlu1 %260 }
  0x8c   :  { %1105 = vmatmul.mubr.msk.bf16.vlgmr.msra.gmra.mxu0 %vm85_vm0, %v1157_v32  ;;  %290 = vmatprep.subr.bf16.mxu1 %v1265_v34  ;;  %v1271_v35 = vsel %vm266_vm3, %v259_v33, %v1265_v34 }
  0x8d   :  { %291 = vmatpush1.bf16.msra.mxu1 %v1271_v35  ;;  %401 = vmatprep.mubr.bf16.mxu0 %v1171_v7 }
  0x8e   :  { %432 = vmatprep.subr.bf16.mxu1 %v77_v18  ;;  %v356_v37 = vpop.permute.xlu0 %355 }
  0x8f   :  { %v358_v38 = vpop.permute.xlu1 %357 }
  0x90   :  { %v361_v39 = vsel %vm359_vm4, %v356_v37, %v358_v38  ;;  %1107 = vmatmul.mubr.msk.bf16.vlgmr.msra.gmra.mxu1 %vm85_vm0, %v1158_v36  ;;  %381 = vmatprep.subr.bf16.mxu0 %v358_v38 }
  0x91   :  { %382 = vmatpush1.bf16.msra.mxu0 %v361_v39  ;;  %433 = vmatpush1.bf16.msra.mxu1 %v80_v20 }
  0x92   :  { %434 = vmatprep.subr.bf16.mxu1 %v73_v19  ;;  %v352_v40 = vpop.permute.xlu0 %351  ;;  %452 = vmatprep.mubr.bf16.mxu1 %v1171_v7 }
  0x93   :  { %v354_v41 = vpop.permute.xlu1 %353 }
  0x94   :  { %v360_v42 = vsel %vm359_vm4, %v352_v40, %v354_v41  ;;  %383 = vmatprep.subr.bf16.mxu0 %v354_v41 }
  0x95   :  { %384 = vmatpush1.bf16.msra.mxu0 %v360_v42  ;;  %435 = vmatpush1.bf16.msra.mxu1 %v79_v23 }
  0x96   :  { %483 = vmatprep.subr.bf16.mxu0 %v1245_v26  ;;  %v528_v45 = vpop.permute.xlu0 %527 }
  0x97   :  { %v530_v46 = vpop.permute.xlu1 %529 }
  0x98   :  { %1109 = vmatmul.mubr.msk.bf16.vlgmr.msra.gmra.mxu0 %vm85_vm0, %v1159_v43  ;;  %1111 = vmatmul.mubr.msk.bf16.vlgmr.msra.gmra.mxu1 %vm85_vm0, %v1160_v44  ;;  %v533_v47 = vsel %vm531_vm5, %v528_v45, %v530_v46 }
  0x99   :  { %553 = vmatprep.subr.bf16.mxu1 %v530_v46  ;;  %484 = vmatpush1.bf16.msra.mxu0 %v1255_v28 }
  0x9a   :  { %554 = vmatpush1.bf16.msra.mxu1 %v533_v47  ;;  %485 = vmatprep.subr.bf16.mxu0 %v1265_v34  ;;  %v524_v48 = vpop.permute.xlu0 %523 }
  0x9b   :  { %v526_v49 = vpop.permute.xlu1 %525  ;;  %503 = vmatprep.mubr.bf16.mxu0 %v1171_v7  ;;  %573 = vmatprep.mubr.bf16.mxu1 %v1171_v7 }
  0x9c   :  { %555 = vmatprep.subr.bf16.mxu1 %v526_v49  ;;  %v532_v50 = vsel %vm531_vm5, %v524_v48, %v526_v49 }
  0x9d   :  { %486 = vmatpush1.bf16.msra.mxu0 %v1271_v35 }
  0x9e   :  { %556 = vmatpush1.bf16.msra.mxu1 %v532_v50  ;;  %621 = vmatprep.subr.bf16.mxu0 %v1245_v26  ;;  %v713_v53 = vpop.permute.xlu0 %712 }
  0x9f   :  { %672 = vmatprep.subr.bf16.mxu1 %v1239_v22  ;;  %v715_v54 = vpop.permute.xlu1 %714 }
  0xa0   :  { %1113 = vmatmul.mubr.msk.bf16.vlgmr.msra.gmra.mxu0 %vm85_vm0, %v1161_v51  ;;  %v718_v61 = vsel %vm716_vm6, %v713_v53, %v715_v54 }
  0xa1   :  { %1115 = vmatmul.mubr.msk.bf16.vlgmr.msra.gmra.mxu1 %vm85_vm0, %v1162_v52  ;;  %622 = vmatpush1.bf16.msra.mxu0 %v1255_v28 }
  0xa2   :  { %673 = vmatpush1.bf16.msra.mxu1 %v1249_v27  ;;  %623 = vmatprep.subr.bf16.mxu0 %v1265_v34  ;;  %v783_v55 = vpop.permute.xlu0 %782 }
  0xa3   :  { %674 = vmatprep.subr.bf16.mxu1 %v191_v30  ;;  %v785_v56 = vpop.permute.xlu1 %784  ;;  %641 = vmatprep.mubr.bf16.mxu0 %v1171_v7 }
  0xa4   :  { %692 = vmatprep.mubr.bf16.mxu1 %v1171_v7  ;;  %v788_v62 = vsel %vm786_vm7, %v783_v55, %v785_v56 }
  0xa5   :  { %624 = vmatpush1.bf16.msra.mxu0 %v1271_v35 }
  0xa6   :  { %675 = vmatpush1.bf16.msra.mxu1 %v1259_v31  ;;  %738 = vmatprep.subr.bf16.mxu0 %v715_v54  ;;  %v709_v59 = vpop.permute.xlu0 %708 }
  0xa7   :  { %808 = vmatprep.subr.bf16.mxu1 %v785_v56  ;;  %v711_v60 = vpop.permute.xlu1 %710 }
  0xa8   :  { %1121 = vmatmul.mubr.msk.bf16.vlgmr.msra.gmra.mxu0 %vm85_vm0, %v1163_v57  ;;  %v717_v1 = vsel %vm716_vm6, %v709_v59, %v711_v60 }
  0xa9   :  { %1123 = vmatmul.mubr.msk.bf16.vlgmr.msra.gmra.mxu1 %vm85_vm0, %v1164_v58  ;;  %739 = vmatpush1.bf16.msra.mxu0 %v718_v61 }
  0xaa   :  { %809 = vmatpush1.bf16.msra.mxu1 %v788_v62  ;;  %740 = vmatprep.subr.bf16.mxu0 %v711_v60  ;;  %v779_v63 = vpop.permute.xlu0 %778 }
  0xab   :  { %v781_v0 = vpop.permute.xlu1 %780  ;;  %758 = vmatprep.mubr.bf16.mxu0 %v1171_v7  ;;  %828 = vmatprep.mubr.bf16.mxu1 %v1171_v7 }
  0xac   :  { %810 = vmatprep.subr.bf16.mxu1 %v781_v0  ;;  %v787_v2 = vsel %vm786_vm7, %v779_v63, %v781_v0 }
  0xad   :  { %741 = vmatpush1.bf16.msra.mxu0 %v717_v1 }
  0xae   :  { %811 = vmatpush1.bf16.msra.mxu1 %v787_v2  ;;  %876 = vmatprep.subr.bf16.mxu0 %v530_v46  ;;  %v1023_v5 = vpop.permute.xlu0 %1022 }
  0xaf   :  { %927 = vmatprep.subr.bf16.mxu1 %v1245_v26  ;;  %v1025_v6 = vpop.permute.xlu1 %1024 }
  0xb0   :  { %1125 = vmatmul.mubr.msk.bf16.vlgmr.msra.gmra.mxu0 %vm85_vm0, %v1165_v3  ;;  %v1028_v10 = vsel %vm1026_vm8, %v1023_v5, %v1025_v6 }
  0xb1   :  { %1127 = vmatmul.mubr.msk.bf16.vlgmr.msra.gmra.mxu1 %vm85_vm0, %v1166_v4  ;;  %877 = vmatpush1.bf16.msra.mxu0 %v533_v47 }
  0xb2   :  { %928 = vmatpush1.bf16.msra.mxu1 %v1255_v28  ;;  %878 = vmatprep.subr.bf16.mxu0 %v526_v49  ;;  %v1019_v11 = vpop.permute.xlu0 %1018 }
  0xb3   :  { %929 = vmatprep.subr.bf16.mxu1 %v1265_v34  ;;  %896 = vmatprep.mubr.bf16.mxu0 %v1171_v7  ;;  %v1021_v12 = vpop.permute.xlu1 %1020 }
  0xb4   :  { %947 = vmatprep.mubr.bf16.mxu1 %v1171_v7  ;;  %v1027_v13 = vsel %vm1026_vm8, %v1019_v11, %v1021_v12 }
  0xb5   :  { %879 = vmatpush1.bf16.msra.mxu0 %v532_v50 }
  0xb6   :  { %930 = vmatpush1.bf16.msra.mxu1 %v1271_v35  ;;  %978 = vmatprep.subr.bf16.mxu0 %v785_v56 }
  0xb7   :  { %1048 = vmatprep.subr.bf16.mxu1 %v1025_v6 }
  0xb8   :  { %1133 = vmatmul.mubr.msk.bf16.vlgmr.msra.gmra.mxu0 %vm85_vm0, %v1167_v8 }
  0xb9   :  { %1135 = vmatmul.mubr.msk.bf16.vlgmr.msra.gmra.mxu1 %vm85_vm0, %v1168_v9  ;;  %979 = vmatpush1.bf16.msra.mxu0 %v788_v62 }
  0xba   :  { %1049 = vmatpush1.bf16.msra.mxu1 %v1028_v10  ;;  %980 = vmatprep.subr.bf16.mxu0 %v781_v0 }
  0xbb   :  { %1050 = vmatprep.subr.bf16.mxu1 %v1021_v12  ;;  %998 = vmatprep.mubr.bf16.mxu0 %v1171_v7 }
  0xbc   :  { %1068 = vmatprep.mubr.bf16.mxu1 %v1171_v7 }
  0xbd   :  { %981 = vmatpush1.bf16.msra.mxu0 %v787_v2 }
  0xbe   :  { %1051 = vmatpush1.bf16.msra.mxu1 %v1027_v13 }
  0xbf   :  { %v1361_v28 = vpop.permute.xlu0 %325 }
  0xc0   :  { %1137 = vmatmul.mubr.msk.bf16.vlgmr.msra.gmra.mxu0 %vm85_vm0, %v1169_v14  ;;  %v1364_v41 = vpop.permute.xlu1 %330 }
  0xc1   :  { %1139 = vmatmul.mubr.msk.bf16.vlgmr.msra.gmra.mxu1 %vm85_vm0, %v1170_v15 }
  0xcd   :  { %v174_v16 = vpop.f32.mrf.mxu1 }
  0xcf   :  { %v176_v19 = vpop.f32.mrf.mxu1 }
  0xd1   :  { %v178_v21 = vpop.f32.mrf.mxu1 }
  0xd3   :  { %v180_v24 = vpop.f32.mrf.mxu1 }
 0x143   :  { %v123_v17 = vpop.f32.mrf.mxu0 }
 0x144   :  { %v175_v23 = vadd.f32 %v174_v16, %v123_v17 }
 0x145   :  { %v125_v18 = vpop.f32.mrf.mxu0 }
 0x146   :  { %v177_v26 = vadd.f32 %v176_v19, %v125_v18 }
 0x147   :  { %v127_v20 = vpop.f32.mrf.mxu0 }
 0x148   :  { %v179_v31 = vadd.f32 %v178_v21, %v127_v20 }
 0x149   :  { %v129_v7 = vpop.f32.mrf.mxu0 }
 0x14a   :  { %v181_v36 = vadd.f32 %v180_v24, %v129_v7 }
 0x14c   :  { %v240_v22 = vpop.f32.mrf.mxu0 }
 0x14d   :  { %v249_v27 = vadd.f32 %v240_v22, %v175_v23 }
 0x14e   :  { %v242_v25 = vpop.f32.mrf.mxu0 }
 0x14f   :  { %v250_v32 = vadd.f32 %v242_v25, %v177_v26 }
 0x150   :  { %v244_v29 = vpop.f32.mrf.mxu0  ;;  %v310_v30 = vpop.f32.mrf.mxu1 }
 0x151   :  { %v319_v33 = vadd.f32 %v310_v30, %v249_v27  ;;  %v251_v37 = vadd.f32 %v244_v29, %v179_v31 }
 0x152   :  { %v246_v34 = vpop.f32.mrf.mxu0  ;;  %v312_v35 = vpop.f32.mrf.mxu1 }
 0x153   :  { %v333_v38 = vadd.f32 %v1361_v28, %v319_v33  ;;  %v320_v39 = vadd.f32 %v312_v35, %v250_v32  ;;  %v252_v43 = vadd.f32 %v246_v34, %v181_v36 }
 0x154   :  { %v314_v40 = vpop.f32.mrf.mxu1 }
 0x155   :  { %v337_v42 = vmax.f32 %v333_v38, 0.0  ;;  %v334_v44 = vadd.f32 %v1361_v28, %v320_v39  ;;  %v321_v45 = vadd.f32 %v314_v40, %v251_v37 }
 0x156   :  { %v316_v46 = vpop.f32.mrf.mxu1 }
 0x157   :  { %341 = vst [vmem:[%s1440_s3] sm:$0xff] %v337_v42  ;;  %v338_v47 = vmax.f32 %v334_v44, 0.0  ;;  %v335_v48 = vadd.f32 %v1364_v41, %v321_v45  ;;  %v322_v49 = vadd.f32 %v316_v46, %v252_v43 }
 0x158   :  { %v403_v50 = vpop.f32.mrf.mxu0  ;;  %v454_v51 = vpop.f32.mrf.mxu1 }
 0x159   :  { %343 = vst.msk [vmem:[%s1440_s3 + $0x8] sm:$0xff] %vm342_vm9, %v338_v47  ;;  %v339_v52 = vmax.f32 %v335_v48, 0.0  ;;  %v336_v53 = vadd.f32 %v1364_v41, %v322_v49  ;;  %v455_v61 = vadd.f32 %v454_v51, %v403_v50 }
 0x15a   :  { %v405_v54 = vpop.f32.mrf.mxu0  ;;  %v456_v55 = vpop.f32.mrf.mxu1 }
 0x15b   :  { %344 = vst [vmem:[%s1440_s3 + $0x10] sm:$0xff] %v339_v52  ;;  %v340_v56 = vmax.f32 %v336_v53, 0.0  ;;  %v457_v63 = vadd.f32 %v456_v55, %v405_v54 }
 0x15c   :  { %v407_v57 = vpop.f32.mrf.mxu0  ;;  %v458_v58 = vpop.f32.mrf.mxu1 }
 0x15d   :  { %345 = vst.msk [vmem:[%s1440_s3 + $0x18] sm:$0xff] %vm342_vm9, %v340_v56  ;;  %v459_v3 = vadd.f32 %v458_v58, %v407_v57 }
 0x15e   :  { %v409_v59 = vpop.f32.mrf.mxu0  ;;  %v460_v60 = vpop.f32.mrf.mxu1 }
 0x15f   :  { %v461_v9 = vadd.f32 %v460_v60, %v409_v59 }
 0x160   :  { %v505_v62 = vpop.f32.mrf.mxu0 }
 0x161   :  { %v514_v0 = vadd.f32 %v505_v62, %v455_v61  ;;  %v575_v1 = vpop.f32.mrf.mxu1 }
 0x162   :  { %v507_v2 = vpop.f32.mrf.mxu0 }
 0x163   :  { %v584_v4 = vadd.f32 %v575_v1, %v514_v0  ;;  %v515_v5 = vadd.f32 %v507_v2, %v457_v63  ;;  %v577_v6 = vpop.f32.mrf.mxu1 }
 0x164   :  { %v509_v8 = vpop.f32.mrf.mxu0 }
 0x165   :  { %v588_v10 = vadd.f32 %v584_v4, %v1361_v28  ;;  %v585_v11 = vadd.f32 %v577_v6, %v515_v5  ;;  %v516_v12 = vadd.f32 %v509_v8, %v459_v3  ;;  %v579_v13 = vpop.f32.mrf.mxu1 }
 0x166   :  { %v511_v14 = vpop.f32.mrf.mxu0 }
 0x167   :  { %v592_v15 = vmax.f32 %v588_v10, 0.0  ;;  %v589_v16 = vadd.f32 %v585_v11, %v1361_v28  ;;  %v586_v17 = vadd.f32 %v579_v13, %v516_v12  ;;  %v517_v18 = vadd.f32 %v511_v14, %v461_v9  ;;  %v581_v19 = vpop.f32.mrf.mxu1 }
 0x168   :  { %v643_v20 = vpop.f32.mrf.mxu0 }
 0x169   :  { %1116 = vst [vmem:[%s1440_s3 + $0x20] sm:$0xff] %v592_v15  ;;  %v593_v7 = vmax.f32 %v589_v16, 0.0  ;;  %v590_v21 = vadd.f32 %v586_v17, %v1364_v41  ;;  %v587_v22 = vadd.f32 %v581_v19, %v517_v18  ;;  %v694_v23 = vpop.f32.mrf.mxu1 }
 0x16a   :  { %v645_v24 = vpop.f32.mrf.mxu0  ;;  %v695_v33 = vadd.f32 %v694_v23, %v643_v20 }
 0x16b   :  { %1117 = vst.msk [vmem:[%s1440_s3 + $0x28] sm:$0xff] %vm342_vm9, %v593_v7  ;;  %v594_v25 = vmax.f32 %v590_v21, 0.0  ;;  %v591_v26 = vadd.f32 %v587_v22, %v1364_v41  ;;  %v696_v27 = vpop.f32.mrf.mxu1 }
 0x16c   :  { %v647_v29 = vpop.f32.mrf.mxu0  ;;  %v697_v36 = vadd.f32 %v696_v27, %v645_v24 }
 0x16d   :  { %1118 = vst [vmem:[%s1440_s3 + $0x30] sm:$0xff] %v594_v25  ;;  %v595_v30 = vmax.f32 %v591_v26, 0.0  ;;  %v698_v31 = vpop.f32.mrf.mxu1 }
 0x16e   :  { %v649_v32 = vpop.f32.mrf.mxu0  ;;  %v699_v40 = vadd.f32 %v698_v31, %v647_v29 }
 0x16f   :  { %1119 = vst.msk [vmem:[%s1440_s3 + $0x38] sm:$0xff] %vm342_vm9, %v595_v30  ;;  %v700_v34 = vpop.f32.mrf.mxu1 }
 0x170   :  { %v760_v35 = vpop.f32.mrf.mxu0  ;;  %v701_v46 = vadd.f32 %v700_v34, %v649_v32 }
 0x171   :  { %v769_v37 = vadd.f32 %v760_v35, %v695_v33  ;;  %v830_v38 = vpop.f32.mrf.mxu1 }
 0x172   :  { %v762_v39 = vpop.f32.mrf.mxu0 }
 0x173   :  { %v839_v42 = vadd.f32 %v830_v38, %v769_v37  ;;  %v770_v43 = vadd.f32 %v762_v39, %v697_v36  ;;  %v832_v44 = vpop.f32.mrf.mxu1 }
 0x174   :  { %v764_v45 = vpop.f32.mrf.mxu0 }
 0x175   :  { %v843_v47 = vadd.f32 %v839_v42, %v1361_v28  ;;  %v840_v48 = vadd.f32 %v832_v44, %v770_v43  ;;  %v771_v49 = vadd.f32 %v764_v45, %v699_v40  ;;  %v834_v50 = vpop.f32.mrf.mxu1 }
 0x176   :  { %v766_v51 = vpop.f32.mrf.mxu0 }
 0x177   :  { %v847_v52 = vmax.f32 %v843_v47, 0.0  ;;  %v844_v53 = vadd.f32 %v840_v48, %v1361_v28  ;;  %v841_v54 = vadd.f32 %v834_v50, %v771_v49  ;;  %v772_v55 = vadd.f32 %v766_v51, %v701_v46  ;;  %v836_v56 = vpop.f32.mrf.mxu1 }
 0x178   :  { %v898_v57 = vpop.f32.mrf.mxu0 }
 0x179   :  { %1128 = vst [vmem:[%s1440_s3 + $0x40] sm:$0xff] %v847_v52  ;;  %v848_v58 = vmax.f32 %v844_v53, 0.0  ;;  %v845_v59 = vadd.f32 %v841_v54, %v1364_v41  ;;  %v842_v60 = vadd.f32 %v836_v56, %v772_v55  ;;  %v949_v61 = vpop.f32.mrf.mxu1 }
 0x17a   :  { %v900_v62 = vpop.f32.mrf.mxu0  ;;  %v950_v6 = vadd.f32 %v949_v61, %v898_v57 }
 0x17b   :  { %1129 = vst.msk [vmem:[%s1440_s3 + $0x48] sm:$0xff] %vm342_vm9, %v848_v58  ;;  %v849_v63 = vmax.f32 %v845_v59, 0.0  ;;  %v846_v0 = vadd.f32 %v842_v60, %v1364_v41  ;;  %v951_v1 = vpop.f32.mrf.mxu1 }
 0x17c   :  { %v902_v2 = vpop.f32.mrf.mxu0  ;;  %v952_v10 = vadd.f32 %v951_v1, %v900_v62 }
 0x17d   :  { %1130 = vst [vmem:[%s1440_s3 + $0x50] sm:$0xff] %v849_v63  ;;  %v850_v3 = vmax.f32 %v846_v0, 0.0  ;;  %v953_v4 = vpop.f32.mrf.mxu1 }
 0x17e   :  { %v904_v5 = vpop.f32.mrf.mxu0  ;;  %v954_v14 = vadd.f32 %v953_v4, %v902_v2 }
 0x17f   :  { %1131 = vst.msk [vmem:[%s1440_s3 + $0x58] sm:$0xff] %vm342_vm9, %v850_v3  ;;  %v955_v8 = vpop.f32.mrf.mxu1 }
 0x180   :  { %v1000_v9 = vpop.f32.mrf.mxu0  ;;  %v956_v19 = vadd.f32 %v955_v8, %v904_v5 }
 0x181   :  { %v1009_v11 = vadd.f32 %v1000_v9, %v950_v6  ;;  %v1070_v12 = vpop.f32.mrf.mxu1 }
 0x182   :  { %v1002_v13 = vpop.f32.mrf.mxu0 }
 0x183   :  { %v1079_v15 = vadd.f32 %v1070_v12, %v1009_v11  ;;  %v1010_v16 = vadd.f32 %v1002_v13, %v952_v10  ;;  %v1072_v17 = vpop.f32.mrf.mxu1 }
 0x184   :  { %v1004_v18 = vpop.f32.mrf.mxu0 }
 0x185   :  { %v1083_v20 = vadd.f32 %v1079_v15, %v1361_v28  ;;  %v1080_v7 = vadd.f32 %v1072_v17, %v1010_v16  ;;  %v1011_v21 = vadd.f32 %v1004_v18, %v954_v14  ;;  %v1074_v22 = vpop.f32.mrf.mxu1 }
 0x186   :  { %v1006_v23 = vpop.f32.mrf.mxu0 }
 0x187   :  { %v1087_v24 = vmax.f32 %v1083_v20, 0.0  ;;  %v1084_v25 = vadd.f32 %v1080_v7, %v1361_v28  ;;  %v1081_v26 = vadd.f32 %v1074_v22, %v1011_v21  ;;  %v1012_v27 = vadd.f32 %v1006_v23, %v956_v19  ;;  %v1076_v29 = vpop.f32.mrf.mxu1 }
 0x189   :  { %1140 = vst [vmem:[%s1440_s3 + $0x60] sm:$0xff] %v1087_v24  ;;  %v1088_v30 = vmax.f32 %v1084_v25, 0.0  ;;  %v1085_v31 = vadd.f32 %v1081_v26, %v1364_v41  ;;  %v1082_v32 = vadd.f32 %v1076_v29, %v1012_v27 }
 0x18b   :  { %1141 = vst.msk [vmem:[%s1440_s3 + $0x68] sm:$0xff] %vm342_vm9, %v1088_v30  ;;  %v1089_v33 = vmax.f32 %v1085_v31, 0.0  ;;  %v1086_v34 = vadd.f32 %v1082_v32, %v1364_v41 }
 0x18d   :  { %1142 = vst [vmem:[%s1440_s3 + $0x70] sm:$0xff] %v1089_v33  ;;  %v1090_v28 = vmax.f32 %v1086_v34, 0.0 }
 0x18f   :  { %1143 = vst.msk [vmem:[%s1440_s3 + $0x78] sm:$0xff] %vm342_vm9, %v1090_v28 }

// kernel: _lambda_.13
= control target key start
LH: loop header
LB: loop body
LE: loop exit
PB: predicated region body
PF: predicated region fallthrough
CT: control target
= control target key end

     0   :  { %v2695_v3 = vmov 0   ;;  %s2696_s28 = smov 127   ;;  %s2697_s10 = smov 110   ;;  %vm68_vm0 = vcmask 1039360   ;;  %vm80_vm1 = vcmask 130048   ;;  %vm345_vm2 = vcmask 900096   ;;  %s3225_s0 = inlined_call_operand.vmem [shape: f32[16,692], index: 0, kind: input, shape index: {}]   ;;  %s3226_s2 = inlined_call_operand.vmem [shape: f32[3,1], index: 2, kind: input, shape index: {}]   ;;  %s3227_s1 = inlined_call_operand.vmem [shape: bf16[4,4,3,16], index: 1, kind: input, shape index: {}]   ;;  %s3228_s3 = inlined_call_operand.vmem [shape: f32[4,3,648], index: 3, kind: output, shape index: {}]  }
   0x1   :  { %v18_v0 = vld [vmem:[%s3225_s0 + $0x18] sm:$0xff]  ;;  %v24_v1 = vld [vmem:[%s3225_s0 + $0x48] sm:$0xff]  ;;  %157 = vmatprep.mubr.bf16.mxu1 %v2695_v3  ;;  %116 = vmatprep.mubr.bf16.mxu0 %v2695_v3  ;;  %v19_v6 = vld [vmem:[%s3225_s0 + $0x20] sm:$0xff]  ;;  %s2699_s11 = smov 126   ;;  %s2700_s12 = smov 108   ;;  %vm501_vm3 = vcmask 891904  }
   0x2   :  { %v16_v2 = vld [vmem:[%s3225_s0 + $0x8] sm:$0xff]  ;;  %v2735_v4 = vpack.c.bf16 %v24_v1, %v18_v0  ;;  %v22_v5 = vld [vmem:[%s3225_s0 + $0x38] sm:$0xff]  ;;  %v25_v7 = vld [vmem:[%s3225_s0 + $0x50] sm:$0xff]  ;;  %2598 = vset.pattern.permute.xlu0 %v2695_v3  ;;  %s2701_s13 = smov 92   ;;  %s2702_s14 = smov 91   ;;  %vm716_vm4 = vcmask 1031168  }
   0x3   :  { %v2747_v8 = vpack.c.bf16 %v22_v5, %v16_v2  ;;  %v17_v9 = vld [vmem:[%s3225_s0 + $0x10] sm:$0xff]  ;;  %v23_v10 = vld [vmem:[%s3225_s0 + $0x40] sm:$0xff]  ;;  %v2756_v11 = vpack.c.bf16 %v25_v7, %v19_v6  ;;  %v20_v13 = vld [vmem:[%s3225_s0 + $0x28] sm:$0xff]  ;;  %s2703_s15 = smov 90   ;;  %vm1124_vm5 = vcmask 883712   ;;  %vm1584_vm6 = vcmask 752640  }
   0x4   :  { %62 = vrot.lane.b32.xlu1 %v2735_v4, %s2696_s28  ;;  %v2759_v12 = vpack.c.bf16 %v23_v10, %v17_v9  ;;  %v26_v14 = vld [vmem:[%s3225_s0 + $0x58] sm:$0xff]  ;;  %v15_v15 = vld [vmem:[%s3225_s0] sm:$0xff]  ;;  %v21_v16 = vld [vmem:[%s3225_s0 + $0x30] sm:$0xff]  ;;  %s2698_s0 = smov 109   ;;  %vm1740_vm7 = vcmask 744448   ;;  %vm2332_vm8 = vcmask 736256  }
   0x5   :  { %58 = vrot.lane.b32.xlu0 %v2747_v8, %s2696_s28  ;;  %v2774_v17 = vpack.c.bf16 %v26_v14, %v20_v13  ;;  %v2777_v18 = vpack.c.bf16 %v21_v16, %v15_v15  ;;  %v49_v19 = vld [vmem:[%s3226_s2] sm:$0x7]  ;;  %v35_v48 = vld [vmem:[%s3227_s1 + $0x4] sm:$0x3]  ;;  %v36_v56 = vld [vmem:[%s3227_s1 + $0x6] sm:$0x3] }
   0x6   :  { %v34_v27 = vld [vmem:[%s3227_s1 + $0x2] sm:$0x3]  ;;  %v33_v34 = vld [vmem:[%s3227_s1] sm:$0x3]  ;;  %v37_v6 = vld [vmem:[%s3227_s1 + $0x8] sm:$0x3] }
   0x7   :  { %vm700_vm9 = vcmask 1042432   ;;  %vm701_vm10 = vcmask 63492  }
   0x8   :  { %64 = vrot.lane.b32.xlu1 %v2756_v11, %s2696_s28  ;;  %vm3147_vm11 = vmor %vm701_vm10, %vm700_vm9 }
   0x9   :  { %60 = vrot.lane.b32.xlu0 %v2759_v12, %s2696_s28 }
   0xc   :  { %66 = vrot.lane.b32.xlu1 %v2774_v17, %s2696_s28 }
   0xd   :  { %56 = vrot.lane.b32.xlu0 %v2777_v18, %s2696_s28 }
  0x10   :  { %337 = vrot.lane.b32.xlu1 %v2759_v12, %s2697_s10 }
  0x11   :  { %335 = vrot.lane.b32.xlu0 %v2747_v8, %s2697_s10 }
  0x14   :  { %341 = vrot.lane.b32.xlu1 %v2756_v11, %s2697_s10 }
  0x15   :  { %339 = vrot.lane.b32.xlu0 %v2735_v4, %s2697_s10 }
  0x18   :  { %491 = vrot.lane.b32.xlu1 %v2747_v8, %s2698_s0 }
  0x19   :  { %333 = vrot.lane.b32.xlu0 %v2777_v18, %s2697_s10 }
  0x1c   :  { %343 = vrot.lane.b32.xlu1 %v2774_v17, %s2697_s10 }
  0x1d   :  { %493 = vrot.lane.b32.xlu0 %v2759_v12, %s2698_s0 }
  0x20   :  { %495 = vrot.lane.b32.xlu1 %v2735_v4, %s2698_s0 }
  0x21   :  { %489 = vrot.lane.b32.xlu0 %v2777_v18, %s2698_s0 }
  0x24   :  { %499 = vrot.lane.b32.xlu1 %v2774_v17, %s2698_s0 }
  0x25   :  { %497 = vrot.lane.b32.xlu0 %v2756_v11, %s2698_s0 }
  0x28   :  { %708 = vrot.lane.b32.xlu1 %v2759_v12, %s2699_s11 }
  0x29   :  { %706 = vrot.lane.b32.xlu0 %v2747_v8, %s2699_s11 }
  0x2c   :  { %712 = vrot.lane.b32.xlu1 %v2756_v11, %s2699_s11 }
  0x2d   :  { %710 = vrot.lane.b32.xlu0 %v2735_v4, %s2699_s11 }
  0x30   :  { %714 = vrot.lane.b32.xlu1 %v2774_v17, %s2699_s11 }
  0x31   :  { %704 = vrot.lane.b32.xlu0 %v2777_v18, %s2699_s11 }
  0x34   :  { %1116 = vrot.lane.b32.xlu1 %v2759_v12, %s2700_s12 }
  0x35   :  { %1114 = vrot.lane.b32.xlu0 %v2747_v8, %s2700_s12 }
  0x38   :  { %1118 = vrot.lane.b32.xlu1 %v2735_v4, %s2700_s12 }
  0x39   :  { %1112 = vrot.lane.b32.xlu0 %v2777_v18, %s2700_s12 }
  0x3c   :  { %1122 = vrot.lane.b32.xlu1 %v2774_v17, %s2700_s12 }
  0x3d   :  { %1120 = vrot.lane.b32.xlu0 %v2756_v11, %s2700_s12 }
  0x40   :  { %1576 = vrot.lane.b32.xlu1 %v2759_v12, %s2701_s13 }
  0x41   :  { %1574 = vrot.lane.b32.xlu0 %v2747_v8, %s2701_s13 }
  0x44   :  { %1580 = vrot.lane.b32.xlu1 %v2756_v11, %s2701_s13 }
  0x45   :  { %1578 = vrot.lane.b32.xlu0 %v2735_v4, %s2701_s13 }
  0x48   :  { %1730 = vrot.lane.b32.xlu1 %v2747_v8, %s2702_s14 }
  0x49   :  { %1572 = vrot.lane.b32.xlu0 %v2777_v18, %s2701_s13 }
  0x4c   :  { %1582 = vrot.lane.b32.xlu1 %v2774_v17, %s2701_s13 }
  0x4d   :  { %1732 = vrot.lane.b32.xlu0 %v2759_v12, %s2702_s14 }
  0x50   :  { %1734 = vrot.lane.b32.xlu1 %v2735_v4, %s2702_s14 }
  0x51   :  { %1728 = vrot.lane.b32.xlu0 %v2777_v18, %s2702_s14 }
  0x54   :  { %1738 = vrot.lane.b32.xlu1 %v2774_v17, %s2702_s14 }
  0x55   :  { %1736 = vrot.lane.b32.xlu0 %v2756_v11, %s2702_s14 }
  0x58   :  { %2324 = vrot.lane.b32.xlu1 %v2759_v12, %s2703_s15 }
  0x59   :  { %2322 = vrot.lane.b32.xlu0 %v2747_v8, %s2703_s15 }
  0x5c   :  { %2326 = vrot.lane.b32.xlu1 %v2735_v4, %s2703_s15 }
  0x5d   :  { %2320 = vrot.lane.b32.xlu0 %v2777_v18, %s2703_s15 }
  0x60   :  { %2330 = vrot.lane.b32.xlu1 %v2774_v17, %s2703_s15 }
  0x61   :  { %2328 = vrot.lane.b32.xlu0 %v2756_v11, %s2703_s15 }
  0x65   :  { %647 = vperm.xlu0 %2598, %v49_v19  }
  0x76   :  { %v63_v20 = vpop.permute.xlu1 %62 }
  0x77   :  { %v59_v21 = vpop.permute.xlu0 %58 }
  0x7a   :  { %v65_v22 = vpop.permute.xlu1 %64 }
  0x7b   :  { %v61_v23 = vpop.permute.xlu0 %60  ;;  %v2827_v24 = vsel %vm68_vm0, %v63_v20, %v65_v22 }
  0x7c   :  { %v2830_v25 = vsel %vm68_vm0, %v59_v21, %v61_v23  ;;  %139 = vmatprep.subr.bf16.mxu1 %v2827_v24  ;;  %v2834_v26 = vsel %vm68_vm0, %v61_v23, %v63_v20 }
  0x7d   :  { %98 = vmatprep.subr.bf16.mxu0 %v2830_v25  ;;  %140 = vmatpush1.bf16.msra.mxu1 %v2834_v26 }
  0x7e   :  { %v2841_v28 = vpop.permute.xlu1 %66  ;;  %224 = vmatprep.subr.bf16.mxu1 %v2747_v8 }
  0x7f   :  { %v57_v29 = vpop.permute.xlu0 %56  ;;  %v2856_v33 = vsel %vm68_vm0, %v65_v22, %v2841_v28 }
  0x80   :  { %2533 = vmatmul.mubr.msk.bf16.vlgmr.msra.gmra.mxu1 %vm80_vm1, %v34_v27  ;;  %v2846_v30 = vsel %vm68_vm0, %v57_v29, %v59_v21  ;;  %v42_v21 = vld [vmem:[%s3227_s1 + $0x12] sm:$0x3] }
  0x81   :  { %99 = vmatpush1.bf16.msra.mxu0 %v2846_v30  ;;  %225 = vmatpush1.bf16.msra.mxu1 %v2777_v18 }
  0x82   :  { %180 = vmatprep.subr.bf16.mxu0 %v2841_v28  ;;  %v338_v31 = vpop.permute.xlu1 %337  ;;  %242 = vmatprep.mubr.bf16.mxu1 %v2695_v3 }
  0x83   :  { %v336_v32 = vpop.permute.xlu0 %335  ;;  %306 = vmatprep.subr.bf16.mxu1 %v2774_v17  ;;  %v40_v17 = vld [vmem:[%s3227_s1 + $0xe] sm:$0x3] }
  0x84   :  { %2532 = vmatmul.mubr.msk.bf16.vlgmr.msra.gmra.mxu0 %vm80_vm1, %v34_v27  ;;  %v2872_v40 = vsel %vm345_vm2, %v336_v32, %v338_v31 }
  0x85   :  { %181 = vmatpush1.bf16.msra.mxu0 %v2856_v33  ;;  %198 = vmatprep.mubr.bf16.mxu0 %v2695_v3 }
  0x86   :  { %v342_v35 = vpop.permute.xlu1 %341  ;;  %265 = vmatprep.subr.bf16.mxu0 %v2735_v4  ;;  %v38_v4 = vld [vmem:[%s3227_s1 + $0xa] sm:$0x3] }
  0x87   :  { %v340_v36 = vpop.permute.xlu0 %339 }
  0x88   :  { %2535 = vmatmul.mubr.msk.bf16.vlgmr.msra.gmra.mxu1 %vm80_vm1, %v33_v34  ;;  %v2866_v37 = vsel %vm345_vm2, %v340_v36, %v342_v35  ;;  %v2878_v41 = vsel %vm345_vm2, %v338_v31, %v340_v36 }
  0x89   :  { %307 = vmatpush1.bf16.msra.mxu1 %v2756_v11  ;;  %324 = vmatprep.mubr.bf16.mxu1 %v2695_v3 }
  0x8a   :  { %v492_v38 = vpop.permute.xlu1 %491  ;;  %415 = vmatprep.subr.bf16.mxu1 %v2866_v37 }
  0x8b   :  { %v334_v39 = vpop.permute.xlu0 %333 }
  0x8c   :  { %2534 = vmatmul.mubr.msk.bf16.vlgmr.msra.gmra.mxu0 %vm80_vm1, %v34_v27  ;;  %v2891_v47 = vsel %vm345_vm2, %v334_v39, %v336_v32 }
  0x8d   :  { %266 = vmatpush1.bf16.msra.mxu0 %v2759_v12  ;;  %283 = vmatprep.mubr.bf16.mxu0 %v2695_v3  ;;  %v39_v12 = vld [vmem:[%s3227_s1 + $0xc] sm:$0x3] }
  0x8e   :  { %374 = vmatprep.subr.bf16.mxu0 %v2872_v40  ;;  %v2881_v42 = vpop.permute.xlu1 %343 }
  0x8f   :  { %v494_v43 = vpop.permute.xlu0 %493  ;;  %v2915_v55 = vsel %vm345_vm2, %v342_v35, %v2881_v42 }
  0x90   :  { %v2884_v44 = vsel %vm501_vm3, %v492_v38, %v494_v43  ;;  %2537 = vmatmul.mubr.msk.bf16.vlgmr.msra.gmra.mxu1 %vm80_vm1, %v33_v34 }
  0x91   :  { %416 = vmatpush1.bf16.msra.mxu1 %v2878_v41  ;;  %433 = vmatprep.mubr.bf16.mxu1 %v2695_v3 }
  0x92   :  { %v496_v45 = vpop.permute.xlu1 %495  ;;  %530 = vmatprep.subr.bf16.mxu1 %v2884_v44 }
  0x93   :  { %v490_v46 = vpop.permute.xlu0 %489  ;;  %v2933_v62 = vsel %vm501_vm3, %v494_v43, %v496_v45  ;;  %v44_v43 = vld [vmem:[%s3227_s1 + $0x16] sm:$0x3] }
  0x94   :  { %2536 = vmatmul.mubr.msk.bf16.vlgmr.msra.gmra.mxu0 %vm80_vm1, %v33_v34  ;;  %v2900_v49 = vsel %vm501_vm3, %v490_v46, %v492_v38 }
  0x95   :  { %375 = vmatpush1.bf16.msra.mxu0 %v2891_v47  ;;  %392 = vmatprep.mubr.bf16.mxu0 %v2695_v3 }
  0x96   :  { %456 = vmatprep.subr.bf16.mxu0 %v2881_v42  ;;  %v2903_v50 = vpop.permute.xlu1 %499 }
  0x97   :  { %v498_v51 = vpop.permute.xlu0 %497 }
  0x98   :  { %2539 = vmatmul.mubr.msk.bf16.vlgmr.msra.gmra.mxu1 %vm80_vm1, %v35_v48  ;;  %v2910_v53 = vsel %vm501_vm3, %v496_v45, %v498_v51  ;;  %v2925_v57 = vsel %vm501_vm3, %v498_v51, %v2903_v50 }
  0x99   :  { %531 = vmatpush1.bf16.msra.mxu1 %v2900_v49  ;;  %548 = vmatprep.mubr.bf16.mxu1 %v2695_v3 }
  0x9a   :  { %612 = vmatprep.subr.bf16.mxu1 %v2903_v50  ;;  %v709_v52 = vpop.permute.xlu1 %708 }
  0x9b   :  { %v707_v54 = vpop.permute.xlu0 %706 }
  0x9c   :  { %2538 = vmatmul.mubr.msk.bf16.vlgmr.msra.gmra.mxu0 %vm80_vm1, %v35_v48  ;;  %v718_v61 = vsel %vm716_vm4, %v707_v54, %v709_v52 }
  0x9d   :  { %457 = vmatpush1.bf16.msra.mxu0 %v2915_v55  ;;  %474 = vmatprep.mubr.bf16.mxu0 %v2695_v3 }
  0x9e   :  { %571 = vmatprep.subr.bf16.mxu0 %v2910_v53  ;;  %v713_v58 = vpop.permute.xlu1 %712 }
  0x9f   :  { %v711_v59 = vpop.permute.xlu0 %710 }
  0xa0   :  { %2541 = vmatmul.mubr.msk.bf16.vlgmr.msra.gmra.mxu1 %vm80_vm1, %v36_v56  ;;  %v720_v60 = vsel %vm716_vm4, %v711_v59, %v713_v58  ;;  %v719_v63 = vsel %vm716_vm4, %v709_v52, %v711_v59 }
  0xa1   :  { %613 = vmatpush1.bf16.msra.mxu1 %v2925_v57  ;;  %630 = vmatprep.mubr.bf16.mxu1 %v2695_v3 }
  0xa2   :  { %786 = vmatprep.subr.bf16.mxu1 %v720_v60  ;;  %v715_v2 = vpop.permute.xlu1 %714 }
  0xa3   :  { %v705_v0 = vpop.permute.xlu0 %704  ;;  %v721_v5 = vsel %vm716_vm4, %v713_v58, %v715_v2  ;;  %v48_v58 = vld [vmem:[%s3227_s1 + $0x1e] sm:$0x3] }
  0xa4   :  { %2540 = vmatmul.mubr.msk.bf16.vlgmr.msra.gmra.mxu0 %vm80_vm1, %v35_v48  ;;  %v717_v1 = vsel %vm716_vm4, %v705_v0, %v707_v54 }
  0xa5   :  { %572 = vmatpush1.bf16.msra.mxu0 %v2933_v62  ;;  %589 = vmatprep.mubr.bf16.mxu0 %v2695_v3 }
  0xa6   :  { %745 = vmatprep.subr.bf16.mxu0 %v718_v61  ;;  %v1117_v7 = vpop.permute.xlu1 %1116 }
  0xa7   :  { %v1115_v8 = vpop.permute.xlu0 %1114 }
  0xa8   :  { %2543 = vmatmul.mubr.msk.bf16.vlgmr.msra.gmra.mxu1 %vm80_vm1, %v36_v56  ;;  %v2968_v9 = vsel %vm1124_vm5, %v1115_v8, %v1117_v7 }
  0xa9   :  { %787 = vmatpush1.bf16.msra.mxu1 %v719_v63  ;;  %804 = vmatprep.mubr.bf16.mxu1 %v2695_v3 }
  0xaa   :  { %871 = vmatprep.subr.bf16.mxu1 %v2830_v25  ;;  %v1119_v10 = vpop.permute.xlu1 %1118  ;;  %v41_v25 = vld [vmem:[%s3227_s1 + $0x10] sm:$0x3] }
  0xab   :  { %v1113_v11 = vpop.permute.xlu0 %1112  ;;  %v3009_v19 = vsel %vm1124_vm5, %v1117_v7, %v1119_v10 }
  0xac   :  { %2542 = vmatmul.mubr.msk.bf16.vlgmr.msra.gmra.mxu0 %vm80_vm1, %v36_v56  ;;  %v2982_v13 = vsel %vm1124_vm5, %v1113_v11, %v1115_v8 }
  0xad   :  { %746 = vmatpush1.bf16.msra.mxu0 %v717_v1  ;;  %763 = vmatprep.mubr.bf16.mxu0 %v2695_v3 }
  0xae   :  { %827 = vmatprep.subr.bf16.mxu0 %v715_v2  ;;  %v2984_v14 = vpop.permute.xlu1 %1122 }
  0xaf   :  { %v1121_v15 = vpop.permute.xlu0 %1120 }
  0xb0   :  { %2545 = vmatmul.mubr.msk.bf16.vlgmr.msra.gmra.mxu1 %vm80_vm1, %v38_v4  ;;  %v2991_v16 = vsel %vm1124_vm5, %v1119_v10, %v1121_v15  ;;  %v3001_v18 = vsel %vm1124_vm5, %v1121_v15, %v2984_v14 }
  0xb1   :  { %872 = vmatpush1.bf16.msra.mxu1 %v2846_v30  ;;  %889 = vmatprep.mubr.bf16.mxu1 %v2695_v3 }
  0xb2   :  { %953 = vmatprep.subr.bf16.mxu1 %v2841_v28  ;;  %v1577_v20 = vpop.permute.xlu1 %1576 }
  0xb3   :  { %v1575_v22 = vpop.permute.xlu0 %1574 }
  0xb4   :  { %2544 = vmatmul.mubr.msk.bf16.vlgmr.msra.gmra.mxu0 %vm80_vm1, %v38_v4  ;;  %v1586_v29 = vsel %vm1584_vm6, %v1575_v22, %v1577_v20 }
  0xb5   :  { %828 = vmatpush1.bf16.msra.mxu0 %v721_v5  ;;  %845 = vmatprep.mubr.bf16.mxu0 %v2695_v3 }
  0xb6   :  { %912 = vmatprep.subr.bf16.mxu0 %v2827_v24  ;;  %v1581_v23 = vpop.permute.xlu1 %1580 }
  0xb7   :  { %v1579_v24 = vpop.permute.xlu0 %1578 }
  0xb8   :  { %2547 = vmatmul.mubr.msk.bf16.vlgmr.msra.gmra.mxu1 %vm80_vm1, %v37_v6  ;;  %v1588_v27 = vsel %vm1584_vm6, %v1579_v24, %v1581_v23  ;;  %v1587_v32 = vsel %vm1584_vm6, %v1577_v20, %v1579_v24 }
  0xb9   :  { %954 = vmatpush1.bf16.msra.mxu1 %v2856_v33  ;;  %971 = vmatprep.mubr.bf16.mxu1 %v2695_v3 }
  0xba   :  { %1038 = vmatprep.subr.bf16.mxu1 %v2910_v53 }
  0xbb   :  { %v1573_v28 = vpop.permute.xlu0 %1572 }
  0xbc   :  { %2546 = vmatmul.mubr.msk.bf16.vlgmr.msra.gmra.mxu0 %vm80_vm1, %v38_v4  ;;  %v1585_v36 = vsel %vm1584_vm6, %v1573_v28, %v1575_v22 }
  0xbd   :  { %913 = vmatpush1.bf16.msra.mxu0 %v2834_v26  ;;  %930 = vmatprep.mubr.bf16.mxu0 %v2695_v3  ;;  %v1731_v26 = vpop.permute.xlu1 %1730 }
  0xbe   :  { %997 = vmatprep.subr.bf16.mxu0 %v2884_v44 }
  0xbf   :  { %v1733_v31 = vpop.permute.xlu0 %1732 }
  0xc0   :  { %2549 = vmatmul.mubr.msk.bf16.vlgmr.msra.gmra.mxu1 %vm80_vm1, %v37_v6  ;;  %v3047_v33 = vsel %vm1740_vm7, %v1731_v26, %v1733_v31 }
  0xc1   :  { %1039 = vmatpush1.bf16.msra.mxu1 %v2933_v62  ;;  %1056 = vmatprep.mubr.bf16.mxu1 %v2695_v3  ;;  %v1583_v30 = vpop.permute.xlu1 %1582 }
  0xc2   :  { %1153 = vmatprep.subr.bf16.mxu1 %v2968_v9 }
  0xc3   :  { %v1729_v35 = vpop.permute.xlu0 %1728 }
  0xc4   :  { %2548 = vmatmul.mubr.msk.bf16.vlgmr.msra.gmra.mxu0 %vm80_vm1, %v37_v6  ;;  %v1741_v38 = vsel %vm1740_vm7, %v1729_v35, %v1731_v26 }
  0xc5   :  { %998 = vmatpush1.bf16.msra.mxu0 %v2900_v49  ;;  %1015 = vmatprep.mubr.bf16.mxu0 %v2695_v3  ;;  %v1735_v34 = vpop.permute.xlu1 %1734 }
  0xc6   :  { %1079 = vmatprep.subr.bf16.mxu0 %v2903_v50  ;;  %v1743_v46 = vsel %vm1740_vm7, %v1733_v31, %v1735_v34 }
  0xc8   :  { %2551 = vmatmul.mubr.msk.bf16.vlgmr.msra.gmra.mxu1 %vm80_vm1, %v39_v12 }
  0xc9   :  { %1154 = vmatpush1.bf16.msra.mxu1 %v2982_v13  ;;  %1171 = vmatprep.mubr.bf16.mxu1 %v2695_v3  ;;  %v1739_v39 = vpop.permute.xlu1 %1738 }
  0xca   :  { %1235 = vmatprep.subr.bf16.mxu1 %v2984_v14 }
  0xcc   :  { %2550 = vmatmul.mubr.msk.bf16.vlgmr.msra.gmra.mxu0 %vm80_vm1, %v39_v12 }
  0xcd   :  { %1080 = vmatpush1.bf16.msra.mxu0 %v2925_v57  ;;  %1097 = vmatprep.mubr.bf16.mxu0 %v2695_v3  ;;  %v2325_v48 = vpop.permute.xlu1 %2324 }
  0xce   :  { %1194 = vmatprep.subr.bf16.mxu0 %v2991_v16 }
  0xd0   :  { %2553 = vmatmul.mubr.msk.bf16.vlgmr.msra.gmra.mxu1 %vm80_vm1, %v40_v17 }
  0xd1   :  { %1236 = vmatpush1.bf16.msra.mxu1 %v3001_v18  ;;  %1253 = vmatprep.mubr.bf16.mxu1 %v2695_v3  ;;  %v2327_v52 = vpop.permute.xlu1 %2326 }
  0xd2   :  { %1378 = vmatprep.subr.bf16.mxu1 %v2910_v53  ;;  %v2335_v60 = vsel %vm2332_vm8, %v2325_v48, %v2327_v52 }
  0xd4   :  { %2552 = vmatmul.mubr.msk.bf16.vlgmr.msra.gmra.mxu0 %vm80_vm1, %v39_v12 }
  0xd5   :  { %1195 = vmatpush1.bf16.msra.mxu0 %v3009_v19  ;;  %1212 = vmatprep.mubr.bf16.mxu0 %v2695_v3 }
  0xd6   :  { %1337 = vmatprep.subr.bf16.mxu0 %v2884_v44 }
  0xd8   :  { %2555 = vmatmul.mubr.msk.bf16.vlgmr.msra.gmra.mxu1 %vm80_vm1, %v40_v17 }
  0xd9   :  { %1379 = vmatpush1.bf16.msra.mxu1 %v2933_v62  ;;  %1396 = vmatprep.mubr.bf16.mxu1 %v2695_v3 }
  0xda   :  { %1463 = vmatprep.subr.bf16.mxu1 %v2872_v40  ;;  %v1737_v40 = vpop.permute.xlu0 %1736 }
  0xdb   :  { %v1745_v45 = vsel %vm1740_vm7, %v1737_v40, %v1739_v39 }
  0xdc   :  { %2554 = vmatmul.mubr.msk.bf16.vlgmr.msra.gmra.mxu0 %vm80_vm1, %v40_v17 }
  0xdd   :  { %1338 = vmatpush1.bf16.msra.mxu0 %v2900_v49  ;;  %1355 = vmatprep.mubr.bf16.mxu0 %v2695_v3 }
  0xde   :  { %1419 = vmatprep.subr.bf16.mxu0 %v2903_v50 }
  0xe0   :  { %2560 = vmatmul.mubr.msk.bf16.vlgmr.msra.gmra.mxu1 %vm80_vm1, %v42_v21 }
  0xe1   :  { %1464 = vmatpush1.bf16.msra.mxu1 %v2891_v47  ;;  %1481 = vmatprep.mubr.bf16.mxu1 %v2695_v3  ;;  %v46_v47 = vld [vmem:[%s3227_s1 + $0x1a] sm:$0x3] }
  0xe2   :  { %1545 = vmatprep.subr.bf16.mxu1 %v2881_v42  ;;  %v1589_v42 = vsel %vm1584_vm6, %v1581_v23, %v1583_v30 }
  0xe4   :  { %2559 = vmatmul.mubr.msk.bf16.vlgmr.msra.gmra.mxu0 %vm80_vm1, %v42_v21 }
  0xe5   :  { %1420 = vmatpush1.bf16.msra.mxu0 %v2925_v57  ;;  %1437 = vmatprep.mubr.bf16.mxu0 %v2695_v3 }
  0xe6   :  { %1504 = vmatprep.subr.bf16.mxu0 %v2866_v37  ;;  %v43_v37 = vld [vmem:[%s3227_s1 + $0x14] sm:$0x3] }
  0xe8   :  { %2562 = vmatmul.mubr.msk.bf16.vlgmr.msra.gmra.mxu1 %vm80_vm1, %v41_v25 }
  0xe9   :  { %1546 = vmatpush1.bf16.msra.mxu1 %v2915_v55  ;;  %1563 = vmatprep.mubr.bf16.mxu1 %v2695_v3  ;;  %v2331_v55 = vpop.permute.xlu1 %2330 }
  0xea   :  { %1654 = vmatprep.subr.bf16.mxu1 %v1588_v27 }
  0xec   :  { %2561 = vmatmul.mubr.msk.bf16.vlgmr.msra.gmra.mxu0 %vm80_vm1, %v42_v21 }
  0xed   :  { %1505 = vmatpush1.bf16.msra.mxu0 %v2878_v41  ;;  %1522 = vmatprep.mubr.bf16.mxu0 %v2695_v3  ;;  %v1744_v41 = vsel %vm1740_vm7, %v1735_v34, %v1737_v40 }
  0xee   :  { %1613 = vmatprep.subr.bf16.mxu0 %v1586_v29 }
  0xf0   :  { %2564 = vmatmul.mubr.msk.bf16.vlgmr.msra.gmra.mxu1 %vm80_vm1, %v41_v25 }
  0xf1   :  { %1655 = vmatpush1.bf16.msra.mxu1 %v1587_v32  ;;  %1672 = vmatprep.mubr.bf16.mxu1 %v2695_v3 }
  0xf2   :  { %1769 = vmatprep.subr.bf16.mxu1 %v3047_v33 }
  0xf4   :  { %2563 = vmatmul.mubr.msk.bf16.vlgmr.msra.gmra.mxu0 %vm80_vm1, %v41_v25 }
  0xf5   :  { %1614 = vmatpush1.bf16.msra.mxu0 %v1585_v36  ;;  %1631 = vmatprep.mubr.bf16.mxu0 %v2695_v3 }
  0xf6   :  { %1695 = vmatprep.subr.bf16.mxu0 %v1583_v30 }
  0xf8   :  { %2566 = vmatmul.mubr.msk.bf16.vlgmr.msra.gmra.mxu1 %vm80_vm1, %v43_v37 }
  0xf9   :  { %1770 = vmatpush1.bf16.msra.mxu1 %v1741_v38  ;;  %1787 = vmatprep.mubr.bf16.mxu1 %v2695_v3 }
  0xfa   :  { %1851 = vmatprep.subr.bf16.mxu1 %v1739_v39 }
  0xfc   :  { %2565 = vmatmul.mubr.msk.bf16.vlgmr.msra.gmra.mxu0 %vm80_vm1, %v43_v37 }
  0xfd   :  { %1696 = vmatpush1.bf16.msra.mxu0 %v1589_v42  ;;  %1713 = vmatprep.mubr.bf16.mxu0 %v2695_v3 }
  0xfe   :  { %1810 = vmatprep.subr.bf16.mxu0 %v1744_v41 }
 0x100   :  { %2568 = vmatmul.mubr.msk.bf16.vlgmr.msra.gmra.mxu1 %vm80_vm1, %v44_v43 }
 0x101   :  { %1852 = vmatpush1.bf16.msra.mxu1 %v1745_v45  ;;  %1869 = vmatprep.mubr.bf16.mxu1 %v2695_v3 }
 0x102   :  { %1994 = vmatprep.subr.bf16.mxu1 %v2991_v16 }
 0x104   :  { %2567 = vmatmul.mubr.msk.bf16.vlgmr.msra.gmra.mxu0 %vm80_vm1, %v43_v37 }
 0x105   :  { %1811 = vmatpush1.bf16.msra.mxu0 %v1743_v46  ;;  %1828 = vmatprep.mubr.bf16.mxu0 %v2695_v3 }
 0x106   :  { %1953 = vmatprep.subr.bf16.mxu0 %v2968_v9 }
 0x108   :  { %2570 = vmatmul.mubr.msk.bf16.vlgmr.msra.gmra.mxu1 %vm80_vm1, %v44_v43 }
 0x109   :  { %1995 = vmatpush1.bf16.msra.mxu1 %v3009_v19  ;;  %2012 = vmatprep.mubr.bf16.mxu1 %v2695_v3 }
 0x10a   :  { %2079 = vmatprep.subr.bf16.mxu1 %v2884_v44  ;;  %v45_v44 = vld [vmem:[%s3227_s1 + $0x18] sm:$0x3] }
 0x10c   :  { %2569 = vmatmul.mubr.msk.bf16.vlgmr.msra.gmra.mxu0 %vm80_vm1, %v44_v43 }
 0x10d   :  { %1954 = vmatpush1.bf16.msra.mxu0 %v2982_v13  ;;  %1971 = vmatprep.mubr.bf16.mxu0 %v2695_v3 }
 0x10e   :  { %2035 = vmatprep.subr.bf16.mxu0 %v2984_v14 }
 0x110   :  { %2575 = vmatmul.mubr.msk.bf16.vlgmr.msra.gmra.mxu1 %vm80_vm1, %v46_v47 }
 0x111   :  { %2080 = vmatpush1.bf16.msra.mxu1 %v2900_v49  ;;  %2097 = vmatprep.mubr.bf16.mxu1 %v2695_v3  ;;  %v2323_v49 = vpop.permute.xlu0 %2322 }
 0x112   :  { %2161 = vmatprep.subr.bf16.mxu1 %v2903_v50  ;;  %v2334_v50 = vsel %vm2332_vm8, %v2323_v49, %v2325_v48 }
 0x114   :  { %2574 = vmatmul.mubr.msk.bf16.vlgmr.msra.gmra.mxu0 %vm80_vm1, %v46_v47 }
 0x115   :  { %2036 = vmatpush1.bf16.msra.mxu0 %v3001_v18  ;;  %2053 = vmatprep.mubr.bf16.mxu0 %v2695_v3  ;;  %v2321_v51 = vpop.permute.xlu0 %2320 }
 0x116   :  { %2120 = vmatprep.subr.bf16.mxu0 %v2910_v53  ;;  %v47_v53 = vld [vmem:[%s3227_s1 + $0x1c] sm:$0x3]  ;;  %v2333_v54 = vsel %vm2332_vm8, %v2321_v51, %v2323_v49 }
 0x118   :  { %2577 = vmatmul.mubr.msk.bf16.vlgmr.msra.gmra.mxu1 %vm80_vm1, %v45_v44 }
 0x119   :  { %2162 = vmatpush1.bf16.msra.mxu1 %v2925_v57  ;;  %2179 = vmatprep.mubr.bf16.mxu1 %v2695_v3  ;;  %v2329_v56 = vpop.permute.xlu0 %2328 }
 0x11a   :  { %2246 = vmatprep.subr.bf16.mxu1 %v1744_v41  ;;  %v2336_v57 = vsel %vm2332_vm8, %v2327_v52, %v2329_v56  ;;  %v2337_v59 = vsel %vm2332_vm8, %v2329_v56, %v2331_v55 }
 0x11c   :  { %2576 = vmatmul.mubr.msk.bf16.vlgmr.msra.gmra.mxu0 %vm80_vm1, %v46_v47 }
 0x11d   :  { %2121 = vmatpush1.bf16.msra.mxu0 %v2933_v62  ;;  %2138 = vmatprep.mubr.bf16.mxu0 %v2695_v3  ;;  %v3130_v30 = vpop.permute.xlu0 %647 }
 0x11e   :  { %2205 = vmatprep.subr.bf16.mxu0 %v3047_v33 }
 0x120   :  { %2579 = vmatmul.mubr.msk.bf16.vlgmr.msra.gmra.mxu1 %vm80_vm1, %v45_v44 }
 0x121   :  { %2247 = vmatpush1.bf16.msra.mxu1 %v1743_v46  ;;  %2264 = vmatprep.mubr.bf16.mxu1 %v2695_v3 }
 0x122   :  { %2361 = vmatprep.subr.bf16.mxu1 %v2334_v50 }
 0x124   :  { %2578 = vmatmul.mubr.msk.bf16.vlgmr.msra.gmra.mxu0 %vm80_vm1, %v45_v44 }
 0x125   :  { %2206 = vmatpush1.bf16.msra.mxu0 %v1741_v38  ;;  %2223 = vmatprep.mubr.bf16.mxu0 %v2695_v3 }
 0x126   :  { %2287 = vmatprep.subr.bf16.mxu0 %v1739_v39 }
 0x128   :  { %2581 = vmatmul.mubr.msk.bf16.vlgmr.msra.gmra.mxu1 %vm80_vm1, %v47_v53 }
 0x129   :  { %2362 = vmatpush1.bf16.msra.mxu1 %v2333_v54  ;;  %2379 = vmatprep.mubr.bf16.mxu1 %v2695_v3 }
 0x12a   :  { %2443 = vmatprep.subr.bf16.mxu1 %v2331_v55 }
 0x12c   :  { %2580 = vmatmul.mubr.msk.bf16.vlgmr.msra.gmra.mxu0 %vm80_vm1, %v47_v53 }
 0x12d   :  { %2288 = vmatpush1.bf16.msra.mxu0 %v1745_v45  ;;  %2305 = vmatprep.mubr.bf16.mxu0 %v2695_v3 }
 0x12e   :  { %2402 = vmatprep.subr.bf16.mxu0 %v2336_v57 }
 0x130   :  { %2583 = vmatmul.mubr.msk.bf16.vlgmr.msra.gmra.mxu1 %vm80_vm1, %v48_v58 }
 0x131   :  { %2444 = vmatpush1.bf16.msra.mxu1 %v2337_v59  ;;  %2461 = vmatprep.mubr.bf16.mxu1 %v2695_v3 }
 0x134   :  { %2582 = vmatmul.mubr.msk.bf16.vlgmr.msra.gmra.mxu0 %vm80_vm1, %v47_v53 }
 0x135   :  { %2403 = vmatpush1.bf16.msra.mxu0 %v2335_v60  ;;  %2420 = vmatprep.mubr.bf16.mxu0 %v2695_v3 }
 0x138   :  { %2585 = vmatmul.mubr.msk.bf16.vlgmr.msra.gmra.mxu1 %vm80_vm1, %v48_v58 }
 0x13c   :  { %2584 = vmatmul.mubr.msk.bf16.vlgmr.msra.gmra.mxu0 %vm80_vm1, %v48_v58 }
 0x140   :  { %v159_v61 = vpop.f32.mrf.mxu1 }
 0x142   :  { %v161_v62 = vpop.f32.mrf.mxu1 }
 0x144   :  { %v118_v63 = vpop.f32.mrf.mxu0  ;;  %v163_v0 = vpop.f32.mrf.mxu1 }
 0x146   :  { %v120_v1 = vpop.f32.mrf.mxu0  ;;  %v164_v2 = vpop.f32.mrf.mxu1 }
 0x148   :  { %v122_v4 = vpop.f32.mrf.mxu0  ;;  %v244_v5 = vpop.f32.mrf.mxu1 }
 0x149   :  { %v245_v25 = vadd.f32 %v244_v5, %v118_v63 }
 0x14a   :  { %v123_v6 = vpop.f32.mrf.mxu0  ;;  %v246_v7 = vpop.f32.mrf.mxu1 }
 0x14b   :  { %v247_v28 = vadd.f32 %v246_v7, %v120_v1 }
 0x14c   :  { %v200_v8 = vpop.f32.mrf.mxu0  ;;  %v248_v9 = vpop.f32.mrf.mxu1 }
 0x14e   :  { %v202_v10 = vpop.f32.mrf.mxu0  ;;  %v249_v11 = vpop.f32.mrf.mxu1 }
 0x150   :  { %v204_v12 = vpop.f32.mrf.mxu0  ;;  %v326_v3 = vpop.f32.mrf.mxu1 }
 0x151   :  { %v327_v41 = vadd.f32 %v326_v3, %v200_v8 }
 0x152   :  { %v205_v13 = vpop.f32.mrf.mxu0  ;;  %v328_v14 = vpop.f32.mrf.mxu1 }
 0x153   :  { %v329_v47 = vadd.f32 %v328_v14, %v202_v10 }
 0x154   :  { %v285_v15 = vpop.f32.mrf.mxu0  ;;  %v330_v16 = vpop.f32.mrf.mxu1 }
 0x155   :  { %v286_v50 = vadd.f32 %v285_v15, %v159_v61 }
 0x156   :  { %v287_v17 = vpop.f32.mrf.mxu0  ;;  %v331_v18 = vpop.f32.mrf.mxu1 }
 0x157   :  { %v288_v56 = vadd.f32 %v287_v17, %v161_v62 }
 0x158   :  { %v289_v19 = vpop.f32.mrf.mxu0  ;;  %v435_v20 = vpop.f32.mrf.mxu1 }
 0x159   :  { %v485_v59 = vadd.f32 %v435_v20, %v286_v50 }
 0x15a   :  { %v290_v21 = vpop.f32.mrf.mxu0  ;;  %v437_v22 = vpop.f32.mrf.mxu1 }
 0x15b   :  { %v486_v2 = vadd.f32 %v437_v22, %v288_v56 }
 0x15c   :  { %v394_v23 = vpop.f32.mrf.mxu0  ;;  %v439_v24 = vpop.f32.mrf.mxu1 }
 0x15d   :  { %v483_v29 = vadd.f32 %v394_v23, %v245_v25 }
 0x15e   :  { %v396_v26 = vpop.f32.mrf.mxu0  ;;  %v440_v27 = vpop.f32.mrf.mxu1 }
 0x15f   :  { %v484_v33 = vadd.f32 %v396_v26, %v247_v28 }
 0x160   :  { %v398_v31 = vpop.f32.mrf.mxu0  ;;  %v550_v32 = vpop.f32.mrf.mxu1 }
 0x161   :  { %v639_v34 = vadd.f32 %v550_v32, %v483_v29 }
 0x162   :  { %v399_v35 = vpop.f32.mrf.mxu0  ;;  %v552_v36 = vpop.f32.mrf.mxu1 }
 0x163   :  { %v640_v37 = vadd.f32 %v552_v36, %v484_v33  ;;  %v650_v38 = vadd.f32 %v3130_v30, %v639_v34 }
 0x164   :  { %v476_v39 = vpop.f32.mrf.mxu0  ;;  %v554_v40 = vpop.f32.mrf.mxu1 }
 0x165   :  { %v651_v42 = vadd.f32 %v3130_v30, %v640_v37  ;;  %v656_v43 = vsub.f32 0.0, %v650_v38  ;;  %v487_v49 = vadd.f32 %v476_v39, %v327_v41 }
 0x166   :  { %v478_v45 = vpop.f32.mrf.mxu0  ;;  %v555_v46 = vpop.f32.mrf.mxu1 }
 0x167   :  { %v657_v44 = vsub.f32 0.0, %v651_v42  ;;  %v662_v48 = vmul.f32 1.442695, %v656_v43  ;;  %v488_v54 = vadd.f32 %v478_v45, %v329_v47 }
 0x168   :  { %v480_v51 = vpop.f32.mrf.mxu0  ;;  %v632_v52 = vpop.f32.mrf.mxu1 }
 0x169   :  { %2599 = vpow2.f32 %v662_v48  ;;  %v664_v53 = vmul.f32 1.442695, %v657_v44  ;;  %v643_v55 = vadd.f32 %v632_v52, %v487_v49 }
 0x16a   :  { %v481_v57 = vpop.f32.mrf.mxu0  ;;  %v634_v58 = vpop.f32.mrf.mxu1 }
 0x16b   :  { %2601 = vpow2.f32 %v664_v53  ;;  %v654_v60 = vadd.f32 %v3130_v30, %v643_v55  ;;  %v644_v63 = vadd.f32 %v634_v58, %v488_v54 }
 0x16c   :  { %v591_v0 = vpop.f32.mrf.mxu0  ;;  %v636_v1 = vpop.f32.mrf.mxu1 }
 0x16d   :  { %v660_v4 = vsub.f32 0.0, %v654_v60  ;;  %v655_v61 = vadd.f32 %v3130_v30, %v644_v63  ;;  %v641_v5 = vadd.f32 %v591_v0, %v485_v59 }
 0x16e   :  { %v593_v6 = vpop.f32.mrf.mxu0  ;;  %v637_v7 = vpop.f32.mrf.mxu1 }
 0x16f   :  { %v670_v8 = vmul.f32 1.442695, %v660_v4  ;;  %v661_v9 = vsub.f32 0.0, %v655_v61  ;;  %v652_v62 = vadd.f32 %v3130_v30, %v641_v5  ;;  %v642_v10 = vadd.f32 %v593_v6, %v486_v2 }
 0x170   :  { %v595_v11 = vpop.f32.mrf.mxu0  ;;  %v3137_v12 = vpop.f32.mrf.mxu1 }
 0x171   :  { %2603 = vpow2.f32 %v670_v8  ;;  %v672_v3 = vmul.f32 1.442695, %v661_v9  ;;  %v658_v13 = vsub.f32 0.0, %v652_v62  ;;  %v653_v14 = vadd.f32 %v3130_v30, %v642_v10 }
 0x172   :  { %v596_v15 = vpop.f32.mrf.mxu0  ;;  %v3140_v16 = vpop.f32.mrf.mxu1 }
 0x173   :  { %2605 = vpow2.f32 %v672_v3  ;;  %v666_v17 = vmul.f32 1.442695, %v658_v13  ;;  %v659_v18 = vsub.f32 0.0, %v653_v14 }
 0x174   :  { %v765_v19 = vpop.f32.mrf.mxu0  ;;  %v810_v20 = vpop.f32.mrf.mxu1 }
 0x175   :  { %2607 = vpow2.f32 %v666_v17  ;;  %v668_v21 = vmul.f32 1.442695, %v659_v18 }
 0x176   :  { %v2600_v22 = vpop.eup %2599  ;;  %v767_v23 = vpop.f32.mrf.mxu0 }
 0x177   :  { %v811_v24 = vpop.f32.mrf.mxu1  ;;  %v674_v25 = vadd.f32 1.0, %v2600_v22  ;;  %2609 = vpow2.f32 %v668_v21 }
 0x178   :  { %v2602_v26 = vpop.eup %2601  ;;  %v769_v27 = vpop.f32.mrf.mxu0 }
 0x179   :  { %v891_v28 = vpop.f32.mrf.mxu1  ;;  %v675_v29 = vadd.f32 1.0, %v2602_v26  ;;  %2611 = vrcp.f32 %v674_v25 }
 0x17a   :  { %v770_v31 = vpop.f32.mrf.mxu0  ;;  %v892_v0 = vadd.f32 %v891_v28, %v765_v19 }
 0x17b   :  { %v893_v32 = vpop.f32.mrf.mxu1  ;;  %2613 = vrcp.f32 %v675_v29 }
 0x17c   :  { %v847_v33 = vpop.f32.mrf.mxu0  ;;  %v894_v61 = vadd.f32 %v893_v32, %v767_v23 }
 0x17d   :  { %v895_v34 = vpop.f32.mrf.mxu1 }
 0x17e   :  { %v2604_v35 = vpop.eup %2603  ;;  %v3142_v36 = vpop.f32.mrf.mxu0 }
 0x17f   :  { %v896_v37 = vpop.f32.mrf.mxu1  ;;  %v678_v38 = vadd.f32 1.0, %v2604_v35 }
 0x180   :  { %v2606_v39 = vpop.eup %2605  ;;  %v851_v40 = vpop.f32.mrf.mxu0 }
 0x181   :  { %v973_v41 = vpop.f32.mrf.mxu1  ;;  %v679_v42 = vadd.f32 1.0, %v2606_v39  ;;  %2615 = vrcp.f32 %v678_v38 }
 0x182   :  { %v2608_v43 = vpop.eup %2607  ;;  %v852_v45 = vpop.f32.mrf.mxu0  ;;  %v974_v22 = vadd.f32 %v973_v41, %v847_v33 }
 0x183   :  { %v975_v46 = vpop.f32.mrf.mxu1  ;;  %2617 = vrcp.f32 %v679_v42  ;;  %v676_v47 = vadd.f32 1.0, %v2608_v43 }
 0x184   :  { %v2610_v44 = vpop.eup %2609  ;;  %v932_v48 = vpop.f32.mrf.mxu0  ;;  %v976_v27 = vadd.f32 %v975_v46, %v3142_v36 }
 0x185   :  { %v977_v49 = vpop.f32.mrf.mxu1  ;;  %v677_v50 = vadd.f32 1.0, %v2610_v44  ;;  %2619 = vrcp.f32 %v676_v47  ;;  %v933_v32 = vadd.f32 %v932_v48, %v3137_v12 }
 0x186   :  { %v934_v51 = vpop.f32.mrf.mxu0  ;;  %v2612_v53 = vpop.eup %2611 }
 0x187   :  { %v978_v52 = vpop.f32.mrf.mxu1  ;;  %2621 = vrcp.f32 %v677_v50  ;;  %v935_v39 = vadd.f32 %v934_v51, %v3140_v16 }
 0x188   :  { %v2614_v54 = vpop.eup %2613  ;;  %v936_v55 = vpop.f32.mrf.mxu0 }
 0x189   :  { %v1058_v56 = vpop.f32.mrf.mxu1  ;;  %v692_v57 = vcombine.low %v2612_v53, %v2614_v54 }
 0x18a   :  { %v937_v58 = vpop.f32.mrf.mxu0  ;;  %v1108_v42 = vadd.f32 %v1058_v56, %v933_v32 }
 0x18b   :  { %v1060_v59 = vpop.f32.mrf.mxu1  ;;  %698 = vst [vmem:[%s3228_s3] sm:$0x77] %v692_v57 }
 0x18c   :  { %v1017_v60 = vpop.f32.mrf.mxu0  ;;  %v1109_v47 = vadd.f32 %v1060_v59, %v935_v39 }
 0x18d   :  { %v1062_v63 = vpop.f32.mrf.mxu1  ;;  %v1106_v5 = vadd.f32 %v1017_v60, %v892_v0 }
 0x18e   :  { %v1019_v1 = vpop.f32.mrf.mxu0  ;;  %v2616_v4 = vpop.eup %2615 }
 0x18f   :  { %v1063_v2 = vpop.f32.mrf.mxu1  ;;  %v1107_v10 = vadd.f32 %v1019_v1, %v894_v61 }
 0x190   :  { %v2618_v6 = vpop.eup %2617  ;;  %v1021_v8 = vpop.f32.mrf.mxu0 }
 0x191   :  { %v1173_v9 = vpop.f32.mrf.mxu1  ;;  %v694_v62 = vcombine.low %v2616_v4, %v2618_v6 }
 0x192   :  { %v1262_v11 = vadd.f32 %v1173_v9, %v1106_v5  ;;  %v1022_v3 = vpop.f32.mrf.mxu0  ;;  %v2620_v14 = vpop.eup %2619 }
 0x193   :  { %v1175_v13 = vpop.f32.mrf.mxu1  ;;  %703 = vst.msk [vmem:[%s3228_s3 + $0x10] sm:$0x77] %vm3147_vm11, %v694_v62 }
 0x194   :  { %v1268_v15 = vadd.f32 %v1262_v11, %v3130_v30  ;;  %v1263_v17 = vadd.f32 %v1175_v13, %v1107_v10  ;;  %v2622_v18 = vpop.eup %2621  ;;  %v1099_v19 = vpop.f32.mrf.mxu0 }
 0x195   :  { %v1177_v20 = vpop.f32.mrf.mxu1  ;;  %v693_v21 = vcombine.low %v2620_v14, %v2622_v18  ;;  %v1110_v31 = vadd.f32 %v1099_v19, %v974_v22 }
 0x196   :  { %v1274_v23 = vsub.f32 0.0, %v1268_v15  ;;  %v1269_v24 = vadd.f32 %v1263_v17, %v3130_v30  ;;  %v1101_v25 = vpop.f32.mrf.mxu0 }
 0x197   :  { %v1178_v26 = vpop.f32.mrf.mxu1  ;;  %699 = vst [vmem:[%s3228_s3 + $0x8] sm:$0x77] %v693_v21  ;;  %v1111_v37 = vadd.f32 %v1101_v25, %v976_v27 }
 0x198   :  { %v1280_v28 = vmul.f32 1.442695, %v1274_v23  ;;  %v1275_v29 = vsub.f32 0.0, %v1269_v24  ;;  %v1103_v34 = vpop.f32.mrf.mxu0 }
 0x199   :  { %v1255_v35 = vpop.f32.mrf.mxu1 }
 0x19a   :  { %2623 = vpow2.f32 %v1280_v28  ;;  %v1282_v33 = vmul.f32 1.442695, %v1275_v29  ;;  %v1266_v38 = vadd.f32 %v1255_v35, %v1110_v31  ;;  %v1104_v40 = vpop.f32.mrf.mxu0 }
 0x19b   :  { %v1257_v41 = vpop.f32.mrf.mxu1 }
 0x19c   :  { %2625 = vpow2.f32 %v1282_v33  ;;  %v1272_v43 = vadd.f32 %v1266_v38, %v3130_v30  ;;  %v1267_v36 = vadd.f32 %v1257_v41, %v1111_v37  ;;  %v1214_v45 = vpop.f32.mrf.mxu0 }
 0x19d   :  { %v1259_v46 = vpop.f32.mrf.mxu1  ;;  %v1264_v48 = vadd.f32 %v1214_v45, %v1108_v42 }
 0x19e   :  { %v1278_v44 = vsub.f32 0.0, %v1272_v43  ;;  %v1273_v12 = vadd.f32 %v1267_v36, %v3130_v30  ;;  %v1216_v49 = vpop.f32.mrf.mxu0 }
 0x19f   :  { %v1260_v50 = vpop.f32.mrf.mxu1  ;;  %v1270_v16 = vadd.f32 %v1264_v48, %v3130_v30  ;;  %v1265_v51 = vadd.f32 %v1216_v49, %v1109_v47 }
 0x1a0   :  { %v1288_v52 = vmul.f32 1.442695, %v1278_v44  ;;  %v1279_v53 = vsub.f32 0.0, %v1273_v12  ;;  %v1218_v54 = vpop.f32.mrf.mxu0 }
 0x1a1   :  { %v3167_v55 = vpop.f32.mrf.mxu1  ;;  %v1276_v57 = vsub.f32 0.0, %v1270_v16  ;;  %v1271_v58 = vadd.f32 %v1265_v51, %v3130_v30 }
 0x1a2   :  { %2627 = vpow2.f32 %v1288_v52  ;;  %v1290_v56 = vmul.f32 1.442695, %v1279_v53  ;;  %v1219_v59 = vpop.f32.mrf.mxu0 }
 0x1a3   :  { %v3170_v60 = vpop.f32.mrf.mxu1  ;;  %v1284_v63 = vmul.f32 1.442695, %v1276_v57  ;;  %v1277_v0 = vsub.f32 0.0, %v1271_v58 }
 0x1a4   :  { %2629 = vpow2.f32 %v1290_v56  ;;  %v1357_v1 = vpop.f32.mrf.mxu0 }
 0x1a5   :  { %v1402_v2 = vpop.f32.mrf.mxu1  ;;  %2631 = vpow2.f32 %v1284_v63  ;;  %v1286_v4 = vmul.f32 1.442695, %v1277_v0 }
 0x1a6   :  { %v1359_v5 = vpop.f32.mrf.mxu0 }
 0x1a7   :  { %v2624_v61 = vpop.eup %2623  ;;  %v1403_v6 = vpop.f32.mrf.mxu1  ;;  %2633 = vpow2.f32 %v1286_v4 }
 0x1a8   :  { %v1292_v8 = vadd.f32 1.0, %v2624_v61  ;;  %v1361_v62 = vpop.f32.mrf.mxu0 }
 0x1a9   :  { %v2626_v9 = vpop.eup %2625  ;;  %v1483_v10 = vpop.f32.mrf.mxu1 }
 0x1aa   :  { %v1293_v11 = vadd.f32 1.0, %v2626_v9  ;;  %2635 = vrcp.f32 %v1292_v8  ;;  %v1362_v3 = vpop.f32.mrf.mxu0  ;;  %v1484_v46 = vadd.f32 %v1483_v10, %v1357_v1 }
 0x1ab   :  { %v1485_v13 = vpop.f32.mrf.mxu1 }
 0x1ac   :  { %2637 = vrcp.f32 %v1293_v11  ;;  %v1439_v14 = vpop.f32.mrf.mxu0  ;;  %v1486_v48 = vadd.f32 %v1485_v13, %v1359_v5 }
 0x1ad   :  { %v1487_v15 = vpop.f32.mrf.mxu1 }
 0x1ae   :  { %v1441_v18 = vpop.f32.mrf.mxu0 }
 0x1af   :  { %v2628_v17 = vpop.eup %2627  ;;  %v1488_v19 = vpop.f32.mrf.mxu1 }
 0x1b0   :  { %v1296_v20 = vadd.f32 1.0, %v2628_v17  ;;  %v1443_v22 = vpop.f32.mrf.mxu0 }
 0x1b1   :  { %v2630_v21 = vpop.eup %2629  ;;  %v1565_v23 = vpop.f32.mrf.mxu1 }
 0x1b2   :  { %v1297_v24 = vadd.f32 1.0, %v2630_v21  ;;  %v2632_v25 = vpop.eup %2631  ;;  %2639 = vrcp.f32 %v1296_v20  ;;  %v1444_v26 = vpop.f32.mrf.mxu0  ;;  %v1566_v61 = vadd.f32 %v1565_v23, %v1439_v14 }
 0x1b3   :  { %v1567_v27 = vpop.f32.mrf.mxu1  ;;  %v1294_v28 = vadd.f32 1.0, %v2632_v25 }
 0x1b4   :  { %2641 = vrcp.f32 %v1297_v24  ;;  %v2634_v29 = vpop.eup %2633  ;;  %v1524_v31 = vpop.f32.mrf.mxu0  ;;  %v1568_v62 = vadd.f32 %v1567_v27, %v1441_v18 }
 0x1b5   :  { %v1569_v32 = vpop.f32.mrf.mxu1  ;;  %v1295_v34 = vadd.f32 1.0, %v2634_v29  ;;  %2643 = vrcp.f32 %v1294_v28  ;;  %v1525_v13 = vadd.f32 %v1524_v31, %v3167_v55 }
 0x1b6   :  { %v1526_v35 = vpop.f32.mrf.mxu0 }
 0x1b7   :  { %v1570_v33 = vpop.f32.mrf.mxu1  ;;  %v2636_v37 = vpop.eup %2635  ;;  %2645 = vrcp.f32 %v1295_v34  ;;  %v1527_v21 = vadd.f32 %v1526_v35, %v3170_v60 }
 0x1b8   :  { %v1528_v39 = vpop.f32.mrf.mxu0 }
 0x1b9   :  { %v2638_v38 = vpop.eup %2637  ;;  %v1674_v40 = vpop.f32.mrf.mxu1 }
 0x1ba   :  { %v1310_v41 = vcombine.low %v2636_v37, %v2638_v38  ;;  %v1529_v42 = vpop.f32.mrf.mxu0  ;;  %v1724_v24 = vadd.f32 %v1674_v40, %v1525_v13 }
 0x1bb   :  { %v1676_v43 = vpop.f32.mrf.mxu1 }
 0x1bc   :  { %2556 = vst [vmem:[%s3228_s3 + $0x18] sm:$0x77] %v1310_v41  ;;  %v1633_v36 = vpop.f32.mrf.mxu0  ;;  %v1725_v28 = vadd.f32 %v1676_v43, %v1527_v21 }
 0x1bd   :  { %v1678_v45 = vpop.f32.mrf.mxu1  ;;  %v1722_v49 = vadd.f32 %v1633_v36, %v1484_v46 }
 0x1be   :  { %v1635_v47 = vpop.f32.mrf.mxu0 }
 0x1bf   :  { %v1679_v44 = vpop.f32.mrf.mxu1  ;;  %v2640_v12 = vpop.eup %2639  ;;  %v1723_v51 = vadd.f32 %v1635_v47, %v1486_v48 }
 0x1c0   :  { %v1637_v52 = vpop.f32.mrf.mxu0 }
 0x1c1   :  { %v2642_v50 = vpop.eup %2641  ;;  %v1789_v53 = vpop.f32.mrf.mxu1 }
 0x1c2   :  { %v1312_v16 = vcombine.low %v2640_v12, %v2642_v50  ;;  %v1878_v54 = vadd.f32 %v1789_v53, %v1722_v49  ;;  %v1638_v56 = vpop.f32.mrf.mxu0  ;;  %v2644_v58 = vpop.eup %2643 }
 0x1c3   :  { %v1791_v57 = vpop.f32.mrf.mxu1 }
 0x1c4   :  { %2558 = vst.msk [vmem:[%s3228_s3 + $0x28] sm:$0x77] %vm3147_vm11, %v1312_v16  ;;  %v1884_v59 = vadd.f32 %v1878_v54, %v3130_v30  ;;  %v1879_v63 = vadd.f32 %v1791_v57, %v1723_v51  ;;  %v2646_v0 = vpop.eup %2645  ;;  %v1715_v1 = vpop.f32.mrf.mxu0 }
 0x1c5   :  { %v1793_v2 = vpop.f32.mrf.mxu1  ;;  %v1311_v4 = vcombine.low %v2644_v58, %v2646_v0  ;;  %v1726_v3 = vadd.f32 %v1715_v1, %v1566_v61 }
 0x1c6   :  { %v1890_v5 = vsub.f32 0.0, %v1884_v59  ;;  %v1885_v6 = vadd.f32 %v1879_v63, %v3130_v30  ;;  %v1717_v8 = vpop.f32.mrf.mxu0 }
 0x1c7   :  { %v1794_v9 = vpop.f32.mrf.mxu1  ;;  %2557 = vst [vmem:[%s3228_s3 + $0x20] sm:$0x77] %v1311_v4  ;;  %v1727_v14 = vadd.f32 %v1717_v8, %v1568_v62 }
 0x1c8   :  { %v1896_v10 = vmul.f32 1.442695, %v1890_v5  ;;  %v1891_v11 = vsub.f32 0.0, %v1885_v6  ;;  %v1719_v15 = vpop.f32.mrf.mxu0 }
 0x1c9   :  { %v1871_v17 = vpop.f32.mrf.mxu1 }
 0x1ca   :  { %2647 = vpow2.f32 %v1896_v10  ;;  %v1898_v19 = vmul.f32 1.442695, %v1891_v11  ;;  %v1882_v20 = vadd.f32 %v1871_v17, %v1726_v3  ;;  %v1720_v22 = vpop.f32.mrf.mxu0 }
 0x1cb   :  { %v1873_v23 = vpop.f32.mrf.mxu1 }
 0x1cc   :  { %2649 = vpow2.f32 %v1898_v19  ;;  %v1888_v25 = vadd.f32 %v1882_v20, %v3130_v30  ;;  %v1883_v18 = vadd.f32 %v1873_v23, %v1727_v14  ;;  %v1830_v26 = vpop.f32.mrf.mxu0 }
 0x1cd   :  { %v1875_v27 = vpop.f32.mrf.mxu1  ;;  %v1880_v31 = vadd.f32 %v1830_v26, %v1724_v24 }
 0x1ce   :  { %v1894_v29 = vsub.f32 0.0, %v1888_v25  ;;  %v1889_v55 = vadd.f32 %v1883_v18, %v3130_v30  ;;  %v1832_v32 = vpop.f32.mrf.mxu0 }
 0x1cf   :  { %v1876_v34 = vpop.f32.mrf.mxu1  ;;  %v1886_v60 = vadd.f32 %v1880_v31, %v3130_v30  ;;  %v1881_v35 = vadd.f32 %v1832_v32, %v1725_v28 }
 0x1d0   :  { %v1904_v33 = vmul.f32 1.442695, %v1894_v29  ;;  %v1895_v37 = vsub.f32 0.0, %v1889_v55  ;;  %v1834_v38 = vpop.f32.mrf.mxu0 }
 0x1d1   :  { %v3190_v39 = vpop.f32.mrf.mxu1  ;;  %v1892_v41 = vsub.f32 0.0, %v1886_v60  ;;  %v1887_v42 = vadd.f32 %v1881_v35, %v3130_v30 }
 0x1d2   :  { %2651 = vpow2.f32 %v1904_v33  ;;  %v1906_v40 = vmul.f32 1.442695, %v1895_v37  ;;  %v1835_v43 = vpop.f32.mrf.mxu0 }
 0x1d3   :  { %v3193_v36 = vpop.f32.mrf.mxu1  ;;  %v1900_v45 = vmul.f32 1.442695, %v1892_v41  ;;  %v1893_v46 = vsub.f32 0.0, %v1887_v42 }
 0x1d4   :  { %2653 = vpow2.f32 %v1906_v40  ;;  %v1973_v47 = vpop.f32.mrf.mxu0 }
 0x1d5   :  { %v2018_v44 = vpop.f32.mrf.mxu1  ;;  %2655 = vpow2.f32 %v1900_v45  ;;  %v1902_v12 = vmul.f32 1.442695, %v1893_v46 }
 0x1d6   :  { %v1975_v49 = vpop.f32.mrf.mxu0 }
 0x1d7   :  { %v2648_v48 = vpop.eup %2647  ;;  %v2019_v50 = vpop.f32.mrf.mxu1  ;;  %2657 = vpow2.f32 %v1902_v12 }
 0x1d8   :  { %v1908_v52 = vadd.f32 1.0, %v2648_v48  ;;  %v1977_v16 = vpop.f32.mrf.mxu0 }
 0x1d9   :  { %v2650_v53 = vpop.eup %2649  ;;  %v2099_v51 = vpop.f32.mrf.mxu1 }
 0x1da   :  { %v1909_v54 = vadd.f32 1.0, %v2650_v53  ;;  %2659 = vrcp.f32 %v1908_v52  ;;  %v1978_v56 = vpop.f32.mrf.mxu0  ;;  %v2100_v27 = vadd.f32 %v2099_v51, %v1973_v47 }
 0x1db   :  { %v2101_v57 = vpop.f32.mrf.mxu1 }
 0x1dc   :  { %2661 = vrcp.f32 %v1909_v54  ;;  %v2055_v58 = vpop.f32.mrf.mxu0  ;;  %v2102_v31 = vadd.f32 %v2101_v57, %v1975_v49 }
 0x1dd   :  { %v2103_v59 = vpop.f32.mrf.mxu1 }
 0x1de   :  { %v2057_v0 = vpop.f32.mrf.mxu0 }
 0x1df   :  { %v2652_v63 = vpop.eup %2651  ;;  %v2104_v1 = vpop.f32.mrf.mxu1 }
 0x1e0   :  { %v1912_v2 = vadd.f32 1.0, %v2652_v63  ;;  %v2059_v61 = vpop.f32.mrf.mxu0 }
 0x1e1   :  { %v2654_v4 = vpop.eup %2653  ;;  %v2181_v5 = vpop.f32.mrf.mxu1 }
 0x1e2   :  { %v1913_v6 = vadd.f32 1.0, %v2654_v4  ;;  %v2656_v8 = vpop.eup %2655  ;;  %2663 = vrcp.f32 %v1912_v2  ;;  %v2060_v9 = vpop.f32.mrf.mxu0  ;;  %v2182_v48 = vadd.f32 %v2181_v5, %v2055_v58 }
 0x1e3   :  { %v2183_v62 = vpop.f32.mrf.mxu1  ;;  %v1910_v10 = vadd.f32 1.0, %v2656_v8 }
 0x1e4   :  { %2665 = vrcp.f32 %v1913_v6  ;;  %v2658_v11 = vpop.eup %2657  ;;  %v2140_v3 = vpop.f32.mrf.mxu0  ;;  %v2184_v16 = vadd.f32 %v2183_v62, %v2057_v0 }
 0x1e5   :  { %v2185_v13 = vpop.f32.mrf.mxu1  ;;  %v1911_v15 = vadd.f32 1.0, %v2658_v11  ;;  %2667 = vrcp.f32 %v1910_v10  ;;  %v2141_v57 = vadd.f32 %v2140_v3, %v3190_v39 }
 0x1e6   :  { %v2142_v17 = vpop.f32.mrf.mxu0 }
 0x1e7   :  { %v2186_v19 = vpop.f32.mrf.mxu1  ;;  %v2660_v14 = vpop.eup %2659  ;;  %2669 = vrcp.f32 %v1911_v15  ;;  %v2143_v4 = vadd.f32 %v2142_v17, %v3193_v36 }
 0x1e8   :  { %v2144_v21 = vpop.f32.mrf.mxu0 }
 0x1e9   :  { %v2662_v20 = vpop.eup %2661  ;;  %v2266_v22 = vpop.f32.mrf.mxu1 }
 0x1ea   :  { %v1926_v23 = vcombine.low %v2660_v14, %v2662_v20  ;;  %v2145_v24 = vpop.f32.mrf.mxu0  ;;  %v2316_v6 = vadd.f32 %v2266_v22, %v2141_v57 }
 0x1eb   :  { %v2268_v25 = vpop.f32.mrf.mxu1 }
 0x1ec   :  { %2571 = vst [vmem:[%s3228_s3 + $0x30] sm:$0x77] %v1926_v23  ;;  %v2225_v18 = vpop.f32.mrf.mxu0  ;;  %v2317_v10 = vadd.f32 %v2268_v25, %v2143_v4 }
 0x1ed   :  { %v2270_v26 = vpop.f32.mrf.mxu1  ;;  %v2314_v32 = vadd.f32 %v2225_v18, %v2100_v27 }
 0x1ee   :  { %v2227_v28 = vpop.f32.mrf.mxu0 }
 0x1ef   :  { %v2271_v29 = vpop.f32.mrf.mxu1  ;;  %v2664_v55 = vpop.eup %2663  ;;  %v2315_v35 = vadd.f32 %v2227_v28, %v2102_v31 }
 0x1f0   :  { %v2229_v33 = vpop.f32.mrf.mxu0 }
 0x1f1   :  { %v2666_v34 = vpop.eup %2665  ;;  %v2381_v37 = vpop.f32.mrf.mxu1 }
 0x1f2   :  { %v1928_v60 = vcombine.low %v2664_v55, %v2666_v34  ;;  %v2470_v38 = vadd.f32 %v2381_v37, %v2314_v32  ;;  %v2230_v40 = vpop.f32.mrf.mxu0  ;;  %v2668_v42 = vpop.eup %2667 }
 0x1f3   :  { %v2383_v41 = vpop.f32.mrf.mxu1 }
 0x1f4   :  { %2573 = vst.msk [vmem:[%s3228_s3 + $0x40] sm:$0x77] %vm3147_vm11, %v1928_v60  ;;  %v2476_v43 = vadd.f32 %v2470_v38, %v3130_v30  ;;  %v2471_v45 = vadd.f32 %v2383_v41, %v2315_v35  ;;  %v2670_v46 = vpop.eup %2669  ;;  %v2307_v47 = vpop.f32.mrf.mxu0 }
 0x1f5   :  { %v2385_v44 = vpop.f32.mrf.mxu1  ;;  %v1927_v12 = vcombine.low %v2668_v42, %v2670_v46  ;;  %v2318_v56 = vadd.f32 %v2307_v47, %v2182_v48 }
 0x1f6   :  { %v2482_v49 = vsub.f32 0.0, %v2476_v43  ;;  %v2477_v50 = vadd.f32 %v2471_v45, %v3130_v30  ;;  %v2309_v52 = vpop.f32.mrf.mxu0 }
 0x1f7   :  { %v2386_v53 = vpop.f32.mrf.mxu1  ;;  %2572 = vst [vmem:[%s3228_s3 + $0x38] sm:$0x77] %v1927_v12  ;;  %v2319_v58 = vadd.f32 %v2309_v52, %v2184_v16 }
 0x1f8   :  { %v2488_v51 = vmul.f32 1.442695, %v2482_v49  ;;  %v2483_v54 = vsub.f32 0.0, %v2477_v50  ;;  %v2311_v59 = vpop.f32.mrf.mxu0 }
 0x1f9   :  { %v2463_v63 = vpop.f32.mrf.mxu1 }
 0x1fa   :  { %2671 = vpow2.f32 %v2488_v51  ;;  %v2490_v1 = vmul.f32 1.442695, %v2483_v54  ;;  %v2474_v2 = vadd.f32 %v2463_v63, %v2318_v56  ;;  %v2312_v61 = vpop.f32.mrf.mxu0 }
 0x1fb   :  { %v2465_v5 = vpop.f32.mrf.mxu1 }
 0x1fc   :  { %2673 = vpow2.f32 %v2490_v1  ;;  %v2480_v8 = vadd.f32 %v2474_v2, %v3130_v30  ;;  %v2475_v0 = vadd.f32 %v2465_v5, %v2319_v58  ;;  %v2422_v9 = vpop.f32.mrf.mxu0 }
 0x1fd   :  { %v2467_v62 = vpop.f32.mrf.mxu1  ;;  %v2472_v3 = vadd.f32 %v2422_v9, %v2316_v6 }
 0x1fe   :  { %v2486_v11 = vsub.f32 0.0, %v2480_v8  ;;  %v2481_v39 = vadd.f32 %v2475_v0, %v3130_v30  ;;  %v2424_v13 = vpop.f32.mrf.mxu0 }
 0x1ff   :  { %v2468_v15 = vpop.f32.mrf.mxu1  ;;  %v2478_v36 = vadd.f32 %v2472_v3, %v3130_v30  ;;  %v2473_v17 = vadd.f32 %v2424_v13, %v2317_v10 }
 0x200   :  { %v2496_v19 = vmul.f32 1.442695, %v2486_v11  ;;  %v2487_v14 = vsub.f32 0.0, %v2481_v39  ;;  %v2426_v20 = vpop.f32.mrf.mxu0 }
 0x201   :  { %v2484_v22 = vsub.f32 0.0, %v2478_v36  ;;  %v2479_v23 = vadd.f32 %v2473_v17, %v3130_v30 }
 0x202   :  { %2675 = vpow2.f32 %v2496_v19  ;;  %v2498_v21 = vmul.f32 1.442695, %v2487_v14  ;;  %v2427_v24 = vpop.f32.mrf.mxu0 }
 0x203   :  { %v2492_v25 = vmul.f32 1.442695, %v2484_v22  ;;  %v2485_v18 = vsub.f32 0.0, %v2479_v23 }
 0x204   :  { %2677 = vpow2.f32 %v2498_v21 }
 0x205   :  { %2679 = vpow2.f32 %v2492_v25  ;;  %v2494_v26 = vmul.f32 1.442695, %v2485_v18 }
 0x207   :  { %v2672_v27 = vpop.eup %2671  ;;  %2681 = vpow2.f32 %v2494_v26 }
 0x208   :  { %v2500_v28 = vadd.f32 1.0, %v2672_v27 }
 0x209   :  { %v2674_v29 = vpop.eup %2673 }
 0x20a   :  { %v2501_v55 = vadd.f32 1.0, %v2674_v29  ;;  %2683 = vrcp.f32 %v2500_v28 }
 0x20c   :  { %2685 = vrcp.f32 %v2501_v55 }
 0x20f   :  { %v2676_v31 = vpop.eup %2675 }
 0x210   :  { %v2504_v32 = vadd.f32 1.0, %v2676_v31 }
 0x211   :  { %v2678_v34 = vpop.eup %2677 }
 0x212   :  { %v2505_v33 = vadd.f32 1.0, %v2678_v34  ;;  %v2680_v37 = vpop.eup %2679  ;;  %2687 = vrcp.f32 %v2504_v32 }
 0x213   :  { %v2502_v30 = vadd.f32 1.0, %v2680_v37 }
 0x214   :  { %2689 = vrcp.f32 %v2505_v33  ;;  %v2682_v60 = vpop.eup %2681 }
 0x215   :  { %v2503_v35 = vadd.f32 1.0, %v2682_v60  ;;  %2691 = vrcp.f32 %v2502_v30 }
 0x217   :  { %v2684_v38 = vpop.eup %2683  ;;  %2693 = vrcp.f32 %v2503_v35 }
 0x219   :  { %v2686_v40 = vpop.eup %2685 }
 0x21a   :  { %v2518_v41 = vcombine.low %v2684_v38, %v2686_v40 }
 0x21c   :  { %2586 = vst [vmem:[%s3228_s3 + $0x48] sm:$0x77] %v2518_v41 }
 0x21f   :  { %v2688_v42 = vpop.eup %2687 }
 0x221   :  { %v2690_v43 = vpop.eup %2689 }
 0x222   :  { %v2520_v45 = vcombine.low %v2688_v42, %v2690_v43  ;;  %v2692_v46 = vpop.eup %2691 }
 0x224   :  { %2588 = vst.msk [vmem:[%s3228_s3 + $0x58] sm:$0x77] %vm3147_vm11, %v2520_v45  ;;  %v2694_v47 = vpop.eup %2693 }
 0x225   :  { %v2519_v44 = vcombine.low %v2692_v46, %v2694_v47 }
 0x227   :  { %2587 = vst [vmem:[%s3228_s3 + $0x50] sm:$0x77] %v2519_v44 }

</bundles_post_ra>
